<compile_context>
chip_gen: v7x
topology: tpu7x:2x2x1
jax: 0.10.0
libtpu: 0.0.40
codegen_flags: <defaults>
</compile_context>

<pallas_src>
import functools
import math

import jax
import jax.numpy as jnp
from jax.experimental import pallas as pl
from jax.experimental.pallas import tpu as pltpu

BN_EPS = 1e-5
NOISE_BOUND = 0.1            # stand-in for Params['noise_bound']
TILE_M = 256                 # rows per GEMM grid step (docs: 256-512 ~ roofline)
VMEM_LIMIT = 32 * 1024 * 1024


def _round_up(x, m):
    return (x + m - 1) // m * m


# ----------------------------- Pallas kernels ------------------------------
# GEMM with fused bias / residual / ReLU epilogue.  The BN per-channel scale is
# pre-folded into the bf16 weight; inputs are bf16, MXU accumulation is fp32.

def _gemm_kernel(p_ref, w_ref, b_ref, o_ref, *, relu):
    acc = jnp.dot(p_ref[...], w_ref[...], preferred_element_type=jnp.float32)
    out = acc + b_ref[...]
    if relu:
        out = jnp.maximum(out, 0.0)
    o_ref[...] = out.astype(o_ref.dtype)


def _gemm_res_kernel(p_ref, w_ref, b_ref, r_ref, o_ref, *, relu):
    acc = jnp.dot(p_ref[...], w_ref[...], preferred_element_type=jnp.float32)
    out = acc + b_ref[...] + r_ref[...].astype(jnp.float32)
    if relu:
        out = jnp.maximum(out, 0.0)
    o_ref[...] = out.astype(o_ref.dtype)


def _final_kernel(p_ref, w_ref, x_ref, ret_ref, diff_ref, *, bound):
    noise = jnp.dot(p_ref[...], w_ref[...], preferred_element_type=jnp.float32)
    noise = jnp.clip(noise, -bound, bound)
    x = x_ref[...]
    returned = jnp.clip(x + noise, 0.0, 1.0)
    ret_ref[...] = returned
    diff_ref[...] = returned - x   # preprocess=False => preprocessed == x


# ------------------------- gridded GEMM dispatcher ---------------------------

def _gemm_shapes(m, k):
    k_pad = _round_up(k, 128)
    tile_m = TILE_M if m >= TILE_M else _round_up(m, 16)
    m_pad = _round_up(m, tile_m)
    return m_pad, k_pad, tile_m


def _compiler_params():
    return pltpu.CompilerParams(
        dimension_semantics=("parallel",),
        vmem_limit_bytes=VMEM_LIMIT,
    )


def _pallas_gemm(patches, w_mat, bias, *, relu, residual=None,
                 out_dtype=jnp.bfloat16):
    """patches (M, K) bf16, w_mat (K, Cout) bf16 (BN scale folded),
    bias (1, Cout) f32.  Gridded over M; K zero-padded to a multiple of 128."""
    m, k = patches.shape
    cout = w_mat.shape[1]
    m_pad, k_pad, tile_m = _gemm_shapes(m, k)

    patches = jnp.pad(patches, ((0, m_pad - m), (0, k_pad - k)))
    w_mat = jnp.pad(w_mat, ((0, k_pad - k), (0, 0)))

    in_specs = [
        pl.BlockSpec((tile_m, k_pad), lambda i: (i, 0)),   # per-tile patches
        pl.BlockSpec((k_pad, cout), lambda i: (0, 0)),     # weight, resident
        pl.BlockSpec((1, cout), lambda i: (0, 0)),         # bias, resident
    ]
    args = [patches, w_mat, bias]
    if residual is None:
        kern = functools.partial(_gemm_kernel, relu=relu)
    else:
        kern = functools.partial(_gemm_res_kernel, relu=relu)
        residual = jnp.pad(residual, ((0, m_pad - m), (0, 0)))
        in_specs.append(pl.BlockSpec((tile_m, cout), lambda i: (i, 0)))
        args.append(residual)

    out = pl.pallas_call(
        kern,
        out_shape=jax.ShapeDtypeStruct((m_pad, cout), out_dtype),
        grid=(m_pad // tile_m,),
        in_specs=in_specs,
        out_specs=pl.BlockSpec((tile_m, cout), lambda i: (i, 0)),
        compiler_params=_compiler_params(),
    )(*args)
    return out[:m]


# ------------------------------- JAX glue -----------------------------------

def _im2col(x_nhwc, kh, kw, stride, pad):
    """pad = ((top, bottom), (left, right)). Returns (N*Ho*Wo, kh*kw*C), (N,Ho,Wo)."""
    # TODO(synk): replace HBM-materialized im2col with in-kernel tap accumulation
    # (halo-windowed BlockSpecs / manual DMA) to remove the kh*kw HBM-read inflation.
    n, h, w, c = x_nhwc.shape
    (pt, pb), (pleft, pright) = pad
    xp = jnp.pad(x_nhwc, ((0, 0), (pt, pb), (pleft, pright), (0, 0)))
    hp, wp = h + pt + pb, w + pleft + pright
    ho = (hp - kh) // stride + 1
    wo = (wp - kw) // stride + 1
    cols = []
    for i in range(kh):
        for j in range(kw):
            cols.append(xp[:, i:i + stride * (ho - 1) + 1:stride,
                           j:j + stride * (wo - 1) + 1:stride, :])
    p = jnp.concatenate(cols, axis=-1)   # (N, Ho, Wo, kh*kw*C), tap order (kh, kw, cin)
    return p.reshape(n * ho * wo, kh * kw * c), (n, ho, wo)


def conv2d_bn_act(x_nhwc, w, scale, bias, *, stride, pad, relu, residual=None):
    """x: bf16 NHWC.  w: (KH, KW, Cin, Cout) f32.  BN scale folded into w."""
    kh, kw, cin, cout = w.shape
    if isinstance(pad, int):
        pad = ((pad, pad), (pad, pad))
    patches, (n, ho, wo) = _im2col(x_nhwc, kh, kw, stride, pad)
    w_mat = (w.reshape(kh * kw * cin, cout) * scale).astype(jnp.bfloat16)
    res2d = None if residual is None else residual.reshape(n * ho * wo, cout)
    out = _pallas_gemm(patches, w_mat, bias, relu=relu, residual=res2d)
    return out.reshape(n, ho, wo, cout)


def conv_transpose2d_bn_act(x_nhwc, w_equiv, scale, bias, *, relu):
    """ConvTranspose2d(k=5, stride=2, pad=2, output_padding=1) via sub-pixel
    decomposition: the four output phases (dy, dx) are computed in a single GEMM
    over a 3x3 window of the *un-upsampled* input (packed weight (9*Cin, 4*Cout))
    and interleaved afterwards.  `w_equiv` is the equivalent stride-1 conv weight
    (spatially flipped / channel-swapped), generated directly in (5,5,Cin,Cout)."""
    n, h, w, cin = x_nhwc.shape
    kh, kw, _, cout = w_equiv.shape            # 5, 5

    # Pack the four phase sub-kernels into one (3, 3, Cin, 2, 2, Cout) weight.
    # Phase (dy, dx): window tap (my, mx) carries w_equiv[ky, kx] with
    #   ky = 2*my (dy == 0)  or  ky = 2*my - 1 (dy == 1), analogously for kx.
    w_pack = jnp.zeros((3, 3, cin, 2, 2, cout), w_equiv.dtype)
    for dy in (0, 1):
        for dx in (0, 1):
            for my in range(3):
                ky = 2 * my if dy == 0 else 2 * my - 1
                if not (0 <= ky < kh):
                    continue
                for mx in range(3):
                    kx = 2 * mx if dx == 0 else 2 * mx - 1
                    if not (0 <= kx < kw):
                        continue
                    w_pack = w_pack.at[my, mx, :, dy, dx, :].set(w_equiv[ky, kx])
    w_mat = w_pack.reshape(9 * cin, 4 * cout)
    scale4 = jnp.tile(scale, (1, 4))           # per-column (dy, dx, cout) scale
    bias4 = jnp.tile(bias, (1, 4))
    w_mat = (w_mat * scale4).astype(jnp.bfloat16)

    patches, (n2, ho, wo) = _im2col(x_nhwc, 3, 3, 1, ((1, 1), (1, 1)))
    out = _pallas_gemm(patches, w_mat, bias4, relu=relu)       # (M, 4*Cout)
    out = out.reshape(n2, ho, wo, 2, 2, cout)                  # [n, r, c, dy, dx, co]
    out = out.transpose(0, 1, 3, 2, 4, 5).reshape(n2, 2 * ho, 2 * wo, cout)
    return out


def final_conv_and_clip(feat_nhwc, x_orig_nhwc, w, bound):
    """Final 9x9 conv (Cout=3, no BN, zero bias) fused with the noise clip, the
    residual add with the original image and the [0,1] clip.  Cout is padded to
    128 so output stores stay lane-dense; real channels are sliced out after."""
    kh, kw, cin, cout = w.shape
    patches, (n, ho, wo) = _im2col(feat_nhwc, kh, kw, 1, ((4, 4), (4, 4)))
    m, k = patches.shape
    cpad = 128
    m_pad, k_pad, tile_m = _gemm_shapes(m, k)

    w_mat = jnp.pad(w.reshape(kh * kw * cin, cout).astype(jnp.bfloat16),
                    ((0, k_pad - k), (0, cpad - cout)))
    x2d = x_orig_nhwc.reshape(m, cout).astype(jnp.float32)
    x2d = jnp.pad(x2d, ((0, m_pad - m), (0, cpad - cout)))
    patches = jnp.pad(patches, ((0, m_pad - m), (0, k_pad - k)))

    kern = functools.partial(_final_kernel, bound=bound)
    ret, diff = pl.pallas_call(
        kern,
        out_shape=(jax.ShapeDtypeStruct((m_pad, cpad), jnp.float32),
                   jax.ShapeDtypeStruct((m_pad, cpad), jnp.float32)),
        grid=(m_pad // tile_m,),
        in_specs=[pl.BlockSpec((tile_m, k_pad), lambda i: (i, 0)),
                  pl.BlockSpec((k_pad, cpad), lambda i: (0, 0)),
                  pl.BlockSpec((tile_m, cpad), lambda i: (i, 0))],
        out_specs=(pl.BlockSpec((tile_m, cpad), lambda i: (i, 0)),
                   pl.BlockSpec((tile_m, cpad), lambda i: (i, 0))),
        compiler_params=_compiler_params(),
    )(patches, w_mat, x2d)
    ret = ret[:m, :cout].reshape(n, ho, wo, cout)
    diff = diff[:m, :cout].reshape(n, ho, wo, cout)
    return ret, diff


# ----------------------------- parameter init -------------------------------

def _kaiming(key, shape):
    kh, kw, cin, _ = shape
    std = math.sqrt(2.0 / (cin * kh * kw))
    return std * jax.random.normal(key, shape, jnp.float32)


def _bn(c):
    scale = jnp.full((1, c), 1.0 / math.sqrt(1.0 + BN_EPS), jnp.float32)
    shift = jnp.zeros((1, c), jnp.float32)   # BN beta = 0 and conv bias = 0
    return scale, shift


def init_params(key):
    keys = iter(jax.random.split(key, 14))
    p = {}
    p['c1_w'] = _kaiming(next(keys), (9, 9, 3, 32));   p['c1_s'], p['c1_b'] = _bn(32)
    p['c2_w'] = _kaiming(next(keys), (5, 5, 32, 64));  p['c2_s'], p['c2_b'] = _bn(64)
    p['c3_w'] = _kaiming(next(keys), (5, 5, 64, 128)); p['c3_s'], p['c3_b'] = _bn(128)
    blocks = []
    for _ in range(4):
        b = {}
        b['w1'] = _kaiming(next(keys), (3, 3, 128, 128)); b['s1'], b['b1'] = _bn(128)
        b['w2'] = _kaiming(next(keys), (3, 3, 128, 128)); b['s2'], b['b2'] = _bn(128)
        blocks.append(b)
    p['blocks'] = blocks
    # ConvTranspose weights are generated directly in the equivalent stride-1
    # conv layout (flipped / channel-swapped); loading real PyTorch weights
    # would require an explicit flip + transpose.
    p['t1_w'] = _kaiming(next(keys), (5, 5, 128, 64)); p['t1_s'], p['t1_b'] = _bn(64)
    p['t2_w'] = _kaiming(next(keys), (5, 5, 64, 32));  p['t2_s'], p['t2_b'] = _bn(32)
    p['c4_w'] = _kaiming(next(keys), (9, 9, 32, 3))
    return p


# ------------------------------ forward pass --------------------------------

def fool_clip_forward(params, x_nchw, bound=NOISE_BOUND):
    # TODO(synk): preprocess=True branch (BatchNorm_PreProcess) not implemented;
    #             the default forward uses preprocess=False, so preprocessed == x.
    x = jnp.transpose(x_nchw, (0, 2, 3, 1)).astype(jnp.float32)   # NHWC, f32
    h = x.astype(jnp.bfloat16)                                    # bf16 activations

    h = conv2d_bn_act(h, params['c1_w'], params['c1_s'], params['c1_b'],
                      stride=1, pad=4, relu=True)
    h = conv2d_bn_act(h, params['c2_w'], params['c2_s'], params['c2_b'],
                      stride=2, pad=2, relu=True)
    h = conv2d_bn_act(h, params['c3_w'], params['c3_s'], params['c3_b'],
                      stride=2, pad=2, relu=True)

    for blk in params['blocks']:   # 4x BasicBlock(128, 128)
        identity = h
        h2 = conv2d_bn_act(h, blk['w1'], blk['s1'], blk['b1'],
                           stride=1, pad=1, relu=True)
        h = conv2d_bn_act(h2, blk['w2'], blk['s2'], blk['b2'],
                          stride=1, pad=1, relu=True, residual=identity)

    h = conv_transpose2d_bn_act(h, params['t1_w'], params['t1_s'], params['t1_b'],
                                relu=True)
    h = conv_transpose2d_bn_act(h, params['t2_w'], params['t2_s'], params['t2_b'],
                                relu=True)

    ret_nhwc, diff_nhwc = final_conv_and_clip(h, x, params['c4_w'], bound)

    returned = jnp.transpose(ret_nhwc, (0, 3, 1, 2))  # back to NCHW
    diff = jnp.transpose(diff_nhwc, (0, 3, 1, 2))
    return returned, diff


if __name__ == "__main__":
    key = jax.random.PRNGKey(0)
    pkey, xkey = jax.random.split(key)
    params = init_params(pkey)
    x = jax.random.uniform(xkey, (2, 3, 16, 16), jnp.float32)  # images in [0, 1]

    fwd = jax.jit(fool_clip_forward)
    returned, diff = fwd(params, x)
    jax.block_until_ready((returned, diff))

    assert returned.shape == (2, 3, 16, 16) and diff.shape == (2, 3, 16, 16)
    assert returned.dtype == jnp.float32 and diff.dtype == jnp.float32
    assert float(jnp.min(returned)) >= 0.0 and float(jnp.max(returned)) <= 1.0
    assert float(jnp.max(jnp.abs(diff))) <= NOISE_BOUND + 1e-6
    print("KERNEL_OK")
</pallas_src>

<mosaic_0001>
module attributes {stable_mosaic.version = 11 : i64} {
  func.func @_gemm_kernel(%arg0: i32, %arg1: memref<256x256xbf16, #tpu.memory_space<vmem>>, %arg2: memref<256x32xbf16, #tpu.memory_space<vmem>>, %arg3: memref<1x32xf32, #tpu.memory_space<vmem>>, %arg4: memref<256x32xbf16, #tpu.memory_space<vmem>>) attributes {dimension_semantics = [#tpu.dimension_semantics<parallel>], iteration_bounds = array<i64: 2>, scalar_prefetch = 0 : i64, scratch_operands = 0 : i64, tpu.core_type = #tpu.core_type<tc>, window_params = [{transform_indices = @transform_0, window_bounds = array<i64: 256, 256>}, {pipeline_mode = #tpu.pipeline_mode<synchronous>, transform_indices = @transform_1, window_bounds = array<i64: 256, 32>}, {pipeline_mode = #tpu.pipeline_mode<synchronous>, transform_indices = @transform_2, window_bounds = array<i64: 1, 32>}, {transform_indices = @transform_3, window_bounds = array<i64: 256, 32>}]} {
    %c0 = arith.constant 0 : index
    %c0_0 = arith.constant 0 : index
    %0 = vector.load %arg1[%c0, %c0_0] : memref<256x256xbf16, #tpu.memory_space<vmem>>, vector<256x256xbf16>
    %c0_1 = arith.constant 0 : index
    %c0_2 = arith.constant 0 : index
    %1 = vector.load %arg2[%c0_1, %c0_2] : memref<256x32xbf16, #tpu.memory_space<vmem>>, vector<256x32xbf16>
    %cst = arith.constant dense<0.000000e+00> : vector<256x32xf32>
    %2 = tpu.matmul %0, %1, %cst {dimension_numbers = #tpu.dot_dimension_numbers<[1], [0], [0], [1], [0, 0, 1, 1], [], []>} : vector<256x256xbf16>, vector<256x32xbf16>, vector<256x32xf32> -> vector<256x32xf32>
    %c0_3 = arith.constant 0 : index
    %c0_4 = arith.constant 0 : index
    %3 = vector.load %arg3[%c0_3, %c0_4] : memref<1x32xf32, #tpu.memory_space<vmem>>, vector<1x32xf32>
    %4 = vector.broadcast %3 : vector<1x32xf32> to vector<256x32xf32>
    %5 = arith.addf %2, %4 : vector<256x32xf32>
    %cst_5 = arith.constant 0.000000e+00 : f32
    %6 = vector.broadcast %cst_5 : f32 to vector<256x32xf32>
    %7 = arith.maximumf %5, %6 : vector<256x32xf32>
    %8 = arith.truncf %7 : vector<256x32xf32> to vector<256x32xbf16>
    %c0_6 = arith.constant 0 : index
    %c0_7 = arith.constant 0 : index
    %9 = vector.load %arg4[%c0_6, %c0_7] : memref<256x32xbf16, #tpu.memory_space<vmem>>, vector<256x32xbf16>
    tpu.vector_store %arg4[%c0_6, %c0_7], %8 {strides = array<i32>} : memref<256x32xbf16, #tpu.memory_space<vmem>>, vector<256x32xbf16>,
    return
  }
  func.func @transform_0(%arg0: i32) -> (i32, i32) {
    %c0_i32 = arith.constant 0 : i32
    %c0_i32_0 = arith.constant 0 : i32
    return %arg0, %c0_i32 : i32, i32
  }
  func.func @transform_1(%arg0: i32) -> (i32, i32) {
    %c0_i32 = arith.constant 0 : i32
    %c0_i32_0 = arith.constant 0 : i32
    %c0_i32_1 = arith.constant 0 : i32
    return %c0_i32, %c0_i32_0 : i32, i32
  }
  func.func @transform_2(%arg0: i32) -> (i32, i32) {
    %c0_i32 = arith.constant 0 : i32
    %c0_i32_0 = arith.constant 0 : i32
    %c0_i32_1 = arith.constant 0 : i32
    return %c0_i32, %c0_i32_0 : i32, i32
  }
  func.func @transform_3(%arg0: i32) -> (i32, i32) {
    %c0_i32 = arith.constant 0 : i32
    %c0_i32_0 = arith.constant 0 : i32
    return %arg0, %c0_i32 : i32, i32
  }
}

module attributes {stable_mosaic.version = 11 : i64} {
  func.func @_gemm_kernel(%arg0: i32, %arg1: memref<128x896xbf16, #tpu.memory_space<vmem>>, %arg2: memref<896x64xbf16, #tpu.memory_space<vmem>>, %arg3: memref<1x64xf32, #tpu.memory_space<vmem>>, %arg4: memref<128x64xbf16, #tpu.memory_space<vmem>>) attributes {dimension_semantics = [#tpu.dimension_semantics<parallel>], iteration_bounds = array<i64: 1>, scalar_prefetch = 0 : i64, scratch_operands = 0 : i64, tpu.core_type = #tpu.core_type<tc>, window_params = [{transform_indices = @transform_0, window_bounds = array<i64: 128, 896>}, {pipeline_mode = #tpu.pipeline_mode<synchronous>, transform_indices = @transform_1, window_bounds = array<i64: 896, 64>}, {pipeline_mode = #tpu.pipeline_mode<synchronous>, transform_indices = @transform_2, window_bounds = array<i64: 1, 64>}, {transform_indices = @transform_3, window_bounds = array<i64: 128, 64>}]} {
    %c0 = arith.constant 0 : index
    %c0_0 = arith.constant 0 : index
    %0 = vector.load %arg1[%c0, %c0_0] : memref<128x896xbf16, #tpu.memory_space<vmem>>, vector<128x896xbf16>
    %c0_1 = arith.constant 0 : index
    %c0_2 = arith.constant 0 : index
    %1 = vector.load %arg2[%c0_1, %c0_2] : memref<896x64xbf16, #tpu.memory_space<vmem>>, vector<896x64xbf16>
    %cst = arith.constant dense<0.000000e+00> : vector<128x64xf32>
    %2 = tpu.matmul %0, %1, %cst {dimension_numbers = #tpu.dot_dimension_numbers<[1], [0], [0], [1], [0, 0, 1, 1], [], []>} : vector<128x896xbf16>, vector<896x64xbf16>, vector<128x64xf32> -> vector<128x64xf32>
    %c0_3 = arith.constant 0 : index
    %c0_4 = arith.constant 0 : index
    %3 = vector.load %arg3[%c0_3, %c0_4] : memref<1x64xf32, #tpu.memory_space<vmem>>, vector<1x64xf32>
    %4 = vector.broadcast %3 : vector<1x64xf32> to vector<128x64xf32>
    %5 = arith.addf %2, %4 : vector<128x64xf32>
    %cst_5 = arith.constant 0.000000e+00 : f32
    %6 = vector.broadcast %cst_5 : f32 to vector<128x64xf32>
    %7 = arith.maximumf %5, %6 : vector<128x64xf32>
    %8 = arith.truncf %7 : vector<128x64xf32> to vector<128x64xbf16>
    %c0_6 = arith.constant 0 : index
    %c0_7 = arith.constant 0 : index
    %9 = vector.load %arg4[%c0_6, %c0_7] : memref<128x64xbf16, #tpu.memory_space<vmem>>, vector<128x64xbf16>
    tpu.vector_store %arg4[%c0_6, %c0_7], %8 {strides = array<i32>} : memref<128x64xbf16, #tpu.memory_space<vmem>>, vector<128x64xbf16>,
    return
  }
  func.func @transform_0(%arg0: i32) -> (i32, i32) {
    %c0_i32 = arith.constant 0 : i32
    %c0_i32_0 = arith.constant 0 : i32
    return %arg0, %c0_i32 : i32, i32
  }
  func.func @transform_1(%arg0: i32) -> (i32, i32) {
    %c0_i32 = arith.constant 0 : i32
    %c0_i32_0 = arith.constant 0 : i32
    %c0_i32_1 = arith.constant 0 : i32
    return %c0_i32, %c0_i32_0 : i32, i32
  }
  func.func @transform_2(%arg0: i32) -> (i32, i32) {
    %c0_i32 = arith.constant 0 : i32
    %c0_i32_0 = arith.constant 0 : i32
    %c0_i32_1 = arith.constant 0 : i32
    return %c0_i32, %c0_i32_0 : i32, i32
  }
  func.func @transform_3(%arg0: i32) -> (i32, i32) {
    %c0_i32 = arith.constant 0 : i32
    %c0_i32_0 = arith.constant 0 : i32
    return %arg0, %c0_i32 : i32, i32
  }
}

module attributes {stable_mosaic.version = 11 : i64} {
  func.func @_gemm_kernel(%arg0: i32, %arg1: memref<32x1664xbf16, #tpu.memory_space<vmem>>, %arg2: memref<1664x128xbf16, #tpu.memory_space<vmem>>, %arg3: memref<1x128xf32, #tpu.memory_space<vmem>>, %arg4: memref<32x128xbf16, #tpu.memory_space<vmem>>) attributes {dimension_semantics = [#tpu.dimension_semantics<parallel>], iteration_bounds = array<i64: 1>, scalar_prefetch = 0 : i64, scratch_operands = 0 : i64, tpu.core_type = #tpu.core_type<tc>, window_params = [{transform_indices = @transform_0, window_bounds = array<i64: 32, 1664>}, {pipeline_mode = #tpu.pipeline_mode<synchronous>, transform_indices = @transform_1, window_bounds = array<i64: 1664, 128>}, {pipeline_mode = #tpu.pipeline_mode<synchronous>, transform_indices = @transform_2, window_bounds = array<i64: 1, 128>}, {transform_indices = @transform_3, window_bounds = array<i64: 32, 128>}]} {
    %c0 = arith.constant 0 : index
    %c0_0 = arith.constant 0 : index
    %0 = vector.load %arg1[%c0, %c0_0] : memref<32x1664xbf16, #tpu.memory_space<vmem>>, vector<32x1664xbf16>
    %c0_1 = arith.constant 0 : index
    %c0_2 = arith.constant 0 : index
    %1 = vector.load %arg2[%c0_1, %c0_2] : memref<1664x128xbf16, #tpu.memory_space<vmem>>, vector<1664x128xbf16>
    %cst = arith.constant dense<0.000000e+00> : vector<32x128xf32>
    %2 = tpu.matmul %0, %1, %cst {dimension_numbers = #tpu.dot_dimension_numbers<[1], [0], [0], [1], [0, 0, 1, 1], [], []>} : vector<32x1664xbf16>, vector<1664x128xbf16>, vector<32x128xf32> -> vector<32x128xf32>
    %c0_3 = arith.constant 0 : index
    %c0_4 = arith.constant 0 : index
    %3 = vector.load %arg3[%c0_3, %c0_4] : memref<1x128xf32, #tpu.memory_space<vmem>>, vector<1x128xf32>
    %4 = vector.broadcast %3 : vector<1x128xf32> to vector<32x128xf32>
    %5 = arith.addf %2, %4 : vector<32x128xf32>
    %cst_5 = arith.constant 0.000000e+00 : f32
    %6 = vector.broadcast %cst_5 : f32 to vector<32x128xf32>
    %7 = arith.maximumf %5, %6 : vector<32x128xf32>
    %8 = arith.truncf %7 : vector<32x128xf32> to vector<32x128xbf16>
    %c0_6 = arith.constant 0 : index
    %c0_7 = arith.constant 0 : index
    %9 = vector.load %arg4[%c0_6, %c0_7] : memref<32x128xbf16, #tpu.memory_space<vmem>>, vector<32x128xbf16>
    tpu.vector_store %arg4[%c0_6, %c0_7], %8 {strides = array<i32>} : memref<32x128xbf16, #tpu.memory_space<vmem>>, vector<32x128xbf16>,
    return
  }
  func.func @transform_0(%arg0: i32) -> (i32, i32) {
    %c0_i32 = arith.constant 0 : i32
    %c0_i32_0 = arith.constant 0 : i32
    return %arg0, %c0_i32 : i32, i32
  }
  func.func @transform_1(%arg0: i32) -> (i32, i32) {
    %c0_i32 = arith.constant 0 : i32
    %c0_i32_0 = arith.constant 0 : i32
    %c0_i32_1 = arith.constant 0 : i32
    return %c0_i32, %c0_i32_0 : i32, i32
  }
  func.func @transform_2(%arg0: i32) -> (i32, i32) {
    %c0_i32 = arith.constant 0 : i32
    %c0_i32_0 = arith.constant 0 : i32
    %c0_i32_1 = arith.constant 0 : i32
    return %c0_i32, %c0_i32_0 : i32, i32
  }
  func.func @transform_3(%arg0: i32) -> (i32, i32) {
    %c0_i32 = arith.constant 0 : i32
    %c0_i32_0 = arith.constant 0 : i32
    return %arg0, %c0_i32 : i32, i32
  }
}

module attributes {stable_mosaic.version = 11 : i64} {
  func.func @_gemm_kernel(%arg0: i32, %arg1: memref<32x1152xbf16, #tpu.memory_space<vmem>>, %arg2: memref<1152x128xbf16, #tpu.memory_space<vmem>>, %arg3: memref<1x128xf32, #tpu.memory_space<vmem>>, %arg4: memref<32x128xbf16, #tpu.memory_space<vmem>>) attributes {dimension_semantics = [#tpu.dimension_semantics<parallel>], iteration_bounds = array<i64: 1>, scalar_prefetch = 0 : i64, scratch_operands = 0 : i64, tpu.core_type = #tpu.core_type<tc>, window_params = [{transform_indices = @transform_0, window_bounds = array<i64: 32, 1152>}, {pipeline_mode = #tpu.pipeline_mode<synchronous>, transform_indices = @transform_1, window_bounds = array<i64: 1152, 128>}, {pipeline_mode = #tpu.pipeline_mode<synchronous>, transform_indices = @transform_2, window_bounds = array<i64: 1, 128>}, {transform_indices = @transform_3, window_bounds = array<i64: 32, 128>}]} {
    %c0 = arith.constant 0 : index
    %c0_0 = arith.constant 0 : index
    %0 = vector.load %arg1[%c0, %c0_0] : memref<32x1152xbf16, #tpu.memory_space<vmem>>, vector<32x1152xbf16>
    %c0_1 = arith.constant 0 : index
    %c0_2 = arith.constant 0 : index
    %1 = vector.load %arg2[%c0_1, %c0_2] : memref<1152x128xbf16, #tpu.memory_space<vmem>>, vector<1152x128xbf16>
    %cst = arith.constant dense<0.000000e+00> : vector<32x128xf32>
    %2 = tpu.matmul %0, %1, %cst {dimension_numbers = #tpu.dot_dimension_numbers<[1], [0], [0], [1], [0, 0, 1, 1], [], []>} : vector<32x1152xbf16>, vector<1152x128xbf16>, vector<32x128xf32> -> vector<32x128xf32>
    %c0_3 = arith.constant 0 : index
    %c0_4 = arith.constant 0 : index
    %3 = vector.load %arg3[%c0_3, %c0_4] : memref<1x128xf32, #tpu.memory_space<vmem>>, vector<1x128xf32>
    %4 = vector.broadcast %3 : vector<1x128xf32> to vector<32x128xf32>
    %5 = arith.addf %2, %4 : vector<32x128xf32>
    %cst_5 = arith.constant 0.000000e+00 : f32
    %6 = vector.broadcast %cst_5 : f32 to vector<32x128xf32>
    %7 = arith.maximumf %5, %6 : vector<32x128xf32>
    %8 = arith.truncf %7 : vector<32x128xf32> to vector<32x128xbf16>
    %c0_6 = arith.constant 0 : index
    %c0_7 = arith.constant 0 : index
    %9 = vector.load %arg4[%c0_6, %c0_7] : memref<32x128xbf16, #tpu.memory_space<vmem>>, vector<32x128xbf16>
    tpu.vector_store %arg4[%c0_6, %c0_7], %8 {strides = array<i32>} : memref<32x128xbf16, #tpu.memory_space<vmem>>, vector<32x128xbf16>,
    return
  }
  func.func @transform_0(%arg0: i32) -> (i32, i32) {
    %c0_i32 = arith.constant 0 : i32
    %c0_i32_0 = arith.constant 0 : i32
    return %arg0, %c0_i32 : i32, i32
  }
  func.func @transform_1(%arg0: i32) -> (i32, i32) {
    %c0_i32 = arith.constant 0 : i32
    %c0_i32_0 = arith.constant 0 : i32
    %c0_i32_1 = arith.constant 0 : i32
    return %c0_i32, %c0_i32_0 : i32, i32
  }
  func.func @transform_2(%arg0: i32) -> (i32, i32) {
    %c0_i32 = arith.constant 0 : i32
    %c0_i32_0 = arith.constant 0 : i32
    %c0_i32_1 = arith.constant 0 : i32
    return %c0_i32, %c0_i32_0 : i32, i32
  }
  func.func @transform_3(%arg0: i32) -> (i32, i32) {
    %c0_i32 = arith.constant 0 : i32
    %c0_i32_0 = arith.constant 0 : i32
    return %arg0, %c0_i32 : i32, i32
  }
}

module attributes {stable_mosaic.version = 11 : i64} {
  func.func @_gemm_res_kernel(%arg0: i32, %arg1: memref<32x1152xbf16, #tpu.memory_space<vmem>>, %arg2: memref<1152x128xbf16, #tpu.memory_space<vmem>>, %arg3: memref<1x128xf32, #tpu.memory_space<vmem>>, %arg4: memref<32x128xbf16, #tpu.memory_space<vmem>>, %arg5: memref<32x128xbf16, #tpu.memory_space<vmem>>) attributes {dimension_semantics = [#tpu.dimension_semantics<parallel>], iteration_bounds = array<i64: 1>, scalar_prefetch = 0 : i64, scratch_operands = 0 : i64, tpu.core_type = #tpu.core_type<tc>, window_params = [{transform_indices = @transform_0, window_bounds = array<i64: 32, 1152>}, {pipeline_mode = #tpu.pipeline_mode<synchronous>, transform_indices = @transform_1, window_bounds = array<i64: 1152, 128>}, {pipeline_mode = #tpu.pipeline_mode<synchronous>, transform_indices = @transform_2, window_bounds = array<i64: 1, 128>}, {transform_indices = @transform_3, window_bounds = array<i64: 32, 128>}, {transform_indices = @transform_4, window_bounds = array<i64: 32, 128>}]} {
    %c0 = arith.constant 0 : index
    %c0_0 = arith.constant 0 : index
    %0 = vector.load %arg1[%c0, %c0_0] : memref<32x1152xbf16, #tpu.memory_space<vmem>>, vector<32x1152xbf16>
    %c0_1 = arith.constant 0 : index
    %c0_2 = arith.constant 0 : index
    %1 = vector.load %arg2[%c0_1, %c0_2] : memref<1152x128xbf16, #tpu.memory_space<vmem>>, vector<1152x128xbf16>
    %cst = arith.constant dense<0.000000e+00> : vector<32x128xf32>
    %2 = tpu.matmul %0, %1, %cst {dimension_numbers = #tpu.dot_dimension_numbers<[1], [0], [0], [1], [0, 0, 1, 1], [], []>} : vector<32x1152xbf16>, vector<1152x128xbf16>, vector<32x128xf32> -> vector<32x128xf32>
    %c0_3 = arith.constant 0 : index
    %c0_4 = arith.constant 0 : index
    %3 = vector.load %arg3[%c0_3, %c0_4] : memref<1x128xf32, #tpu.memory_space<vmem>>, vector<1x128xf32>
    %4 = vector.broadcast %3 : vector<1x128xf32> to vector<32x128xf32>
    %5 = arith.addf %2, %4 : vector<32x128xf32>
    %c0_5 = arith.constant 0 : index
    %c0_6 = arith.constant 0 : index
    %6 = vector.load %arg4[%c0_5, %c0_6] : memref<32x128xbf16, #tpu.memory_space<vmem>>, vector<32x128xbf16>
    %7 = arith.extf %6 : vector<32x128xbf16> to vector<32x128xf32>
    %8 = arith.addf %5, %7 : vector<32x128xf32>
    %cst_7 = arith.constant 0.000000e+00 : f32
    %9 = vector.broadcast %cst_7 : f32 to vector<32x128xf32>
    %10 = arith.maximumf %8, %9 : vector<32x128xf32>
    %11 = arith.truncf %10 : vector<32x128xf32> to vector<32x128xbf16>
    %c0_8 = arith.constant 0 : index
    %c0_9 = arith.constant 0 : index
    %12 = vector.load %arg5[%c0_8, %c0_9] : memref<32x128xbf16, #tpu.memory_space<vmem>>, vector<32x128xbf16>
    tpu.vector_store %arg5[%c0_8, %c0_9], %11 {strides = array<i32>} : memref<32x128xbf16, #tpu.memory_space<vmem>>, vector<32x128xbf16>,
    return
  }
  func.func @transform_0(%arg0: i32) -> (i32, i32) {
    %c0_i32 = arith.constant 0 : i32
    %c0_i32_0 = arith.constant 0 : i32
    return %arg0, %c0_i32 : i32, i32
  }
  func.func @transform_1(%arg0: i32) -> (i32, i32) {
    %c0_i32 = arith.constant 0 : i32
    %c0_i32_0 = arith.constant 0 : i32
    %c0_i32_1 = arith.constant 0 : i32
    return %c0_i32, %c0_i32_0 : i32, i32
  }
  func.func @transform_2(%arg0: i32) -> (i32, i32) {
    %c0_i32 = arith.constant 0 : i32
    %c0_i32_0 = arith.constant 0 : i32
    %c0_i32_1 = arith.constant 0 : i32
    return %c0_i32, %c0_i32_0 : i32, i32
  }
  func.func @transform_3(%arg0: i32) -> (i32, i32) {
    %c0_i32 = arith.constant 0 : i32
    %c0_i32_0 = arith.constant 0 : i32
    return %arg0, %c0_i32 : i32, i32
  }
  func.func @transform_4(%arg0: i32) -> (i32, i32) {
    %c0_i32 = arith.constant 0 : i32
    %c0_i32_0 = arith.constant 0 : i32
    return %arg0, %c0_i32 : i32, i32
  }
}

module attributes {stable_mosaic.version = 11 : i64} {
  func.func @_gemm_kernel(%arg0: i32, %arg1: memref<32x1152xbf16, #tpu.memory_space<vmem>>, %arg2: memref<1152x256xbf16, #tpu.memory_space<vmem>>, %arg3: memref<1x256xf32, #tpu.memory_space<vmem>>, %arg4: memref<32x256xbf16, #tpu.memory_space<vmem>>) attributes {dimension_semantics = [#tpu.dimension_semantics<parallel>], iteration_bounds = array<i64: 1>, scalar_prefetch = 0 : i64, scratch_operands = 0 : i64, tpu.core_type = #tpu.core_type<tc>, window_params = [{transform_indices = @transform_0, window_bounds = array<i64: 32, 1152>}, {pipeline_mode = #tpu.pipeline_mode<synchronous>, transform_indices = @transform_1, window_bounds = array<i64: 1152, 256>}, {pipeline_mode = #tpu.pipeline_mode<synchronous>, transform_indices = @transform_2, window_bounds = array<i64: 1, 256>}, {transform_indices = @transform_3, window_bounds = array<i64: 32, 256>}]} {
    %c0 = arith.constant 0 : index
    %c0_0 = arith.constant 0 : index
    %0 = vector.load %arg1[%c0, %c0_0] : memref<32x1152xbf16, #tpu.memory_space<vmem>>, vector<32x1152xbf16>
    %c0_1 = arith.constant 0 : index
    %c0_2 = arith.constant 0 : index
    %1 = vector.load %arg2[%c0_1, %c0_2] : memref<1152x256xbf16, #tpu.memory_space<vmem>>, vector<1152x256xbf16>
    %cst = arith.constant dense<0.000000e+00> : vector<32x256xf32>
    %2 = tpu.matmul %0, %1, %cst {dimension_numbers = #tpu.dot_dimension_numbers<[1], [0], [0], [1], [0, 0, 1, 1], [], []>} : vector<32x1152xbf16>, vector<1152x256xbf16>, vector<32x256xf32> -> vector<32x256xf32>
    %c0_3 = arith.constant 0 : index
    %c0_4 = arith.constant 0 : index
    %3 = vector.load %arg3[%c0_3, %c0_4] : memref<1x256xf32, #tpu.memory_space<vmem>>, vector<1x256xf32>
    %4 = vector.broadcast %3 : vector<1x256xf32> to vector<32x256xf32>
    %5 = arith.addf %2, %4 : vector<32x256xf32>
    %cst_5 = arith.constant 0.000000e+00 : f32
    %6 = vector.broadcast %cst_5 : f32 to vector<32x256xf32>
    %7 = arith.maximumf %5, %6 : vector<32x256xf32>
    %8 = arith.truncf %7 : vector<32x256xf32> to vector<32x256xbf16>
    %c0_6 = arith.constant 0 : index
    %c0_7 = arith.constant 0 : index
    %9 = vector.load %arg4[%c0_6, %c0_7] : memref<32x256xbf16, #tpu.memory_space<vmem>>, vector<32x256xbf16>
    tpu.vector_store %arg4[%c0_6, %c0_7], %8 {strides = array<i32>} : memref<32x256xbf16, #tpu.memory_space<vmem>>, vector<32x256xbf16>,
    return
  }
  func.func @transform_0(%arg0: i32) -> (i32, i32) {
    %c0_i32 = arith.constant 0 : i32
    %c0_i32_0 = arith.constant 0 : i32
    return %arg0, %c0_i32 : i32, i32
  }
  func.func @transform_1(%arg0: i32) -> (i32, i32) {
    %c0_i32 = arith.constant 0 : i32
    %c0_i32_0 = arith.constant 0 : i32
    %c0_i32_1 = arith.constant 0 : i32
    return %c0_i32, %c0_i32_0 : i32, i32
  }
  func.func @transform_2(%arg0: i32) -> (i32, i32) {
    %c0_i32 = arith.constant 0 : i32
    %c0_i32_0 = arith.constant 0 : i32
    %c0_i32_1 = arith.constant 0 : i32
    return %c0_i32, %c0_i32_0 : i32, i32
  }
  func.func @transform_3(%arg0: i32) -> (i32, i32) {
    %c0_i32 = arith.constant 0 : i32
    %c0_i32_0 = arith.constant 0 : i32
    return %arg0, %c0_i32 : i32, i32
  }
}

module attributes {stable_mosaic.version = 11 : i64} {
  func.func @_gemm_kernel(%arg0: i32, %arg1: memref<128x640xbf16, #tpu.memory_space<vmem>>, %arg2: memref<640x128xbf16, #tpu.memory_space<vmem>>, %arg3: memref<1x128xf32, #tpu.memory_space<vmem>>, %arg4: memref<128x128xbf16, #tpu.memory_space<vmem>>) attributes {dimension_semantics = [#tpu.dimension_semantics<parallel>], iteration_bounds = array<i64: 1>, scalar_prefetch = 0 : i64, scratch_operands = 0 : i64, tpu.core_type = #tpu.core_type<tc>, window_params = [{transform_indices = @transform_0, window_bounds = array<i64: 128, 640>}, {pipeline_mode = #tpu.pipeline_mode<synchronous>, transform_indices = @transform_1, window_bounds = array<i64: 640, 128>}, {pipeline_mode = #tpu.pipeline_mode<synchronous>, transform_indices = @transform_2, window_bounds = array<i64: 1, 128>}, {transform_indices = @transform_3, window_bounds = array<i64: 128, 128>}]} {
    %c0 = arith.constant 0 : index
    %c0_0 = arith.constant 0 : index
    %0 = vector.load %arg1[%c0, %c0_0] : memref<128x640xbf16, #tpu.memory_space<vmem>>, vector<128x640xbf16>
    %c0_1 = arith.constant 0 : index
    %c0_2 = arith.constant 0 : index
    %1 = vector.load %arg2[%c0_1, %c0_2] : memref<640x128xbf16, #tpu.memory_space<vmem>>, vector<640x128xbf16>
    %cst = arith.constant dense<0.000000e+00> : vector<128x128xf32>
    %2 = tpu.matmul %0, %1, %cst {dimension_numbers = #tpu.dot_dimension_numbers<[1], [0], [0], [1], [0, 0, 1, 1], [], []>} : vector<128x640xbf16>, vector<640x128xbf16>, vector<128x128xf32> -> vector<128x128xf32>
    %c0_3 = arith.constant 0 : index
    %c0_4 = arith.constant 0 : index
    %3 = vector.load %arg3[%c0_3, %c0_4] : memref<1x128xf32, #tpu.memory_space<vmem>>, vector<1x128xf32>
    %4 = vector.broadcast %3 : vector<1x128xf32> to vector<128x128xf32>
    %5 = arith.addf %2, %4 : vector<128x128xf32>
    %cst_5 = arith.constant 0.000000e+00 : f32
    %6 = vector.broadcast %cst_5 : f32 to vector<128x128xf32>
    %7 = arith.maximumf %5, %6 : vector<128x128xf32>
    %8 = arith.truncf %7 : vector<128x128xf32> to vector<128x128xbf16>
    %c0_6 = arith.constant 0 : index
    %c0_7 = arith.constant 0 : index
    %9 = vector.load %arg4[%c0_6, %c0_7] : memref<128x128xbf16, #tpu.memory_space<vmem>>, vector<128x128xbf16>
    tpu.vector_store %arg4[%c0_6, %c0_7], %8 {strides = array<i32>} : memref<128x128xbf16, #tpu.memory_space<vmem>>, vector<128x128xbf16>,
    return
  }
  func.func @transform_0(%arg0: i32) -> (i32, i32) {
    %c0_i32 = arith.constant 0 : i32
    %c0_i32_0 = arith.constant 0 : i32
    return %arg0, %c0_i32 : i32, i32
  }
  func.func @transform_1(%arg0: i32) -> (i32, i32) {
    %c0_i32 = arith.constant 0 : i32
    %c0_i32_0 = arith.constant 0 : i32
    %c0_i32_1 = arith.constant 0 : i32
    return %c0_i32, %c0_i32_0 : i32, i32
  }
  func.func @transform_2(%arg0: i32) -> (i32, i32) {
    %c0_i32 = arith.constant 0 : i32
    %c0_i32_0 = arith.constant 0 : i32
    %c0_i32_1 = arith.constant 0 : i32
    return %c0_i32, %c0_i32_0 : i32, i32
  }
  func.func @transform_3(%arg0: i32) -> (i32, i32) {
    %c0_i32 = arith.constant 0 : i32
    %c0_i32_0 = arith.constant 0 : i32
    return %arg0, %c0_i32 : i32, i32
  }
}

module attributes {stable_mosaic.version = 11 : i64} {
  func.func @_final_kernel(%arg0: i32, %arg1: memref<256x2688xbf16, #tpu.memory_space<vmem>>, %arg2: memref<2688x128xbf16, #tpu.memory_space<vmem>>, %arg3: memref<256x128xf32, #tpu.memory_space<vmem>>, %arg4: memref<256x128xf32, #tpu.memory_space<vmem>>, %arg5: memref<256x128xf32, #tpu.memory_space<vmem>>) attributes {dimension_semantics = [#tpu.dimension_semantics<parallel>], iteration_bounds = array<i64: 2>, scalar_prefetch = 0 : i64, scratch_operands = 0 : i64, tpu.core_type = #tpu.core_type<tc>, window_params = [{transform_indices = @transform_0, window_bounds = array<i64: 256, 2688>}, {pipeline_mode = #tpu.pipeline_mode<synchronous>, transform_indices = @transform_1, window_bounds = array<i64: 2688, 128>}, {transform_indices = @transform_2, window_bounds = array<i64: 256, 128>}, {transform_indices = @transform_3, window_bounds = array<i64: 256, 128>}, {transform_indices = @transform_4, window_bounds = array<i64: 256, 128>}]} {
    %c0 = arith.constant 0 : index
    %c0_0 = arith.constant 0 : index
    %0 = vector.load %arg1[%c0, %c0_0] : memref<256x2688xbf16, #tpu.memory_space<vmem>>, vector<256x2688xbf16>
    %c0_1 = arith.constant 0 : index
    %c0_2 = arith.constant 0 : index
    %1 = vector.load %arg2[%c0_1, %c0_2] : memref<2688x128xbf16, #tpu.memory_space<vmem>>, vector<2688x128xbf16>
    %cst = arith.constant dense<0.000000e+00> : vector<256x128xf32>
    %2 = tpu.matmul %0, %1, %cst {dimension_numbers = #tpu.dot_dimension_numbers<[1], [0], [0], [1], [0, 0, 1, 1], [], []>} : vector<256x2688xbf16>, vector<2688x128xbf16>, vector<256x128xf32> -> vector<256x128xf32>
    %cst_3 = arith.constant -1.000000e-01 : f32
    %cst_4 = arith.constant 1.000000e-01 : f32
    %3 = vector.broadcast %cst_3 : f32 to vector<256x128xf32>
    %4 = arith.maximumf %3, %2 : vector<256x128xf32>
    %5 = vector.broadcast %cst_4 : f32 to vector<256x128xf32>
    %6 = arith.minimumf %5, %4 : vector<256x128xf32>
    %c0_5 = arith.constant 0 : index
    %c0_6 = arith.constant 0 : index
    %7 = vector.load %arg3[%c0_5, %c0_6] : memref<256x128xf32, #tpu.memory_space<vmem>>, vector<256x128xf32>
    %8 = arith.addf %7, %6 : vector<256x128xf32>
    %cst_7 = arith.constant 0.000000e+00 : f32
    %cst_8 = arith.constant 1.000000e+00 : f32
    %9 = vector.broadcast %cst_7 : f32 to vector<256x128xf32>
    %10 = arith.maximumf %9, %8 : vector<256x128xf32>
    %11 = vector.broadcast %cst_8 : f32 to vector<256x128xf32>
    %12 = arith.minimumf %11, %10 : vector<256x128xf32>
    %c0_9 = arith.constant 0 : index
    %c0_10 = arith.constant 0 : index
    %13 = vector.load %arg4[%c0_9, %c0_10] : memref<256x128xf32, #tpu.memory_space<vmem>>, vector<256x128xf32>
    tpu.vector_store %arg4[%c0_9, %c0_10], %12 {strides = array<i32>} : memref<256x128xf32, #tpu.memory_space<vmem>>, vector<256x128xf32>,
    %14 = arith.subf %12, %7 : vector<256x128xf32>
    %c0_11 = arith.constant 0 : index
    %c0_12 = arith.constant 0 : index
    %15 = vector.load %arg5[%c0_11, %c0_12] : memref<256x128xf32, #tpu.memory_space<vmem>>, vector<256x128xf32>
    tpu.vector_store %arg5[%c0_11, %c0_12], %14 {strides = array<i32>} : memref<256x128xf32, #tpu.memory_space<vmem>>, vector<256x128xf32>,
    return
  }
  func.func @transform_0(%arg0: i32) -> (i32, i32) {
    %c0_i32 = arith.constant 0 : i32
    %c0_i32_0 = arith.constant 0 : i32
    return %arg0, %c0_i32 : i32, i32
  }
  func.func @transform_1(%arg0: i32) -> (i32, i32) {
    %c0_i32 = arith.constant 0 : i32
    %c0_i32_0 = arith.constant 0 : i32
    %c0_i32_1 = arith.constant 0 : i32
    return %c0_i32, %c0_i32_0 : i32, i32
  }
  func.func @transform_2(%arg0: i32) -> (i32, i32) {
    %c0_i32 = arith.constant 0 : i32
    %c0_i32_0 = arith.constant 0 : i32
    return %arg0, %c0_i32 : i32, i32
  }
  func.func @transform_3(%arg0: i32) -> (i32, i32) {
    %c0_i32 = arith.constant 0 : i32
    %c0_i32_0 = arith.constant 0 : i32
    return %arg0, %c0_i32 : i32, i32
  }
  func.func @transform_4(%arg0: i32) -> (i32, i32) {
    %c0_i32 = arith.constant 0 : i32
    %c0_i32_0 = arith.constant 0 : i32
    return %arg0, %c0_i32 : i32, i32
  }
}

</mosaic_0001>

<bundles_post_ra>
// kernel: fool_clip_forward.14
= control target key start
LH: loop header
LB: loop body
LE: loop exit
PB: predicated region body
PF: predicated region fallthrough
CT: control target
= control target key end

     0   :  { %s1269_s12 = smov 0   ;;  %s1475_s0 = inlined_call_operand.vmem [shape: bf16[512,256], index: 0, kind: input, shape index: {}]   ;;  %s1476_s1 = inlined_call_operand.vmem [shape: bf16[256,32], index: 1, kind: input, shape index: {}]   ;;  %s1477_s2 = inlined_call_operand.vmem [shape: f32[1,32], index: 2, kind: input, shape index: {}]   ;;  %s1478_s3 = inlined_call_operand.vmem [shape: bf16[512,32], index: 3, kind: output, shape index: {}]  }
   0x1 LB: > { %s915_s13 = sadd.s32 4294967295, %s1247_s12   ;;  %p919_p0 = scmp.ge.s32.totalorder %s1247_s12, 1  ;;  %s1247_s12 = sphi %s1269_s12, %s13_s12  }
   0x2   : > { %p139_p1 = scmp.lt.s32.totalorder %s1247_s12, 3 }
   0x4   : > { %p140_p2 = pnand %p919_p0, %p139_p1 }
   0x5   : > { %v1177_v0 = vld [vmem:[%s1476_s1 + $0x40] sm:$0xff] (!%p140_p2)   ;;  %s920_s16 = sshll.u32 (!%p140_p2), %s915_s13, 5  ;;  %v1179_v2 = vld [vmem:[%s1476_s1 + $0x48] sm:$0xff] (!%p140_p2)   ;;  %v1181_v4 = vld [vmem:[%s1476_s1 + $0x50] sm:$0xff] (!%p140_p2)   ;;  %vm826_vm0 = vcmask (!%p140_p2), 257024  }
   0x6   : > { %143 = sbr.rel (%p140_p2) target bundleno = 318 (0x13e), region = 32  ;;  %v1178_v1 = vld [vmem:[%s1476_s1] sm:$0xff] (!%p140_p2)   ;;  %1041 = vmatprep.subr.bf16.mxu0 (!%p140_p2), %v1177_v0  ;;  %1153 = vmatprep.subr.bf16.mxu1 (!%p140_p2), %v1177_v0  ;;  %v1180_v3 = vld [vmem:[%s1476_s1 + $0x8] sm:$0xff] (!%p140_p2)   ;;  %p165_p3 = scmp.lt.s32.totalorder (!%p140_p2), %s920_s16, 63  ;;  %v1182_v5 = vld [vmem:[%s1476_s1 + $0x10] sm:$0xff] (!%p140_p2)  }
   0x7   : > { %1042 = vmatpush3.bf16.msra.mxu0 (!%p140_p2), %v1178_v1  ;;  %1161 = vmatpush3.bf16.msra.mxu1 (!%p140_p2), %v1178_v1  ;;  %v1183_v6 = vld [vmem:[%s1476_s1 + $0x58] sm:$0xff] (!%p140_p2)   ;;  %v1185_v8 = vld [vmem:[%s1476_s1 + $0x60] sm:$0xff] (!%p140_p2)   ;;  %v1187_v10 = vld [vmem:[%s1476_s1 + $0x68] sm:$0xff] (!%p140_p2)  }
   0x8   : > { %1043 = vmatprep.subr.bf16.mxu0 (!%p140_p2), %v1179_v2  ;;  %1154 = vmatprep.subr.bf16.mxu1 (!%p140_p2), %v1179_v2  ;;  %v1184_v7 = vld [vmem:[%s1476_s1 + $0x18] sm:$0xff] (!%p140_p2)   ;;  %v1186_v9 = vld [vmem:[%s1476_s1 + $0x20] sm:$0xff] (!%p140_p2)   ;;  %v1188_v13 = vld [vmem:[%s1476_s1 + $0x28] sm:$0xff] (!%p140_p2)  }
   0x9   : > { %v1189_v14 = vld [vmem:[%s1476_s1 + $0x70] sm:$0xff] (!%p140_p2)   ;;  %v1191_v16 = vld [vmem:[%s1476_s1 + $0x78] sm:$0xff] (!%p140_p2)   ;;  %v1368_v50 = vld [vmem:[%s1477_s2] ss:$0 sm:$0xff] (!%p140_p2) }
   0xa   : > { %v1190_v15 = vld [vmem:[%s1476_s1 + $0x30] sm:$0xff] (!%p140_p2)   ;;  %v1192_v17 = vld [vmem:[%s1476_s1 + $0x38] sm:$0xff] (!%p140_p2)  }
   0xb   : > { %1044 = vmatpush3.bf16.msra.mxu0 (!%p140_p2), %v1180_v3  ;;  %1162 = vmatpush3.bf16.msra.mxu1 (!%p140_p2), %v1180_v3 }
   0xc   : > { %1045 = vmatprep.subr.bf16.mxu0 (!%p140_p2), %v1181_v4  ;;  %1155 = vmatprep.subr.bf16.mxu1 (!%p140_p2), %v1181_v4 }
   0xd   : > { %s1480_s16 = smov (!%p165_p3, %s920_s16), 63 }
   0xe   : > { %s1008_s4 = sshll.u32 %s1480_s16, 3  ;;  %s924_s28 = sshll.u32 %s1480_s16, 2 }
   0xf   : > { %1046 = vmatpush3.bf16.msra.mxu0 %v1182_v5  ;;  %1163 = vmatpush3.bf16.msra.mxu1 %v1182_v5  ;;  %s1310_s9 = scalar_lea.vmem %s1475_s0, %s1008_s4  ;;  %s1378_s4 = scalar_lea.vmem %s1478_s3, %s924_s28 }
  0x10   : > { %1047 = vmatprep.subr.bf16.mxu0 %v1183_v6  ;;  %1156 = vmatprep.subr.bf16.mxu1 %v1183_v6  ;;  %v1195_v11 = vld [vmem:[%s1310_s9 + $0x4] ss:$8 sps:$4 sm:$0xff]   ;;  %v1193_v18 = vld [vmem:[%s1310_s9] ss:$8 sps:$4 sm:$0xff]   ;;  %v1199_v20 = vld [vmem:[%s1310_s9 + $0x14] ss:$8 sps:$4 sm:$0xff]  }
  0x11   : > { %v1198_v12 = vld [vmem:[%s1310_s9 + $0x84] ss:$8 sps:$4 sm:$0xff]   ;;  %537 = vmatprep.mubr.bf16.mxu0 %v1195_v11  ;;  %v1196_v19 = vld [vmem:[%s1310_s9 + $0x80] ss:$8 sps:$4 sm:$0xff]   ;;  %v1201_v21 = vld [vmem:[%s1310_s9 + $0x94] ss:$8 sps:$4 sm:$0xff]  }
  0x12   : > { %601 = vmatprep.mubr.bf16.mxu1 %v1198_v12  ;;  %v1203_v22 = vld [vmem:[%s1310_s9 + $0x10] ss:$8 sps:$4 sm:$0xff]   ;;  %v1205_v24 = vld [vmem:[%s1310_s9 + $0x24] ss:$8 sps:$4 sm:$0xff]   ;;  %v1209_v26 = vld [vmem:[%s1310_s9 + $0x20] ss:$8 sps:$4 sm:$0xff]  }
  0x13   : > { %1048 = vmatpush3.bf16.msra.mxu0 %v1184_v7  ;;  %1164 = vmatpush3.bf16.msra.mxu1 %v1184_v7  ;;  %v1204_v23 = vld [vmem:[%s1310_s9 + $0x90] ss:$8 sps:$4 sm:$0xff]   ;;  %v1207_v25 = vld [vmem:[%s1310_s9 + $0xa4] ss:$8 sps:$4 sm:$0xff]   ;;  %v1210_v27 = vld [vmem:[%s1310_s9 + $0xa0] ss:$8 sps:$4 sm:$0xff]  }
  0x14   : > { %1049 = vmatprep.subr.bf16.mxu0 %v1185_v8  ;;  %1157 = vmatprep.subr.bf16.mxu1 %v1185_v8  ;;  %v1211_v28 = vld [vmem:[%s1310_s9 + $0x34] ss:$8 sps:$4 sm:$0xff]   ;;  %v1215_v30 = vld [vmem:[%s1310_s9 + $0x30] ss:$8 sps:$4 sm:$0xff]   ;;  %v1217_v32 = vld [vmem:[%s1310_s9 + $0x44] ss:$8 sps:$4 sm:$0xff]  }
  0x15   : > { %v1213_v29 = vld [vmem:[%s1310_s9 + $0xb4] ss:$8 sps:$4 sm:$0xff]   ;;  %v1216_v31 = vld [vmem:[%s1310_s9 + $0xb0] ss:$8 sps:$4 sm:$0xff]   ;;  %v1219_v33 = vld [vmem:[%s1310_s9 + $0xc4] ss:$8 sps:$4 sm:$0xff]  }
  0x16   : > { %v1221_v34 = vld [vmem:[%s1310_s9 + $0x40] ss:$8 sps:$4 sm:$0xff]   ;;  %v1223_v36 = vld [vmem:[%s1310_s9 + $0x54] ss:$8 sps:$4 sm:$0xff]   ;;  %v1227_v38 = vld [vmem:[%s1310_s9 + $0x50] ss:$8 sps:$4 sm:$0xff]  }
  0x17   : > { %1050 = vmatpush3.bf16.msra.mxu0 %v1186_v9  ;;  %1165 = vmatpush3.bf16.msra.mxu1 %v1186_v9  ;;  %v1222_v35 = vld [vmem:[%s1310_s9 + $0xc0] ss:$8 sps:$4 sm:$0xff]   ;;  %v1225_v37 = vld [vmem:[%s1310_s9 + $0xd4] ss:$8 sps:$4 sm:$0xff]   ;;  %v1228_v39 = vld [vmem:[%s1310_s9 + $0xd0] ss:$8 sps:$4 sm:$0xff]  }
  0x18   : > { %1051 = vmatprep.subr.bf16.mxu0 %v1187_v10  ;;  %1158 = vmatprep.subr.bf16.mxu1 %v1187_v10  ;;  %v1229_v40 = vld [vmem:[%s1310_s9 + $0x64] ss:$8 sps:$4 sm:$0xff]   ;;  %v1233_v42 = vld [vmem:[%s1310_s9 + $0x60] ss:$8 sps:$4 sm:$0xff]   ;;  %v1235_v44 = vld [vmem:[%s1310_s9 + $0x74] ss:$8 sps:$4 sm:$0xff]  }
  0x19   : > { %v1231_v41 = vld [vmem:[%s1310_s9 + $0xe4] ss:$8 sps:$4 sm:$0xff]   ;;  %v1234_v43 = vld [vmem:[%s1310_s9 + $0xe0] ss:$8 sps:$4 sm:$0xff]   ;;  %v1237_v45 = vld [vmem:[%s1310_s9 + $0xf4] ss:$8 sps:$4 sm:$0xff]  }
  0x1a   : > { %v1239_v46 = vld [vmem:[%s1310_s9 + $0x70] ss:$8 sps:$4 sm:$0xff]  }
  0x1b   : > { %1052 = vmatpush3.bf16.msra.mxu0 %v1188_v13  ;;  %1166 = vmatpush3.bf16.msra.mxu1 %v1188_v13  ;;  %v1240_v47 = vld [vmem:[%s1310_s9 + $0xf0] ss:$8 sps:$4 sm:$0xff]  }
  0x1c   : > { %1053 = vmatprep.subr.bf16.mxu0 %v1189_v14  ;;  %1159 = vmatprep.subr.bf16.mxu1 %v1189_v14 }
  0x1f   : > { %1054 = vmatpush3.bf16.msra.mxu0 %v1190_v15  ;;  %1167 = vmatpush3.bf16.msra.mxu1 %v1190_v15 }
  0x20   : > { %1055 = vmatprep.subr.bf16.mxu0 %v1191_v16  ;;  %1160 = vmatprep.subr.bf16.mxu1 %v1191_v16 }
  0x23   : > { %1056 = vmatpush3.bf16.msra.mxu0 %v1192_v17  ;;  %1168 = vmatpush3.bf16.msra.mxu1 %v1192_v17 }
  0x26   : > { %538 = vmatmul.mubr.bf16.vlgmr.msra.gmra.mrb[0].mxu0 %v1193_v18  ;;  %602 = vmatmul.mubr.bf16.vlgmr.msra.gmra.mrb[0].mxu1 %v1196_v19 }
  0x27   : > { %545 = vmatprep.mubr.bf16.mxu0 %v1199_v20  ;;  %609 = vmatprep.mubr.bf16.mxu1 %v1201_v21 }
  0x2e   : > { %546 = vmatmul.mubr.bf16.gmra.mrb[4].mxu0 %v1203_v22  ;;  %610 = vmatmul.mubr.bf16.gmra.mrb[4].mxu1 %v1204_v23 }
  0x2f   : > { %553 = vmatprep.mubr.bf16.mxu0 %v1205_v24  ;;  %617 = vmatprep.mubr.bf16.mxu1 %v1207_v25 }
  0x36   : > { %554 = vmatmul.mubr.bf16.gmra.mrb[8].mxu0 %v1209_v26  ;;  %618 = vmatmul.mubr.bf16.gmra.mrb[8].mxu1 %v1210_v27 }
  0x37   : > { %561 = vmatprep.mubr.bf16.mxu0 %v1211_v28  ;;  %625 = vmatprep.mubr.bf16.mxu1 %v1213_v29 }
  0x3e   : > { %562 = vmatmul.mubr.bf16.gmra.mrb[12].mxu0 %v1215_v30  ;;  %626 = vmatmul.mubr.bf16.gmra.mrb[12].mxu1 %v1216_v31 }
  0x3f   : > { %569 = vmatprep.mubr.bf16.mxu0 %v1217_v32  ;;  %633 = vmatprep.mubr.bf16.mxu1 %v1219_v33 }
  0x46   : > { %570 = vmatmul.mubr.bf16.gmra.mrb[16].mxu0 %v1221_v34  ;;  %634 = vmatmul.mubr.bf16.gmra.mrb[16].mxu1 %v1222_v35 }
  0x47   : > { %577 = vmatprep.mubr.bf16.mxu0 %v1223_v36  ;;  %641 = vmatprep.mubr.bf16.mxu1 %v1225_v37 }
  0x4e   : > { %578 = vmatmul.mubr.bf16.gmra.mrb[20].mxu0 %v1227_v38  ;;  %642 = vmatmul.mubr.bf16.gmra.mrb[20].mxu1 %v1228_v39 }
  0x4f   : > { %585 = vmatprep.mubr.bf16.mxu0 %v1229_v40  ;;  %649 = vmatprep.mubr.bf16.mxu1 %v1231_v41 }
  0x56   : > { %586 = vmatmul.mubr.bf16.gmra.mrb[24].mxu0 %v1233_v42  ;;  %650 = vmatmul.mubr.bf16.gmra.mrb[24].mxu1 %v1234_v43 }
  0x57   : > { %593 = vmatprep.mubr.bf16.mxu0 %v1235_v44  ;;  %657 = vmatprep.mubr.bf16.mxu1 %v1237_v45 }
  0x5e   : > { %594 = vmatmul.mubr.bf16.gmra.mrb[28].mxu0 %v1239_v46  ;;  %658 = vmatmul.mubr.bf16.gmra.mrb[28].mxu1 %v1240_v47 }
  0xf9   : > { %v1057_v48 = vpop.f32.mrb[0].mxu0  ;;  %v1105_v49 = vpop.f32.mrb[0].mxu1 }
  0xfa   : > { %v1058_v51 = vpop.f32.mrb[1].mxu0  ;;  %v1106_v52 = vpop.f32.mrb[1].mxu1 }
  0xfb   : > { %v1059_v53 = vadd.f32 %v1058_v51, %v1057_v48  ;;  %v1107_v54 = vadd.f32 %v1106_v52, %v1105_v49  ;;  %v1060_v55 = vpop.f32.mrb[2].mxu0  ;;  %v1108_v56 = vpop.f32.mrb[2].mxu1 }
  0xfc   : > { %v1061_v57 = vpop.f32.mrb[3].mxu0  ;;  %v1109_v58 = vpop.f32.mrb[3].mxu1 }
  0xfd   : > { %v540_v59 = vadd.f32 %v1059_v53, %v1368_v50  ;;  %v604_v60 = vadd.f32 %v1107_v54, %v1368_v50  ;;  %v1062_v61 = vadd.f32 %v1061_v57, %v1060_v55  ;;  %v1110_v62 = vadd.f32 %v1109_v58, %v1108_v56 }
  0xff   : > { %v666_v63 = vmax.f32 %v540_v59, 0.0  ;;  %v682_v0 = vmax.f32 %v604_v60, 0.0  ;;  %v543_v1 = vadd.f32 %v1062_v61, %v1368_v50  ;;  %v607_v2 = vadd.f32 %v1110_v62, %v1368_v50 }
 0x101   : > { %v1009_v3 = vpack.c.bf16 %v666_v63, %v666_v63  ;;  %v1025_v4 = vpack.c.bf16 %v682_v0, %v682_v0  ;;  %v667_v5 = vmax.f32 %v543_v1, 0.0  ;;  %v683_v6 = vmax.f32 %v607_v2, 0.0  ;;  %v1063_v7 = vpop.f32.mrb[4].mxu0  ;;  %v1111_v8 = vpop.f32.mrb[4].mxu1 }
 0x102   : > { %v1064_v9 = vpop.f32.mrb[5].mxu0  ;;  %v1112_v10 = vpop.f32.mrb[5].mxu1 }
 0x103   : > { %827 = vst.msk [vmem:[%s1378_s4] sm:$0xf] %vm826_vm0, %v1009_v3  ;;  %843 = vst.msk [vmem:[%s1378_s4 + $0x40] sm:$0xf] %vm826_vm0, %v1025_v4  ;;  %v1010_v11 = vpack.c.bf16 %v667_v5, %v667_v5  ;;  %v1026_v12 = vpack.c.bf16 %v683_v6, %v683_v6  ;;  %v1065_v13 = vadd.f32 %v1064_v9, %v1063_v7  ;;  %v1066_v15 = vpop.f32.mrb[6].mxu0  ;;  %v1114_v16 = vpop.f32.mrb[6].mxu1 }
 0x104   : > { %v1113_v14 = vadd.f32 %v1112_v10, %v1111_v8  ;;  %v1067_v17 = vpop.f32.mrb[7].mxu0  ;;  %v1115_v18 = vpop.f32.mrb[7].mxu1 }
 0x105   : > { %828 = vst.msk [vmem:[%s1378_s4 + $0x4] sm:$0xf] %vm826_vm0, %v1010_v11  ;;  %844 = vst.msk [vmem:[%s1378_s4 + $0x44] sm:$0xf] %vm826_vm0, %v1026_v12  ;;  %v548_v19 = vadd.f32 %v1065_v13, %v1368_v50  ;;  %v1068_v21 = vadd.f32 %v1067_v17, %v1066_v15  ;;  %v1116_v22 = vadd.f32 %v1115_v18, %v1114_v16 }
 0x106   : > { %v612_v20 = vadd.f32 %v1113_v14, %v1368_v50 }
 0x107   : > { %v668_v23 = vmax.f32 %v548_v19, 0.0  ;;  %v551_v25 = vadd.f32 %v1068_v21, %v1368_v50  ;;  %v615_v26 = vadd.f32 %v1116_v22, %v1368_v50 }
 0x108   : > { %v684_v24 = vmax.f32 %v612_v20, 0.0 }
 0x109   : > { %v1011_v27 = vpack.c.bf16 %v668_v23, %v668_v23  ;;  %v669_v29 = vmax.f32 %v551_v25, 0.0  ;;  %v685_v30 = vmax.f32 %v615_v26, 0.0  ;;  %v1069_v31 = vpop.f32.mrb[8].mxu0  ;;  %v1117_v32 = vpop.f32.mrb[8].mxu1 }
 0x10a   : > { %v1027_v28 = vpack.c.bf16 %v684_v24, %v684_v24  ;;  %v1070_v33 = vpop.f32.mrb[9].mxu0  ;;  %v1118_v34 = vpop.f32.mrb[9].mxu1 }
 0x10b   : > { %829 = vst.msk [vmem:[%s1378_s4 + $0x8] sm:$0xf] %vm826_vm0, %v1011_v27  ;;  %v1012_v35 = vpack.c.bf16 %v669_v29, %v669_v29  ;;  %v1028_v36 = vpack.c.bf16 %v685_v30, %v685_v30  ;;  %v1071_v37 = vadd.f32 %v1070_v33, %v1069_v31  ;;  %v1119_v38 = vadd.f32 %v1118_v34, %v1117_v32  ;;  %v1072_v39 = vpop.f32.mrb[10].mxu0  ;;  %v1120_v40 = vpop.f32.mrb[10].mxu1 }
 0x10c   : > { %845 = vst.msk [vmem:[%s1378_s4 + $0x48] sm:$0xf] %vm826_vm0, %v1027_v28  ;;  %v1073_v41 = vpop.f32.mrb[11].mxu0  ;;  %v1121_v42 = vpop.f32.mrb[11].mxu1 }
 0x10d   : > { %830 = vst.msk [vmem:[%s1378_s4 + $0xc] sm:$0xf] %vm826_vm0, %v1012_v35  ;;  %846 = vst.msk [vmem:[%s1378_s4 + $0x4c] sm:$0xf] %vm826_vm0, %v1028_v36  ;;  %v556_v43 = vadd.f32 %v1071_v37, %v1368_v50  ;;  %v620_v44 = vadd.f32 %v1119_v38, %v1368_v50  ;;  %v1074_v45 = vadd.f32 %v1073_v41, %v1072_v39 }
 0x10e   : > { %v1122_v46 = vadd.f32 %v1121_v42, %v1120_v40 }
 0x10f   : > { %v670_v47 = vmax.f32 %v556_v43, 0.0  ;;  %v686_v48 = vmax.f32 %v620_v44, 0.0  ;;  %v559_v49 = vadd.f32 %v1074_v45, %v1368_v50 }
 0x110   : > { %v623_v51 = vadd.f32 %v1122_v46, %v1368_v50 }
 0x111   : > { %v1013_v52 = vpack.c.bf16 %v670_v47, %v670_v47  ;;  %v1029_v53 = vpack.c.bf16 %v686_v48, %v686_v48  ;;  %v671_v54 = vmax.f32 %v559_v49, 0.0  ;;  %v1075_v56 = vpop.f32.mrb[12].mxu0  ;;  %v1123_v57 = vpop.f32.mrb[12].mxu1 }
 0x112   : > { %v687_v55 = vmax.f32 %v623_v51, 0.0  ;;  %v1076_v58 = vpop.f32.mrb[13].mxu0  ;;  %v1124_v59 = vpop.f32.mrb[13].mxu1 }
 0x113   : > { %831 = vst.msk [vmem:[%s1378_s4 + $0x10] sm:$0xf] %vm826_vm0, %v1013_v52  ;;  %847 = vst.msk [vmem:[%s1378_s4 + $0x50] sm:$0xf] %vm826_vm0, %v1029_v53  ;;  %v1014_v60 = vpack.c.bf16 %v671_v54, %v671_v54  ;;  %v1077_v62 = vadd.f32 %v1076_v58, %v1075_v56  ;;  %v1125_v63 = vadd.f32 %v1124_v59, %v1123_v57  ;;  %v1078_v0 = vpop.f32.mrb[14].mxu0  ;;  %v1126_v1 = vpop.f32.mrb[14].mxu1 }
 0x114   : > { %v1030_v61 = vpack.c.bf16 %v687_v55, %v687_v55  ;;  %v1079_v2 = vpop.f32.mrb[15].mxu0  ;;  %v1127_v3 = vpop.f32.mrb[15].mxu1 }
 0x115   : > { %832 = vst.msk [vmem:[%s1378_s4 + $0x14] sm:$0xf] %vm826_vm0, %v1014_v60  ;;  %v564_v4 = vadd.f32 %v1077_v62, %v1368_v50  ;;  %v628_v5 = vadd.f32 %v1125_v63, %v1368_v50  ;;  %v1080_v6 = vadd.f32 %v1079_v2, %v1078_v0  ;;  %v1128_v7 = vadd.f32 %v1127_v3, %v1126_v1 }
 0x116   : > { %848 = vst.msk [vmem:[%s1378_s4 + $0x54] sm:$0xf] %vm826_vm0, %v1030_v61 }
 0x117   : > { %v672_v8 = vmax.f32 %v564_v4, 0.0  ;;  %v688_v9 = vmax.f32 %v628_v5, 0.0  ;;  %v567_v10 = vadd.f32 %v1080_v6, %v1368_v50  ;;  %v631_v11 = vadd.f32 %v1128_v7, %v1368_v50 }
 0x119   : > { %v1015_v12 = vpack.c.bf16 %v672_v8, %v672_v8  ;;  %v1031_v13 = vpack.c.bf16 %v688_v9, %v688_v9  ;;  %v673_v14 = vmax.f32 %v567_v10, 0.0  ;;  %v689_v15 = vmax.f32 %v631_v11, 0.0  ;;  %v1081_v16 = vpop.f32.mrb[16].mxu0  ;;  %v1129_v17 = vpop.f32.mrb[16].mxu1 }
 0x11a   : > { %v1082_v18 = vpop.f32.mrb[17].mxu0  ;;  %v1130_v19 = vpop.f32.mrb[17].mxu1 }
 0x11b   : > { %833 = vst.msk [vmem:[%s1378_s4 + $0x18] sm:$0xf] %vm826_vm0, %v1015_v12  ;;  %849 = vst.msk [vmem:[%s1378_s4 + $0x58] sm:$0xf] %vm826_vm0, %v1031_v13  ;;  %v1016_v20 = vpack.c.bf16 %v673_v14, %v673_v14  ;;  %v1032_v21 = vpack.c.bf16 %v689_v15, %v689_v15  ;;  %v1083_v22 = vadd.f32 %v1082_v18, %v1081_v16  ;;  %v1084_v24 = vpop.f32.mrb[18].mxu0  ;;  %v1132_v25 = vpop.f32.mrb[18].mxu1 }
 0x11c   : > { %v1131_v23 = vadd.f32 %v1130_v19, %v1129_v17  ;;  %v1085_v26 = vpop.f32.mrb[19].mxu0  ;;  %v1133_v27 = vpop.f32.mrb[19].mxu1 }
 0x11d   : > { %834 = vst.msk [vmem:[%s1378_s4 + $0x1c] sm:$0xf] %vm826_vm0, %v1016_v20  ;;  %850 = vst.msk [vmem:[%s1378_s4 + $0x5c] sm:$0xf] %vm826_vm0, %v1032_v21  ;;  %v572_v28 = vadd.f32 %v1083_v22, %v1368_v50  ;;  %v1086_v30 = vadd.f32 %v1085_v26, %v1084_v24  ;;  %v1134_v31 = vadd.f32 %v1133_v27, %v1132_v25 }
 0x11e   : > { %v636_v29 = vadd.f32 %v1131_v23, %v1368_v50 }
 0x11f   : > { %v674_v32 = vmax.f32 %v572_v28, 0.0  ;;  %v575_v34 = vadd.f32 %v1086_v30, %v1368_v50  ;;  %v639_v35 = vadd.f32 %v1134_v31, %v1368_v50 }
 0x120   : > { %v690_v33 = vmax.f32 %v636_v29, 0.0 }
 0x121   : > { %v1017_v36 = vpack.c.bf16 %v674_v32, %v674_v32  ;;  %v675_v38 = vmax.f32 %v575_v34, 0.0  ;;  %v691_v39 = vmax.f32 %v639_v35, 0.0  ;;  %v1087_v40 = vpop.f32.mrb[20].mxu0  ;;  %v1135_v41 = vpop.f32.mrb[20].mxu1 }
 0x122   : > { %v1033_v37 = vpack.c.bf16 %v690_v33, %v690_v33  ;;  %v1088_v42 = vpop.f32.mrb[21].mxu0  ;;  %v1136_v43 = vpop.f32.mrb[21].mxu1 }
 0x123   : > { %835 = vst.msk [vmem:[%s1378_s4 + $0x20] sm:$0xf] %vm826_vm0, %v1017_v36  ;;  %v1018_v44 = vpack.c.bf16 %v675_v38, %v675_v38  ;;  %v1034_v45 = vpack.c.bf16 %v691_v39, %v691_v39  ;;  %v1089_v46 = vadd.f32 %v1088_v42, %v1087_v40  ;;  %v1137_v47 = vadd.f32 %v1136_v43, %v1135_v41  ;;  %v1090_v48 = vpop.f32.mrb[22].mxu0  ;;  %v1138_v49 = vpop.f32.mrb[22].mxu1 }
 0x124   : > { %851 = vst.msk [vmem:[%s1378_s4 + $0x60] sm:$0xf] %vm826_vm0, %v1033_v37  ;;  %v1091_v51 = vpop.f32.mrb[23].mxu0  ;;  %v1139_v52 = vpop.f32.mrb[23].mxu1 }
 0x125   : > { %836 = vst.msk [vmem:[%s1378_s4 + $0x24] sm:$0xf] %vm826_vm0, %v1018_v44  ;;  %852 = vst.msk [vmem:[%s1378_s4 + $0x64] sm:$0xf] %vm826_vm0, %v1034_v45  ;;  %v580_v53 = vadd.f32 %v1089_v46, %v1368_v50  ;;  %v644_v54 = vadd.f32 %v1137_v47, %v1368_v50  ;;  %v1092_v55 = vadd.f32 %v1091_v51, %v1090_v48 }
 0x126   : > { %v1140_v56 = vadd.f32 %v1139_v52, %v1138_v49 }
 0x127   : > { %v676_v57 = vmax.f32 %v580_v53, 0.0  ;;  %v692_v58 = vmax.f32 %v644_v54, 0.0  ;;  %v583_v59 = vadd.f32 %v1092_v55, %v1368_v50 }
 0x128   : > { %v647_v60 = vadd.f32 %v1140_v56, %v1368_v50 }
 0x129   : > { %v1019_v61 = vpack.c.bf16 %v676_v57, %v676_v57  ;;  %v1035_v62 = vpack.c.bf16 %v692_v58, %v692_v58  ;;  %v677_v63 = vmax.f32 %v583_v59, 0.0  ;;  %v1093_v1 = vpop.f32.mrb[24].mxu0  ;;  %v1141_v2 = vpop.f32.mrb[24].mxu1 }
 0x12a   : > { %v693_v0 = vmax.f32 %v647_v60, 0.0  ;;  %v1094_v3 = vpop.f32.mrb[25].mxu0  ;;  %v1142_v4 = vpop.f32.mrb[25].mxu1 }
 0x12b   : > { %837 = vst.msk [vmem:[%s1378_s4 + $0x28] sm:$0xf] %vm826_vm0, %v1019_v61  ;;  %853 = vst.msk [vmem:[%s1378_s4 + $0x68] sm:$0xf] %vm826_vm0, %v1035_v62  ;;  %v1020_v5 = vpack.c.bf16 %v677_v63, %v677_v63  ;;  %v1095_v7 = vadd.f32 %v1094_v3, %v1093_v1  ;;  %v1143_v8 = vadd.f32 %v1142_v4, %v1141_v2  ;;  %v1096_v9 = vpop.f32.mrb[26].mxu0  ;;  %v1144_v10 = vpop.f32.mrb[26].mxu1 }
 0x12c   : > { %v1036_v6 = vpack.c.bf16 %v693_v0, %v693_v0  ;;  %v1097_v11 = vpop.f32.mrb[27].mxu0  ;;  %v1145_v12 = vpop.f32.mrb[27].mxu1 }
 0x12d   : > { %838 = vst.msk [vmem:[%s1378_s4 + $0x2c] sm:$0xf] %vm826_vm0, %v1020_v5  ;;  %v588_v13 = vadd.f32 %v1095_v7, %v1368_v50  ;;  %v652_v14 = vadd.f32 %v1143_v8, %v1368_v50  ;;  %v1098_v15 = vadd.f32 %v1097_v11, %v1096_v9  ;;  %v1146_v16 = vadd.f32 %v1145_v12, %v1144_v10 }
 0x12e   : > { %854 = vst.msk [vmem:[%s1378_s4 + $0x6c] sm:$0xf] %vm826_vm0, %v1036_v6 }
 0x12f   : > { %v678_v17 = vmax.f32 %v588_v13, 0.0  ;;  %v694_v18 = vmax.f32 %v652_v14, 0.0  ;;  %v591_v19 = vadd.f32 %v1098_v15, %v1368_v50  ;;  %v655_v20 = vadd.f32 %v1146_v16, %v1368_v50 }
 0x131   : > { %v1021_v21 = vpack.c.bf16 %v678_v17, %v678_v17  ;;  %v1037_v22 = vpack.c.bf16 %v694_v18, %v694_v18  ;;  %v679_v23 = vmax.f32 %v591_v19, 0.0  ;;  %v695_v24 = vmax.f32 %v655_v20, 0.0  ;;  %v1099_v25 = vpop.f32.mrb[28].mxu0  ;;  %v1147_v26 = vpop.f32.mrb[28].mxu1 }
 0x132   : > { %v1100_v27 = vpop.f32.mrb[29].mxu0  ;;  %v1148_v28 = vpop.f32.mrb[29].mxu1 }
 0x133   : > { %839 = vst.msk [vmem:[%s1378_s4 + $0x30] sm:$0xf] %vm826_vm0, %v1021_v21  ;;  %855 = vst.msk [vmem:[%s1378_s4 + $0x70] sm:$0xf] %vm826_vm0, %v1037_v22  ;;  %v1022_v29 = vpack.c.bf16 %v679_v23, %v679_v23  ;;  %v1038_v30 = vpack.c.bf16 %v695_v24, %v695_v24  ;;  %v1101_v31 = vadd.f32 %v1100_v27, %v1099_v25  ;;  %v1102_v33 = vpop.f32.mrb[30].mxu0  ;;  %v1150_v34 = vpop.f32.mrb[30].mxu1 }
 0x134   : > { %v1149_v32 = vadd.f32 %v1148_v28, %v1147_v26  ;;  %v1103_v35 = vpop.f32.mrb[31].mxu0  ;;  %v1151_v36 = vpop.f32.mrb[31].mxu1 }
 0x135   : > { %840 = vst.msk [vmem:[%s1378_s4 + $0x34] sm:$0xf] %vm826_vm0, %v1022_v29  ;;  %856 = vst.msk [vmem:[%s1378_s4 + $0x74] sm:$0xf] %vm826_vm0, %v1038_v30  ;;  %v596_v37 = vadd.f32 %v1101_v31, %v1368_v50  ;;  %v1104_v39 = vadd.f32 %v1103_v35, %v1102_v33  ;;  %v1152_v40 = vadd.f32 %v1151_v36, %v1150_v34 }
 0x136   : > { %v660_v38 = vadd.f32 %v1149_v32, %v1368_v50 }
 0x137   : > { %v680_v41 = vmax.f32 %v596_v37, 0.0  ;;  %v599_v43 = vadd.f32 %v1104_v39, %v1368_v50  ;;  %v663_v44 = vadd.f32 %v1152_v40, %v1368_v50 }
 0x138   : > { %v696_v42 = vmax.f32 %v660_v38, 0.0 }
 0x139   : > { %v1023_v45 = vpack.c.bf16 %v680_v41, %v680_v41  ;;  %v681_v47 = vmax.f32 %v599_v43, 0.0  ;;  %v697_v48 = vmax.f32 %v663_v44, 0.0 }
 0x13a   : > { %v1039_v46 = vpack.c.bf16 %v696_v42, %v696_v42 }
 0x13b   : > { %841 = vst.msk [vmem:[%s1378_s4 + $0x38] sm:$0xf] %vm826_vm0, %v1023_v45  ;;  %v1024_v49 = vpack.c.bf16 %v681_v47, %v681_v47  ;;  %v1040_v51 = vpack.c.bf16 %v697_v48, %v697_v48 }
 0x13c   : > { %857 = vst.msk [vmem:[%s1378_s4 + $0x78] sm:$0xf] %vm826_vm0, %v1039_v46 }
 0x13d   : > { %842 = vst.msk [vmem:[%s1378_s4 + $0x3c] sm:$0xf] %vm826_vm0, %v1024_v49  ;;  %858 = vst.msk [vmem:[%s1378_s4 + $0x7c] sm:$0xf] %vm826_vm0, %v1040_v51 }
 0x13e PF: > { %s13_s12 = sadd.s32 1, %s1247_s12  }
 0x13f   : > { %p10_p4 = scmp.ge.s32.totalorder %s13_s12, 4  }
 0x141   :  { %12 = sbr.rel (!%p10_p4) target bundleno = 1 (0x1), region = 62 }

// kernel: fool_clip_forward.15
= control target key start
LH: loop header
LB: loop body
LE: loop exit
PB: predicated region body
PF: predicated region fallthrough
CT: control target
= control target key end

     0   :  { %vm1290_vm0 = vcmask 519168   ;;  %s2327_s1 = inlined_call_operand.vmem [shape: bf16[896,64], index: 1, kind: input, shape index: {}]   ;;  %s2328_s0 = inlined_call_operand.vmem [shape: bf16[128,896], index: 0, kind: input, shape index: {}]   ;;  %s2329_s2 = inlined_call_operand.vmem [shape: f32[1,64], index: 2, kind: input, shape index: {}]   ;;  %s2330_s3 = inlined_call_operand.vmem [shape: bf16[128,64], index: 3, kind: output, shape index: {}]  }
   0x1   :  { %v1696_v0 = vld [vmem:[%s2327_s1 + $0x40] sm:$0xff]   ;;  %v1700_v4 = vld [vmem:[%s2327_s1 + $0x48] sm:$0xff]   ;;  %v1704_v8 = vld [vmem:[%s2327_s1 + $0x50] sm:$0xff]  }
   0x2   :  { %v1697_v1 = vld [vmem:[%s2327_s1] sm:$0xff]   ;;  %1456 = vmatprep.subr.bf16.mxu0 %v1696_v0  ;;  %v1701_v5 = vld [vmem:[%s2327_s1 + $0x8] sm:$0xff]   ;;  %v1705_v9 = vld [vmem:[%s2327_s1 + $0x10] sm:$0xff]  }
   0x3   :  { %v1698_v2 = vld [vmem:[%s2327_s1 + $0xc0] sm:$0xff]   ;;  %1457 = vmatpush3.bf16.msra.mxu0 %v1697_v1  ;;  %v1702_v6 = vld [vmem:[%s2327_s1 + $0xc8] sm:$0xff]   ;;  %v1706_v10 = vld [vmem:[%s2327_s1 + $0xd0] sm:$0xff]  }
   0x4   :  { %v1699_v3 = vld [vmem:[%s2327_s1 + $0x80] sm:$0xff]   ;;  %1520 = vmatprep.subr.bf16.mxu1 %v1698_v2  ;;  %1458 = vmatprep.subr.bf16.mxu0 %v1700_v4  ;;  %v1703_v7 = vld [vmem:[%s2327_s1 + $0x88] sm:$0xff]   ;;  %v1707_v11 = vld [vmem:[%s2327_s1 + $0x90] sm:$0xff]  }
   0x5   :  { %1521 = vmatpush3.bf16.msra.mxu1 %v1699_v3  ;;  %v1708_v12 = vld [vmem:[%s2327_s1 + $0x58] sm:$0xff]   ;;  %v1712_v16 = vld [vmem:[%s2327_s1 + $0x60] sm:$0xff]   ;;  %v1716_v20 = vld [vmem:[%s2327_s1 + $0x68] sm:$0xff]  }
   0x6   :  { %1522 = vmatprep.subr.bf16.mxu1 %v1702_v6  ;;  %v1709_v13 = vld [vmem:[%s2327_s1 + $0x18] sm:$0xff]   ;;  %v1713_v17 = vld [vmem:[%s2327_s1 + $0x20] sm:$0xff]   ;;  %v1717_v21 = vld [vmem:[%s2327_s1 + $0x28] sm:$0xff]  }
   0x7   :  { %1459 = vmatpush3.bf16.msra.mxu0 %v1701_v5  ;;  %v1710_v14 = vld [vmem:[%s2327_s1 + $0xd8] sm:$0xff]   ;;  %v1714_v18 = vld [vmem:[%s2327_s1 + $0xe0] sm:$0xff]   ;;  %v1718_v22 = vld [vmem:[%s2327_s1 + $0xe8] sm:$0xff]  }
   0x8   :  { %1460 = vmatprep.subr.bf16.mxu0 %v1704_v8  ;;  %v1711_v15 = vld [vmem:[%s2327_s1 + $0x98] sm:$0xff]   ;;  %v1715_v19 = vld [vmem:[%s2327_s1 + $0xa0] sm:$0xff]   ;;  %v1719_v23 = vld [vmem:[%s2327_s1 + $0xa8] sm:$0xff]  }
   0x9   :  { %1523 = vmatpush3.bf16.msra.mxu1 %v1703_v7  ;;  %v1720_v24 = vld [vmem:[%s2327_s1 + $0x70] sm:$0xff]   ;;  %v1724_v28 = vld [vmem:[%s2327_s1 + $0x78] sm:$0xff]   ;;  %v1729_v32 = vld [vmem:[%s2328_s0 + $0x4] ss:$28 sps:$4 sm:$0xff]  }
   0xa   :  { %1524 = vmatprep.subr.bf16.mxu1 %v1706_v10  ;;  %v1721_v25 = vld [vmem:[%s2327_s1 + $0x30] sm:$0xff]   ;;  %v1725_v29 = vld [vmem:[%s2327_s1 + $0x38] sm:$0xff]   ;;  %854 = vmatprep.mubr.bf16.mxu0 %v1729_v32  ;;  %v1731_v34 = vld [vmem:[%s2327_s1 + $0x140] sm:$0xff]  }
   0xb   :  { %1461 = vmatpush3.bf16.msra.mxu0 %v1705_v9  ;;  %v1722_v26 = vld [vmem:[%s2327_s1 + $0xf0] sm:$0xff]   ;;  %v1726_v30 = vld [vmem:[%s2327_s1 + $0xf8] sm:$0xff]   ;;  %v1732_v35 = vld [vmem:[%s2328_s0 + $0x8] ss:$28 sps:$4 sm:$0xff]  }
   0xc   :  { %1462 = vmatprep.subr.bf16.mxu0 %v1708_v12  ;;  %v1723_v27 = vld [vmem:[%s2327_s1 + $0xb0] sm:$0xff]   ;;  %v1727_v31 = vld [vmem:[%s2328_s0] ss:$28 sps:$4 sm:$0xff]   ;;  %v1734_v36 = vld [vmem:[%s2328_s0 + $0xc] ss:$28 sps:$4 sm:$0xff]  }
   0xd   :  { %1525 = vmatpush3.bf16.msra.mxu1 %v1707_v11  ;;  %v1730_v33 = vld [vmem:[%s2327_s1 + $0xb8] sm:$0xff]   ;;  %v1735_v37 = vld [vmem:[%s2327_s1 + $0x100] sm:$0xff]   ;;  %951 = vmatprep.mubr.bf16.mxu1 %v1734_v36  ;;  %v1739_v40 = vld [vmem:[%s2327_s1 + $0x148] sm:$0xff]  }
   0xe   :  { %1526 = vmatprep.subr.bf16.mxu1 %v1710_v14  ;;  %v1736_v38 = vld [vmem:[%s2328_s0 + $0x3c] ss:$28 sps:$4 sm:$0xff]   ;;  %v1740_v41 = vld [vmem:[%s2328_s0 + $0x44] ss:$28 sps:$4 sm:$0xff]   ;;  %v1742_v42 = vld [vmem:[%s2327_s1 + $0x108] sm:$0xff]  }
   0xf   :  { %1463 = vmatpush3.bf16.msra.mxu0 %v1709_v13  ;;  %v1738_v39 = vld [vmem:[%s2328_s0 + $0x38] ss:$28 sps:$4 sm:$0xff]   ;;  %v1743_v43 = vld [vmem:[%s2328_s0 + $0x40] ss:$28 sps:$4 sm:$0xff]   ;;  %v1746_v48 = vld [vmem:[%s2328_s0 + $0x70] ss:$28 sps:$4 sm:$0xff]  }
  0x10   :  { %1464 = vmatprep.subr.bf16.mxu0 %v1712_v16  ;;  %v1744_v44 = vld [vmem:[%s2328_s0 + $0x74] ss:$28 sps:$4 sm:$0xff]   ;;  %v1748_v46 = vld [vmem:[%s2328_s0 + $0x7c] ss:$28 sps:$4 sm:$0xff]   ;;  %v1752_v49 = vld [vmem:[%s2328_s0 + $0xac] ss:$28 sps:$4 sm:$0xff]  }
  0x11   :  { %1527 = vmatpush3.bf16.msra.mxu1 %v1711_v15  ;;  %v1747_v45 = vld [vmem:[%s2327_s1 + $0x150] sm:$0xff]   ;;  %v1755_v50 = vld [vmem:[%s2327_s1 + $0x158] sm:$0xff]   ;;  %v1763_v54 = vld [vmem:[%s2327_s1 + $0x160] sm:$0xff]  }
  0x12   :  { %1528 = vmatprep.subr.bf16.mxu1 %v1714_v18  ;;  %v1750_v47 = vld [vmem:[%s2327_s1 + $0x110] sm:$0xff]   ;;  %v1758_v52 = vld [vmem:[%s2327_s1 + $0x118] sm:$0xff]   ;;  %v1754_v55 = vld [vmem:[%s2328_s0 + $0xa8] ss:$28 sps:$4 sm:$0xff]  }
  0x13   :  { %1465 = vmatpush3.bf16.msra.mxu0 %v1713_v17  ;;  %v1751_v51 = vld [vmem:[%s2328_s0 + $0x78] ss:$28 sps:$4 sm:$0xff]   ;;  %v1766_v56 = vld [vmem:[%s2327_s1 + $0x120] sm:$0xff]   ;;  %v1759_v59 = vld [vmem:[%s2328_s0 + $0xb0] ss:$28 sps:$4 sm:$0xff]  }
  0x14   :  { %1466 = vmatprep.subr.bf16.mxu0 %v1716_v20  ;;  %v1756_v53 = vld [vmem:[%s2328_s0 + $0xb4] ss:$28 sps:$4 sm:$0xff]   ;;  %v1760_v57 = vld [vmem:[%s2328_s0 + $0xe4] ss:$28 sps:$4 sm:$0xff]   ;;  %v1764_v60 = vld [vmem:[%s2328_s0 + $0xec] ss:$28 sps:$4 sm:$0xff]  }
  0x15   :  { %1529 = vmatpush3.bf16.msra.mxu1 %v1715_v19  ;;  %v1768_v58 = vld [vmem:[%s2327_s1 + $0x180] sm:$0xff]   ;;  %v1772_v61 = vld [vmem:[%s2327_s1 + $0x168] sm:$0xff]   ;;  %v1778_v0 = vld [vmem:[%s2327_s1 + $0x190] sm:$0xff]  }
  0x16   :  { %1530 = vmatprep.subr.bf16.mxu1 %v1718_v22  ;;  %v1773_v62 = vld [vmem:[%s2327_s1 + $0x188] sm:$0xff]   ;;  %v1762_v1 = vld [vmem:[%s2328_s0 + $0xe0] ss:$28 sps:$4 sm:$0xff]   ;;  %v1782_v4 = vld [vmem:[%s2327_s1 + $0x170] sm:$0xff]  }
  0x17   :  { %1467 = vmatpush3.bf16.msra.mxu0 %v1717_v21  ;;  %v1776_v63 = vld [vmem:[%s2327_s1 + $0x128] sm:$0xff]   ;;  %v1769_v3 = vld [vmem:[%s2328_s0 + $0x11c] ss:$28 sps:$4 sm:$0xff]   ;;  %v1774_v6 = vld [vmem:[%s2328_s0 + $0x124] ss:$28 sps:$4 sm:$0xff]  }
  0x18   :  { %1468 = vmatprep.subr.bf16.mxu0 %v1720_v24  ;;  %v1767_v2 = vld [vmem:[%s2328_s0 + $0xe8] ss:$28 sps:$4 sm:$0xff]   ;;  %v1783_v5 = vld [vmem:[%s2327_s1 + $0x198] sm:$0xff]   ;;  %v1786_v7 = vld [vmem:[%s2327_s1 + $0x130] sm:$0xff]  }
  0x19   :  { %1531 = vmatpush3.bf16.msra.mxu1 %v1719_v23  ;;  %v1788_v8 = vld [vmem:[%s2327_s1 + $0x1a0] sm:$0xff]   ;;  %v1771_v9 = vld [vmem:[%s2328_s0 + $0x118] ss:$28 sps:$4 sm:$0xff]   ;;  %v1793_v13 = vld [vmem:[%s2327_s1 + $0x1a8] sm:$0xff]  }
  0x1a   :  { %1532 = vmatprep.subr.bf16.mxu1 %v1722_v26  ;;  %v1792_v10 = vld [vmem:[%s2327_s1 + $0x178] sm:$0xff]   ;;  %v1779_v12 = vld [vmem:[%s2328_s0 + $0x154] ss:$28 sps:$4 sm:$0xff]   ;;  %v1789_v18 = vld [vmem:[%s2328_s0 + $0x18c] ss:$28 sps:$4 sm:$0xff]  }
  0x1b   :  { %1469 = vmatpush3.bf16.msra.mxu0 %v1721_v25  ;;  %v1777_v11 = vld [vmem:[%s2328_s0 + $0x120] ss:$28 sps:$4 sm:$0xff]   ;;  %v1798_v16 = vld [vmem:[%s2327_s1 + $0x1b0] sm:$0xff]   ;;  %v1791_v22 = vld [vmem:[%s2328_s0 + $0x188] ss:$28 sps:$4 sm:$0xff]  }
  0x1c   :  { %1470 = vmatprep.subr.bf16.mxu0 %v1724_v28  ;;  %v1796_v14 = vld [vmem:[%s2327_s1 + $0x138] sm:$0xff]   ;;  %v1781_v17 = vld [vmem:[%s2328_s0 + $0x150] ss:$28 sps:$4 sm:$0xff]  }
  0x1d   :  { %1533 = vmatpush3.bf16.msra.mxu1 %v1723_v27  ;;  %v1784_v15 = vld [vmem:[%s2328_s0 + $0x15c] ss:$28 sps:$4 sm:$0xff]   ;;  %v1794_v21 = vld [vmem:[%s2328_s0 + $0x194] ss:$28 sps:$4 sm:$0xff]   ;;  %v1805_v27 = vld [vmem:[%s2328_s0 + $0x4c] ss:$28 sps:$4 sm:$0xff]  }
  0x1e   :  { %1534 = vmatprep.subr.bf16.mxu1 %v1726_v30  ;;  %v1802_v19 = vld [vmem:[%s2327_s1 + $0x1b8] sm:$0xff]   ;;  %v1801_v23 = vld [vmem:[%s2328_s0 + $0x14] ss:$28 sps:$4 sm:$0xff]   ;;  %v1807_v30 = vld [vmem:[%s2328_s0 + $0x48] ss:$28 sps:$4 sm:$0xff]  }
  0x1f   :  { %1471 = vmatpush3.bf16.msra.mxu0 %v1725_v29  ;;  %v1787_v20 = vld [vmem:[%s2328_s0 + $0x158] ss:$28 sps:$4 sm:$0xff]   ;;  %v1797_v24 = vld [vmem:[%s2328_s0 + $0x190] ss:$28 sps:$4 sm:$0xff]   ;;  %v1811_v29 = vld [vmem:[%s2328_s0 + $0x88] ss:$28 sps:$4 sm:$0xff]  }
  0x20   :  { %1584 = vmatprep.subr.bf16.mxu0 %v1731_v34  ;;  %v1803_v25 = vld [vmem:[%s2328_s0 + $0x18] ss:$28 sps:$4 sm:$0xff]   ;;  %v1799_v26 = vld [vmem:[%s2328_s0 + $0x10] ss:$28 sps:$4 sm:$0xff]   ;;  %v1812_v32 = vld [vmem:[%s2328_s0 + $0xc0] ss:$28 sps:$4 sm:$0xff]  }
  0x21   :  { %1535 = vmatpush3.bf16.msra.mxu1 %v1730_v33  ;;  %v1804_v28 = vld [vmem:[%s2328_s0 + $0x50] ss:$28 sps:$4 sm:$0xff]   ;;  %v1819_v33 = vld [vmem:[%s2328_s0 + $0xf8] ss:$28 sps:$4 sm:$0xff]   ;;  %v1810_v34 = vld [vmem:[%s2328_s0 + $0x80] ss:$28 sps:$4 sm:$0xff]  }
  0x22   :  { %855 = vmatmul.mubr.bf16.vlgmr.msra.gmra.mrb[0].mxu0 %v1727_v31  ;;  %1664 = vmatprep.subr.bf16.mxu1 %v1768_v58  ;;  %v1808_v31 = vld [vmem:[%s2328_s0 + $0x84] ss:$28 sps:$4 sm:$0xff]   ;;  %v1820_v36 = vld [vmem:[%s2328_s0 + $0x130] ss:$28 sps:$4 sm:$0xff]  }
  0x23   :  { %1585 = vmatpush3.bf16.msra.mxu0 %v1735_v37  ;;  %862 = vmatprep.mubr.bf16.mxu0 %v1736_v38  ;;  %v1827_v37 = vld [vmem:[%s2328_s0 + $0x168] ss:$28 sps:$4 sm:$0xff]   ;;  %v1815_v38 = vld [vmem:[%s2328_s0 + $0xb8] ss:$28 sps:$4 sm:$0xff]  }
  0x24   :  { %952 = vmatmul.mubr.bf16.vlgmr.msra.gmra.mrb[0].mxu1 %v1732_v35  ;;  %1586 = vmatprep.subr.bf16.mxu0 %v1739_v40  ;;  %v1813_v35 = vld [vmem:[%s2328_s0 + $0xbc] ss:$28 sps:$4 sm:$0xff]  }
  0x25   :  { %959 = vmatprep.mubr.bf16.mxu1 %v1740_v41  ;;  %1665 = vmatpush3.bf16.msra.mxu1 %v1768_v58  ;;  %v1828_v40 = vld [vmem:[%s2328_s0 + $0x1a0] ss:$28 sps:$4 sm:$0xff]   ;;  %v1818_v41 = vld [vmem:[%s2328_s0 + $0xf0] ss:$28 sps:$4 sm:$0xff]  }
  0x26   :  { %1666 = vmatprep.subr.bf16.mxu1 %v1773_v62 }
  0x27   :  { %1587 = vmatpush3.bf16.msra.mxu0 %v1742_v42  ;;  %v1821_v42 = vld [vmem:[%s2328_s0 + $0x12c] ss:$28 sps:$4 sm:$0xff]  }
  0x28   :  { %1588 = vmatprep.subr.bf16.mxu0 %v1747_v45  ;;  %v1826_v45 = vld [vmem:[%s2328_s0 + $0x160] ss:$28 sps:$4 sm:$0xff]  }
  0x29   :  { %1667 = vmatpush3.bf16.msra.mxu1 %v1773_v62 }
  0x2a   :  { %863 = vmatmul.mubr.bf16.gmra.mrb[4].mxu0 %v1738_v39  ;;  %1668 = vmatprep.subr.bf16.mxu1 %v1778_v0  ;;  %v1816_v39 = vld [vmem:[%s2328_s0 + $0xf4] ss:$28 sps:$4 sm:$0xff]  }
  0x2b   :  { %870 = vmatprep.mubr.bf16.mxu0 %v1744_v44  ;;  %1589 = vmatpush3.bf16.msra.mxu0 %v1750_v47  ;;  %v1824_v44 = vld [vmem:[%s2328_s0 + $0x164] ss:$28 sps:$4 sm:$0xff]   ;;  %v1831_v47 = vld [vmem:[%s2328_s0 + $0x198] ss:$28 sps:$4 sm:$0xff]  }
  0x2c   :  { %960 = vmatmul.mubr.bf16.gmra.mrb[4].mxu1 %v1743_v43  ;;  %1590 = vmatprep.subr.bf16.mxu0 %v1755_v50  ;;  %v1823_v43 = vld [vmem:[%s2328_s0 + $0x128] ss:$28 sps:$4 sm:$0xff]  }
  0x2d   :  { %967 = vmatprep.mubr.bf16.mxu1 %v1748_v46  ;;  %1669 = vmatpush3.bf16.msra.mxu1 %v1778_v0  ;;  %v1829_v46 = vld [vmem:[%s2328_s0 + $0x19c] ss:$28 sps:$4 sm:$0xff]  }
  0x2e   :  { %1670 = vmatprep.subr.bf16.mxu1 %v1783_v5 }
  0x2f   :  { %1591 = vmatpush3.bf16.msra.mxu0 %v1758_v52 }
  0x30   :  { %1592 = vmatprep.subr.bf16.mxu0 %v1763_v54 }
  0x31   :  { %1671 = vmatpush3.bf16.msra.mxu1 %v1783_v5 }
  0x32   :  { %871 = vmatmul.mubr.bf16.gmra.mrb[8].mxu0 %v1746_v48  ;;  %1672 = vmatprep.subr.bf16.mxu1 %v1788_v8 }
  0x33   :  { %878 = vmatprep.mubr.bf16.mxu0 %v1752_v49  ;;  %1593 = vmatpush3.bf16.msra.mxu0 %v1766_v56  ;;  %v2191_v49 = vld [vmem:[%s2329_s2] ss:$0 sm:$0xff] }
  0x34   :  { %968 = vmatmul.mubr.bf16.gmra.mrb[8].mxu1 %v1751_v51  ;;  %1594 = vmatprep.subr.bf16.mxu0 %v1772_v61 }
  0x35   :  { %975 = vmatprep.mubr.bf16.mxu1 %v1756_v53  ;;  %1673 = vmatpush3.bf16.msra.mxu1 %v1788_v8 }
  0x36   :  { %1674 = vmatprep.subr.bf16.mxu1 %v1793_v13 }
  0x37   :  { %1595 = vmatpush3.bf16.msra.mxu0 %v1776_v63 }
  0x38   :  { %1596 = vmatprep.subr.bf16.mxu0 %v1782_v4 }
  0x39   :  { %1675 = vmatpush3.bf16.msra.mxu1 %v1793_v13 }
  0x3a   :  { %879 = vmatmul.mubr.bf16.gmra.mrb[12].mxu0 %v1754_v55  ;;  %1676 = vmatprep.subr.bf16.mxu1 %v1798_v16 }
  0x3b   :  { %886 = vmatprep.mubr.bf16.mxu0 %v1760_v57  ;;  %1597 = vmatpush3.bf16.msra.mxu0 %v1786_v7 }
  0x3c   :  { %976 = vmatmul.mubr.bf16.gmra.mrb[12].mxu1 %v1759_v59  ;;  %1598 = vmatprep.subr.bf16.mxu0 %v1792_v10 }
  0x3d   :  { %983 = vmatprep.mubr.bf16.mxu1 %v1764_v60  ;;  %1677 = vmatpush3.bf16.msra.mxu1 %v1798_v16 }
  0x3e   :  { %1678 = vmatprep.subr.bf16.mxu1 %v1802_v19 }
  0x3f   :  { %1599 = vmatpush3.bf16.msra.mxu0 %v1796_v14 }
  0x41   :  { %1679 = vmatpush3.bf16.msra.mxu1 %v1802_v19 }
  0x42   :  { %887 = vmatmul.mubr.bf16.gmra.mrb[16].mxu0 %v1762_v1 }
  0x43   :  { %894 = vmatprep.mubr.bf16.mxu0 %v1769_v3 }
  0x44   :  { %984 = vmatmul.mubr.bf16.gmra.mrb[16].mxu1 %v1767_v2 }
  0x45   :  { %991 = vmatprep.mubr.bf16.mxu1 %v1774_v6 }
  0x4a   :  { %895 = vmatmul.mubr.bf16.gmra.mrb[20].mxu0 %v1771_v9 }
  0x4b   :  { %902 = vmatprep.mubr.bf16.mxu0 %v1779_v12 }
  0x4c   :  { %992 = vmatmul.mubr.bf16.gmra.mrb[20].mxu1 %v1777_v11 }
  0x4d   :  { %999 = vmatprep.mubr.bf16.mxu1 %v1784_v15 }
  0x52   :  { %903 = vmatmul.mubr.bf16.gmra.mrb[24].mxu0 %v1781_v17 }
  0x53   :  { %910 = vmatprep.mubr.bf16.mxu0 %v1789_v18 }
  0x54   :  { %1000 = vmatmul.mubr.bf16.gmra.mrb[24].mxu1 %v1787_v20 }
  0x55   :  { %1007 = vmatprep.mubr.bf16.mxu1 %v1794_v21 }
  0x5a   :  { %911 = vmatmul.mubr.bf16.gmra.mrb[28].mxu0 %v1791_v22 }
  0x5b   :  { %1048 = vmatprep.mubr.bf16.mxu0 %v1801_v23 }
  0x5c   :  { %1008 = vmatmul.mubr.bf16.gmra.mrb[28].mxu1 %v1797_v24 }
  0x5d   :  { %1680 = vmatprep.mubr.bf16.mxu1 %v1803_v25 }
  0x62   :  { %1049 = vmatmul.mubr.bf16.vlgmr.msra.gmra.mrb[32].mxu0 %v1799_v26 }
  0x63   :  { %1056 = vmatprep.mubr.bf16.mxu0 %v1805_v27 }
  0x64   :  { %1681 = vmatmul.mubr.bf16.vlgmr.msra.gmra.mrb[32].mxu1 %v1804_v28 }
  0x65   :  { %1684 = vmatprep.mubr.bf16.mxu1 %v1811_v29 }
  0x6a   :  { %1057 = vmatmul.mubr.bf16.gmra.mrb[36].mxu0 %v1807_v30 }
  0x6b   :  { %1064 = vmatprep.mubr.bf16.mxu0 %v1808_v31 }
  0x6c   :  { %1685 = vmatmul.mubr.bf16.gmra.mrb[36].mxu1 %v1812_v32 }
  0x6d   :  { %1688 = vmatprep.mubr.bf16.mxu1 %v1819_v33 }
  0x72   :  { %1065 = vmatmul.mubr.bf16.gmra.mrb[40].mxu0 %v1810_v34 }
  0x73   :  { %1072 = vmatprep.mubr.bf16.mxu0 %v1813_v35 }
  0x74   :  { %1689 = vmatmul.mubr.bf16.gmra.mrb[40].mxu1 %v1820_v36 }
  0x75   :  { %1692 = vmatprep.mubr.bf16.mxu1 %v1827_v37 }
  0x7a   :  { %1073 = vmatmul.mubr.bf16.gmra.mrb[44].mxu0 %v1815_v38 }
  0x7b   :  { %1080 = vmatprep.mubr.bf16.mxu0 %v1816_v39 }
  0x7c   :  { %1693 = vmatmul.mubr.bf16.gmra.mrb[44].mxu1 %v1828_v40 }
  0x82   :  { %1081 = vmatmul.mubr.bf16.gmra.mrb[48].mxu0 %v1818_v41 }
  0x83   :  { %1088 = vmatprep.mubr.bf16.mxu0 %v1821_v42 }
  0x8a   :  { %1089 = vmatmul.mubr.bf16.gmra.mrb[52].mxu0 %v1823_v43 }
  0x8b   :  { %1096 = vmatprep.mubr.bf16.mxu0 %v1824_v44 }
  0x92   :  { %1097 = vmatmul.mubr.bf16.gmra.mrb[56].mxu0 %v1826_v45 }
  0x93   :  { %1104 = vmatprep.mubr.bf16.mxu0 %v1829_v46 }
  0x9a   :  { %1105 = vmatmul.mubr.bf16.gmra.mrb[60].mxu0 %v1831_v47 }
  0xf5   :  { %v1472_v48 = vpop.f32.mrb[0].mxu0 }
  0xf6   :  { %v1473_v50 = vpop.f32.mrb[1].mxu0 }
  0xf7   :  { %v1474_v51 = vadd.f32 %v1473_v50, %v1472_v48  ;;  %v1475_v52 = vpop.f32.mrb[2].mxu0  ;;  %v1536_v53 = vpop.f32.mrb[0].mxu1 }
  0xf8   :  { %v1476_v54 = vpop.f32.mrb[3].mxu0  ;;  %v1537_v57 = vpop.f32.mrb[1].mxu1 }
  0xf9   :  { %v857_v55 = vadd.f32 %v1474_v51, %v2191_v49  ;;  %v1477_v56 = vadd.f32 %v1476_v54, %v1475_v52  ;;  %v1538_v58 = vadd.f32 %v1537_v57, %v1536_v53  ;;  %v1539_v59 = vpop.f32.mrb[2].mxu1 }
  0xfa   :  { %v1540_v61 = vpop.f32.mrb[3].mxu1 }
  0xfb   :  { %v860_v60 = vadd.f32 %v1477_v56, %v2191_v49  ;;  %v2195_v62 = vadd.f32 %v1538_v58, %v857_v55  ;;  %v1541_v63 = vadd.f32 %v1540_v61, %v1539_v59 }
  0xfd   :  { %v1478_v0 = vpop.f32.mrb[4].mxu0  ;;  %v2197_v1 = vadd.f32 %v1541_v63, %v860_v60 }
  0xfe   :  { %v1479_v2 = vpop.f32.mrb[5].mxu0 }
  0xff   :  { %v1480_v3 = vadd.f32 %v1479_v2, %v1478_v0  ;;  %v1481_v4 = vpop.f32.mrb[6].mxu0  ;;  %v1542_v5 = vpop.f32.mrb[4].mxu1 }
 0x100   :  { %v1482_v6 = vpop.f32.mrb[7].mxu0  ;;  %v1543_v9 = vpop.f32.mrb[5].mxu1 }
 0x101   :  { %v865_v7 = vadd.f32 %v1480_v3, %v2191_v49  ;;  %v1483_v8 = vadd.f32 %v1482_v6, %v1481_v4  ;;  %v1544_v10 = vadd.f32 %v1543_v9, %v1542_v5  ;;  %v1545_v11 = vpop.f32.mrb[6].mxu1 }
 0x102   :  { %v1546_v13 = vpop.f32.mrb[7].mxu1 }
 0x103   :  { %v868_v12 = vadd.f32 %v1483_v8, %v2191_v49  ;;  %v2201_v14 = vadd.f32 %v1544_v10, %v865_v7  ;;  %v1547_v15 = vadd.f32 %v1546_v13, %v1545_v11 }
 0x105   :  { %v1484_v16 = vpop.f32.mrb[8].mxu0  ;;  %v2203_v17 = vadd.f32 %v1547_v15, %v868_v12 }
 0x106   :  { %v1485_v18 = vpop.f32.mrb[9].mxu0 }
 0x107   :  { %v1486_v19 = vadd.f32 %v1485_v18, %v1484_v16  ;;  %v1487_v20 = vpop.f32.mrb[10].mxu0  ;;  %v1548_v21 = vpop.f32.mrb[8].mxu1 }
 0x108   :  { %v1488_v22 = vpop.f32.mrb[11].mxu0  ;;  %v1549_v25 = vpop.f32.mrb[9].mxu1 }
 0x109   :  { %v873_v23 = vadd.f32 %v1486_v19, %v2191_v49  ;;  %v1489_v24 = vadd.f32 %v1488_v22, %v1487_v20  ;;  %v1550_v26 = vadd.f32 %v1549_v25, %v1548_v21  ;;  %v1551_v27 = vpop.f32.mrb[10].mxu1 }
 0x10a   :  { %v1552_v29 = vpop.f32.mrb[11].mxu1 }
 0x10b   :  { %v876_v28 = vadd.f32 %v1489_v24, %v2191_v49  ;;  %v2207_v30 = vadd.f32 %v1550_v26, %v873_v23  ;;  %v1553_v31 = vadd.f32 %v1552_v29, %v1551_v27 }
 0x10d   :  { %v1490_v32 = vpop.f32.mrb[12].mxu0  ;;  %v2209_v33 = vadd.f32 %v1553_v31, %v876_v28 }
 0x10e   :  { %v1491_v34 = vpop.f32.mrb[13].mxu0 }
 0x10f   :  { %v1492_v35 = vadd.f32 %v1491_v34, %v1490_v32  ;;  %v1493_v36 = vpop.f32.mrb[14].mxu0  ;;  %v1554_v37 = vpop.f32.mrb[12].mxu1 }
 0x110   :  { %v1494_v38 = vpop.f32.mrb[15].mxu0  ;;  %v1555_v41 = vpop.f32.mrb[13].mxu1 }
 0x111   :  { %v881_v39 = vadd.f32 %v1492_v35, %v2191_v49  ;;  %v1495_v40 = vadd.f32 %v1494_v38, %v1493_v36  ;;  %v1556_v42 = vadd.f32 %v1555_v41, %v1554_v37  ;;  %v1557_v43 = vpop.f32.mrb[14].mxu1 }
 0x112   :  { %v1558_v45 = vpop.f32.mrb[15].mxu1 }
 0x113   :  { %v884_v44 = vadd.f32 %v1495_v40, %v2191_v49  ;;  %v2213_v46 = vadd.f32 %v1556_v42, %v881_v39  ;;  %v1559_v47 = vadd.f32 %v1558_v45, %v1557_v43 }
 0x115   :  { %v1496_v48 = vpop.f32.mrb[16].mxu0  ;;  %v2215_v50 = vadd.f32 %v1559_v47, %v884_v44 }
 0x116   :  { %v1497_v51 = vpop.f32.mrb[17].mxu0 }
 0x117   :  { %v1498_v52 = vadd.f32 %v1497_v51, %v1496_v48  ;;  %v1499_v53 = vpop.f32.mrb[18].mxu0  ;;  %v1560_v54 = vpop.f32.mrb[16].mxu1 }
 0x118   :  { %v1500_v55 = vpop.f32.mrb[19].mxu0  ;;  %v1561_v58 = vpop.f32.mrb[17].mxu1 }
 0x119   :  { %v889_v56 = vadd.f32 %v1498_v52, %v2191_v49  ;;  %v1501_v57 = vadd.f32 %v1500_v55, %v1499_v53  ;;  %v1562_v59 = vadd.f32 %v1561_v58, %v1560_v54  ;;  %v1563_v60 = vpop.f32.mrb[18].mxu1 }
 0x11a   :  { %v1564_v63 = vpop.f32.mrb[19].mxu1 }
 0x11b   :  { %v892_v61 = vadd.f32 %v1501_v57, %v2191_v49  ;;  %v2219_v0 = vadd.f32 %v1562_v59, %v889_v56  ;;  %v1565_v2 = vadd.f32 %v1564_v63, %v1563_v60 }
 0x11d   :  { %v1502_v3 = vpop.f32.mrb[20].mxu0  ;;  %v2221_v4 = vadd.f32 %v1565_v2, %v892_v61 }
 0x11e   :  { %v1503_v5 = vpop.f32.mrb[21].mxu0 }
 0x11f   :  { %v1504_v6 = vadd.f32 %v1503_v5, %v1502_v3  ;;  %v1505_v7 = vpop.f32.mrb[22].mxu0  ;;  %v1566_v8 = vpop.f32.mrb[20].mxu1 }
 0x120   :  { %v1506_v9 = vpop.f32.mrb[23].mxu0  ;;  %v1567_v12 = vpop.f32.mrb[21].mxu1 }
 0x121   :  { %v897_v10 = vadd.f32 %v1504_v6, %v2191_v49  ;;  %v1507_v11 = vadd.f32 %v1506_v9, %v1505_v7  ;;  %v1568_v13 = vadd.f32 %v1567_v12, %v1566_v8  ;;  %v1569_v15 = vpop.f32.mrb[22].mxu1 }
 0x122   :  { %v1570_v18 = vpop.f32.mrb[23].mxu1 }
 0x123   :  { %v900_v16 = vadd.f32 %v1507_v11, %v2191_v49  ;;  %v2225_v19 = vadd.f32 %v1568_v13, %v897_v10  ;;  %v1571_v20 = vadd.f32 %v1570_v18, %v1569_v15 }
 0x125   :  { %v1508_v21 = vpop.f32.mrb[24].mxu0  ;;  %v2227_v22 = vadd.f32 %v1571_v20, %v900_v16 }
 0x126   :  { %v1509_v23 = vpop.f32.mrb[25].mxu0 }
 0x127   :  { %v1510_v24 = vadd.f32 %v1509_v23, %v1508_v21  ;;  %v1511_v25 = vpop.f32.mrb[26].mxu0  ;;  %v1572_v26 = vpop.f32.mrb[24].mxu1 }
 0x128   :  { %v1512_v27 = vpop.f32.mrb[27].mxu0  ;;  %v1573_v31 = vpop.f32.mrb[25].mxu1 }
 0x129   :  { %v905_v28 = vadd.f32 %v1510_v24, %v2191_v49  ;;  %v1513_v29 = vadd.f32 %v1512_v27, %v1511_v25  ;;  %v1574_v32 = vadd.f32 %v1573_v31, %v1572_v26  ;;  %v1575_v34 = vpop.f32.mrb[26].mxu1 }
 0x12a   :  { %v1576_v36 = vpop.f32.mrb[27].mxu1 }
 0x12b   :  { %v908_v35 = vadd.f32 %v1513_v29, %v2191_v49  ;;  %v2231_v37 = vadd.f32 %v1574_v32, %v905_v28  ;;  %v1577_v38 = vadd.f32 %v1576_v36, %v1575_v34 }
 0x12d   :  { %v1514_v39 = vpop.f32.mrb[28].mxu0  ;;  %v2233_v40 = vadd.f32 %v1577_v38, %v908_v35 }
 0x12e   :  { %v1515_v41 = vpop.f32.mrb[29].mxu0 }
 0x12f   :  { %v1516_v42 = vadd.f32 %v1515_v41, %v1514_v39  ;;  %v1517_v43 = vpop.f32.mrb[30].mxu0  ;;  %v1578_v44 = vpop.f32.mrb[28].mxu1 }
 0x130   :  { %v1518_v45 = vpop.f32.mrb[31].mxu0  ;;  %v1579_v51 = vpop.f32.mrb[29].mxu1 }
 0x131   :  { %v913_v47 = vadd.f32 %v1516_v42, %v2191_v49  ;;  %v1519_v48 = vadd.f32 %v1518_v45, %v1517_v43  ;;  %v1580_v52 = vadd.f32 %v1579_v51, %v1578_v44  ;;  %v1581_v53 = vpop.f32.mrb[30].mxu1 }
 0x132   :  { %v1582_v55 = vpop.f32.mrb[31].mxu1 }
 0x133   :  { %v916_v54 = vadd.f32 %v1519_v48, %v2191_v49  ;;  %v2237_v56 = vadd.f32 %v1580_v52, %v913_v47  ;;  %v1583_v57 = vadd.f32 %v1582_v55, %v1581_v53 }
 0x135   :  { %v1600_v58 = vpop.f32.mrb[32].mxu0  ;;  %v2239_v59 = vadd.f32 %v1583_v57, %v916_v54 }
 0x136   :  { %v1601_v60 = vpop.f32.mrb[33].mxu0 }
 0x137   :  { %v1602_v61 = vadd.f32 %v1601_v60, %v1600_v58  ;;  %v1603_v63 = vpop.f32.mrb[34].mxu0  ;;  %v1682_v3 = vpop.f32.mrb[32].mxu1 }
 0x138   :  { %v1604_v2 = vpop.f32.mrb[35].mxu0  ;;  %v1147_v7 = vpop.f32.mrb[33].mxu1 }
 0x139   :  { %v1605_v5 = vadd.f32 %v1604_v2, %v1603_v63  ;;  %v1051_v6 = vadd.f32 %v1602_v61, %v2195_v62  ;;  %v1683_v8 = vpop.f32.mrb[34].mxu1 }
 0x13a   :  { %v1150_v10 = vpop.f32.mrb[35].mxu1 }
 0x13b   :  { %v1148_v9 = vadd.f32 %v1147_v7, %v1051_v6  ;;  %v1054_v49 = vadd.f32 %v1605_v5, %v2197_v1 }
 0x13d   :  { %v1210_v11 = vmax.f32 %v1148_v9, 0.0  ;;  %v1151_v12 = vadd.f32 %v1150_v10, %v1054_v49  ;;  %v1606_v13 = vpop.f32.mrb[36].mxu0 }
 0x13e   :  { %v1607_v15 = vpop.f32.mrb[37].mxu0 }
 0x13f   :  { %v1440_v16 = vpack.c.bf16 %v1210_v11, %v1210_v11  ;;  %v1211_v18 = vmax.f32 %v1151_v12, 0.0  ;;  %v1608_v20 = vadd.f32 %v1607_v15, %v1606_v13  ;;  %v1609_v21 = vpop.f32.mrb[38].mxu0  ;;  %v1686_v24 = vpop.f32.mrb[36].mxu1 }
 0x140   :  { %v1610_v23 = vpop.f32.mrb[39].mxu0  ;;  %v1163_v26 = vpop.f32.mrb[37].mxu1 }
 0x141   :  { %1291 = vst.msk [vmem:[%s2330_s3] sm:$0xf] %vm1290_vm0, %v1440_v16  ;;  %v1441_v62 = vpack.c.bf16 %v1211_v18, %v1211_v18  ;;  %v1059_v1 = vadd.f32 %v1608_v20, %v2201_v14  ;;  %v1611_v25 = vadd.f32 %v1610_v23, %v1609_v21  ;;  %v1687_v27 = vpop.f32.mrb[38].mxu1 }
 0x142   :  { %v1166_v31 = vpop.f32.mrb[39].mxu1 }
 0x143   :  { %1292 = vst.msk [vmem:[%s2330_s3 + $0x4] sm:$0xf] %vm1290_vm0, %v1441_v62  ;;  %v1156_v28 = vadd.f32 %v1682_v3, %v1059_v1  ;;  %v1062_v29 = vadd.f32 %v1611_v25, %v2203_v17 }
 0x145   :  { %v1212_v32 = vmax.f32 %v1156_v28, 0.0  ;;  %v1159_v34 = vadd.f32 %v1683_v8, %v1062_v29  ;;  %v1612_v35 = vpop.f32.mrb[40].mxu0 }
 0x146   :  { %v1613_v36 = vpop.f32.mrb[41].mxu0 }
 0x147   :  { %v1442_v38 = vpack.c.bf16 %v1212_v32, %v1212_v32  ;;  %v1213_v39 = vmax.f32 %v1159_v34, 0.0  ;;  %v1614_v41 = vadd.f32 %v1613_v36, %v1612_v35  ;;  %v1615_v14 = vpop.f32.mrb[42].mxu0  ;;  %v1690_v43 = vpop.f32.mrb[40].mxu1 }
 0x148   :  { %v1616_v42 = vpop.f32.mrb[43].mxu0  ;;  %v1179_v47 = vpop.f32.mrb[41].mxu1 }
 0x149   :  { %1293 = vst.msk [vmem:[%s2330_s3 + $0x8] sm:$0xf] %vm1290_vm0, %v1442_v38  ;;  %v1443_v44 = vpack.c.bf16 %v1213_v39, %v1213_v39  ;;  %v1617_v45 = vadd.f32 %v1616_v42, %v1615_v14  ;;  %v1067_v17 = vadd.f32 %v1614_v41, %v2207_v30  ;;  %v1691_v48 = vpop.f32.mrb[42].mxu1 }
 0x14a   :  { %v1182_v53 = vpop.f32.mrb[43].mxu1 }
 0x14b   :  { %1294 = vst.msk [vmem:[%s2330_s3 + $0xc] sm:$0xf] %vm1290_vm0, %v1443_v44  ;;  %v1164_v51 = vadd.f32 %v1163_v26, %v1067_v17  ;;  %v1070_v52 = vadd.f32 %v1617_v45, %v2209_v33 }
 0x14d   :  { %v1214_v54 = vmax.f32 %v1164_v51, 0.0  ;;  %v1167_v55 = vadd.f32 %v1166_v31, %v1070_v52  ;;  %v1618_v57 = vpop.f32.mrb[44].mxu0 }
 0x14e   :  { %v1619_v58 = vpop.f32.mrb[45].mxu0 }
 0x14f   :  { %v1444_v60 = vpack.c.bf16 %v1214_v54, %v1214_v54  ;;  %v1215_v61 = vmax.f32 %v1167_v55, 0.0  ;;  %v1620_v63 = vadd.f32 %v1619_v58, %v1618_v57  ;;  %v1621_v2 = vpop.f32.mrb[46].mxu0  ;;  %v2263_v3 = vpop.f32.mrb[44].mxu1 }
 0x150   :  { %v1622_v30 = vpop.f32.mrb[47].mxu0  ;;  %v1195_v7 = vpop.f32.mrb[45].mxu1 }
 0x151   :  { %1295 = vst.msk [vmem:[%s2330_s3 + $0x10] sm:$0xf] %vm1290_vm0, %v1444_v60  ;;  %v1445_v5 = vpack.c.bf16 %v1215_v61, %v1215_v61  ;;  %v1075_v33 = vadd.f32 %v1620_v63, %v2213_v46  ;;  %v1623_v6 = vadd.f32 %v1622_v30, %v1621_v2  ;;  %v2270_v8 = vpop.f32.mrb[46].mxu1 }
 0x152   :  { %v1198_v10 = vpop.f32.mrb[47].mxu1 }
 0x153   :  { %1296 = vst.msk [vmem:[%s2330_s3 + $0x14] sm:$0xf] %vm1290_vm0, %v1445_v5  ;;  %v1172_v9 = vadd.f32 %v1686_v24, %v1075_v33  ;;  %v1078_v49 = vadd.f32 %v1623_v6, %v2215_v50 }
 0x155   :  { %v1216_v11 = vmax.f32 %v1172_v9, 0.0  ;;  %v1175_v12 = vadd.f32 %v1687_v27, %v1078_v49  ;;  %v1624_v13 = vpop.f32.mrb[48].mxu0 }
 0x156   :  { %v1625_v15 = vpop.f32.mrb[49].mxu0 }
 0x157   :  { %v1446_v16 = vpack.c.bf16 %v1216_v11, %v1216_v11  ;;  %v1217_v18 = vmax.f32 %v1175_v12, 0.0  ;;  %v1626_v46 = vadd.f32 %v1625_v15, %v1624_v13  ;;  %v1627_v20 = vpop.f32.mrb[50].mxu0 }
 0x158   :  { %v1628_v21 = vpop.f32.mrb[51].mxu0 }
 0x159   :  { %1297 = vst.msk [vmem:[%s2330_s3 + $0x18] sm:$0xf] %vm1290_vm0, %v1446_v16  ;;  %v1447_v23 = vpack.c.bf16 %v1217_v18, %v1217_v18  ;;  %v1629_v62 = vadd.f32 %v1628_v21, %v1627_v20  ;;  %v1083_v24 = vadd.f32 %v1626_v46, %v2219_v0 }
 0x15b   :  { %1298 = vst.msk [vmem:[%s2330_s3 + $0x1c] sm:$0xf] %vm1290_vm0, %v1447_v23  ;;  %v1180_v50 = vadd.f32 %v1179_v47, %v1083_v24  ;;  %v1086_v1 = vadd.f32 %v1629_v62, %v2221_v4 }
 0x15d   :  { %v1218_v25 = vmax.f32 %v1180_v50, 0.0  ;;  %v1183_v26 = vadd.f32 %v1182_v53, %v1086_v1  ;;  %v1630_v27 = vpop.f32.mrb[52].mxu0 }
 0x15e   :  { %v1631_v28 = vpop.f32.mrb[53].mxu0 }
 0x15f   :  { %v1448_v29 = vpack.c.bf16 %v1218_v25, %v1218_v25  ;;  %v1219_v31 = vmax.f32 %v1183_v26, 0.0  ;;  %v1632_v32 = vadd.f32 %v1631_v28, %v1630_v27  ;;  %v1633_v34 = vpop.f32.mrb[54].mxu0 }
 0x160   :  { %v1634_v35 = vpop.f32.mrb[55].mxu0 }
 0x161   :  { %1299 = vst.msk [vmem:[%s2330_s3 + $0x20] sm:$0xf] %vm1290_vm0, %v1448_v29  ;;  %v1449_v0 = vpack.c.bf16 %v1219_v31, %v1219_v31  ;;  %v1091_v36 = vadd.f32 %v1632_v32, %v2225_v19  ;;  %v1635_v38 = vadd.f32 %v1634_v35, %v1633_v34 }
 0x163   :  { %1300 = vst.msk [vmem:[%s2330_s3 + $0x24] sm:$0xf] %vm1290_vm0, %v1449_v0  ;;  %v1188_v4 = vadd.f32 %v1690_v43, %v1091_v36  ;;  %v1094_v39 = vadd.f32 %v1635_v38, %v2227_v22 }
 0x165   :  { %v1220_v41 = vmax.f32 %v1188_v4, 0.0  ;;  %v1191_v14 = vadd.f32 %v1691_v48, %v1094_v39  ;;  %v1636_v42 = vpop.f32.mrb[56].mxu0 }
 0x166   :  { %v1637_v44 = vpop.f32.mrb[57].mxu0 }
 0x167   :  { %v1450_v45 = vpack.c.bf16 %v1220_v41, %v1220_v41  ;;  %v1221_v17 = vmax.f32 %v1191_v14, 0.0  ;;  %v1638_v47 = vadd.f32 %v1637_v44, %v1636_v42  ;;  %v1639_v51 = vpop.f32.mrb[58].mxu0 }
 0x168   :  { %v1640_v52 = vpop.f32.mrb[59].mxu0 }
 0x169   :  { %1301 = vst.msk [vmem:[%s2330_s3 + $0x28] sm:$0xf] %vm1290_vm0, %v1450_v45  ;;  %v1451_v19 = vpack.c.bf16 %v1221_v17, %v1221_v17  ;;  %v1641_v53 = vadd.f32 %v1640_v52, %v1639_v51  ;;  %v1099_v43 = vadd.f32 %v1638_v47, %v2231_v37 }
 0x16b   :  { %1302 = vst.msk [vmem:[%s2330_s3 + $0x2c] sm:$0xf] %vm1290_vm0, %v1451_v19  ;;  %v1196_v22 = vadd.f32 %v1195_v7, %v1099_v43  ;;  %v1102_v48 = vadd.f32 %v1641_v53, %v2233_v40 }
 0x16d   :  { %v1222_v54 = vmax.f32 %v1196_v22, 0.0  ;;  %v1199_v55 = vadd.f32 %v1198_v10, %v1102_v48  ;;  %v1642_v57 = vpop.f32.mrb[60].mxu0 }
 0x16e   :  { %v1643_v58 = vpop.f32.mrb[61].mxu0 }
 0x16f   :  { %v1452_v60 = vpack.c.bf16 %v1222_v54, %v1222_v54  ;;  %v1223_v61 = vmax.f32 %v1199_v55, 0.0  ;;  %v1644_v63 = vadd.f32 %v1643_v58, %v1642_v57  ;;  %v1645_v2 = vpop.f32.mrb[62].mxu0 }
 0x170   :  { %v1646_v30 = vpop.f32.mrb[63].mxu0 }
 0x171   :  { %1303 = vst.msk [vmem:[%s2330_s3 + $0x30] sm:$0xf] %vm1290_vm0, %v1452_v60  ;;  %v1453_v37 = vpack.c.bf16 %v1223_v61, %v1223_v61  ;;  %v1107_v5 = vadd.f32 %v1644_v63, %v2237_v56  ;;  %v1647_v33 = vadd.f32 %v1646_v30, %v1645_v2 }
 0x173   :  { %1304 = vst.msk [vmem:[%s2330_s3 + $0x34] sm:$0xf] %vm1290_vm0, %v1453_v37  ;;  %v1204_v40 = vadd.f32 %v2263_v3, %v1107_v5  ;;  %v1110_v6 = vadd.f32 %v1647_v33, %v2239_v59 }
 0x175   :  { %v1224_v7 = vmax.f32 %v1204_v40, 0.0  ;;  %v1207_v9 = vadd.f32 %v2270_v8, %v1110_v6 }
 0x177   :  { %v1454_v49 = vpack.c.bf16 %v1224_v7, %v1224_v7  ;;  %v1225_v10 = vmax.f32 %v1207_v9, 0.0 }
 0x179   :  { %1305 = vst.msk [vmem:[%s2330_s3 + $0x38] sm:$0xf] %vm1290_vm0, %v1454_v49  ;;  %v1455_v56 = vpack.c.bf16 %v1225_v10, %v1225_v10 }
 0x17b   :  { %1306 = vst.msk [vmem:[%s2330_s3 + $0x3c] sm:$0xf] %vm1290_vm0, %v1455_v56 }

// kernel: fool_clip_forward.16
= control target key start
LH: loop header
LB: loop body
LE: loop exit
PB: predicated region body
PF: predicated region fallthrough
CT: control target
= control target key end

     0   :  { %s2294_s1 = inlined_call_operand.vmem [shape: bf16[1664,128], index: 1, kind: input, shape index: {}]   ;;  %s2295_s0 = inlined_call_operand.vmem [shape: bf16[32,1664], index: 0, kind: input, shape index: {}]   ;;  %s2296_s2 = inlined_call_operand.vmem [shape: f32[1,128], index: 2, kind: input, shape index: {}]   ;;  %s2297_s3 = inlined_call_operand.vmem [shape: bf16[32,128], index: 3, kind: output, shape index: {}]  }
   0x1   :  { %v1733_v0 = vld [vmem:[%s2294_s1 + $0x40] sm:$0xff]   ;;  %v1737_v4 = vld [vmem:[%s2294_s1 + $0x48] sm:$0xff]   ;;  %v1741_v8 = vld [vmem:[%s2294_s1 + $0x50] sm:$0xff]  }
   0x2   :  { %v1734_v1 = vld [vmem:[%s2294_s1] sm:$0xff]   ;;  %1535 = vmatprep.subr.bf16.mxu0 %v1733_v0  ;;  %v1738_v5 = vld [vmem:[%s2294_s1 + $0x8] sm:$0xff]   ;;  %v1742_v9 = vld [vmem:[%s2294_s1 + $0x10] sm:$0xff]  }
   0x3   :  { %v1735_v2 = vld [vmem:[%s2294_s1 + $0xc0] sm:$0xff]   ;;  %1536 = vmatpush3.bf16.msra.mxu0 %v1734_v1  ;;  %v1739_v6 = vld [vmem:[%s2294_s1 + $0xc8] sm:$0xff]   ;;  %v1743_v10 = vld [vmem:[%s2294_s1 + $0xd0] sm:$0xff]  }
   0x4   :  { %v1736_v3 = vld [vmem:[%s2294_s1 + $0x80] sm:$0xff]   ;;  %1563 = vmatprep.subr.bf16.mxu1 %v1735_v2  ;;  %1537 = vmatprep.subr.bf16.mxu0 %v1737_v4  ;;  %v1740_v7 = vld [vmem:[%s2294_s1 + $0x88] sm:$0xff]   ;;  %v1744_v11 = vld [vmem:[%s2294_s1 + $0x90] sm:$0xff]  }
   0x5   :  { %1564 = vmatpush3.bf16.msra.mxu1 %v1736_v3  ;;  %v1745_v12 = vld [vmem:[%s2294_s1 + $0x58] sm:$0xff]   ;;  %v1749_v16 = vld [vmem:[%s2294_s1 + $0x60] sm:$0xff]   ;;  %v1753_v20 = vld [vmem:[%s2294_s1 + $0x68] sm:$0xff]  }
   0x6   :  { %1565 = vmatprep.subr.bf16.mxu1 %v1739_v6  ;;  %v1746_v13 = vld [vmem:[%s2294_s1 + $0x18] sm:$0xff]   ;;  %v1750_v17 = vld [vmem:[%s2294_s1 + $0x20] sm:$0xff]   ;;  %v1754_v21 = vld [vmem:[%s2294_s1 + $0x28] sm:$0xff]  }
   0x7   :  { %1538 = vmatpush3.bf16.msra.mxu0 %v1738_v5  ;;  %v1747_v14 = vld [vmem:[%s2294_s1 + $0xd8] sm:$0xff]   ;;  %v1751_v18 = vld [vmem:[%s2294_s1 + $0xe0] sm:$0xff]   ;;  %v1755_v22 = vld [vmem:[%s2294_s1 + $0xe8] sm:$0xff]  }
   0x8   :  { %1539 = vmatprep.subr.bf16.mxu0 %v1741_v8  ;;  %v1748_v15 = vld [vmem:[%s2294_s1 + $0x98] sm:$0xff]   ;;  %v1752_v19 = vld [vmem:[%s2294_s1 + $0xa0] sm:$0xff]   ;;  %v1756_v23 = vld [vmem:[%s2294_s1 + $0xa8] sm:$0xff]  }
   0x9   :  { %1566 = vmatpush3.bf16.msra.mxu1 %v1740_v7  ;;  %v1757_v24 = vld [vmem:[%s2294_s1 + $0x70] sm:$0xff]   ;;  %v1761_v28 = vld [vmem:[%s2294_s1 + $0x78] sm:$0xff]   ;;  %v1768_v34 = vld [vmem:[%s2294_s1 + $0x140] sm:$0xff]  }
   0xa   :  { %1567 = vmatprep.subr.bf16.mxu1 %v1743_v10  ;;  %v1758_v25 = vld [vmem:[%s2294_s1 + $0x30] sm:$0xff]   ;;  %v1762_v29 = vld [vmem:[%s2294_s1 + $0x38] sm:$0xff]   ;;  %v1771_v36 = vld [vmem:[%s2295_s0 + $0xc] ss:$52 sps:$4 sm:$0xff]  }
   0xb   :  { %1540 = vmatpush3.bf16.msra.mxu0 %v1742_v9  ;;  %v1759_v26 = vld [vmem:[%s2294_s1 + $0xf0] sm:$0xff]   ;;  %v1763_v30 = vld [vmem:[%s2294_s1 + $0xf8] sm:$0xff]   ;;  %v1772_v37 = vld [vmem:[%s2294_s1 + $0x100] sm:$0xff]   ;;  %1095 = vmatprep.mubr.bf16.mxu1 %v1771_v36 }
   0xc   :  { %1541 = vmatprep.subr.bf16.mxu0 %v1745_v12  ;;  %v1760_v27 = vld [vmem:[%s2294_s1 + $0xb0] sm:$0xff]   ;;  %v1766_v32 = vld [vmem:[%s2295_s0 + $0x4] ss:$52 sps:$4 sm:$0xff]   ;;  %v1769_v35 = vld [vmem:[%s2295_s0 + $0x8] ss:$52 sps:$4 sm:$0xff]  }
   0xd   :  { %1568 = vmatpush3.bf16.msra.mxu1 %v1744_v11  ;;  %v1764_v31 = vld [vmem:[%s2295_s0] ss:$52 sps:$4 sm:$0xff]   ;;  %v1767_v33 = vld [vmem:[%s2294_s1 + $0xb8] sm:$0xff]   ;;  %1046 = vmatprep.mubr.bf16.mxu0 %v1766_v32  ;;  %v1775_v40 = vld [vmem:[%s2294_s1 + $0x148] sm:$0xff]  }
   0xe   :  { %1569 = vmatprep.subr.bf16.mxu1 %v1747_v14  ;;  %v1773_v38 = vld [vmem:[%s2294_s1 + $0x1c0] sm:$0xff]   ;;  %v1776_v41 = vld [vmem:[%s2294_s1 + $0x108] sm:$0xff]   ;;  %v1779_v44 = vld [vmem:[%s2294_s1 + $0x150] sm:$0xff]  }
   0xf   :  { %1542 = vmatpush3.bf16.msra.mxu0 %v1746_v13  ;;  %v1774_v39 = vld [vmem:[%s2294_s1 + $0x180] sm:$0xff]   ;;  %v1777_v42 = vld [vmem:[%s2294_s1 + $0x1c8] sm:$0xff]   ;;  %v1780_v45 = vld [vmem:[%s2294_s1 + $0x110] sm:$0xff]  }
  0x10   :  { %1543 = vmatprep.subr.bf16.mxu0 %v1749_v16  ;;  %v1778_v43 = vld [vmem:[%s2294_s1 + $0x188] sm:$0xff]   ;;  %v1781_v46 = vld [vmem:[%s2294_s1 + $0x1d0] sm:$0xff]   ;;  %v1783_v48 = vld [vmem:[%s2294_s1 + $0x158] sm:$0xff]  }
  0x11   :  { %1570 = vmatpush3.bf16.msra.mxu1 %v1748_v15  ;;  %v1782_v47 = vld [vmem:[%s2294_s1 + $0x190] sm:$0xff]   ;;  %v1784_v49 = vld [vmem:[%s2294_s1 + $0x118] sm:$0xff]   ;;  %v1787_v52 = vld [vmem:[%s2294_s1 + $0x160] sm:$0xff]  }
  0x12   :  { %1571 = vmatprep.subr.bf16.mxu1 %v1751_v18  ;;  %v1785_v50 = vld [vmem:[%s2294_s1 + $0x1d8] sm:$0xff]   ;;  %v1788_v53 = vld [vmem:[%s2294_s1 + $0x120] sm:$0xff]   ;;  %v1791_v56 = vld [vmem:[%s2294_s1 + $0x168] sm:$0xff]  }
  0x13   :  { %1544 = vmatpush3.bf16.msra.mxu0 %v1750_v17  ;;  %v1786_v51 = vld [vmem:[%s2294_s1 + $0x198] sm:$0xff]   ;;  %v1789_v54 = vld [vmem:[%s2294_s1 + $0x1e0] sm:$0xff]   ;;  %v1794_v58 = vld [vmem:[%s2294_s1 + $0x128] sm:$0xff]  }
  0x14   :  { %1545 = vmatprep.subr.bf16.mxu0 %v1753_v20  ;;  %v1790_v55 = vld [vmem:[%s2294_s1 + $0x1a0] sm:$0xff]   ;;  %v1795_v59 = vld [vmem:[%s2295_s0 + $0x68] ss:$52 sps:$4 sm:$0xff]   ;;  %v1801_v0 = vld [vmem:[%s2294_s1 + $0x170] sm:$0xff]  }
  0x15   :  { %1572 = vmatpush3.bf16.msra.mxu1 %v1752_v19  ;;  %v1792_v57 = vld [vmem:[%s2295_s0 + $0x6c] ss:$52 sps:$4 sm:$0xff]   ;;  %v1797_v61 = vld [vmem:[%s2295_s0 + $0x74] ss:$52 sps:$4 sm:$0xff]   ;;  %v1800_v63 = vld [vmem:[%s2295_s0 + $0x70] ss:$52 sps:$4 sm:$0xff]  }
  0x16   :  { %1573 = vmatprep.subr.bf16.mxu1 %v1755_v22  ;;  %v1796_v60 = vld [vmem:[%s2294_s1 + $0x1e8] sm:$0xff]   ;;  %v1802_v1 = vld [vmem:[%s2294_s1 + $0x130] sm:$0xff]   ;;  %v1805_v4 = vld [vmem:[%s2294_s1 + $0x178] sm:$0xff]  }
  0x17   :  { %1546 = vmatpush3.bf16.msra.mxu0 %v1754_v21  ;;  %v1799_v62 = vld [vmem:[%s2294_s1 + $0x1a8] sm:$0xff]   ;;  %v1803_v2 = vld [vmem:[%s2294_s1 + $0x1f0] sm:$0xff]   ;;  %v1806_v5 = vld [vmem:[%s2294_s1 + $0x138] sm:$0xff]  }
  0x18   :  { %1547 = vmatprep.subr.bf16.mxu0 %v1757_v24  ;;  %v1804_v3 = vld [vmem:[%s2294_s1 + $0x1b0] sm:$0xff]   ;;  %v1807_v6 = vld [vmem:[%s2294_s1 + $0x1f8] sm:$0xff]   ;;  %v1812_v10 = vld [vmem:[%s2294_s1 + $0x240] sm:$0xff]  }
  0x19   :  { %1574 = vmatpush3.bf16.msra.mxu1 %v1756_v23  ;;  %v1808_v7 = vld [vmem:[%s2295_s0 + $0x10] ss:$52 sps:$4 sm:$0xff]   ;;  %v1810_v8 = vld [vmem:[%s2295_s0 + $0x14] ss:$52 sps:$4 sm:$0xff]   ;;  %v1811_v9 = vld [vmem:[%s2294_s1 + $0x1b8] sm:$0xff]  }
  0x1a   :  { %1575 = vmatprep.subr.bf16.mxu1 %v1759_v26  ;;  %v1813_v11 = vld [vmem:[%s2295_s0 + $0x18] ss:$52 sps:$4 sm:$0xff]   ;;  %v1815_v12 = vld [vmem:[%s2295_s0 + $0x1c] ss:$52 sps:$4 sm:$0xff]   ;;  %v1816_v13 = vld [vmem:[%s2294_s1 + $0x200] sm:$0xff]  }
  0x1b   :  { %1548 = vmatpush3.bf16.msra.mxu0 %v1758_v25  ;;  %v1817_v14 = vld [vmem:[%s2294_s1 + $0x2c0] sm:$0xff]   ;;  %v1819_v16 = vld [vmem:[%s2294_s1 + $0x248] sm:$0xff]   ;;  %v1822_v19 = vld [vmem:[%s2295_s0 + $0x7c] ss:$52 sps:$4 sm:$0xff]  }
  0x1c   :  { %1549 = vmatprep.subr.bf16.mxu0 %v1761_v28  ;;  %v1818_v15 = vld [vmem:[%s2294_s1 + $0x280] sm:$0xff]   ;;  %v1820_v17 = vld [vmem:[%s2294_s1 + $0x208] sm:$0xff]   ;;  %v1826_v22 = vld [vmem:[%s2294_s1 + $0x250] sm:$0xff]  }
  0x1d   :  { %1576 = vmatpush3.bf16.msra.mxu1 %v1760_v27  ;;  %v1821_v18 = vld [vmem:[%s2294_s1 + $0x2c8] sm:$0xff]   ;;  %v1827_v23 = vld [vmem:[%s2295_s0 + $0x84] ss:$52 sps:$4 sm:$0xff]   ;;  %v1829_v24 = vld [vmem:[%s2294_s1 + $0x210] sm:$0xff]  }
  0x1e   :  { %1577 = vmatprep.subr.bf16.mxu1 %v1763_v30  ;;  %v1824_v20 = vld [vmem:[%s2294_s1 + $0x288] sm:$0xff]   ;;  %v1830_v25 = vld [vmem:[%s2295_s0 + $0x80] ss:$52 sps:$4 sm:$0xff]   ;;  %v1833_v28 = vld [vmem:[%s2294_s1 + $0x258] sm:$0xff]  }
  0x1f   :  { %1550 = vmatpush3.bf16.msra.mxu0 %v1762_v29  ;;  %v1825_v21 = vld [vmem:[%s2295_s0 + $0x78] ss:$52 sps:$4 sm:$0xff]   ;;  %v1831_v26 = vld [vmem:[%s2294_s1 + $0x2d0] sm:$0xff]   ;;  %v1837_v32 = vld [vmem:[%s2294_s1 + $0x260] sm:$0xff]  }
  0x20   :  { %1591 = vmatprep.subr.bf16.mxu0 %v1768_v34  ;;  %v1832_v27 = vld [vmem:[%s2294_s1 + $0x290] sm:$0xff]   ;;  %v1834_v29 = vld [vmem:[%s2294_s1 + $0x218] sm:$0xff]   ;;  %v1839_v34 = vld [vmem:[%s2294_s1 + $0x2e0] sm:$0xff]  }
  0x21   :  { %1578 = vmatpush3.bf16.msra.mxu1 %v1767_v33  ;;  %v1835_v30 = vld [vmem:[%s2294_s1 + $0x2d8] sm:$0xff]   ;;  %v1838_v33 = vld [vmem:[%s2294_s1 + $0x220] sm:$0xff]   ;;  %v1841_v36 = vld [vmem:[%s2294_s1 + $0x268] sm:$0xff]  }
  0x22   :  { %1047 = vmatmul.mubr.bf16.vlgmr.msra.gmra.mrb[0].mxu0 %v1764_v31  ;;  %1619 = vmatprep.subr.bf16.mxu1 %v1773_v38  ;;  %v1836_v31 = vld [vmem:[%s2294_s1 + $0x298] sm:$0xff]   ;;  %v1843_v38 = vld [vmem:[%s2294_s1 + $0x2e8] sm:$0xff]  }
  0x23   :  { %1592 = vmatpush3.bf16.msra.mxu0 %v1772_v37  ;;  %1054 = vmatprep.mubr.bf16.mxu0 %v1792_v57  ;;  %v1842_v37 = vld [vmem:[%s2294_s1 + $0x228] sm:$0xff]  }
  0x24   :  { %1096 = vmatmul.mubr.bf16.vlgmr.msra.gmra.mrb[0].mxu1 %v1769_v35  ;;  %1593 = vmatprep.subr.bf16.mxu0 %v1775_v40  ;;  %v1840_v35 = vld [vmem:[%s2294_s1 + $0x2a0] sm:$0xff]   ;;  %v1845_v40 = vld [vmem:[%s2294_s1 + $0x270] sm:$0xff]  }
  0x25   :  { %1620 = vmatpush3.bf16.msra.mxu1 %v1774_v39  ;;  %1103 = vmatprep.mubr.bf16.mxu1 %v1797_v61  ;;  %v1844_v39 = vld [vmem:[%s2294_s1 + $0x2a8] sm:$0xff]   ;;  %v1873_v61 = vld [vmem:[%s2295_s0 + $0x30] ss:$52 sps:$4 sm:$0xff]  }
  0x26   :  { %1621 = vmatprep.subr.bf16.mxu1 %v1777_v42  ;;  %v1847_v42 = vld [vmem:[%s2294_s1 + $0x2f0] sm:$0xff]  }
  0x27   :  { %1594 = vmatpush3.bf16.msra.mxu0 %v1776_v41  ;;  %v1846_v41 = vld [vmem:[%s2294_s1 + $0x230] sm:$0xff]  }
  0x28   :  { %1595 = vmatprep.subr.bf16.mxu0 %v1779_v44  ;;  %v1849_v44 = vld [vmem:[%s2294_s1 + $0x278] sm:$0xff]   ;;  %v1865_v57 = vld [vmem:[%s2295_s0 + $0x94] ss:$52 sps:$4 sm:$0xff]  }
  0x29   :  { %1622 = vmatpush3.bf16.msra.mxu1 %v1778_v43  ;;  %v1848_v43 = vld [vmem:[%s2294_s1 + $0x2b0] sm:$0xff]  }
  0x2a   :  { %1623 = vmatprep.subr.bf16.mxu1 %v1781_v46  ;;  %1055 = vmatmul.mubr.bf16.gmra.mrb[4].mxu0 %v1795_v59  ;;  %v1851_v46 = vld [vmem:[%s2294_s1 + $0x2f8] sm:$0xff]   ;;  %v1867_v59 = vld [vmem:[%s2295_s0 + $0x90] ss:$52 sps:$4 sm:$0xff]  }
  0x2b   :  { %1596 = vmatpush3.bf16.msra.mxu0 %v1780_v45  ;;  %1144 = vmatprep.mubr.bf16.mxu0 %v1810_v8  ;;  %v1850_v45 = vld [vmem:[%s2294_s1 + $0x238] sm:$0xff]  }
  0x2c   :  { %1597 = vmatprep.subr.bf16.mxu0 %v1783_v48  ;;  %1104 = vmatmul.mubr.bf16.gmra.mrb[4].mxu1 %v1800_v63  ;;  %v1854_v48 = vld [vmem:[%s2295_s0 + $0x24] ss:$52 sps:$4 sm:$0xff]   ;;  %v1871_v63 = vld [vmem:[%s2294_s1 + $0x330] sm:$0xff]  }
  0x2d   :  { %1624 = vmatpush3.bf16.msra.mxu1 %v1782_v47  ;;  %1193 = vmatprep.mubr.bf16.mxu1 %v1815_v12  ;;  %v1852_v47 = vld [vmem:[%s2295_s0 + $0x20] ss:$52 sps:$4 sm:$0xff]  }
  0x2e   :  { %1625 = vmatprep.subr.bf16.mxu1 %v1785_v50  ;;  %v1856_v50 = vld [vmem:[%s2294_s1 + $0x300] sm:$0xff]  }
  0x2f   :  { %1598 = vmatpush3.bf16.msra.mxu0 %v1784_v49  ;;  %v1855_v49 = vld [vmem:[%s2294_s1 + $0x2b8] sm:$0xff]  }
  0x30   :  { %1599 = vmatprep.subr.bf16.mxu0 %v1787_v52  ;;  %v1859_v52 = vld [vmem:[%s2295_s0 + $0x2c] ss:$52 sps:$4 sm:$0xff]  }
  0x31   :  { %1626 = vmatpush3.bf16.msra.mxu1 %v1786_v51  ;;  %v1857_v51 = vld [vmem:[%s2295_s0 + $0x28] ss:$52 sps:$4 sm:$0xff]  }
  0x32   :  { %1627 = vmatprep.subr.bf16.mxu1 %v1789_v54  ;;  %v1861_v54 = vld [vmem:[%s2295_s0 + $0x8c] ss:$52 sps:$4 sm:$0xff]  }
  0x33   :  { %1600 = vmatpush3.bf16.msra.mxu0 %v1788_v53  ;;  %v1860_v53 = vld [vmem:[%s2294_s1 + $0x308] sm:$0xff]  }
  0x34   :  { %1601 = vmatprep.subr.bf16.mxu0 %v1791_v56  ;;  %v1864_v56 = vld [vmem:[%s2294_s1 + $0x310] sm:$0xff]  }
  0x35   :  { %1628 = vmatpush3.bf16.msra.mxu1 %v1790_v55  ;;  %v1863_v55 = vld [vmem:[%s2295_s0 + $0x88] ss:$52 sps:$4 sm:$0xff]  }
  0x36   :  { %1629 = vmatprep.subr.bf16.mxu1 %v1796_v60  ;;  %v1869_v60 = vld [vmem:[%s2294_s1 + $0x320] sm:$0xff]  }
  0x37   :  { %1602 = vmatpush3.bf16.msra.mxu0 %v1794_v58  ;;  %v1868_v58 = vld [vmem:[%s2294_s1 + $0x318] sm:$0xff]  }
  0x38   :  { %1603 = vmatprep.subr.bf16.mxu0 %v1801_v0  ;;  %v1872_v0 = vld [vmem:[%s2294_s1 + $0x338] sm:$0xff]  }
  0x39   :  { %1630 = vmatpush3.bf16.msra.mxu1 %v1799_v62  ;;  %v1870_v62 = vld [vmem:[%s2294_s1 + $0x328] sm:$0xff]  }
  0x3a   :  { %1631 = vmatprep.subr.bf16.mxu1 %v1803_v2 }
  0x3b   :  { %1604 = vmatpush3.bf16.msra.mxu0 %v1802_v1  ;;  %v1874_v1 = vld [vmem:[%s2295_s0 + $0x98] ss:$52 sps:$4 sm:$0xff]  }
  0x3c   :  { %1605 = vmatprep.subr.bf16.mxu0 %v1805_v4 }
  0x3d   :  { %1632 = vmatpush3.bf16.msra.mxu1 %v1804_v3  ;;  %v1385_v3 = vld [vmem:[%s2296_s2] ss:$0 sm:$0xff] }
  0x3e   :  { %1633 = vmatprep.subr.bf16.mxu1 %v1807_v6 }
  0x3f   :  { %1606 = vmatpush3.bf16.msra.mxu0 %v1806_v5 }
  0x40   :  { %1647 = vmatprep.subr.bf16.mxu0 %v1812_v10 }
  0x41   :  { %1634 = vmatpush3.bf16.msra.mxu1 %v1811_v9 }
  0x42   :  { %1145 = vmatmul.mubr.bf16.vlgmr.msra.gmra.mrb[8].mxu0 %v1808_v7  ;;  %1675 = vmatprep.subr.bf16.mxu1 %v1817_v14 }
  0x43   :  { %1648 = vmatpush3.bf16.msra.mxu0 %v1816_v13  ;;  %1152 = vmatprep.mubr.bf16.mxu0 %v1822_v19 }
  0x44   :  { %1194 = vmatmul.mubr.bf16.vlgmr.msra.gmra.mrb[8].mxu1 %v1813_v11  ;;  %1649 = vmatprep.subr.bf16.mxu0 %v1819_v16 }
  0x45   :  { %1676 = vmatpush3.bf16.msra.mxu1 %v1818_v15  ;;  %1201 = vmatprep.mubr.bf16.mxu1 %v1827_v23 }
  0x46   :  { %1677 = vmatprep.subr.bf16.mxu1 %v1821_v18 }
  0x47   :  { %1650 = vmatpush3.bf16.msra.mxu0 %v1820_v17 }
  0x48   :  { %1651 = vmatprep.subr.bf16.mxu0 %v1826_v22 }
  0x49   :  { %1678 = vmatpush3.bf16.msra.mxu1 %v1824_v20 }
  0x4a   :  { %1153 = vmatmul.mubr.bf16.gmra.mrb[12].mxu0 %v1825_v21  ;;  %1679 = vmatprep.subr.bf16.mxu1 %v1831_v26 }
  0x4b   :  { %1652 = vmatpush3.bf16.msra.mxu0 %v1829_v24  ;;  %1242 = vmatprep.mubr.bf16.mxu0 %v1854_v48 }
  0x4c   :  { %1202 = vmatmul.mubr.bf16.gmra.mrb[12].mxu1 %v1830_v25  ;;  %1653 = vmatprep.subr.bf16.mxu0 %v1833_v28 }
  0x4d   :  { %1680 = vmatpush3.bf16.msra.mxu1 %v1832_v27  ;;  %1291 = vmatprep.mubr.bf16.mxu1 %v1859_v52 }
  0x4e   :  { %1681 = vmatprep.subr.bf16.mxu1 %v1835_v30 }
  0x4f   :  { %1654 = vmatpush3.bf16.msra.mxu0 %v1834_v29 }
  0x50   :  { %1655 = vmatprep.subr.bf16.mxu0 %v1837_v32 }
  0x51   :  { %1682 = vmatpush3.bf16.msra.mxu1 %v1836_v31 }
  0x52   :  { %1683 = vmatprep.subr.bf16.mxu1 %v1839_v34 }
  0x53   :  { %1656 = vmatpush3.bf16.msra.mxu0 %v1838_v33 }
  0x54   :  { %1657 = vmatprep.subr.bf16.mxu0 %v1841_v36 }
  0x55   :  { %1684 = vmatpush3.bf16.msra.mxu1 %v1840_v35 }
  0x56   :  { %1685 = vmatprep.subr.bf16.mxu1 %v1843_v38 }
  0x57   :  { %1658 = vmatpush3.bf16.msra.mxu0 %v1842_v37 }
  0x58   :  { %1659 = vmatprep.subr.bf16.mxu0 %v1845_v40 }
  0x59   :  { %1686 = vmatpush3.bf16.msra.mxu1 %v1844_v39 }
  0x5a   :  { %1687 = vmatprep.subr.bf16.mxu1 %v1847_v42 }
  0x5b   :  { %1660 = vmatpush3.bf16.msra.mxu0 %v1846_v41 }
  0x5c   :  { %1661 = vmatprep.subr.bf16.mxu0 %v1849_v44 }
  0x5d   :  { %1688 = vmatpush3.bf16.msra.mxu1 %v1848_v43 }
  0x5e   :  { %1689 = vmatprep.subr.bf16.mxu1 %v1851_v46 }
  0x5f   :  { %1662 = vmatpush3.bf16.msra.mxu0 %v1850_v45 }
  0x60   :  { %1713 = vmatprep.subr.bf16.mxu0 %v1856_v50 }
  0x61   :  { %1690 = vmatpush3.bf16.msra.mxu1 %v1855_v49 }
  0x62   :  { %1243 = vmatmul.mubr.bf16.vlgmr.msra.gmra.mrb[16].mxu0 %v1852_v47 }
  0x63   :  { %1714 = vmatpush3.bf16.msra.mxu0 %v1856_v50  ;;  %1250 = vmatprep.mubr.bf16.mxu0 %v1861_v54 }
  0x64   :  { %1292 = vmatmul.mubr.bf16.vlgmr.msra.gmra.mrb[16].mxu1 %v1857_v51  ;;  %1715 = vmatprep.subr.bf16.mxu0 %v1860_v53 }
  0x65   :  { %1299 = vmatprep.mubr.bf16.mxu1 %v1865_v57 }
  0x67   :  { %1716 = vmatpush3.bf16.msra.mxu0 %v1860_v53 }
  0x68   :  { %1717 = vmatprep.subr.bf16.mxu0 %v1864_v56 }
  0x6a   :  { %1251 = vmatmul.mubr.bf16.gmra.mrb[20].mxu0 %v1863_v55 }
  0x6b   :  { %1718 = vmatpush3.bf16.msra.mxu0 %v1864_v56  ;;  %1729 = vmatprep.mubr.bf16.mxu0 %v1873_v61 }
  0x6c   :  { %1719 = vmatprep.subr.bf16.mxu0 %v1868_v58  ;;  %1300 = vmatmul.mubr.bf16.gmra.mrb[20].mxu1 %v1867_v59 }
  0x6f   :  { %1720 = vmatpush3.bf16.msra.mxu0 %v1868_v58 }
  0x70   :  { %1721 = vmatprep.subr.bf16.mxu0 %v1869_v60 }
  0x73   :  { %1722 = vmatpush3.bf16.msra.mxu0 %v1869_v60 }
  0x74   :  { %1723 = vmatprep.subr.bf16.mxu0 %v1870_v62 }
  0x77   :  { %1724 = vmatpush3.bf16.msra.mxu0 %v1870_v62 }
  0x78   :  { %1725 = vmatprep.subr.bf16.mxu0 %v1871_v63 }
  0x7b   :  { %1726 = vmatpush3.bf16.msra.mxu0 %v1871_v63 }
  0x7c   :  { %1727 = vmatprep.subr.bf16.mxu0 %v1872_v0 }
  0x7f   :  { %1728 = vmatpush3.bf16.msra.mxu0 %v1872_v0 }
  0x82   :  { %1730 = vmatmul.mubr.bf16.vlgmr.msra.gmra.mrb[24].mxu0 %v1874_v1 }
  0xf5   :  { %v1551_v2 = vpop.f32.mrb[0].mxu0 }
  0xf6   :  { %v1552_v4 = vpop.f32.mrb[1].mxu0 }
  0xf7   :  { %v1553_v5 = vadd.f32 %v1552_v4, %v1551_v2  ;;  %v1554_v6 = vpop.f32.mrb[2].mxu0  ;;  %v1579_v7 = vpop.f32.mrb[0].mxu1 }
  0xf8   :  { %v1555_v8 = vpop.f32.mrb[3].mxu0  ;;  %v1580_v11 = vpop.f32.mrb[1].mxu1 }
  0xf9   :  { %v1049_v9 = vadd.f32 %v1553_v5, %v1385_v3  ;;  %v1556_v10 = vadd.f32 %v1555_v8, %v1554_v6  ;;  %v1581_v12 = vadd.f32 %v1580_v11, %v1579_v7  ;;  %v1582_v13 = vpop.f32.mrb[2].mxu1 }
  0xfa   :  { %v1583_v15 = vpop.f32.mrb[3].mxu1 }
  0xfb   :  { %v1052_v14 = vadd.f32 %v1556_v10, %v1385_v3  ;;  %v1098_v16 = vadd.f32 %v1581_v12, %v1049_v9  ;;  %v1584_v17 = vadd.f32 %v1583_v15, %v1582_v13 }
  0xfd   :  { %v1101_v18 = vadd.f32 %v1584_v17, %v1052_v14  ;;  %v1557_v19 = vpop.f32.mrb[4].mxu0 }
  0xfe   :  { %v1558_v20 = vpop.f32.mrb[5].mxu0 }
  0xff   :  { %v1559_v21 = vadd.f32 %v1558_v20, %v1557_v19  ;;  %v1560_v22 = vpop.f32.mrb[6].mxu0  ;;  %v1585_v23 = vpop.f32.mrb[4].mxu1 }
 0x100   :  { %v1561_v24 = vpop.f32.mrb[7].mxu0  ;;  %v1586_v27 = vpop.f32.mrb[5].mxu1 }
 0x101   :  { %v1057_v25 = vadd.f32 %v1559_v21, %v1385_v3  ;;  %v1562_v26 = vadd.f32 %v1561_v24, %v1560_v22  ;;  %v1587_v28 = vadd.f32 %v1586_v27, %v1585_v23  ;;  %v1588_v29 = vpop.f32.mrb[6].mxu1 }
 0x102   :  { %v1589_v31 = vpop.f32.mrb[7].mxu1 }
 0x103   :  { %v1060_v30 = vadd.f32 %v1562_v26, %v1385_v3  ;;  %v1106_v32 = vadd.f32 %v1587_v28, %v1057_v25  ;;  %v1590_v33 = vadd.f32 %v1589_v31, %v1588_v29 }
 0x105   :  { %v1109_v34 = vadd.f32 %v1590_v33, %v1060_v30 }
 0x115   :  { %v1607_v35 = vpop.f32.mrb[8].mxu0 }
 0x116   :  { %v1608_v36 = vpop.f32.mrb[9].mxu0 }
 0x117   :  { %v1609_v37 = vadd.f32 %v1608_v36, %v1607_v35  ;;  %v1610_v38 = vpop.f32.mrb[10].mxu0  ;;  %v1635_v39 = vpop.f32.mrb[8].mxu1 }
 0x118   :  { %v1611_v40 = vpop.f32.mrb[11].mxu0  ;;  %v1636_v43 = vpop.f32.mrb[9].mxu1 }
 0x119   :  { %v1147_v41 = vadd.f32 %v1609_v37, %v1098_v16  ;;  %v1612_v42 = vadd.f32 %v1611_v40, %v1610_v38  ;;  %v1637_v44 = vadd.f32 %v1636_v43, %v1635_v39  ;;  %v1638_v45 = vpop.f32.mrb[10].mxu1 }
 0x11a   :  { %v1639_v47 = vpop.f32.mrb[11].mxu1 }
 0x11b   :  { %v1150_v46 = vadd.f32 %v1612_v42, %v1101_v18  ;;  %v1196_v48 = vadd.f32 %v1637_v44, %v1147_v41  ;;  %v1640_v49 = vadd.f32 %v1639_v47, %v1638_v45 }
 0x11d   :  { %v1199_v50 = vadd.f32 %v1640_v49, %v1150_v46  ;;  %v1613_v51 = vpop.f32.mrb[12].mxu0 }
 0x11e   :  { %v1614_v52 = vpop.f32.mrb[13].mxu0 }
 0x11f   :  { %v1615_v53 = vadd.f32 %v1614_v52, %v1613_v51  ;;  %v1616_v54 = vpop.f32.mrb[14].mxu0  ;;  %v1641_v55 = vpop.f32.mrb[12].mxu1 }
 0x120   :  { %v1617_v56 = vpop.f32.mrb[15].mxu0  ;;  %v1642_v59 = vpop.f32.mrb[13].mxu1 }
 0x121   :  { %v1155_v57 = vadd.f32 %v1615_v53, %v1106_v32  ;;  %v1618_v58 = vadd.f32 %v1617_v56, %v1616_v54  ;;  %v1643_v60 = vadd.f32 %v1642_v59, %v1641_v55  ;;  %v1644_v61 = vpop.f32.mrb[14].mxu1 }
 0x122   :  { %v1645_v63 = vpop.f32.mrb[15].mxu1 }
 0x123   :  { %v1158_v62 = vadd.f32 %v1618_v58, %v1109_v34  ;;  %v1204_v0 = vadd.f32 %v1643_v60, %v1155_v57  ;;  %v1646_v1 = vadd.f32 %v1645_v63, %v1644_v61 }
 0x125   :  { %v1207_v2 = vadd.f32 %v1646_v1, %v1158_v62 }
 0x135   :  { %v1663_v3 = vpop.f32.mrb[16].mxu0 }
 0x136   :  { %v1664_v4 = vpop.f32.mrb[17].mxu0 }
 0x137   :  { %v1665_v5 = vadd.f32 %v1664_v4, %v1663_v3  ;;  %v1666_v6 = vpop.f32.mrb[18].mxu0  ;;  %v1691_v9 = vpop.f32.mrb[16].mxu1 }
 0x138   :  { %v1667_v7 = vpop.f32.mrb[19].mxu0  ;;  %v1692_v11 = vpop.f32.mrb[17].mxu1 }
 0x139   :  { %v1245_v8 = vadd.f32 %v1665_v5, %v1196_v48  ;;  %v1668_v10 = vadd.f32 %v1667_v7, %v1666_v6  ;;  %v1693_v13 = vadd.f32 %v1692_v11, %v1691_v9  ;;  %v1694_v14 = vpop.f32.mrb[18].mxu1 }
 0x13a   :  { %v1695_v15 = vpop.f32.mrb[19].mxu1 }
 0x13b   :  { %v1248_v12 = vadd.f32 %v1668_v10, %v1199_v50  ;;  %v1696_v16 = vadd.f32 %v1695_v15, %v1694_v14  ;;  %v1294_v18 = vadd.f32 %v1693_v13, %v1245_v8 }
 0x13d   :  { %v1669_v17 = vpop.f32.mrb[20].mxu0  ;;  %v1297_v22 = vadd.f32 %v1696_v16, %v1248_v12 }
 0x13e   :  { %v1670_v19 = vpop.f32.mrb[21].mxu0 }
 0x13f   :  { %v1671_v20 = vadd.f32 %v1670_v19, %v1669_v17  ;;  %v1672_v21 = vpop.f32.mrb[22].mxu0  ;;  %v1697_v25 = vpop.f32.mrb[20].mxu1 }
 0x140   :  { %v1673_v23 = vpop.f32.mrb[23].mxu0  ;;  %v1698_v27 = vpop.f32.mrb[21].mxu1 }
 0x141   :  { %v1253_v24 = vadd.f32 %v1671_v20, %v1204_v0  ;;  %v1674_v26 = vadd.f32 %v1673_v23, %v1672_v21  ;;  %v1699_v29 = vadd.f32 %v1698_v27, %v1697_v25  ;;  %v1700_v30 = vpop.f32.mrb[22].mxu1 }
 0x142   :  { %v1701_v31 = vpop.f32.mrb[23].mxu1 }
 0x143   :  { %v1256_v28 = vadd.f32 %v1674_v26, %v1207_v2  ;;  %v1702_v32 = vadd.f32 %v1701_v31, %v1700_v30  ;;  %v1302_v33 = vadd.f32 %v1699_v29, %v1253_v24 }
 0x145   :  { %v1305_v34 = vadd.f32 %v1702_v32, %v1256_v28 }
 0x155   :  { %v1731_v35 = vpop.f32.mrb[24].mxu0 }
 0x156   :  { %v1351_v36 = vadd.f32 %v1731_v35, %v1302_v33  ;;  %v1342_v37 = vpop.f32.mrb[25].mxu0 }
 0x157   :  { %v1343_v38 = vadd.f32 %v1342_v37, %v1294_v18  ;;  %v1732_v39 = vpop.f32.mrb[26].mxu0 }
 0x158   :  { %v1354_v40 = vadd.f32 %v1732_v39, %v1305_v34  ;;  %v1345_v41 = vpop.f32.mrb[27].mxu0  ;;  %v1359_v43 = vmax.f32 %v1351_v36, 0.0 }
 0x159   :  { %v1346_v42 = vadd.f32 %v1345_v41, %v1297_v22  ;;  %v1357_v45 = vmax.f32 %v1343_v38, 0.0 }
 0x15a   :  { %v1360_v44 = vmax.f32 %v1354_v40, 0.0 }
 0x15b   :  { %v1358_v46 = vmax.f32 %v1346_v42, 0.0 }
 0x15c   :  { %v1532_v47 = vpack.c.bf16 %v1360_v44, %v1359_v43 }
 0x15d   :  { %v1527_v48 = vpack.c.bf16 %v1358_v46, %v1357_v45 }
 0x15e   :  { %1534 = vst [vmem:[%s2297_s3 + $0x8] sm:$0xff] %v1532_v47  }
 0x15f   :  { %1528 = vst [vmem:[%s2297_s3] sm:$0xff] %v1527_v48  }

// kernel: fool_clip_forward.17
= control target key start
LH: loop header
LB: loop body
LE: loop exit
PB: predicated region body
PF: predicated region fallthrough
CT: control target
= control target key end

     0   :  { %s1632_s1 = inlined_call_operand.vmem [shape: bf16[1152,128], index: 1, kind: input, shape index: {}]   ;;  %s1633_s0 = inlined_call_operand.vmem [shape: bf16[32,1152], index: 0, kind: input, shape index: {}]   ;;  %s1634_s2 = inlined_call_operand.vmem [shape: f32[1,128], index: 2, kind: input, shape index: {}]   ;;  %s1635_s3 = inlined_call_operand.vmem [shape: bf16[32,128], index: 3, kind: output, shape index: {}]  }
   0x1   :  { %v1235_v0 = vld [vmem:[%s1632_s1 + $0x40] sm:$0xff]   ;;  %v1239_v4 = vld [vmem:[%s1632_s1 + $0x48] sm:$0xff]   ;;  %v1243_v8 = vld [vmem:[%s1632_s1 + $0x50] sm:$0xff]  }
   0x2   :  { %v1236_v1 = vld [vmem:[%s1632_s1] sm:$0xff]   ;;  %1093 = vmatprep.subr.bf16.mxu0 %v1235_v0  ;;  %v1240_v5 = vld [vmem:[%s1632_s1 + $0x8] sm:$0xff]   ;;  %v1244_v9 = vld [vmem:[%s1632_s1 + $0x10] sm:$0xff]  }
   0x3   :  { %v1237_v2 = vld [vmem:[%s1632_s1 + $0xc0] sm:$0xff]   ;;  %1094 = vmatpush3.bf16.msra.mxu0 %v1236_v1  ;;  %v1241_v6 = vld [vmem:[%s1632_s1 + $0xc8] sm:$0xff]   ;;  %v1245_v10 = vld [vmem:[%s1632_s1 + $0xd0] sm:$0xff]  }
   0x4   :  { %v1238_v3 = vld [vmem:[%s1632_s1 + $0x80] sm:$0xff]   ;;  %1121 = vmatprep.subr.bf16.mxu1 %v1237_v2  ;;  %1095 = vmatprep.subr.bf16.mxu0 %v1239_v4  ;;  %v1242_v7 = vld [vmem:[%s1632_s1 + $0x88] sm:$0xff]   ;;  %v1246_v11 = vld [vmem:[%s1632_s1 + $0x90] sm:$0xff]  }
   0x5   :  { %1122 = vmatpush3.bf16.msra.mxu1 %v1238_v3  ;;  %v1247_v12 = vld [vmem:[%s1632_s1 + $0x58] sm:$0xff]   ;;  %v1251_v16 = vld [vmem:[%s1632_s1 + $0x60] sm:$0xff]   ;;  %v1255_v20 = vld [vmem:[%s1632_s1 + $0x68] sm:$0xff]  }
   0x6   :  { %1123 = vmatprep.subr.bf16.mxu1 %v1241_v6  ;;  %v1248_v13 = vld [vmem:[%s1632_s1 + $0x18] sm:$0xff]   ;;  %v1252_v17 = vld [vmem:[%s1632_s1 + $0x20] sm:$0xff]   ;;  %v1256_v21 = vld [vmem:[%s1632_s1 + $0x28] sm:$0xff]  }
   0x7   :  { %1096 = vmatpush3.bf16.msra.mxu0 %v1240_v5  ;;  %v1249_v14 = vld [vmem:[%s1632_s1 + $0xd8] sm:$0xff]   ;;  %v1253_v18 = vld [vmem:[%s1632_s1 + $0xe0] sm:$0xff]   ;;  %v1257_v22 = vld [vmem:[%s1632_s1 + $0xe8] sm:$0xff]  }
   0x8   :  { %1097 = vmatprep.subr.bf16.mxu0 %v1243_v8  ;;  %v1250_v15 = vld [vmem:[%s1632_s1 + $0x98] sm:$0xff]   ;;  %v1254_v19 = vld [vmem:[%s1632_s1 + $0xa0] sm:$0xff]   ;;  %v1258_v23 = vld [vmem:[%s1632_s1 + $0xa8] sm:$0xff]  }
   0x9   :  { %1124 = vmatpush3.bf16.msra.mxu1 %v1242_v7  ;;  %v1259_v24 = vld [vmem:[%s1632_s1 + $0x70] sm:$0xff]   ;;  %v1263_v28 = vld [vmem:[%s1632_s1 + $0x78] sm:$0xff]   ;;  %v1266_v31 = vld [vmem:[%s1633_s0] ss:$36 sps:$4 sm:$0xff]  }
   0xa   :  { %1125 = vmatprep.subr.bf16.mxu1 %v1245_v10  ;;  %v1260_v25 = vld [vmem:[%s1632_s1 + $0x30] sm:$0xff]   ;;  %v1264_v29 = vld [vmem:[%s1632_s1 + $0x38] sm:$0xff]   ;;  %v1268_v32 = vld [vmem:[%s1633_s0 + $0x4] ss:$36 sps:$4 sm:$0xff]  }
   0xb   :  { %1098 = vmatpush3.bf16.msra.mxu0 %v1244_v9  ;;  %v1261_v26 = vld [vmem:[%s1632_s1 + $0xf0] sm:$0xff]   ;;  %v1265_v30 = vld [vmem:[%s1632_s1 + $0xf8] sm:$0xff]   ;;  %742 = vmatprep.mubr.bf16.mxu0 %v1268_v32  ;;  %v1270_v34 = vld [vmem:[%s1632_s1 + $0x140] sm:$0xff]  }
   0xc   :  { %1099 = vmatprep.subr.bf16.mxu0 %v1247_v12  ;;  %v1262_v27 = vld [vmem:[%s1632_s1 + $0xb0] sm:$0xff]   ;;  %v1269_v33 = vld [vmem:[%s1632_s1 + $0xb8] sm:$0xff]   ;;  %v1271_v35 = vld [vmem:[%s1633_s0 + $0x8] ss:$36 sps:$4 sm:$0xff]  }
   0xd   :  { %1126 = vmatpush3.bf16.msra.mxu1 %v1246_v11  ;;  %v1273_v36 = vld [vmem:[%s1633_s0 + $0xc] ss:$36 sps:$4 sm:$0xff]   ;;  %v1274_v37 = vld [vmem:[%s1632_s1 + $0x100] sm:$0xff]   ;;  %v1285_v48 = vld [vmem:[%s1632_s1 + $0x158] sm:$0xff]  }
   0xe   :  { %1127 = vmatprep.subr.bf16.mxu1 %v1249_v14  ;;  %791 = vmatprep.mubr.bf16.mxu1 %v1273_v36  ;;  %v1275_v38 = vld [vmem:[%s1632_s1 + $0x1c0] sm:$0xff]   ;;  %v1277_v40 = vld [vmem:[%s1632_s1 + $0x148] sm:$0xff]   ;;  %v1281_v44 = vld [vmem:[%s1632_s1 + $0x150] sm:$0xff]  }
   0xf   :  { %1100 = vmatpush3.bf16.msra.mxu0 %v1248_v13  ;;  %v1276_v39 = vld [vmem:[%s1632_s1 + $0x180] sm:$0xff]   ;;  %v1278_v41 = vld [vmem:[%s1632_s1 + $0x108] sm:$0xff]   ;;  %v1282_v45 = vld [vmem:[%s1632_s1 + $0x110] sm:$0xff]  }
  0x10   :  { %1101 = vmatprep.subr.bf16.mxu0 %v1251_v16  ;;  %v1279_v42 = vld [vmem:[%s1632_s1 + $0x1c8] sm:$0xff]   ;;  %v1283_v46 = vld [vmem:[%s1632_s1 + $0x1d0] sm:$0xff]   ;;  %v1286_v49 = vld [vmem:[%s1632_s1 + $0x118] sm:$0xff]  }
  0x11   :  { %1128 = vmatpush3.bf16.msra.mxu1 %v1250_v15  ;;  %v1280_v43 = vld [vmem:[%s1632_s1 + $0x188] sm:$0xff]   ;;  %v1284_v47 = vld [vmem:[%s1632_s1 + $0x190] sm:$0xff]   ;;  %v1287_v50 = vld [vmem:[%s1632_s1 + $0x1d8] sm:$0xff]  }
  0x12   :  { %1129 = vmatprep.subr.bf16.mxu1 %v1253_v18  ;;  %v1288_v51 = vld [vmem:[%s1632_s1 + $0x198] sm:$0xff]   ;;  %v1289_v52 = vld [vmem:[%s1632_s1 + $0x160] sm:$0xff]   ;;  %v1293_v56 = vld [vmem:[%s1632_s1 + $0x168] sm:$0xff]  }
  0x13   :  { %1102 = vmatpush3.bf16.msra.mxu0 %v1252_v17  ;;  %v1290_v53 = vld [vmem:[%s1632_s1 + $0x120] sm:$0xff]   ;;  %v1294_v57 = vld [vmem:[%s1633_s0 + $0x4c] ss:$36 sps:$4 sm:$0xff]   ;;  %v1299_v61 = vld [vmem:[%s1633_s0 + $0x54] ss:$36 sps:$4 sm:$0xff]  }
  0x14   :  { %1103 = vmatprep.subr.bf16.mxu0 %v1255_v20  ;;  %v1291_v54 = vld [vmem:[%s1632_s1 + $0x1e0] sm:$0xff]   ;;  %v1296_v58 = vld [vmem:[%s1632_s1 + $0x128] sm:$0xff]   ;;  %v1302_v63 = vld [vmem:[%s1633_s0 + $0x50] ss:$36 sps:$4 sm:$0xff]  }
  0x15   :  { %1130 = vmatpush3.bf16.msra.mxu1 %v1254_v19  ;;  %v1292_v55 = vld [vmem:[%s1632_s1 + $0x1a0] sm:$0xff]   ;;  %v1297_v59 = vld [vmem:[%s1633_s0 + $0x48] ss:$36 sps:$4 sm:$0xff]   ;;  %v1303_v0 = vld [vmem:[%s1632_s1 + $0x170] sm:$0xff]  }
  0x16   :  { %1131 = vmatprep.subr.bf16.mxu1 %v1257_v22  ;;  %v1298_v60 = vld [vmem:[%s1632_s1 + $0x1e8] sm:$0xff]   ;;  %v1304_v1 = vld [vmem:[%s1632_s1 + $0x130] sm:$0xff]   ;;  %v1307_v4 = vld [vmem:[%s1632_s1 + $0x178] sm:$0xff]  }
  0x17   :  { %1104 = vmatpush3.bf16.msra.mxu0 %v1256_v21  ;;  %v1301_v62 = vld [vmem:[%s1632_s1 + $0x1a8] sm:$0xff]   ;;  %v1305_v2 = vld [vmem:[%s1632_s1 + $0x1f0] sm:$0xff]   ;;  %v1308_v5 = vld [vmem:[%s1632_s1 + $0x138] sm:$0xff]  }
  0x18   :  { %1105 = vmatprep.subr.bf16.mxu0 %v1259_v24  ;;  %v1306_v3 = vld [vmem:[%s1632_s1 + $0x1b0] sm:$0xff]   ;;  %v1309_v6 = vld [vmem:[%s1632_s1 + $0x1f8] sm:$0xff]   ;;  %v1314_v10 = vld [vmem:[%s1632_s1 + $0x200] sm:$0xff]  }
  0x19   :  { %1132 = vmatpush3.bf16.msra.mxu1 %v1258_v23  ;;  %v1310_v7 = vld [vmem:[%s1633_s0 + $0x10] ss:$36 sps:$4 sm:$0xff]   ;;  %v1313_v9 = vld [vmem:[%s1632_s1 + $0x1b8] sm:$0xff]   ;;  %v1318_v13 = vld [vmem:[%s1632_s1 + $0x208] sm:$0xff]  }
  0x1a   :  { %1133 = vmatprep.subr.bf16.mxu1 %v1261_v26  ;;  %v1312_v8 = vld [vmem:[%s1633_s0 + $0x14] ss:$36 sps:$4 sm:$0xff]   ;;  %v1317_v12 = vld [vmem:[%s1633_s0 + $0x1c] ss:$36 sps:$4 sm:$0xff]   ;;  %v1323_v17 = vld [vmem:[%s1633_s0 + $0x64] ss:$36 sps:$4 sm:$0xff]  }
  0x1b   :  { %1106 = vmatpush3.bf16.msra.mxu0 %v1260_v25  ;;  %v1315_v11 = vld [vmem:[%s1633_s0 + $0x18] ss:$36 sps:$4 sm:$0xff]   ;;  %v1322_v16 = vld [vmem:[%s1632_s1 + $0x210] sm:$0xff]   ;;  %v1325_v18 = vld [vmem:[%s1633_s0 + $0x60] ss:$36 sps:$4 sm:$0xff]  }
  0x1c   :  { %1107 = vmatprep.subr.bf16.mxu0 %v1263_v28  ;;  %v1319_v14 = vld [vmem:[%s1633_s0 + $0x5c] ss:$36 sps:$4 sm:$0xff]   ;;  %v1328_v22 = vld [vmem:[%s1632_s1 + $0x228] sm:$0xff]   ;;  %v1329_v23 = vld [vmem:[%s1632_s1 + $0x230] sm:$0xff]  }
  0x1d   :  { %1134 = vmatpush3.bf16.msra.mxu1 %v1262_v27  ;;  %v1321_v15 = vld [vmem:[%s1633_s0 + $0x58] ss:$36 sps:$4 sm:$0xff]   ;;  %v1327_v20 = vld [vmem:[%s1632_s1 + $0x220] sm:$0xff]   ;;  %v1332_v25 = vld [vmem:[%s1633_s0 + $0x68] ss:$36 sps:$4 sm:$0xff]  }
  0x1e   :  { %1135 = vmatprep.subr.bf16.mxu1 %v1265_v30  ;;  %v1326_v19 = vld [vmem:[%s1632_s1 + $0x218] sm:$0xff]   ;;  %v1331_v21 = vld [vmem:[%s1633_s0 + $0x20] ss:$36 sps:$4 sm:$0xff]  }
  0x1f   :  { %1108 = vmatpush3.bf16.msra.mxu0 %v1264_v29  ;;  %v1330_v24 = vld [vmem:[%s1632_s1 + $0x238] sm:$0xff]   ;;  %v983_v27 = vld [vmem:[%s1634_s2] ss:$0 sm:$0xff] }
  0x20   :  { %1149 = vmatprep.subr.bf16.mxu0 %v1270_v34 }
  0x21   :  { %1136 = vmatpush3.bf16.msra.mxu1 %v1269_v33 }
  0x22   :  { %743 = vmatmul.mubr.bf16.vlgmr.msra.gmra.mrb[0].mxu0 %v1266_v31  ;;  %1177 = vmatprep.subr.bf16.mxu1 %v1275_v38 }
  0x23   :  { %1150 = vmatpush3.bf16.msra.mxu0 %v1274_v37  ;;  %750 = vmatprep.mubr.bf16.mxu0 %v1294_v57 }
  0x24   :  { %792 = vmatmul.mubr.bf16.vlgmr.msra.gmra.mrb[0].mxu1 %v1271_v35  ;;  %1151 = vmatprep.subr.bf16.mxu0 %v1277_v40 }
  0x25   :  { %1178 = vmatpush3.bf16.msra.mxu1 %v1276_v39  ;;  %799 = vmatprep.mubr.bf16.mxu1 %v1299_v61 }
  0x26   :  { %1179 = vmatprep.subr.bf16.mxu1 %v1279_v42 }
  0x27   :  { %1152 = vmatpush3.bf16.msra.mxu0 %v1278_v41 }
  0x28   :  { %1153 = vmatprep.subr.bf16.mxu0 %v1281_v44 }
  0x29   :  { %1180 = vmatpush3.bf16.msra.mxu1 %v1280_v43 }
  0x2a   :  { %1181 = vmatprep.subr.bf16.mxu1 %v1283_v46  ;;  %751 = vmatmul.mubr.bf16.gmra.mrb[4].mxu0 %v1297_v59 }
  0x2b   :  { %1154 = vmatpush3.bf16.msra.mxu0 %v1282_v45  ;;  %840 = vmatprep.mubr.bf16.mxu0 %v1312_v8 }
  0x2c   :  { %1155 = vmatprep.subr.bf16.mxu0 %v1285_v48  ;;  %800 = vmatmul.mubr.bf16.gmra.mrb[4].mxu1 %v1302_v63 }
  0x2d   :  { %1182 = vmatpush3.bf16.msra.mxu1 %v1284_v47  ;;  %889 = vmatprep.mubr.bf16.mxu1 %v1317_v12 }
  0x2e   :  { %1183 = vmatprep.subr.bf16.mxu1 %v1287_v50 }
  0x2f   :  { %1156 = vmatpush3.bf16.msra.mxu0 %v1286_v49 }
  0x30   :  { %1157 = vmatprep.subr.bf16.mxu0 %v1289_v52 }
  0x31   :  { %1184 = vmatpush3.bf16.msra.mxu1 %v1288_v51 }
  0x32   :  { %1185 = vmatprep.subr.bf16.mxu1 %v1291_v54 }
  0x33   :  { %1158 = vmatpush3.bf16.msra.mxu0 %v1290_v53 }
  0x34   :  { %1159 = vmatprep.subr.bf16.mxu0 %v1293_v56 }
  0x35   :  { %1186 = vmatpush3.bf16.msra.mxu1 %v1292_v55 }
  0x36   :  { %1187 = vmatprep.subr.bf16.mxu1 %v1298_v60 }
  0x37   :  { %1160 = vmatpush3.bf16.msra.mxu0 %v1296_v58 }
  0x38   :  { %1161 = vmatprep.subr.bf16.mxu0 %v1303_v0 }
  0x39   :  { %1188 = vmatpush3.bf16.msra.mxu1 %v1301_v62 }
  0x3a   :  { %1189 = vmatprep.subr.bf16.mxu1 %v1305_v2 }
  0x3b   :  { %1162 = vmatpush3.bf16.msra.mxu0 %v1304_v1 }
  0x3c   :  { %1163 = vmatprep.subr.bf16.mxu0 %v1307_v4 }
  0x3d   :  { %1190 = vmatpush3.bf16.msra.mxu1 %v1306_v3 }
  0x3e   :  { %1191 = vmatprep.subr.bf16.mxu1 %v1309_v6 }
  0x3f   :  { %1164 = vmatpush3.bf16.msra.mxu0 %v1308_v5 }
  0x40   :  { %1215 = vmatprep.subr.bf16.mxu0 %v1314_v10 }
  0x41   :  { %1192 = vmatpush3.bf16.msra.mxu1 %v1313_v9 }
  0x42   :  { %841 = vmatmul.mubr.bf16.vlgmr.msra.gmra.mrb[8].mxu0 %v1310_v7 }
  0x43   :  { %1216 = vmatpush3.bf16.msra.mxu0 %v1314_v10  ;;  %848 = vmatprep.mubr.bf16.mxu0 %v1319_v14 }
  0x44   :  { %890 = vmatmul.mubr.bf16.vlgmr.msra.gmra.mrb[8].mxu1 %v1315_v11  ;;  %1217 = vmatprep.subr.bf16.mxu0 %v1318_v13 }
  0x45   :  { %897 = vmatprep.mubr.bf16.mxu1 %v1323_v17 }
  0x47   :  { %1218 = vmatpush3.bf16.msra.mxu0 %v1318_v13 }
  0x48   :  { %1219 = vmatprep.subr.bf16.mxu0 %v1322_v16 }
  0x4a   :  { %849 = vmatmul.mubr.bf16.gmra.mrb[12].mxu0 %v1321_v15 }
  0x4b   :  { %1220 = vmatpush3.bf16.msra.mxu0 %v1322_v16  ;;  %1231 = vmatprep.mubr.bf16.mxu0 %v1331_v21 }
  0x4c   :  { %898 = vmatmul.mubr.bf16.gmra.mrb[12].mxu1 %v1325_v18  ;;  %1221 = vmatprep.subr.bf16.mxu0 %v1326_v19 }
  0x4f   :  { %1222 = vmatpush3.bf16.msra.mxu0 %v1326_v19 }
  0x50   :  { %1223 = vmatprep.subr.bf16.mxu0 %v1327_v20 }
  0x53   :  { %1224 = vmatpush3.bf16.msra.mxu0 %v1327_v20 }
  0x54   :  { %1225 = vmatprep.subr.bf16.mxu0 %v1328_v22 }
  0x57   :  { %1226 = vmatpush3.bf16.msra.mxu0 %v1328_v22 }
  0x58   :  { %1227 = vmatprep.subr.bf16.mxu0 %v1329_v23 }
  0x5b   :  { %1228 = vmatpush3.bf16.msra.mxu0 %v1329_v23 }
  0x5c   :  { %1229 = vmatprep.subr.bf16.mxu0 %v1330_v24 }
  0x5f   :  { %1230 = vmatpush3.bf16.msra.mxu0 %v1330_v24 }
  0x62   :  { %1232 = vmatmul.mubr.bf16.vlgmr.msra.gmra.mrb[16].mxu0 %v1332_v25 }
  0xf5   :  { %v1109_v26 = vpop.f32.mrb[0].mxu0 }
  0xf6   :  { %v1110_v28 = vpop.f32.mrb[1].mxu0 }
  0xf7   :  { %v1111_v29 = vadd.f32 %v1110_v28, %v1109_v26  ;;  %v1112_v30 = vpop.f32.mrb[2].mxu0  ;;  %v1137_v31 = vpop.f32.mrb[0].mxu1 }
  0xf8   :  { %v1113_v32 = vpop.f32.mrb[3].mxu0  ;;  %v1138_v35 = vpop.f32.mrb[1].mxu1 }
  0xf9   :  { %v745_v33 = vadd.f32 %v1111_v29, %v983_v27  ;;  %v1114_v34 = vadd.f32 %v1113_v32, %v1112_v30  ;;  %v1139_v36 = vadd.f32 %v1138_v35, %v1137_v31  ;;  %v1140_v37 = vpop.f32.mrb[2].mxu1 }
  0xfa   :  { %v1141_v39 = vpop.f32.mrb[3].mxu1 }
  0xfb   :  { %v748_v38 = vadd.f32 %v1114_v34, %v983_v27  ;;  %v794_v40 = vadd.f32 %v1139_v36, %v745_v33  ;;  %v1142_v41 = vadd.f32 %v1141_v39, %v1140_v37 }
  0xfd   :  { %v797_v42 = vadd.f32 %v1142_v41, %v748_v38  ;;  %v1115_v43 = vpop.f32.mrb[4].mxu0 }
  0xfe   :  { %v1116_v44 = vpop.f32.mrb[5].mxu0 }
  0xff   :  { %v1117_v45 = vadd.f32 %v1116_v44, %v1115_v43  ;;  %v1118_v46 = vpop.f32.mrb[6].mxu0  ;;  %v1143_v47 = vpop.f32.mrb[4].mxu1 }
 0x100   :  { %v1119_v48 = vpop.f32.mrb[7].mxu0  ;;  %v1144_v51 = vpop.f32.mrb[5].mxu1 }
 0x101   :  { %v753_v49 = vadd.f32 %v1117_v45, %v983_v27  ;;  %v1120_v50 = vadd.f32 %v1119_v48, %v1118_v46  ;;  %v1145_v52 = vadd.f32 %v1144_v51, %v1143_v47  ;;  %v1146_v53 = vpop.f32.mrb[6].mxu1 }
 0x102   :  { %v1147_v55 = vpop.f32.mrb[7].mxu1 }
 0x103   :  { %v756_v54 = vadd.f32 %v1120_v50, %v983_v27  ;;  %v802_v56 = vadd.f32 %v1145_v52, %v753_v49  ;;  %v1148_v57 = vadd.f32 %v1147_v55, %v1146_v53 }
 0x105   :  { %v805_v58 = vadd.f32 %v1148_v57, %v756_v54 }
 0x115   :  { %v1165_v59 = vpop.f32.mrb[8].mxu0 }
 0x116   :  { %v1166_v60 = vpop.f32.mrb[9].mxu0 }
 0x117   :  { %v1167_v61 = vadd.f32 %v1166_v60, %v1165_v59  ;;  %v1168_v62 = vpop.f32.mrb[10].mxu0  ;;  %v1193_v63 = vpop.f32.mrb[8].mxu1 }
 0x118   :  { %v1169_v0 = vpop.f32.mrb[11].mxu0  ;;  %v1194_v3 = vpop.f32.mrb[9].mxu1 }
 0x119   :  { %v843_v1 = vadd.f32 %v1167_v61, %v794_v40  ;;  %v1170_v2 = vadd.f32 %v1169_v0, %v1168_v62  ;;  %v1195_v4 = vadd.f32 %v1194_v3, %v1193_v63  ;;  %v1196_v5 = vpop.f32.mrb[10].mxu1 }
 0x11a   :  { %v1197_v7 = vpop.f32.mrb[11].mxu1 }
 0x11b   :  { %v846_v6 = vadd.f32 %v1170_v2, %v797_v42  ;;  %v1198_v8 = vadd.f32 %v1197_v7, %v1196_v5  ;;  %v892_v9 = vadd.f32 %v1195_v4, %v843_v1 }
 0x11d   :  { %v1171_v10 = vpop.f32.mrb[12].mxu0  ;;  %v895_v12 = vadd.f32 %v1198_v8, %v846_v6 }
 0x11e   :  { %v1172_v11 = vpop.f32.mrb[13].mxu0 }
 0x11f   :  { %v1173_v13 = vadd.f32 %v1172_v11, %v1171_v10  ;;  %v1174_v14 = vpop.f32.mrb[14].mxu0  ;;  %v1199_v15 = vpop.f32.mrb[12].mxu1 }
 0x120   :  { %v1175_v16 = vpop.f32.mrb[15].mxu0  ;;  %v1200_v19 = vpop.f32.mrb[13].mxu1 }
 0x121   :  { %v851_v17 = vadd.f32 %v1173_v13, %v802_v56  ;;  %v1176_v18 = vadd.f32 %v1175_v16, %v1174_v14  ;;  %v1201_v20 = vadd.f32 %v1200_v19, %v1199_v15  ;;  %v1202_v21 = vpop.f32.mrb[14].mxu1 }
 0x122   :  { %v1203_v23 = vpop.f32.mrb[15].mxu1 }
 0x123   :  { %v854_v22 = vadd.f32 %v1176_v18, %v805_v58  ;;  %v1204_v24 = vadd.f32 %v1203_v23, %v1202_v21  ;;  %v900_v25 = vadd.f32 %v1201_v20, %v851_v17 }
 0x125   :  { %v903_v26 = vadd.f32 %v1204_v24, %v854_v22 }
 0x135   :  { %v1233_v27 = vpop.f32.mrb[16].mxu0 }
 0x136   :  { %v949_v28 = vadd.f32 %v1233_v27, %v900_v25  ;;  %v940_v29 = vpop.f32.mrb[17].mxu0 }
 0x137   :  { %v941_v30 = vadd.f32 %v940_v29, %v892_v9  ;;  %v1234_v31 = vpop.f32.mrb[18].mxu0 }
 0x138   :  { %v952_v32 = vadd.f32 %v1234_v31, %v903_v26  ;;  %v943_v33 = vpop.f32.mrb[19].mxu0  ;;  %v957_v35 = vmax.f32 %v949_v28, 0.0 }
 0x139   :  { %v944_v34 = vadd.f32 %v943_v33, %v895_v12  ;;  %v955_v37 = vmax.f32 %v941_v30, 0.0 }
 0x13a   :  { %v958_v36 = vmax.f32 %v952_v32, 0.0 }
 0x13b   :  { %v956_v38 = vmax.f32 %v944_v34, 0.0 }
 0x13c   :  { %v1090_v39 = vpack.c.bf16 %v958_v36, %v957_v35 }
 0x13d   :  { %v1085_v40 = vpack.c.bf16 %v956_v38, %v955_v37 }
 0x13e   :  { %1092 = vst [vmem:[%s1635_s3 + $0x8] sm:$0xff] %v1090_v39  }
 0x13f   :  { %1086 = vst [vmem:[%s1635_s3] sm:$0xff] %v1085_v40  }

// kernel: fool_clip_forward.18
= control target key start
LH: loop header
LB: loop body
LE: loop exit
PB: predicated region body
PF: predicated region fallthrough
CT: control target
= control target key end

     0   :  { %s1667_s1 = inlined_call_operand.vmem [shape: bf16[1152,128], index: 1, kind: input, shape index: {}]   ;;  %s1668_s0 = inlined_call_operand.vmem [shape: bf16[32,1152], index: 0, kind: input, shape index: {}]   ;;  %s1669_s2 = inlined_call_operand.vmem [shape: f32[1,128], index: 2, kind: input, shape index: {}]   ;;  %s1670_s3 = inlined_call_operand.vmem [shape: bf16[32,128], index: 3, kind: input, shape index: {}]   ;;  %s1671_s4 = inlined_call_operand.vmem [shape: bf16[32,128], index: 4, kind: output, shape index: {}]  }
   0x1   :  { %v1259_v0 = vld [vmem:[%s1667_s1 + $0x40] sm:$0xff]   ;;  %v1263_v4 = vld [vmem:[%s1667_s1 + $0x48] sm:$0xff]   ;;  %v1267_v8 = vld [vmem:[%s1667_s1 + $0x50] sm:$0xff]  }
   0x2   :  { %v1260_v1 = vld [vmem:[%s1667_s1] sm:$0xff]   ;;  %1117 = vmatprep.subr.bf16.mxu0 %v1259_v0  ;;  %v1264_v5 = vld [vmem:[%s1667_s1 + $0x8] sm:$0xff]   ;;  %v1268_v9 = vld [vmem:[%s1667_s1 + $0x10] sm:$0xff]  }
   0x3   :  { %v1261_v2 = vld [vmem:[%s1667_s1 + $0xc0] sm:$0xff]   ;;  %1118 = vmatpush3.bf16.msra.mxu0 %v1260_v1  ;;  %v1265_v6 = vld [vmem:[%s1667_s1 + $0xc8] sm:$0xff]   ;;  %v1269_v10 = vld [vmem:[%s1667_s1 + $0xd0] sm:$0xff]  }
   0x4   :  { %v1262_v3 = vld [vmem:[%s1667_s1 + $0x80] sm:$0xff]   ;;  %1145 = vmatprep.subr.bf16.mxu1 %v1261_v2  ;;  %1119 = vmatprep.subr.bf16.mxu0 %v1263_v4  ;;  %v1266_v7 = vld [vmem:[%s1667_s1 + $0x88] sm:$0xff]   ;;  %v1270_v11 = vld [vmem:[%s1667_s1 + $0x90] sm:$0xff]  }
   0x5   :  { %1146 = vmatpush3.bf16.msra.mxu1 %v1262_v3  ;;  %v1271_v12 = vld [vmem:[%s1667_s1 + $0x58] sm:$0xff]   ;;  %v1275_v16 = vld [vmem:[%s1667_s1 + $0x60] sm:$0xff]   ;;  %v1279_v20 = vld [vmem:[%s1667_s1 + $0x68] sm:$0xff]  }
   0x6   :  { %1147 = vmatprep.subr.bf16.mxu1 %v1265_v6  ;;  %v1272_v13 = vld [vmem:[%s1667_s1 + $0x18] sm:$0xff]   ;;  %v1276_v17 = vld [vmem:[%s1667_s1 + $0x20] sm:$0xff]   ;;  %v1280_v21 = vld [vmem:[%s1667_s1 + $0x28] sm:$0xff]  }
   0x7   :  { %1120 = vmatpush3.bf16.msra.mxu0 %v1264_v5  ;;  %v1273_v14 = vld [vmem:[%s1667_s1 + $0xd8] sm:$0xff]   ;;  %v1277_v18 = vld [vmem:[%s1667_s1 + $0xe0] sm:$0xff]   ;;  %v1281_v22 = vld [vmem:[%s1667_s1 + $0xe8] sm:$0xff]  }
   0x8   :  { %1121 = vmatprep.subr.bf16.mxu0 %v1267_v8  ;;  %v1274_v15 = vld [vmem:[%s1667_s1 + $0x98] sm:$0xff]   ;;  %v1278_v19 = vld [vmem:[%s1667_s1 + $0xa0] sm:$0xff]   ;;  %v1282_v23 = vld [vmem:[%s1667_s1 + $0xa8] sm:$0xff]  }
   0x9   :  { %1148 = vmatpush3.bf16.msra.mxu1 %v1266_v7  ;;  %v1283_v24 = vld [vmem:[%s1667_s1 + $0x70] sm:$0xff]   ;;  %v1287_v28 = vld [vmem:[%s1667_s1 + $0x78] sm:$0xff]   ;;  %v1290_v31 = vld [vmem:[%s1668_s0] ss:$36 sps:$4 sm:$0xff]  }
   0xa   :  { %1149 = vmatprep.subr.bf16.mxu1 %v1269_v10  ;;  %v1284_v25 = vld [vmem:[%s1667_s1 + $0x30] sm:$0xff]   ;;  %v1288_v29 = vld [vmem:[%s1667_s1 + $0x38] sm:$0xff]   ;;  %v1292_v32 = vld [vmem:[%s1668_s0 + $0x4] ss:$36 sps:$4 sm:$0xff]  }
   0xb   :  { %1122 = vmatpush3.bf16.msra.mxu0 %v1268_v9  ;;  %v1285_v26 = vld [vmem:[%s1667_s1 + $0xf0] sm:$0xff]   ;;  %v1289_v30 = vld [vmem:[%s1667_s1 + $0xf8] sm:$0xff]   ;;  %745 = vmatprep.mubr.bf16.mxu0 %v1292_v32  ;;  %v1294_v34 = vld [vmem:[%s1667_s1 + $0x140] sm:$0xff]  }
   0xc   :  { %1123 = vmatprep.subr.bf16.mxu0 %v1271_v12  ;;  %v1286_v27 = vld [vmem:[%s1667_s1 + $0xb0] sm:$0xff]   ;;  %v1293_v33 = vld [vmem:[%s1667_s1 + $0xb8] sm:$0xff]   ;;  %v1295_v35 = vld [vmem:[%s1668_s0 + $0x8] ss:$36 sps:$4 sm:$0xff]  }
   0xd   :  { %1150 = vmatpush3.bf16.msra.mxu1 %v1270_v11  ;;  %v1297_v36 = vld [vmem:[%s1668_s0 + $0xc] ss:$36 sps:$4 sm:$0xff]   ;;  %v1298_v37 = vld [vmem:[%s1667_s1 + $0x100] sm:$0xff]   ;;  %v1309_v48 = vld [vmem:[%s1667_s1 + $0x158] sm:$0xff]  }
   0xe   :  { %1151 = vmatprep.subr.bf16.mxu1 %v1273_v14  ;;  %794 = vmatprep.mubr.bf16.mxu1 %v1297_v36  ;;  %v1299_v38 = vld [vmem:[%s1667_s1 + $0x1c0] sm:$0xff]   ;;  %v1301_v40 = vld [vmem:[%s1667_s1 + $0x148] sm:$0xff]   ;;  %v1305_v44 = vld [vmem:[%s1667_s1 + $0x150] sm:$0xff]  }
   0xf   :  { %1124 = vmatpush3.bf16.msra.mxu0 %v1272_v13  ;;  %v1300_v39 = vld [vmem:[%s1667_s1 + $0x180] sm:$0xff]   ;;  %v1302_v41 = vld [vmem:[%s1667_s1 + $0x108] sm:$0xff]   ;;  %v1306_v45 = vld [vmem:[%s1667_s1 + $0x110] sm:$0xff]  }
  0x10   :  { %1125 = vmatprep.subr.bf16.mxu0 %v1275_v16  ;;  %v1303_v42 = vld [vmem:[%s1667_s1 + $0x1c8] sm:$0xff]   ;;  %v1307_v46 = vld [vmem:[%s1667_s1 + $0x1d0] sm:$0xff]   ;;  %v1310_v49 = vld [vmem:[%s1667_s1 + $0x118] sm:$0xff]  }
  0x11   :  { %1152 = vmatpush3.bf16.msra.mxu1 %v1274_v15  ;;  %v1304_v43 = vld [vmem:[%s1667_s1 + $0x188] sm:$0xff]   ;;  %v1308_v47 = vld [vmem:[%s1667_s1 + $0x190] sm:$0xff]   ;;  %v1311_v50 = vld [vmem:[%s1667_s1 + $0x1d8] sm:$0xff]  }
  0x12   :  { %1153 = vmatprep.subr.bf16.mxu1 %v1277_v18  ;;  %v1312_v51 = vld [vmem:[%s1667_s1 + $0x198] sm:$0xff]   ;;  %v1313_v52 = vld [vmem:[%s1667_s1 + $0x160] sm:$0xff]   ;;  %v1317_v56 = vld [vmem:[%s1667_s1 + $0x168] sm:$0xff]  }
  0x13   :  { %1126 = vmatpush3.bf16.msra.mxu0 %v1276_v17  ;;  %v1314_v53 = vld [vmem:[%s1667_s1 + $0x120] sm:$0xff]   ;;  %v1318_v57 = vld [vmem:[%s1668_s0 + $0x4c] ss:$36 sps:$4 sm:$0xff]   ;;  %v1323_v61 = vld [vmem:[%s1668_s0 + $0x54] ss:$36 sps:$4 sm:$0xff]  }
  0x14   :  { %1127 = vmatprep.subr.bf16.mxu0 %v1279_v20  ;;  %v1315_v54 = vld [vmem:[%s1667_s1 + $0x1e0] sm:$0xff]   ;;  %v1320_v58 = vld [vmem:[%s1667_s1 + $0x128] sm:$0xff]   ;;  %v1326_v63 = vld [vmem:[%s1668_s0 + $0x50] ss:$36 sps:$4 sm:$0xff]  }
  0x15   :  { %1154 = vmatpush3.bf16.msra.mxu1 %v1278_v19  ;;  %v1316_v55 = vld [vmem:[%s1667_s1 + $0x1a0] sm:$0xff]   ;;  %v1321_v59 = vld [vmem:[%s1668_s0 + $0x48] ss:$36 sps:$4 sm:$0xff]   ;;  %v1327_v0 = vld [vmem:[%s1667_s1 + $0x170] sm:$0xff]  }
  0x16   :  { %1155 = vmatprep.subr.bf16.mxu1 %v1281_v22  ;;  %v1322_v60 = vld [vmem:[%s1667_s1 + $0x1e8] sm:$0xff]   ;;  %v1328_v1 = vld [vmem:[%s1667_s1 + $0x130] sm:$0xff]   ;;  %v1331_v4 = vld [vmem:[%s1667_s1 + $0x178] sm:$0xff]  }
  0x17   :  { %1128 = vmatpush3.bf16.msra.mxu0 %v1280_v21  ;;  %v1325_v62 = vld [vmem:[%s1667_s1 + $0x1a8] sm:$0xff]   ;;  %v1329_v2 = vld [vmem:[%s1667_s1 + $0x1f0] sm:$0xff]   ;;  %v1332_v5 = vld [vmem:[%s1667_s1 + $0x138] sm:$0xff]  }
  0x18   :  { %1129 = vmatprep.subr.bf16.mxu0 %v1283_v24  ;;  %v1330_v3 = vld [vmem:[%s1667_s1 + $0x1b0] sm:$0xff]   ;;  %v1333_v6 = vld [vmem:[%s1667_s1 + $0x1f8] sm:$0xff]   ;;  %v1338_v10 = vld [vmem:[%s1667_s1 + $0x200] sm:$0xff]  }
  0x19   :  { %1156 = vmatpush3.bf16.msra.mxu1 %v1282_v23  ;;  %v1334_v7 = vld [vmem:[%s1668_s0 + $0x10] ss:$36 sps:$4 sm:$0xff]   ;;  %v1337_v9 = vld [vmem:[%s1667_s1 + $0x1b8] sm:$0xff]   ;;  %v1342_v13 = vld [vmem:[%s1667_s1 + $0x208] sm:$0xff]  }
  0x1a   :  { %1157 = vmatprep.subr.bf16.mxu1 %v1285_v26  ;;  %v1336_v8 = vld [vmem:[%s1668_s0 + $0x14] ss:$36 sps:$4 sm:$0xff]   ;;  %v1341_v12 = vld [vmem:[%s1668_s0 + $0x1c] ss:$36 sps:$4 sm:$0xff]   ;;  %v1347_v17 = vld [vmem:[%s1668_s0 + $0x64] ss:$36 sps:$4 sm:$0xff]  }
  0x1b   :  { %1130 = vmatpush3.bf16.msra.mxu0 %v1284_v25  ;;  %v1339_v11 = vld [vmem:[%s1668_s0 + $0x18] ss:$36 sps:$4 sm:$0xff]   ;;  %v1346_v16 = vld [vmem:[%s1667_s1 + $0x210] sm:$0xff]   ;;  %v1349_v18 = vld [vmem:[%s1668_s0 + $0x60] ss:$36 sps:$4 sm:$0xff]  }
  0x1c   :  { %1131 = vmatprep.subr.bf16.mxu0 %v1287_v28  ;;  %v1343_v14 = vld [vmem:[%s1668_s0 + $0x5c] ss:$36 sps:$4 sm:$0xff]   ;;  %v1352_v22 = vld [vmem:[%s1667_s1 + $0x228] sm:$0xff]   ;;  %v1353_v23 = vld [vmem:[%s1667_s1 + $0x230] sm:$0xff]  }
  0x1d   :  { %1158 = vmatpush3.bf16.msra.mxu1 %v1286_v27  ;;  %v1345_v15 = vld [vmem:[%s1668_s0 + $0x58] ss:$36 sps:$4 sm:$0xff]   ;;  %v1351_v20 = vld [vmem:[%s1667_s1 + $0x220] sm:$0xff]   ;;  %v1356_v25 = vld [vmem:[%s1668_s0 + $0x68] ss:$36 sps:$4 sm:$0xff]  }
  0x1e   :  { %1159 = vmatprep.subr.bf16.mxu1 %v1289_v30  ;;  %v1350_v19 = vld [vmem:[%s1667_s1 + $0x218] sm:$0xff]   ;;  %v1355_v21 = vld [vmem:[%s1668_s0 + $0x20] ss:$36 sps:$4 sm:$0xff]  }
  0x1f   :  { %1132 = vmatpush3.bf16.msra.mxu0 %v1288_v29  ;;  %v1354_v24 = vld [vmem:[%s1667_s1 + $0x238] sm:$0xff]   ;;  %v998_v27 = vld [vmem:[%s1669_s2] ss:$0 sm:$0xff] }
  0x20   :  { %1173 = vmatprep.subr.bf16.mxu0 %v1294_v34 }
  0x21   :  { %1160 = vmatpush3.bf16.msra.mxu1 %v1293_v33 }
  0x22   :  { %746 = vmatmul.mubr.bf16.vlgmr.msra.gmra.mrb[0].mxu0 %v1290_v31  ;;  %1201 = vmatprep.subr.bf16.mxu1 %v1299_v38 }
  0x23   :  { %1174 = vmatpush3.bf16.msra.mxu0 %v1298_v37  ;;  %753 = vmatprep.mubr.bf16.mxu0 %v1318_v57 }
  0x24   :  { %795 = vmatmul.mubr.bf16.vlgmr.msra.gmra.mrb[0].mxu1 %v1295_v35  ;;  %1175 = vmatprep.subr.bf16.mxu0 %v1301_v40 }
  0x25   :  { %1202 = vmatpush3.bf16.msra.mxu1 %v1300_v39  ;;  %802 = vmatprep.mubr.bf16.mxu1 %v1323_v61 }
  0x26   :  { %1203 = vmatprep.subr.bf16.mxu1 %v1303_v42 }
  0x27   :  { %1176 = vmatpush3.bf16.msra.mxu0 %v1302_v41 }
  0x28   :  { %1177 = vmatprep.subr.bf16.mxu0 %v1305_v44 }
  0x29   :  { %1204 = vmatpush3.bf16.msra.mxu1 %v1304_v43 }
  0x2a   :  { %1205 = vmatprep.subr.bf16.mxu1 %v1307_v46  ;;  %754 = vmatmul.mubr.bf16.gmra.mrb[4].mxu0 %v1321_v59 }
  0x2b   :  { %1178 = vmatpush3.bf16.msra.mxu0 %v1306_v45  ;;  %843 = vmatprep.mubr.bf16.mxu0 %v1336_v8 }
  0x2c   :  { %1179 = vmatprep.subr.bf16.mxu0 %v1309_v48  ;;  %803 = vmatmul.mubr.bf16.gmra.mrb[4].mxu1 %v1326_v63 }
  0x2d   :  { %1206 = vmatpush3.bf16.msra.mxu1 %v1308_v47  ;;  %892 = vmatprep.mubr.bf16.mxu1 %v1341_v12 }
  0x2e   :  { %1207 = vmatprep.subr.bf16.mxu1 %v1311_v50 }
  0x2f   :  { %1180 = vmatpush3.bf16.msra.mxu0 %v1310_v49 }
  0x30   :  { %1181 = vmatprep.subr.bf16.mxu0 %v1313_v52 }
  0x31   :  { %1208 = vmatpush3.bf16.msra.mxu1 %v1312_v51 }
  0x32   :  { %1209 = vmatprep.subr.bf16.mxu1 %v1315_v54 }
  0x33   :  { %1182 = vmatpush3.bf16.msra.mxu0 %v1314_v53 }
  0x34   :  { %1183 = vmatprep.subr.bf16.mxu0 %v1317_v56 }
  0x35   :  { %1210 = vmatpush3.bf16.msra.mxu1 %v1316_v55 }
  0x36   :  { %1211 = vmatprep.subr.bf16.mxu1 %v1322_v60 }
  0x37   :  { %1184 = vmatpush3.bf16.msra.mxu0 %v1320_v58 }
  0x38   :  { %1185 = vmatprep.subr.bf16.mxu0 %v1327_v0 }
  0x39   :  { %1212 = vmatpush3.bf16.msra.mxu1 %v1325_v62 }
  0x3a   :  { %1213 = vmatprep.subr.bf16.mxu1 %v1329_v2 }
  0x3b   :  { %1186 = vmatpush3.bf16.msra.mxu0 %v1328_v1 }
  0x3c   :  { %1187 = vmatprep.subr.bf16.mxu0 %v1331_v4 }
  0x3d   :  { %1214 = vmatpush3.bf16.msra.mxu1 %v1330_v3 }
  0x3e   :  { %1215 = vmatprep.subr.bf16.mxu1 %v1333_v6 }
  0x3f   :  { %1188 = vmatpush3.bf16.msra.mxu0 %v1332_v5 }
  0x40   :  { %1239 = vmatprep.subr.bf16.mxu0 %v1338_v10 }
  0x41   :  { %1216 = vmatpush3.bf16.msra.mxu1 %v1337_v9 }
  0x42   :  { %844 = vmatmul.mubr.bf16.vlgmr.msra.gmra.mrb[8].mxu0 %v1334_v7 }
  0x43   :  { %1240 = vmatpush3.bf16.msra.mxu0 %v1338_v10  ;;  %851 = vmatprep.mubr.bf16.mxu0 %v1343_v14 }
  0x44   :  { %893 = vmatmul.mubr.bf16.vlgmr.msra.gmra.mrb[8].mxu1 %v1339_v11  ;;  %1241 = vmatprep.subr.bf16.mxu0 %v1342_v13 }
  0x45   :  { %900 = vmatprep.mubr.bf16.mxu1 %v1347_v17 }
  0x47   :  { %1242 = vmatpush3.bf16.msra.mxu0 %v1342_v13 }
  0x48   :  { %1243 = vmatprep.subr.bf16.mxu0 %v1346_v16 }
  0x4a   :  { %852 = vmatmul.mubr.bf16.gmra.mrb[12].mxu0 %v1345_v15 }
  0x4b   :  { %1244 = vmatpush3.bf16.msra.mxu0 %v1346_v16  ;;  %1255 = vmatprep.mubr.bf16.mxu0 %v1355_v21 }
  0x4c   :  { %901 = vmatmul.mubr.bf16.gmra.mrb[12].mxu1 %v1349_v18  ;;  %1245 = vmatprep.subr.bf16.mxu0 %v1350_v19 }
  0x4f   :  { %1246 = vmatpush3.bf16.msra.mxu0 %v1350_v19 }
  0x50   :  { %1247 = vmatprep.subr.bf16.mxu0 %v1351_v20 }
  0x53   :  { %1248 = vmatpush3.bf16.msra.mxu0 %v1351_v20 }
  0x54   :  { %1249 = vmatprep.subr.bf16.mxu0 %v1352_v22 }
  0x57   :  { %1250 = vmatpush3.bf16.msra.mxu0 %v1352_v22 }
  0x58   :  { %1251 = vmatprep.subr.bf16.mxu0 %v1353_v23 }
  0x5b   :  { %1252 = vmatpush3.bf16.msra.mxu0 %v1353_v23 }
  0x5c   :  { %1253 = vmatprep.subr.bf16.mxu0 %v1354_v24 }
  0x5f   :  { %1254 = vmatpush3.bf16.msra.mxu0 %v1354_v24 }
  0x62   :  { %1256 = vmatmul.mubr.bf16.vlgmr.msra.gmra.mrb[16].mxu0 %v1356_v25 }
  0xf5   :  { %v1133_v26 = vpop.f32.mrb[0].mxu0 }
  0xf6   :  { %v1134_v28 = vpop.f32.mrb[1].mxu0 }
  0xf7   :  { %v1135_v29 = vadd.f32 %v1134_v28, %v1133_v26  ;;  %v1136_v30 = vpop.f32.mrb[2].mxu0  ;;  %v1161_v31 = vpop.f32.mrb[0].mxu1  ;;  %v1098_v28 = vld [vmem:[%s1670_s3] sm:$0xff]  }
  0xf8   :  { %v1137_v32 = vpop.f32.mrb[3].mxu0  ;;  %v1162_v35 = vpop.f32.mrb[1].mxu1 }
  0xf9   :  { %v748_v33 = vadd.f32 %v1135_v29, %v998_v27  ;;  %v1138_v34 = vadd.f32 %v1137_v32, %v1136_v30  ;;  %v1163_v36 = vadd.f32 %v1162_v35, %v1161_v31  ;;  %v1164_v37 = vpop.f32.mrb[2].mxu1  ;;  %v1099_v31 = vunpack.c.l.bf16 %v1098_v28 }
  0xfa   :  { %v1165_v39 = vpop.f32.mrb[3].mxu1 }
  0xfb   :  { %v751_v38 = vadd.f32 %v1138_v34, %v998_v27  ;;  %v797_v40 = vadd.f32 %v1163_v36, %v748_v33  ;;  %v1166_v41 = vadd.f32 %v1165_v39, %v1164_v37  ;;  %v1100_v37 = vunpack.c.h.bf16 %v1098_v28 }
  0xfd   :  { %v800_v42 = vadd.f32 %v1166_v41, %v751_v38  ;;  %v1139_v43 = vpop.f32.mrb[4].mxu0 }
  0xfe   :  { %v1140_v44 = vpop.f32.mrb[5].mxu0 }
  0xff   :  { %v1141_v45 = vadd.f32 %v1140_v44, %v1139_v43  ;;  %v1142_v46 = vpop.f32.mrb[6].mxu0  ;;  %v1167_v47 = vpop.f32.mrb[4].mxu1 }
 0x100   :  { %v1143_v48 = vpop.f32.mrb[7].mxu0  ;;  %v1168_v51 = vpop.f32.mrb[5].mxu1 }
 0x101   :  { %v756_v49 = vadd.f32 %v1141_v45, %v998_v27  ;;  %v1144_v50 = vadd.f32 %v1143_v48, %v1142_v46  ;;  %v1169_v52 = vadd.f32 %v1168_v51, %v1167_v47  ;;  %v1170_v53 = vpop.f32.mrb[6].mxu1 }
 0x102   :  { %v1171_v55 = vpop.f32.mrb[7].mxu1 }
 0x103   :  { %v759_v54 = vadd.f32 %v1144_v50, %v998_v27  ;;  %v805_v56 = vadd.f32 %v1169_v52, %v756_v49  ;;  %v1172_v57 = vadd.f32 %v1171_v55, %v1170_v53  ;;  %v1115_v27 = vld [vmem:[%s1670_s3 + $0x8] sm:$0xff]  }
 0x104   :  { %v1103_v29 = vunpack.c.l.bf16 %v1115_v27  ;;  %v1104_v34 = vunpack.c.h.bf16 %v1115_v27 }
 0x105   :  { %v808_v58 = vadd.f32 %v1172_v57, %v759_v54 }
 0x115   :  { %v1189_v59 = vpop.f32.mrb[8].mxu0 }
 0x116   :  { %v1190_v60 = vpop.f32.mrb[9].mxu0 }
 0x117   :  { %v1191_v61 = vadd.f32 %v1190_v60, %v1189_v59  ;;  %v1192_v62 = vpop.f32.mrb[10].mxu0  ;;  %v1217_v63 = vpop.f32.mrb[8].mxu1 }
 0x118   :  { %v1193_v0 = vpop.f32.mrb[11].mxu0  ;;  %v1218_v3 = vpop.f32.mrb[9].mxu1 }
 0x119   :  { %v846_v1 = vadd.f32 %v1191_v61, %v797_v40  ;;  %v1194_v2 = vadd.f32 %v1193_v0, %v1192_v62  ;;  %v1219_v4 = vadd.f32 %v1218_v3, %v1217_v63  ;;  %v1220_v5 = vpop.f32.mrb[10].mxu1 }
 0x11a   :  { %v1221_v7 = vpop.f32.mrb[11].mxu1 }
 0x11b   :  { %v849_v6 = vadd.f32 %v1194_v2, %v800_v42  ;;  %v1222_v8 = vadd.f32 %v1221_v7, %v1220_v5  ;;  %v895_v9 = vadd.f32 %v1219_v4, %v846_v1 }
 0x11d   :  { %v1195_v10 = vpop.f32.mrb[12].mxu0  ;;  %v898_v12 = vadd.f32 %v1222_v8, %v849_v6 }
 0x11e   :  { %v1196_v11 = vpop.f32.mrb[13].mxu0 }
 0x11f   :  { %v1197_v13 = vadd.f32 %v1196_v11, %v1195_v10  ;;  %v1198_v14 = vpop.f32.mrb[14].mxu0  ;;  %v1223_v15 = vpop.f32.mrb[12].mxu1 }
 0x120   :  { %v1199_v16 = vpop.f32.mrb[15].mxu0  ;;  %v1224_v19 = vpop.f32.mrb[13].mxu1 }
 0x121   :  { %v854_v17 = vadd.f32 %v1197_v13, %v805_v56  ;;  %v1200_v18 = vadd.f32 %v1199_v16, %v1198_v14  ;;  %v1225_v20 = vadd.f32 %v1224_v19, %v1223_v15  ;;  %v1226_v21 = vpop.f32.mrb[14].mxu1 }
 0x122   :  { %v1227_v23 = vpop.f32.mrb[15].mxu1 }
 0x123   :  { %v857_v22 = vadd.f32 %v1200_v18, %v808_v58  ;;  %v1228_v24 = vadd.f32 %v1227_v23, %v1226_v21  ;;  %v903_v25 = vadd.f32 %v1225_v20, %v854_v17 }
 0x125   :  { %v906_v26 = vadd.f32 %v1228_v24, %v857_v22 }
 0x135   :  { %v1257_v30 = vpop.f32.mrb[16].mxu0 }
 0x136   :  { %v952_v32 = vadd.f32 %v1257_v30, %v903_v25  ;;  %v943_v33 = vpop.f32.mrb[17].mxu0 }
 0x137   :  { %v944_v35 = vadd.f32 %v943_v33, %v895_v9  ;;  %v1258_v36 = vpop.f32.mrb[18].mxu0 }
 0x138   :  { %v968_v38 = vadd.f32 %v1103_v29, %v952_v32  ;;  %v955_v39 = vadd.f32 %v1258_v36, %v906_v26  ;;  %v946_v40 = vpop.f32.mrb[19].mxu0 }
 0x139   :  { %v966_v41 = vadd.f32 %v1099_v31, %v944_v35  ;;  %v947_v42 = vadd.f32 %v946_v40, %v898_v12 }
 0x13a   :  { %v969_v43 = vadd.f32 %v1104_v34, %v955_v39  ;;  %v972_v45 = vmax.f32 %v968_v38, 0.0 }
 0x13b   :  { %v967_v44 = vadd.f32 %v1100_v37, %v947_v42  ;;  %v970_v47 = vmax.f32 %v966_v41, 0.0 }
 0x13c   :  { %v973_v46 = vmax.f32 %v969_v43, 0.0 }
 0x13d   :  { %v971_v48 = vmax.f32 %v967_v44, 0.0 }
 0x13e   :  { %v1113_v49 = vpack.c.bf16 %v973_v46, %v972_v45 }
 0x13f   :  { %v1108_v50 = vpack.c.bf16 %v971_v48, %v970_v47 }
 0x140   :  { %1116 = vst [vmem:[%s1671_s4 + $0x8] sm:$0xff] %v1113_v49  }
 0x141   :  { %1109 = vst [vmem:[%s1671_s4] sm:$0xff] %v1108_v50  }

// kernel: fool_clip_forward.25
= control target key start
LH: loop header
LB: loop body
LE: loop exit
PB: predicated region body
PF: predicated region fallthrough
CT: control target
= control target key end

     0   :  { %s2299_s1 = inlined_call_operand.vmem [shape: bf16[1152,256], index: 1, kind: input, shape index: {}]   ;;  %s2300_s0 = inlined_call_operand.vmem [shape: bf16[32,1152], index: 0, kind: input, shape index: {}]   ;;  %s2301_s2 = inlined_call_operand.vmem [shape: f32[1,256], index: 2, kind: input, shape index: {}]   ;;  %s2302_s3 = inlined_call_operand.vmem [shape: bf16[32,256], index: 3, kind: output, shape index: {}]  }
   0x1   :  { %v1535_v0 = vld [vmem:[%s2299_s1 + $0x4] ss:$8 sps:$4 sm:$0xff]   ;;  %v1539_v2 = vld [vmem:[%s2299_s1] ss:$8 sps:$4 sm:$0xff]   ;;  %v1541_v4 = vld [vmem:[%s2299_s1 + $0x14] ss:$8 sps:$4 sm:$0xff]  }
   0x2   :  { %v1537_v1 = vld [vmem:[%s2299_s1 + $0x204] ss:$8 sps:$4 sm:$0xff]   ;;  %1003 = vmatprep.subr.bf16.mxu1 %v1535_v0  ;;  %v1540_v3 = vld [vmem:[%s2299_s1 + $0x200] ss:$8 sps:$4 sm:$0xff]   ;;  %v1543_v5 = vld [vmem:[%s2299_s1 + $0x214] ss:$8 sps:$4 sm:$0xff]  }
   0x3   :  { %1109 = vmatprep.subr.bf16.mxu0 %v1537_v1  ;;  %1004 = vmatpush1.bf16.msra.mxu1 %v1539_v2  ;;  %v1545_v6 = vld [vmem:[%s2299_s1 + $0x10] ss:$8 sps:$4 sm:$0xff]   ;;  %v1547_v8 = vld [vmem:[%s2299_s1 + $0x24] ss:$8 sps:$4 sm:$0xff]   ;;  %v1551_v10 = vld [vmem:[%s2299_s1 + $0x20] ss:$8 sps:$4 sm:$0xff]  }
   0x4   :  { %1110 = vmatpush1.bf16.msra.mxu0 %v1540_v3  ;;  %1005 = vmatprep.subr.bf16.mxu1 %v1541_v4  ;;  %v1546_v7 = vld [vmem:[%s2299_s1 + $0x210] ss:$8 sps:$4 sm:$0xff]   ;;  %v1549_v9 = vld [vmem:[%s2299_s1 + $0x224] ss:$8 sps:$4 sm:$0xff]   ;;  %v1552_v11 = vld [vmem:[%s2299_s1 + $0x220] ss:$8 sps:$4 sm:$0xff]  }
   0x5   :  { %1111 = vmatprep.subr.bf16.mxu0 %v1543_v5  ;;  %v1553_v12 = vld [vmem:[%s2299_s1 + $0x34] ss:$8 sps:$4 sm:$0xff]   ;;  %v1557_v14 = vld [vmem:[%s2299_s1 + $0x30] ss:$8 sps:$4 sm:$0xff]   ;;  %v1559_v16 = vld [vmem:[%s2299_s1 + $0x44] ss:$8 sps:$4 sm:$0xff]  }
   0x6   :  { %v1555_v13 = vld [vmem:[%s2299_s1 + $0x234] ss:$8 sps:$4 sm:$0xff]   ;;  %v1558_v15 = vld [vmem:[%s2299_s1 + $0x230] ss:$8 sps:$4 sm:$0xff]   ;;  %v1561_v17 = vld [vmem:[%s2299_s1 + $0x244] ss:$8 sps:$4 sm:$0xff]  }
   0x7   :  { %1006 = vmatpush1.bf16.msra.mxu1 %v1545_v6  ;;  %v1563_v18 = vld [vmem:[%s2299_s1 + $0x40] ss:$8 sps:$4 sm:$0xff]   ;;  %v1565_v20 = vld [vmem:[%s2299_s1 + $0x54] ss:$8 sps:$4 sm:$0xff]   ;;  %v1569_v22 = vld [vmem:[%s2299_s1 + $0x50] ss:$8 sps:$4 sm:$0xff]  }
   0x8   :  { %1112 = vmatpush1.bf16.msra.mxu0 %v1546_v7  ;;  %1007 = vmatprep.subr.bf16.mxu1 %v1547_v8  ;;  %v1564_v19 = vld [vmem:[%s2299_s1 + $0x240] ss:$8 sps:$4 sm:$0xff]   ;;  %v1567_v21 = vld [vmem:[%s2299_s1 + $0x254] ss:$8 sps:$4 sm:$0xff]   ;;  %v1570_v23 = vld [vmem:[%s2299_s1 + $0x250] ss:$8 sps:$4 sm:$0xff]  }
   0x9   :  { %1113 = vmatprep.subr.bf16.mxu0 %v1549_v9  ;;  %v1571_v24 = vld [vmem:[%s2299_s1 + $0x64] ss:$8 sps:$4 sm:$0xff]   ;;  %v1575_v26 = vld [vmem:[%s2299_s1 + $0x60] ss:$8 sps:$4 sm:$0xff]   ;;  %v1577_v28 = vld [vmem:[%s2299_s1 + $0x74] ss:$8 sps:$4 sm:$0xff]  }
   0xa   :  { %v1573_v25 = vld [vmem:[%s2299_s1 + $0x264] ss:$8 sps:$4 sm:$0xff]   ;;  %v1576_v27 = vld [vmem:[%s2299_s1 + $0x260] ss:$8 sps:$4 sm:$0xff]   ;;  %v1579_v29 = vld [vmem:[%s2299_s1 + $0x274] ss:$8 sps:$4 sm:$0xff]  }
   0xb   :  { %1008 = vmatpush1.bf16.msra.mxu1 %v1551_v10  ;;  %v1581_v30 = vld [vmem:[%s2299_s1 + $0x70] ss:$8 sps:$4 sm:$0xff]   ;;  %v1583_v32 = vld [vmem:[%s2299_s1 + $0x84] ss:$8 sps:$4 sm:$0xff]   ;;  %v1587_v34 = vld [vmem:[%s2299_s1 + $0x80] ss:$8 sps:$4 sm:$0xff]  }
   0xc   :  { %1114 = vmatpush1.bf16.msra.mxu0 %v1552_v11  ;;  %1009 = vmatprep.subr.bf16.mxu1 %v1553_v12  ;;  %v1582_v31 = vld [vmem:[%s2299_s1 + $0x270] ss:$8 sps:$4 sm:$0xff]   ;;  %v1585_v33 = vld [vmem:[%s2299_s1 + $0x284] ss:$8 sps:$4 sm:$0xff]   ;;  %v1588_v35 = vld [vmem:[%s2299_s1 + $0x280] ss:$8 sps:$4 sm:$0xff]  }
   0xd   :  { %1115 = vmatprep.subr.bf16.mxu0 %v1555_v13  ;;  %v1589_v36 = vld [vmem:[%s2299_s1 + $0x94] ss:$8 sps:$4 sm:$0xff]   ;;  %v1593_v38 = vld [vmem:[%s2299_s1 + $0x90] ss:$8 sps:$4 sm:$0xff]   ;;  %v1595_v40 = vld [vmem:[%s2299_s1 + $0xa4] ss:$8 sps:$4 sm:$0xff]  }
   0xe   :  { %v1591_v37 = vld [vmem:[%s2299_s1 + $0x294] ss:$8 sps:$4 sm:$0xff]   ;;  %v1594_v39 = vld [vmem:[%s2299_s1 + $0x290] ss:$8 sps:$4 sm:$0xff]   ;;  %v1597_v41 = vld [vmem:[%s2299_s1 + $0x2a4] ss:$8 sps:$4 sm:$0xff]  }
   0xf   :  { %1010 = vmatpush1.bf16.msra.mxu1 %v1557_v14  ;;  %v1599_v42 = vld [vmem:[%s2299_s1 + $0xa0] ss:$8 sps:$4 sm:$0xff]   ;;  %v1601_v44 = vld [vmem:[%s2299_s1 + $0xb4] ss:$8 sps:$4 sm:$0xff]   ;;  %v1605_v46 = vld [vmem:[%s2299_s1 + $0xb0] ss:$8 sps:$4 sm:$0xff]  }
  0x10   :  { %1116 = vmatpush1.bf16.msra.mxu0 %v1558_v15  ;;  %1011 = vmatprep.subr.bf16.mxu1 %v1559_v16  ;;  %v1600_v43 = vld [vmem:[%s2299_s1 + $0x2a0] ss:$8 sps:$4 sm:$0xff]   ;;  %v1603_v45 = vld [vmem:[%s2299_s1 + $0x2b4] ss:$8 sps:$4 sm:$0xff]   ;;  %v1606_v47 = vld [vmem:[%s2299_s1 + $0x2b0] ss:$8 sps:$4 sm:$0xff]  }
  0x11   :  { %1117 = vmatprep.subr.bf16.mxu0 %v1561_v17  ;;  %v1633_v48 = vld [vmem:[%s2300_s0 + $0x4] ss:$36 sps:$4 sm:$0xff]   ;;  %v1639_v51 = vld [vmem:[%s2300_s0 + $0x14] ss:$36 sps:$4 sm:$0xff]  }
  0x12   :  { %v1607_v49 = vld [vmem:[%s2299_s1 + $0xc4] ss:$8 sps:$4 sm:$0xff]   ;;  %1035 = vmatprep.mubr.bf16.mxu1 %v1633_v48  ;;  %v1611_v52 = vld [vmem:[%s2299_s1 + $0xc0] ss:$8 sps:$4 sm:$0xff]   ;;  %v1613_v54 = vld [vmem:[%s2299_s1 + $0xd4] ss:$8 sps:$4 sm:$0xff]   ;;  %1141 = vmatprep.mubr.bf16.mxu0 %v1639_v51 }
  0x13   :  { %1012 = vmatpush1.bf16.msra.mxu1 %v1563_v18  ;;  %v1609_v50 = vld [vmem:[%s2299_s1 + $0x2c4] ss:$8 sps:$4 sm:$0xff]   ;;  %v1612_v53 = vld [vmem:[%s2299_s1 + $0x2c0] ss:$8 sps:$4 sm:$0xff]   ;;  %v1615_v55 = vld [vmem:[%s2299_s1 + $0x2d4] ss:$8 sps:$4 sm:$0xff]  }
  0x14   :  { %1118 = vmatpush1.bf16.msra.mxu0 %v1564_v19  ;;  %1013 = vmatprep.subr.bf16.mxu1 %v1565_v20  ;;  %v1617_v56 = vld [vmem:[%s2299_s1 + $0xd0] ss:$8 sps:$4 sm:$0xff]   ;;  %v1619_v58 = vld [vmem:[%s2299_s1 + $0xe4] ss:$8 sps:$4 sm:$0xff]   ;;  %v1623_v60 = vld [vmem:[%s2299_s1 + $0xe0] ss:$8 sps:$4 sm:$0xff]  }
  0x15   :  { %1119 = vmatprep.subr.bf16.mxu0 %v1567_v21  ;;  %v1618_v57 = vld [vmem:[%s2299_s1 + $0x2d0] ss:$8 sps:$4 sm:$0xff]   ;;  %v1621_v59 = vld [vmem:[%s2299_s1 + $0x2e4] ss:$8 sps:$4 sm:$0xff]   ;;  %v1624_v61 = vld [vmem:[%s2299_s1 + $0x2e0] ss:$8 sps:$4 sm:$0xff]  }
  0x16   :  { %v1625_v62 = vld [vmem:[%s2299_s1 + $0xf4] ss:$8 sps:$4 sm:$0xff]   ;;  %v1629_v0 = vld [vmem:[%s2299_s1 + $0xf0] ss:$8 sps:$4 sm:$0xff]   ;;  %v1636_v2 = vld [vmem:[%s2299_s1 + $0x104] ss:$8 sps:$4 sm:$0xff]  }
  0x17   :  { %1014 = vmatpush1.bf16.msra.mxu1 %v1569_v22  ;;  %v1627_v63 = vld [vmem:[%s2299_s1 + $0x2f4] ss:$8 sps:$4 sm:$0xff]   ;;  %v1630_v1 = vld [vmem:[%s2299_s1 + $0x2f0] ss:$8 sps:$4 sm:$0xff]   ;;  %v1642_v3 = vld [vmem:[%s2299_s1 + $0x304] ss:$8 sps:$4 sm:$0xff]  }
  0x18   :  { %1120 = vmatpush1.bf16.msra.mxu0 %v1570_v23  ;;  %1015 = vmatprep.subr.bf16.mxu1 %v1571_v24  ;;  %v1631_v4 = vld [vmem:[%s2300_s0] ss:$36 sps:$4 sm:$0xff]   ;;  %v1637_v6 = vld [vmem:[%s2300_s0 + $0x10] ss:$36 sps:$4 sm:$0xff]  }
  0x19   :  { %1121 = vmatprep.subr.bf16.mxu0 %v1573_v25  ;;  %v1634_v5 = vld [vmem:[%s2299_s1 + $0x100] ss:$8 sps:$4 sm:$0xff]   ;;  %v1645_v8 = vld [vmem:[%s2299_s1 + $0x114] ss:$8 sps:$4 sm:$0xff]   ;;  %v1643_v10 = vld [vmem:[%s2299_s1 + $0x110] ss:$8 sps:$4 sm:$0xff]  }
  0x1a   :  { %v1640_v7 = vld [vmem:[%s2299_s1 + $0x300] ss:$8 sps:$4 sm:$0xff]   ;;  %v1648_v9 = vld [vmem:[%s2299_s1 + $0x314] ss:$8 sps:$4 sm:$0xff]   ;;  %v1646_v11 = vld [vmem:[%s2299_s1 + $0x310] ss:$8 sps:$4 sm:$0xff]  }
  0x1b   :  { %1016 = vmatpush1.bf16.msra.mxu1 %v1575_v26  ;;  %v1651_v12 = vld [vmem:[%s2299_s1 + $0x124] ss:$8 sps:$4 sm:$0xff]   ;;  %v1649_v14 = vld [vmem:[%s2299_s1 + $0x120] ss:$8 sps:$4 sm:$0xff]   ;;  %v1657_v16 = vld [vmem:[%s2299_s1 + $0x134] ss:$8 sps:$4 sm:$0xff]  }
  0x1c   :  { %1122 = vmatpush1.bf16.msra.mxu0 %v1576_v27  ;;  %1017 = vmatprep.subr.bf16.mxu1 %v1577_v28  ;;  %v1654_v13 = vld [vmem:[%s2299_s1 + $0x324] ss:$8 sps:$4 sm:$0xff]   ;;  %v1652_v15 = vld [vmem:[%s2299_s1 + $0x320] ss:$8 sps:$4 sm:$0xff]   ;;  %v1660_v17 = vld [vmem:[%s2299_s1 + $0x334] ss:$8 sps:$4 sm:$0xff]  }
  0x1d   :  { %1123 = vmatprep.subr.bf16.mxu0 %v1579_v29  ;;  %v1655_v18 = vld [vmem:[%s2299_s1 + $0x130] ss:$8 sps:$4 sm:$0xff]   ;;  %v1663_v20 = vld [vmem:[%s2299_s1 + $0x144] ss:$8 sps:$4 sm:$0xff]   ;;  %v1661_v22 = vld [vmem:[%s2299_s1 + $0x140] ss:$8 sps:$4 sm:$0xff]  }
  0x1e   :  { %v1658_v19 = vld [vmem:[%s2299_s1 + $0x330] ss:$8 sps:$4 sm:$0xff]   ;;  %v1666_v21 = vld [vmem:[%s2299_s1 + $0x344] ss:$8 sps:$4 sm:$0xff]   ;;  %v1664_v23 = vld [vmem:[%s2299_s1 + $0x340] ss:$8 sps:$4 sm:$0xff]  }
  0x1f   :  { %1018 = vmatpush1.bf16.msra.mxu1 %v1581_v30  ;;  %v1669_v24 = vld [vmem:[%s2299_s1 + $0x154] ss:$8 sps:$4 sm:$0xff]   ;;  %v1667_v26 = vld [vmem:[%s2299_s1 + $0x150] ss:$8 sps:$4 sm:$0xff]   ;;  %v1675_v28 = vld [vmem:[%s2299_s1 + $0x164] ss:$8 sps:$4 sm:$0xff]  }
  0x20   :  { %1124 = vmatpush1.bf16.msra.mxu0 %v1582_v31  ;;  %1019 = vmatprep.subr.bf16.mxu1 %v1583_v32  ;;  %v1672_v25 = vld [vmem:[%s2299_s1 + $0x354] ss:$8 sps:$4 sm:$0xff]   ;;  %v1670_v27 = vld [vmem:[%s2299_s1 + $0x350] ss:$8 sps:$4 sm:$0xff]   ;;  %v1725_v31 = vld [vmem:[%s2300_s0 + $0x48] ss:$36 sps:$4 sm:$0xff]  }
  0x21   :  { %1125 = vmatprep.subr.bf16.mxu0 %v1585_v33  ;;  %v1721_v29 = vld [vmem:[%s2300_s0 + $0x4c] ss:$36 sps:$4 sm:$0xff]   ;;  %v1723_v30 = vld [vmem:[%s2300_s0 + $0x5c] ss:$36 sps:$4 sm:$0xff]  }
  0x22   :  { %v1678_v32 = vld [vmem:[%s2299_s1 + $0x364] ss:$8 sps:$4 sm:$0xff]   ;;  %v1729_v33 = vld [vmem:[%s2300_s0 + $0x58] ss:$36 sps:$4 sm:$0xff]  }
  0x23   :  { %1020 = vmatpush1.bf16.msra.mxu1 %v1587_v34  ;;  %v1673_v34 = vld [vmem:[%s2299_s1 + $0x160] ss:$8 sps:$4 sm:$0xff]   ;;  %v1691_v48 = vld [vmem:[%s2299_s1 + $0x190] ss:$8 sps:$4 sm:$0xff]   ;;  %v1702_v51 = vld [vmem:[%s2299_s1 + $0x3a4] ss:$8 sps:$4 sm:$0xff]  }
  0x24   :  { %1126 = vmatpush1.bf16.msra.mxu0 %v1588_v35  ;;  %1021 = vmatprep.subr.bf16.mxu1 %v1589_v36  ;;  %v1676_v35 = vld [vmem:[%s2299_s1 + $0x360] ss:$8 sps:$4 sm:$0xff]   ;;  %v1681_v36 = vld [vmem:[%s2299_s1 + $0x174] ss:$8 sps:$4 sm:$0xff]  }
  0x25   :  { %1127 = vmatprep.subr.bf16.mxu0 %v1591_v37  ;;  %v1684_v37 = vld [vmem:[%s2299_s1 + $0x374] ss:$8 sps:$4 sm:$0xff]  }
  0x27   :  { %1022 = vmatpush1.bf16.msra.mxu1 %v1593_v38  ;;  %v1679_v38 = vld [vmem:[%s2299_s1 + $0x170] ss:$8 sps:$4 sm:$0xff]  }
  0x28   :  { %1128 = vmatpush1.bf16.msra.mxu0 %v1594_v39  ;;  %1023 = vmatprep.subr.bf16.mxu1 %v1595_v40  ;;  %v1682_v39 = vld [vmem:[%s2299_s1 + $0x370] ss:$8 sps:$4 sm:$0xff]   ;;  %v1687_v40 = vld [vmem:[%s2299_s1 + $0x184] ss:$8 sps:$4 sm:$0xff]  }
  0x29   :  { %1129 = vmatprep.subr.bf16.mxu0 %v1597_v41  ;;  %v1741_v41 = vld [vmem:[%s2300_s0 + $0xc] ss:$36 sps:$4 sm:$0xff]  }
  0x2b   :  { %1024 = vmatpush1.bf16.msra.mxu1 %v1599_v42  ;;  %v1690_v42 = vld [vmem:[%s2299_s1 + $0x384] ss:$8 sps:$4 sm:$0xff]  }
  0x2c   :  { %1130 = vmatpush1.bf16.msra.mxu0 %v1600_v43  ;;  %1025 = vmatprep.subr.bf16.mxu1 %v1601_v44  ;;  %v1744_v43 = vld [vmem:[%s2300_s0 + $0x1c] ss:$36 sps:$4 sm:$0xff]  }
  0x2d   :  { %1131 = vmatprep.subr.bf16.mxu0 %v1603_v45  ;;  %v1685_v44 = vld [vmem:[%s2299_s1 + $0x180] ss:$8 sps:$4 sm:$0xff]  }
  0x2e   :  { %v1688_v45 = vld [vmem:[%s2299_s1 + $0x380] ss:$8 sps:$4 sm:$0xff]  }
  0x2f   :  { %1026 = vmatpush1.bf16.msra.mxu1 %v1605_v46  ;;  %v1693_v46 = vld [vmem:[%s2299_s1 + $0x194] ss:$8 sps:$4 sm:$0xff]  }
  0x30   :  { %1132 = vmatpush1.bf16.msra.mxu0 %v1606_v47  ;;  %1027 = vmatprep.subr.bf16.mxu1 %v1607_v49  ;;  %v1696_v47 = vld [vmem:[%s2299_s1 + $0x394] ss:$8 sps:$4 sm:$0xff]   ;;  %v1694_v49 = vld [vmem:[%s2299_s1 + $0x390] ss:$8 sps:$4 sm:$0xff]  }
  0x31   :  { %1133 = vmatprep.subr.bf16.mxu0 %v1609_v50  ;;  %v1699_v50 = vld [vmem:[%s2299_s1 + $0x1a4] ss:$8 sps:$4 sm:$0xff]  }
  0x33   :  { %1028 = vmatpush1.bf16.msra.mxu1 %v1611_v52  ;;  %v1697_v52 = vld [vmem:[%s2299_s1 + $0x1a0] ss:$8 sps:$4 sm:$0xff]  }
  0x34   :  { %1134 = vmatpush1.bf16.msra.mxu0 %v1612_v53  ;;  %1029 = vmatprep.subr.bf16.mxu1 %v1613_v54  ;;  %v1700_v53 = vld [vmem:[%s2299_s1 + $0x3a0] ss:$8 sps:$4 sm:$0xff]   ;;  %v1705_v54 = vld [vmem:[%s2299_s1 + $0x1b4] ss:$8 sps:$4 sm:$0xff]  }
  0x35   :  { %1135 = vmatprep.subr.bf16.mxu0 %v1615_v55  ;;  %v1708_v55 = vld [vmem:[%s2299_s1 + $0x3b4] ss:$8 sps:$4 sm:$0xff]  }
  0x37   :  { %1030 = vmatpush1.bf16.msra.mxu1 %v1617_v56  ;;  %v1703_v56 = vld [vmem:[%s2299_s1 + $0x1b0] ss:$8 sps:$4 sm:$0xff]  }
  0x38   :  { %1136 = vmatpush1.bf16.msra.mxu0 %v1618_v57  ;;  %1031 = vmatprep.subr.bf16.mxu1 %v1619_v58  ;;  %v1706_v57 = vld [vmem:[%s2299_s1 + $0x3b0] ss:$8 sps:$4 sm:$0xff]   ;;  %v1711_v58 = vld [vmem:[%s2299_s1 + $0x1c4] ss:$8 sps:$4 sm:$0xff]  }
  0x39   :  { %1137 = vmatprep.subr.bf16.mxu0 %v1621_v59  ;;  %v1714_v59 = vld [vmem:[%s2299_s1 + $0x3c4] ss:$8 sps:$4 sm:$0xff]  }
  0x3b   :  { %1032 = vmatpush1.bf16.msra.mxu1 %v1623_v60  ;;  %v1709_v60 = vld [vmem:[%s2299_s1 + $0x1c0] ss:$8 sps:$4 sm:$0xff]  }
  0x3c   :  { %1138 = vmatpush1.bf16.msra.mxu0 %v1624_v61  ;;  %1033 = vmatprep.subr.bf16.mxu1 %v1625_v62  ;;  %v1712_v61 = vld [vmem:[%s2299_s1 + $0x3c0] ss:$8 sps:$4 sm:$0xff]   ;;  %v1717_v62 = vld [vmem:[%s2299_s1 + $0x1d4] ss:$8 sps:$4 sm:$0xff]  }
  0x3d   :  { %1139 = vmatprep.subr.bf16.mxu0 %v1627_v63  ;;  %v1720_v63 = vld [vmem:[%s2299_s1 + $0x3d4] ss:$8 sps:$4 sm:$0xff]  }
  0x3f   :  { %1034 = vmatpush1.bf16.msra.mxu1 %v1629_v0  ;;  %v1715_v0 = vld [vmem:[%s2299_s1 + $0x1d0] ss:$8 sps:$4 sm:$0xff]  }
  0x40   :  { %1140 = vmatpush1.bf16.msra.mxu0 %v1630_v1  ;;  %1056 = vmatprep.subr.bf16.mxu1 %v1636_v2  ;;  %v1718_v1 = vld [vmem:[%s2299_s1 + $0x3d0] ss:$8 sps:$4 sm:$0xff]   ;;  %v1728_v2 = vld [vmem:[%s2299_s1 + $0x1e4] ss:$8 sps:$4 sm:$0xff]  }
  0x41   :  { %1162 = vmatprep.subr.bf16.mxu0 %v1642_v3  ;;  %v1732_v3 = vld [vmem:[%s2299_s1 + $0x3e4] ss:$8 sps:$4 sm:$0xff]  }
  0x42   :  { %1036 = vmatmul.mubr.bf16.vlgmr.msra.gmra.mrb[0].mxu1 %v1631_v4  ;;  %v1726_v4 = vld [vmem:[%s2299_s1 + $0x1e0] ss:$8 sps:$4 sm:$0xff]  }
  0x43   :  { %1142 = vmatmul.mubr.bf16.vlgmr.msra.gmra.mrb[0].mxu0 %v1637_v6  ;;  %1057 = vmatpush1.bf16.msra.mxu1 %v1634_v5  ;;  %v1730_v5 = vld [vmem:[%s2299_s1 + $0x3e0] ss:$8 sps:$4 sm:$0xff]   ;;  %v1735_v6 = vld [vmem:[%s2299_s1 + $0x1f4] ss:$8 sps:$4 sm:$0xff]  }
  0x44   :  { %1163 = vmatpush1.bf16.msra.mxu0 %v1640_v7  ;;  %1058 = vmatprep.subr.bf16.mxu1 %v1645_v8  ;;  %v1738_v7 = vld [vmem:[%s2299_s1 + $0x3f4] ss:$8 sps:$4 sm:$0xff]   ;;  %v1733_v8 = vld [vmem:[%s2299_s1 + $0x1f0] ss:$8 sps:$4 sm:$0xff]  }
  0x45   :  { %1164 = vmatprep.subr.bf16.mxu0 %v1648_v9  ;;  %1045 = vmatprep.mubr.bf16.mxu1 %v1721_v29  ;;  %v1736_v9 = vld [vmem:[%s2299_s1 + $0x3f0] ss:$8 sps:$4 sm:$0xff]   ;;  %v1771_v29 = vld [vmem:[%s2299_s1 + $0x464] ss:$8 sps:$4 sm:$0xff]  }
  0x46   :  { %1151 = vmatprep.mubr.bf16.mxu0 %v1723_v30  ;;  %v1769_v30 = vld [vmem:[%s2299_s1 + $0x460] ss:$8 sps:$4 sm:$0xff]  }
  0x47   :  { %1059 = vmatpush1.bf16.msra.mxu1 %v1643_v10  ;;  %v1747_v10 = vld [vmem:[%s2299_s1 + $0x404] ss:$8 sps:$4 sm:$0xff]  }
  0x48   :  { %1165 = vmatpush1.bf16.msra.mxu0 %v1646_v11  ;;  %1060 = vmatprep.subr.bf16.mxu1 %v1651_v12  ;;  %v1739_v11 = vld [vmem:[%s2300_s0 + $0x8] ss:$36 sps:$4 sm:$0xff]   ;;  %v1742_v12 = vld [vmem:[%s2300_s0 + $0x18] ss:$36 sps:$4 sm:$0xff]  }
  0x49   :  { %1166 = vmatprep.subr.bf16.mxu0 %v1654_v13  ;;  %v1745_v13 = vld [vmem:[%s2299_s1 + $0x400] ss:$8 sps:$4 sm:$0xff]  }
  0x4a   :  { %1046 = vmatmul.mubr.bf16.gmra.mrb[4].mxu1 %v1725_v31  ;;  %v1774_v31 = vld [vmem:[%s2299_s1 + $0x474] ss:$8 sps:$4 sm:$0xff]  }
  0x4b   :  { %1061 = vmatpush1.bf16.msra.mxu1 %v1649_v14  ;;  %1152 = vmatmul.mubr.bf16.gmra.mrb[4].mxu0 %v1729_v33  ;;  %v1750_v14 = vld [vmem:[%s2299_s1 + $0x414] ss:$8 sps:$4 sm:$0xff]   ;;  %v1775_v33 = vld [vmem:[%s2300_s0 + $0x20] ss:$36 sps:$4 sm:$0xff]  }
  0x4c   :  { %1167 = vmatpush1.bf16.msra.mxu0 %v1652_v15  ;;  %1062 = vmatprep.subr.bf16.mxu1 %v1657_v16  ;;  %v1751_v15 = vld [vmem:[%s2300_s0 + $0x54] ss:$36 sps:$4 sm:$0xff]   ;;  %v1753_v16 = vld [vmem:[%s2300_s0 + $0x64] ss:$36 sps:$4 sm:$0xff]  }
  0x4d   :  { %1168 = vmatprep.subr.bf16.mxu0 %v1660_v17  ;;  %1088 = vmatprep.mubr.bf16.mxu1 %v1741_v41  ;;  %v1748_v17 = vld [vmem:[%s2299_s1 + $0x410] ss:$8 sps:$4 sm:$0xff]  }
  0x4e   :  { %1194 = vmatprep.mubr.bf16.mxu0 %v1744_v43 }
  0x4f   :  { %1063 = vmatpush1.bf16.msra.mxu1 %v1655_v18  ;;  %v1759_v18 = vld [vmem:[%s2299_s1 + $0x424] ss:$8 sps:$4 sm:$0xff]  }
  0x50   :  { %1169 = vmatpush1.bf16.msra.mxu0 %v1658_v19  ;;  %1064 = vmatprep.subr.bf16.mxu1 %v1663_v20  ;;  %v1755_v19 = vld [vmem:[%s2300_s0 + $0x50] ss:$36 sps:$4 sm:$0xff]   ;;  %v1756_v20 = vld [vmem:[%s2300_s0 + $0x60] ss:$36 sps:$4 sm:$0xff]  }
  0x51   :  { %1170 = vmatprep.subr.bf16.mxu0 %v1666_v21  ;;  %v1757_v21 = vld [vmem:[%s2299_s1 + $0x420] ss:$8 sps:$4 sm:$0xff]  }
  0x53   :  { %1065 = vmatpush1.bf16.msra.mxu1 %v1661_v22  ;;  %v1762_v22 = vld [vmem:[%s2299_s1 + $0x434] ss:$8 sps:$4 sm:$0xff]  }
  0x54   :  { %1171 = vmatpush1.bf16.msra.mxu0 %v1664_v23  ;;  %1066 = vmatprep.subr.bf16.mxu1 %v1669_v24  ;;  %v1760_v23 = vld [vmem:[%s2299_s1 + $0x430] ss:$8 sps:$4 sm:$0xff]   ;;  %v1765_v24 = vld [vmem:[%s2299_s1 + $0x444] ss:$8 sps:$4 sm:$0xff]  }
  0x55   :  { %1172 = vmatprep.subr.bf16.mxu0 %v1672_v25  ;;  %v1777_v25 = vmov 0  }
  0x57   :  { %1067 = vmatpush1.bf16.msra.mxu1 %v1667_v26  ;;  %v1763_v26 = vld [vmem:[%s2299_s1 + $0x440] ss:$8 sps:$4 sm:$0xff]  }
  0x58   :  { %1173 = vmatpush1.bf16.msra.mxu0 %v1670_v27  ;;  %1068 = vmatprep.subr.bf16.mxu1 %v1675_v28  ;;  %v1768_v27 = vld [vmem:[%s2299_s1 + $0x454] ss:$8 sps:$4 sm:$0xff]   ;;  %v1766_v28 = vld [vmem:[%s2299_s1 + $0x450] ss:$8 sps:$4 sm:$0xff]  }
  0x59   :  { %1174 = vmatprep.subr.bf16.mxu0 %v1678_v32  ;;  %v1772_v32 = vld [vmem:[%s2299_s1 + $0x470] ss:$8 sps:$4 sm:$0xff]  }
  0x5b   :  { %1069 = vmatpush1.bf16.msra.mxu1 %v1673_v34  ;;  %v1776_v34 = vld [vmem:[%s2300_s0 + $0x68] ss:$36 sps:$4 sm:$0xff]  }
  0x5c   :  { %1175 = vmatpush1.bf16.msra.mxu0 %v1676_v35  ;;  %1070 = vmatprep.subr.bf16.mxu1 %v1681_v36  ;;  %v181_v35 = vlaneseq }
  0x5d   :  { %1176 = vmatprep.subr.bf16.mxu0 %v1684_v37 }
  0x5e   :  { %v182_v36 = vshrl.u32 %v181_v35, 7 }
  0x5f   :  { %1071 = vmatpush1.bf16.msra.mxu1 %v1679_v38 }
  0x60   :  { %1177 = vmatpush1.bf16.msra.mxu0 %v1682_v39  ;;  %1072 = vmatprep.subr.bf16.mxu1 %v1687_v40  ;;  %v183_v40 = vsub.s32 0, %v182_v36  ;;  %v187_v43 = vsub.s32 1, %v182_v36 }
  0x61   :  { %1178 = vmatprep.subr.bf16.mxu0 %v1690_v42  ;;  %v179_v42 = vld [vmem:[%s2301_s2] sm:$0x3] }
  0x63   :  { %1073 = vmatpush1.bf16.msra.mxu1 %v1685_v44  ;;  %v184_v44 = vrot.slane %v179_v42, %v183_v40 }
  0x64   :  { %1179 = vmatpush1.bf16.msra.mxu0 %v1688_v45  ;;  %1074 = vmatprep.subr.bf16.mxu1 %v1693_v46  ;;  %v188_v45 = vrot.slane %v179_v42, %v187_v43 }
  0x65   :  { %1180 = vmatprep.subr.bf16.mxu0 %v1696_v47 }
  0x67   :  { %1075 = vmatpush1.bf16.msra.mxu1 %v1691_v48 }
  0x68   :  { %1181 = vmatpush1.bf16.msra.mxu0 %v1694_v49  ;;  %1076 = vmatprep.subr.bf16.mxu1 %v1699_v50 }
  0x69   :  { %1182 = vmatprep.subr.bf16.mxu0 %v1702_v51 }
  0x6b   :  { %1077 = vmatpush1.bf16.msra.mxu1 %v1697_v52 }
  0x6c   :  { %1183 = vmatpush1.bf16.msra.mxu0 %v1700_v53  ;;  %1078 = vmatprep.subr.bf16.mxu1 %v1705_v54 }
  0x6d   :  { %1184 = vmatprep.subr.bf16.mxu0 %v1708_v55 }
  0x6f   :  { %1079 = vmatpush1.bf16.msra.mxu1 %v1703_v56 }
  0x70   :  { %1185 = vmatpush1.bf16.msra.mxu0 %v1706_v57  ;;  %1080 = vmatprep.subr.bf16.mxu1 %v1711_v58 }
  0x71   :  { %1186 = vmatprep.subr.bf16.mxu0 %v1714_v59 }
  0x73   :  { %1081 = vmatpush1.bf16.msra.mxu1 %v1709_v60 }
  0x74   :  { %1187 = vmatpush1.bf16.msra.mxu0 %v1712_v61  ;;  %1082 = vmatprep.subr.bf16.mxu1 %v1717_v62 }
  0x75   :  { %1188 = vmatprep.subr.bf16.mxu0 %v1720_v63 }
  0x77   :  { %1083 = vmatpush1.bf16.msra.mxu1 %v1715_v0 }
  0x78   :  { %1189 = vmatpush1.bf16.msra.mxu0 %v1718_v1  ;;  %1084 = vmatprep.subr.bf16.mxu1 %v1728_v2 }
  0x79   :  { %1190 = vmatprep.subr.bf16.mxu0 %v1732_v3 }
  0x7b   :  { %1085 = vmatpush1.bf16.msra.mxu1 %v1726_v4 }
  0x7c   :  { %1191 = vmatpush1.bf16.msra.mxu0 %v1730_v5  ;;  %1086 = vmatprep.subr.bf16.mxu1 %v1735_v6 }
  0x7d   :  { %1192 = vmatprep.subr.bf16.mxu0 %v1738_v7 }
  0x7f   :  { %1087 = vmatpush1.bf16.msra.mxu1 %v1733_v8 }
  0x80   :  { %1193 = vmatpush1.bf16.msra.mxu0 %v1736_v9  ;;  %1478 = vmatprep.subr.bf16.mxu1 %v1747_v10 }
  0x81   :  { %1215 = vmatprep.subr.bf16.mxu0 %v1747_v10 }
  0x82   :  { %1089 = vmatmul.mubr.bf16.vlgmr.msra.gmra.mrb[0].mxu1 %v1739_v11 }
  0x83   :  { %1195 = vmatmul.mubr.bf16.vlgmr.msra.gmra.mrb[0].mxu0 %v1742_v12  ;;  %1486 = vmatpush1.bf16.msra.mxu1 %v1745_v13 }
  0x84   :  { %1216 = vmatpush1.bf16.msra.mxu0 %v1745_v13  ;;  %1479 = vmatprep.subr.bf16.mxu1 %v1750_v14 }
  0x85   :  { %1217 = vmatprep.subr.bf16.mxu0 %v1750_v14  ;;  %1098 = vmatprep.mubr.bf16.mxu1 %v1751_v15 }
  0x86   :  { %1204 = vmatprep.mubr.bf16.mxu0 %v1753_v16 }
  0x87   :  { %1487 = vmatpush1.bf16.msra.mxu1 %v1748_v17 }
  0x88   :  { %1218 = vmatpush1.bf16.msra.mxu0 %v1748_v17  ;;  %1480 = vmatprep.subr.bf16.mxu1 %v1759_v18 }
  0x89   :  { %1219 = vmatprep.subr.bf16.mxu0 %v1759_v18 }
  0x8a   :  { %1099 = vmatmul.mubr.bf16.gmra.mrb[4].mxu1 %v1755_v19 }
  0x8b   :  { %1205 = vmatmul.mubr.bf16.gmra.mrb[4].mxu0 %v1756_v20  ;;  %1488 = vmatpush1.bf16.msra.mxu1 %v1757_v21 }
  0x8c   :  { %1220 = vmatpush1.bf16.msra.mxu0 %v1757_v21  ;;  %1481 = vmatprep.subr.bf16.mxu1 %v1762_v22 }
  0x8d   :  { %1221 = vmatprep.subr.bf16.mxu0 %v1762_v22  ;;  %1247 = vmatprep.mubr.bf16.mxu0 %v1777_v25 }
  0x8e   :  { %1257 = vmatprep.mubr.bf16.mxu1 %v1777_v25 }
  0x8f   :  { %1489 = vmatpush1.bf16.msra.mxu1 %v1760_v23 }
  0x90   :  { %1222 = vmatpush1.bf16.msra.mxu0 %v1760_v23  ;;  %1482 = vmatprep.subr.bf16.mxu1 %v1765_v24 }
  0x91   :  { %1223 = vmatprep.subr.bf16.mxu0 %v1765_v24 }
  0x93   :  { %1490 = vmatpush1.bf16.msra.mxu1 %v1763_v26 }
  0x94   :  { %1224 = vmatpush1.bf16.msra.mxu0 %v1763_v26  ;;  %1483 = vmatprep.subr.bf16.mxu1 %v1768_v27 }
  0x95   :  { %1225 = vmatprep.subr.bf16.mxu0 %v1768_v27 }
  0x97   :  { %1491 = vmatpush1.bf16.msra.mxu1 %v1766_v28 }
  0x98   :  { %1226 = vmatpush1.bf16.msra.mxu0 %v1766_v28  ;;  %1484 = vmatprep.subr.bf16.mxu1 %v1771_v29 }
  0x99   :  { %1227 = vmatprep.subr.bf16.mxu0 %v1771_v29 }
  0x9b   :  { %1492 = vmatpush1.bf16.msra.mxu1 %v1769_v30 }
  0x9c   :  { %1228 = vmatpush1.bf16.msra.mxu0 %v1769_v30  ;;  %1485 = vmatprep.subr.bf16.mxu1 %v1774_v31 }
  0x9d   :  { %1229 = vmatprep.subr.bf16.mxu0 %v1774_v31 }
  0x9f   :  { %1493 = vmatpush1.bf16.msra.mxu1 %v1772_v32 }
  0xa0   :  { %1230 = vmatpush1.bf16.msra.mxu0 %v1772_v32 }
  0xa2   :  { %1258 = vmatmul.mubr.bf16.vlgmr.msra.gmra.mrb[8].mxu1 %v1776_v34 }
  0xa3   :  { %1248 = vmatmul.mubr.bf16.vlgmr.msra.gmra.mrb[0].mxu0 %v1775_v33 }
 0x155   :  { %v1090_v37 = vpop.f32.mrb[0].mxu1 }
 0x156   :  { %v1092_v38 = vpop.f32.mrb[1].mxu1  ;;  %v1494_v62 = vadd.f32 %v1090_v37, %v184_v44 }
 0x157   :  { %v1094_v39 = vpop.f32.mrb[2].mxu1  ;;  %v1496_v63 = vadd.f32 %v1092_v38, %v188_v45 }
 0x158   :  { %v1096_v41 = vpop.f32.mrb[3].mxu1  ;;  %v1498_v2 = vadd.f32 %v1094_v39, %v184_v44 }
 0x159   :  { %v1500_v7 = vadd.f32 %v1096_v41, %v188_v45 }
 0x15d   :  { %v1100_v46 = vpop.f32.mrb[4].mxu1 }
 0x15e   :  { %v1206_v47 = vpop.f32.mrb[4].mxu0  ;;  %v1502_v48 = vadd.f32 %v1100_v46, %v184_v44  ;;  %v1102_v49 = vpop.f32.mrb[5].mxu1 }
 0x15f   :  { %v1208_v50 = vpop.f32.mrb[5].mxu0  ;;  %v1505_v51 = vadd.f32 %v1102_v49, %v188_v45  ;;  %v1104_v52 = vpop.f32.mrb[6].mxu1 }
 0x160   :  { %v1210_v53 = vpop.f32.mrb[6].mxu0  ;;  %v1503_v54 = vadd.f32 %v1502_v48, %v1206_v47  ;;  %v1508_v55 = vadd.f32 %v1104_v52, %v184_v44  ;;  %v1106_v56 = vpop.f32.mrb[7].mxu1 }
 0x161   :  { %v1212_v57 = vpop.f32.mrb[7].mxu0  ;;  %v1506_v58 = vadd.f32 %v1505_v51, %v1208_v50  ;;  %v1511_v59 = vadd.f32 %v1106_v56, %v188_v45 }
 0x162   :  { %v1509_v60 = vadd.f32 %v1508_v55, %v1210_v53 }
 0x163   :  { %v1512_v61 = vadd.f32 %v1511_v59, %v1212_v57 }
 0x175   :  { %v1259_v1 = vpop.f32.mrb[8].mxu1 }
 0x176   :  { %v1249_v0 = vpop.f32.mrb[0].mxu0  ;;  %v1504_v4 = vadd.f32 %v1503_v54, %v1259_v1  ;;  %v1261_v6 = vpop.f32.mrb[9].mxu1 }
 0x177   :  { %v1495_v3 = vadd.f32 %v1494_v62, %v1249_v0  ;;  %v1251_v5 = vpop.f32.mrb[1].mxu0  ;;  %v1507_v9 = vadd.f32 %v1506_v58, %v1261_v6  ;;  %v1263_v11 = vpop.f32.mrb[10].mxu1 }
 0x178   :  { %v1497_v8 = vadd.f32 %v1496_v63, %v1251_v5  ;;  %v1253_v10 = vpop.f32.mrb[2].mxu0  ;;  %v1272_v13 = vmax.f32 %v1504_v4, 0.0  ;;  %v1510_v15 = vadd.f32 %v1509_v60, %v1263_v11  ;;  %v1265_v17 = vpop.f32.mrb[11].mxu1 }
 0x179   :  { %v1268_v12 = vmax.f32 %v1495_v3, 0.0  ;;  %v1499_v14 = vadd.f32 %v1498_v2, %v1253_v10  ;;  %v1255_v16 = vpop.f32.mrb[3].mxu0  ;;  %v1273_v19 = vmax.f32 %v1507_v9, 0.0  ;;  %v1513_v21 = vadd.f32 %v1512_v61, %v1265_v17 }
 0x17a   :  { %v1269_v18 = vmax.f32 %v1497_v8, 0.0  ;;  %v1501_v20 = vadd.f32 %v1500_v7, %v1255_v16  ;;  %v1274_v23 = vmax.f32 %v1510_v15, 0.0 }
 0x17b   :  { %v1270_v22 = vmax.f32 %v1499_v14, 0.0  ;;  %v1476_v25 = vpack.c.bf16 %v1273_v19, %v1272_v13  ;;  %v1275_v27 = vmax.f32 %v1513_v21, 0.0 }
 0x17c   :  { %v1474_v24 = vpack.c.bf16 %v1269_v18, %v1268_v12  ;;  %v1271_v26 = vmax.f32 %v1501_v20, 0.0 }
 0x17d   :  { %1302 = vst [vmem:[%s2302_s3 + $0x10] sm:$0xff] %v1476_v25  ;;  %v1477_v29 = vpack.c.bf16 %v1275_v27, %v1274_v23 }
 0x17e   :  { %1300 = vst [vmem:[%s2302_s3] sm:$0xff] %v1474_v24  ;;  %v1475_v28 = vpack.c.bf16 %v1271_v26, %v1270_v22 }
 0x17f   :  { %1303 = vst [vmem:[%s2302_s3 + $0x18] sm:$0xff] %v1477_v29 }
 0x180   :  { %1301 = vst [vmem:[%s2302_s3 + $0x8] sm:$0xff] %v1475_v28 }

// kernel: fool_clip_forward.26
= control target key start
LH: loop header
LB: loop body
LE: loop exit
PB: predicated region body
PF: predicated region fallthrough
CT: control target
= control target key end

     0   :  { %s1772_s1 = inlined_call_operand.vmem [shape: bf16[640,128], index: 1, kind: input, shape index: {}]   ;;  %s1773_s0 = inlined_call_operand.vmem [shape: bf16[128,640], index: 0, kind: input, shape index: {}]   ;;  %s1774_s2 = inlined_call_operand.vmem [shape: f32[1,128], index: 2, kind: input, shape index: {}]   ;;  %s1775_s3 = inlined_call_operand.vmem [shape: bf16[128,128], index: 3, kind: output, shape index: {}]  }
   0x1   :  { %v1341_v0 = vld [vmem:[%s1772_s1 + $0x40] sm:$0xff]   ;;  %v1345_v4 = vld [vmem:[%s1772_s1 + $0x48] sm:$0xff]   ;;  %v1349_v8 = vld [vmem:[%s1772_s1 + $0x50] sm:$0xff]  }
   0x2   :  { %v1342_v1 = vld [vmem:[%s1772_s1 + $0xc0] sm:$0xff]   ;;  %1149 = vmatprep.subr.bf16.mxu0 %v1341_v0  ;;  %v1346_v5 = vld [vmem:[%s1772_s1 + $0xc8] sm:$0xff]   ;;  %v1350_v9 = vld [vmem:[%s1772_s1 + $0xd0] sm:$0xff]  }
   0x3   :  { %v1343_v2 = vld [vmem:[%s1772_s1] sm:$0xff]   ;;  %1213 = vmatprep.subr.bf16.mxu1 %v1342_v1  ;;  %v1347_v6 = vld [vmem:[%s1772_s1 + $0x8] sm:$0xff]   ;;  %v1351_v10 = vld [vmem:[%s1772_s1 + $0x10] sm:$0xff]  }
   0x4   :  { %v1344_v3 = vld [vmem:[%s1772_s1 + $0x80] sm:$0xff]   ;;  %1150 = vmatpush3.bf16.msra.mxu0 %v1343_v2  ;;  %v1348_v7 = vld [vmem:[%s1772_s1 + $0x88] sm:$0xff]   ;;  %v1352_v11 = vld [vmem:[%s1772_s1 + $0x90] sm:$0xff]  }
   0x5   :  { %1214 = vmatpush3.bf16.msra.mxu1 %v1344_v3  ;;  %1151 = vmatprep.subr.bf16.mxu0 %v1345_v4  ;;  %v1353_v12 = vld [vmem:[%s1772_s1 + $0x58] sm:$0xff]   ;;  %v1357_v16 = vld [vmem:[%s1772_s1 + $0x60] sm:$0xff]   ;;  %v1361_v20 = vld [vmem:[%s1772_s1 + $0x68] sm:$0xff]  }
   0x6   :  { %1215 = vmatprep.subr.bf16.mxu1 %v1346_v5  ;;  %v1354_v13 = vld [vmem:[%s1772_s1 + $0xd8] sm:$0xff]   ;;  %v1358_v17 = vld [vmem:[%s1772_s1 + $0xe0] sm:$0xff]   ;;  %v1362_v21 = vld [vmem:[%s1772_s1 + $0xe8] sm:$0xff]  }
   0x7   :  { %v1355_v14 = vld [vmem:[%s1772_s1 + $0x18] sm:$0xff]   ;;  %v1359_v18 = vld [vmem:[%s1772_s1 + $0x20] sm:$0xff]   ;;  %v1363_v22 = vld [vmem:[%s1772_s1 + $0x28] sm:$0xff]  }
   0x8   :  { %1152 = vmatpush3.bf16.msra.mxu0 %v1347_v6  ;;  %v1356_v15 = vld [vmem:[%s1772_s1 + $0x98] sm:$0xff]   ;;  %v1360_v19 = vld [vmem:[%s1772_s1 + $0xa0] sm:$0xff]   ;;  %v1364_v23 = vld [vmem:[%s1772_s1 + $0xa8] sm:$0xff]  }
   0x9   :  { %1216 = vmatpush3.bf16.msra.mxu1 %v1348_v7  ;;  %1153 = vmatprep.subr.bf16.mxu0 %v1349_v8  ;;  %v1365_v24 = vld [vmem:[%s1772_s1 + $0x70] sm:$0xff]   ;;  %v1369_v28 = vld [vmem:[%s1772_s1 + $0x78] sm:$0xff]   ;;  %v1378_v35 = vld [vmem:[%s1773_s0 + $0xc] ss:$20 sps:$4 sm:$0xff]  }
   0xa   :  { %1217 = vmatprep.subr.bf16.mxu1 %v1350_v9  ;;  %v1366_v25 = vld [vmem:[%s1772_s1 + $0xf0] sm:$0xff]   ;;  %v1370_v29 = vld [vmem:[%s1772_s1 + $0xf8] sm:$0xff]   ;;  %v1379_v36 = vld [vmem:[%s1772_s1 + $0x100] sm:$0xff]   ;;  %727 = vmatprep.mubr.bf16.mxu1 %v1378_v35 }
   0xb   :  { %v1367_v26 = vld [vmem:[%s1772_s1 + $0x30] sm:$0xff]   ;;  %v1371_v30 = vld [vmem:[%s1772_s1 + $0x38] sm:$0xff]   ;;  %v1380_v37 = vld [vmem:[%s1773_s0 + $0x2c] ss:$20 sps:$4 sm:$0xff]  }
   0xc   :  { %1154 = vmatpush3.bf16.msra.mxu0 %v1351_v10  ;;  %v1368_v27 = vld [vmem:[%s1772_s1 + $0xb0] sm:$0xff]   ;;  %v1372_v31 = vld [vmem:[%s1772_s1 + $0xb8] sm:$0xff]   ;;  %v1386_v39 = vld [vmem:[%s1772_s1 + $0x108] sm:$0xff]  }
   0xd   :  { %1218 = vmatpush3.bf16.msra.mxu1 %v1352_v11  ;;  %1155 = vmatprep.subr.bf16.mxu0 %v1353_v12  ;;  %v1373_v32 = vld [vmem:[%s1773_s0] ss:$20 sps:$4 sm:$0xff]   ;;  %v1375_v33 = vld [vmem:[%s1773_s0 + $0x4] ss:$20 sps:$4 sm:$0xff]   ;;  %v1376_v34 = vld [vmem:[%s1773_s0 + $0x8] ss:$20 sps:$4 sm:$0xff]  }
   0xe   :  { %1219 = vmatprep.subr.bf16.mxu1 %v1354_v13  ;;  %630 = vmatprep.mubr.bf16.mxu0 %v1375_v33  ;;  %v1382_v38 = vld [vmem:[%s1773_s0 + $0x34] ss:$20 sps:$4 sm:$0xff]   ;;  %v1385_v41 = vld [vmem:[%s1773_s0 + $0x30] ss:$20 sps:$4 sm:$0xff]   ;;  %v1400_v45 = vld [vmem:[%s1772_s1 + $0x118] sm:$0xff]  }
   0xf   :  { %v1384_v40 = vld [vmem:[%s1773_s0 + $0x28] ss:$20 sps:$4 sm:$0xff]   ;;  %v1393_v44 = vld [vmem:[%s1772_s1 + $0x110] sm:$0xff]   ;;  %v1392_v47 = vld [vmem:[%s1773_s0 + $0x58] ss:$20 sps:$4 sm:$0xff]  }
  0x10   :  { %1156 = vmatpush3.bf16.msra.mxu0 %v1355_v14  ;;  %v1387_v42 = vld [vmem:[%s1773_s0 + $0x54] ss:$20 sps:$4 sm:$0xff]   ;;  %v1389_v43 = vld [vmem:[%s1773_s0 + $0x5c] ss:$20 sps:$4 sm:$0xff]   ;;  %v1396_v49 = vld [vmem:[%s1773_s0 + $0x84] ss:$20 sps:$4 sm:$0xff]  }
  0x11   :  { %1220 = vmatpush3.bf16.msra.mxu1 %v1356_v15  ;;  %1157 = vmatprep.subr.bf16.mxu0 %v1357_v16  ;;  %v1391_v46 = vld [vmem:[%s1773_s0 + $0x50] ss:$20 sps:$4 sm:$0xff]   ;;  %v1414_v51 = vld [vmem:[%s1772_s1 + $0x128] sm:$0xff]   ;;  %v1399_v53 = vld [vmem:[%s1773_s0 + $0x80] ss:$20 sps:$4 sm:$0xff]  }
  0x12   :  { %1221 = vmatprep.subr.bf16.mxu1 %v1358_v17  ;;  %v1394_v48 = vld [vmem:[%s1773_s0 + $0x7c] ss:$20 sps:$4 sm:$0xff]   ;;  %v1407_v50 = vld [vmem:[%s1772_s1 + $0x120] sm:$0xff]   ;;  %v1398_v52 = vld [vmem:[%s1773_s0 + $0x78] ss:$20 sps:$4 sm:$0xff]  }
  0x13   :  { %v1401_v54 = vld [vmem:[%s1773_s0 + $0xa4] ss:$20 sps:$4 sm:$0xff]   ;;  %v1421_v55 = vld [vmem:[%s1772_s1 + $0x130] sm:$0xff]   ;;  %v1403_v56 = vld [vmem:[%s1773_s0 + $0xac] ss:$20 sps:$4 sm:$0xff]  }
  0x14   :  { %1158 = vmatpush3.bf16.msra.mxu0 %v1359_v18  ;;  %v1428_v57 = vld [vmem:[%s1772_s1 + $0x138] sm:$0xff]   ;;  %v1405_v58 = vld [vmem:[%s1773_s0 + $0xa0] ss:$20 sps:$4 sm:$0xff]   ;;  %v1413_v63 = vld [vmem:[%s1773_s0 + $0xd0] ss:$20 sps:$4 sm:$0xff]  }
  0x15   :  { %1222 = vmatpush3.bf16.msra.mxu1 %v1360_v19  ;;  %1159 = vmatprep.subr.bf16.mxu0 %v1361_v20  ;;  %v1406_v59 = vld [vmem:[%s1773_s0 + $0xa8] ss:$20 sps:$4 sm:$0xff]   ;;  %v1408_v60 = vld [vmem:[%s1773_s0 + $0xcc] ss:$20 sps:$4 sm:$0xff]   ;;  %v1419_v2 = vld [vmem:[%s1773_s0 + $0xf0] ss:$20 sps:$4 sm:$0xff]  }
  0x16   :  { %1223 = vmatprep.subr.bf16.mxu1 %v1362_v21  ;;  %v1410_v61 = vld [vmem:[%s1773_s0 + $0xd4] ss:$20 sps:$4 sm:$0xff]   ;;  %v1417_v1 = vld [vmem:[%s1773_s0 + $0xfc] ss:$20 sps:$4 sm:$0xff]   ;;  %v1420_v3 = vld [vmem:[%s1773_s0 + $0xf8] ss:$20 sps:$4 sm:$0xff]  }
  0x17   :  { %v1412_v62 = vld [vmem:[%s1773_s0 + $0xc8] ss:$20 sps:$4 sm:$0xff]   ;;  %v1424_v5 = vld [vmem:[%s1773_s0 + $0x124] ss:$20 sps:$4 sm:$0xff]   ;;  %v1427_v7 = vld [vmem:[%s1773_s0 + $0x120] ss:$20 sps:$4 sm:$0xff]  }
  0x18   :  { %1160 = vmatpush3.bf16.msra.mxu0 %v1363_v22  ;;  %v1415_v0 = vld [vmem:[%s1773_s0 + $0xf4] ss:$20 sps:$4 sm:$0xff]   ;;  %v1422_v4 = vld [vmem:[%s1773_s0 + $0x11c] ss:$20 sps:$4 sm:$0xff]   ;;  %v1426_v6 = vld [vmem:[%s1773_s0 + $0x118] ss:$20 sps:$4 sm:$0xff]  }
  0x19   :  { %1224 = vmatpush3.bf16.msra.mxu1 %v1364_v23  ;;  %1161 = vmatprep.subr.bf16.mxu0 %v1365_v24  ;;  %v1429_v8 = vld [vmem:[%s1773_s0 + $0x10] ss:$20 sps:$4 sm:$0xff]   ;;  %v1431_v10 = vld [vmem:[%s1773_s0 + $0x38] ss:$20 sps:$4 sm:$0xff]   ;;  %v1433_v12 = vld [vmem:[%s1773_s0 + $0x60] ss:$20 sps:$4 sm:$0xff]  }
  0x1a   :  { %1225 = vmatprep.subr.bf16.mxu1 %v1366_v25  ;;  %v1430_v9 = vld [vmem:[%s1773_s0 + $0xb0] ss:$20 sps:$4 sm:$0xff]   ;;  %v1432_v11 = vld [vmem:[%s1773_s0 + $0xd8] ss:$20 sps:$4 sm:$0xff]   ;;  %v1434_v13 = vld [vmem:[%s1773_s0 + $0x100] ss:$20 sps:$4 sm:$0xff]  }
  0x1b   :  { %v1435_v14 = vld [vmem:[%s1773_s0 + $0x88] ss:$20 sps:$4 sm:$0xff]   ;;  %v1700_v18 = vld [vmem:[%s1774_s2] ss:$0 sm:$0xff] }
  0x1c   :  { %1162 = vmatpush3.bf16.msra.mxu0 %v1367_v26  ;;  %v1436_v15 = vld [vmem:[%s1773_s0 + $0x128] ss:$20 sps:$4 sm:$0xff]  }
  0x1d   :  { %1226 = vmatpush3.bf16.msra.mxu1 %v1368_v27  ;;  %1163 = vmatprep.subr.bf16.mxu0 %v1369_v28 }
  0x1e   :  { %1227 = vmatprep.subr.bf16.mxu1 %v1370_v29 }
  0x20   :  { %1164 = vmatpush3.bf16.msra.mxu0 %v1371_v30 }
  0x21   :  { %1228 = vmatpush3.bf16.msra.mxu1 %v1372_v31  ;;  %1293 = vmatprep.subr.bf16.mxu0 %v1379_v36 }
  0x22   :  { %1325 = vmatprep.subr.bf16.mxu1 %v1379_v36 }
  0x23   :  { %631 = vmatmul.mubr.bf16.vlgmr.msra.gmra.mrb[0].mxu0 %v1373_v32 }
  0x24   :  { %728 = vmatmul.mubr.bf16.vlgmr.msra.gmra.mrb[0].mxu1 %v1376_v34  ;;  %1294 = vmatpush3.bf16.msra.mxu0 %v1379_v36 }
  0x25   :  { %1333 = vmatpush3.bf16.msra.mxu1 %v1379_v36  ;;  %638 = vmatprep.mubr.bf16.mxu0 %v1380_v37 }
  0x26   :  { %735 = vmatprep.mubr.bf16.mxu1 %v1382_v38  ;;  %1295 = vmatprep.subr.bf16.mxu0 %v1386_v39 }
  0x27   :  { %1326 = vmatprep.subr.bf16.mxu1 %v1386_v39 }
  0x28   :  { %1296 = vmatpush3.bf16.msra.mxu0 %v1386_v39 }
  0x29   :  { %1334 = vmatpush3.bf16.msra.mxu1 %v1386_v39  ;;  %1297 = vmatprep.subr.bf16.mxu0 %v1393_v44 }
  0x2a   :  { %1327 = vmatprep.subr.bf16.mxu1 %v1393_v44 }
  0x2b   :  { %639 = vmatmul.mubr.bf16.gmra.mrb[4].mxu0 %v1384_v40 }
  0x2c   :  { %736 = vmatmul.mubr.bf16.gmra.mrb[4].mxu1 %v1385_v41  ;;  %646 = vmatprep.mubr.bf16.mxu0 %v1387_v42 }
  0x2d   :  { %743 = vmatprep.mubr.bf16.mxu1 %v1389_v43  ;;  %1298 = vmatpush3.bf16.msra.mxu0 %v1393_v44 }
  0x2e   :  { %1335 = vmatpush3.bf16.msra.mxu1 %v1393_v44  ;;  %1299 = vmatprep.subr.bf16.mxu0 %v1400_v45 }
  0x2f   :  { %1328 = vmatprep.subr.bf16.mxu1 %v1400_v45 }
  0x31   :  { %1300 = vmatpush3.bf16.msra.mxu0 %v1400_v45 }
  0x32   :  { %1336 = vmatpush3.bf16.msra.mxu1 %v1400_v45  ;;  %1301 = vmatprep.subr.bf16.mxu0 %v1407_v50 }
  0x33   :  { %647 = vmatmul.mubr.bf16.gmra.mrb[8].mxu0 %v1391_v46  ;;  %1329 = vmatprep.subr.bf16.mxu1 %v1407_v50 }
  0x34   :  { %744 = vmatmul.mubr.bf16.gmra.mrb[8].mxu1 %v1392_v47  ;;  %654 = vmatprep.mubr.bf16.mxu0 %v1394_v48 }
  0x35   :  { %751 = vmatprep.mubr.bf16.mxu1 %v1396_v49  ;;  %1302 = vmatpush3.bf16.msra.mxu0 %v1407_v50 }
  0x36   :  { %1337 = vmatpush3.bf16.msra.mxu1 %v1407_v50  ;;  %1303 = vmatprep.subr.bf16.mxu0 %v1414_v51 }
  0x37   :  { %1330 = vmatprep.subr.bf16.mxu1 %v1414_v51 }
  0x39   :  { %1304 = vmatpush3.bf16.msra.mxu0 %v1414_v51 }
  0x3a   :  { %1338 = vmatpush3.bf16.msra.mxu1 %v1414_v51  ;;  %1305 = vmatprep.subr.bf16.mxu0 %v1421_v55 }
  0x3b   :  { %655 = vmatmul.mubr.bf16.gmra.mrb[12].mxu0 %v1398_v52  ;;  %1331 = vmatprep.subr.bf16.mxu1 %v1421_v55 }
  0x3c   :  { %752 = vmatmul.mubr.bf16.gmra.mrb[12].mxu1 %v1399_v53  ;;  %662 = vmatprep.mubr.bf16.mxu0 %v1401_v54 }
  0x3d   :  { %759 = vmatprep.mubr.bf16.mxu1 %v1403_v56  ;;  %1306 = vmatpush3.bf16.msra.mxu0 %v1421_v55 }
  0x3e   :  { %1339 = vmatpush3.bf16.msra.mxu1 %v1421_v55  ;;  %1307 = vmatprep.subr.bf16.mxu0 %v1428_v57 }
  0x3f   :  { %1332 = vmatprep.subr.bf16.mxu1 %v1428_v57 }
  0x41   :  { %1308 = vmatpush3.bf16.msra.mxu0 %v1428_v57 }
  0x42   :  { %1340 = vmatpush3.bf16.msra.mxu1 %v1428_v57 }
  0x43   :  { %663 = vmatmul.mubr.bf16.gmra.mrb[16].mxu0 %v1405_v58 }
  0x44   :  { %760 = vmatmul.mubr.bf16.gmra.mrb[16].mxu1 %v1406_v59  ;;  %670 = vmatprep.mubr.bf16.mxu0 %v1408_v60 }
  0x45   :  { %767 = vmatprep.mubr.bf16.mxu1 %v1410_v61 }
  0x4b   :  { %671 = vmatmul.mubr.bf16.gmra.mrb[20].mxu0 %v1412_v62 }
  0x4c   :  { %768 = vmatmul.mubr.bf16.gmra.mrb[20].mxu1 %v1413_v63  ;;  %678 = vmatprep.mubr.bf16.mxu0 %v1415_v0 }
  0x4d   :  { %775 = vmatprep.mubr.bf16.mxu1 %v1417_v1 }
  0x53   :  { %679 = vmatmul.mubr.bf16.gmra.mrb[24].mxu0 %v1419_v2 }
  0x54   :  { %776 = vmatmul.mubr.bf16.gmra.mrb[24].mxu1 %v1420_v3  ;;  %686 = vmatprep.mubr.bf16.mxu0 %v1422_v4 }
  0x55   :  { %783 = vmatprep.mubr.bf16.mxu1 %v1424_v5 }
  0x5b   :  { %687 = vmatmul.mubr.bf16.gmra.mrb[28].mxu0 %v1426_v6 }
  0x5c   :  { %784 = vmatmul.mubr.bf16.gmra.mrb[28].mxu1 %v1427_v7  ;;  %1309 = vmatprep.mubr.bf16.mxu0 %v1429_v8 }
  0x5d   :  { %1317 = vmatprep.mubr.bf16.mxu1 %v1430_v9 }
  0x63   :  { %1310 = vmatmul.mubr.bf16.vlgmr.msra.gmra.mrb[32].mxu0 %v1431_v10 }
  0x64   :  { %1318 = vmatmul.mubr.bf16.vlgmr.msra.gmra.mrb[32].mxu1 %v1432_v11  ;;  %1313 = vmatprep.mubr.bf16.mxu0 %v1433_v12 }
  0x65   :  { %1321 = vmatprep.mubr.bf16.mxu1 %v1434_v13 }
  0x6b   :  { %1314 = vmatmul.mubr.bf16.gmra.mrb[36].mxu0 %v1435_v14 }
  0x6c   :  { %1322 = vmatmul.mubr.bf16.gmra.mrb[36].mxu1 %v1436_v15 }
  0xf6   :  { %v1165_v16 = vpop.f32.mrb[0].mxu0 }
  0xf7   :  { %v1229_v17 = vpop.f32.mrb[0].mxu1  ;;  %v1166_v19 = vpop.f32.mrb[1].mxu0 }
  0xf8   :  { %v1167_v20 = vadd.f32 %v1166_v19, %v1165_v16  ;;  %v1230_v21 = vpop.f32.mrb[1].mxu1  ;;  %v1168_v22 = vpop.f32.mrb[2].mxu0 }
  0xf9   :  { %v1231_v23 = vadd.f32 %v1230_v21, %v1229_v17  ;;  %v1232_v24 = vpop.f32.mrb[2].mxu1  ;;  %v1169_v25 = vpop.f32.mrb[3].mxu0 }
  0xfa   :  { %v633_v26 = vadd.f32 %v1167_v20, %v1700_v18  ;;  %v1170_v27 = vadd.f32 %v1169_v25, %v1168_v22  ;;  %v1233_v28 = vpop.f32.mrb[3].mxu1 }
  0xfb   :  { %v1234_v29 = vadd.f32 %v1233_v28, %v1232_v24 }
  0xfc   :  { %v636_v30 = vadd.f32 %v1170_v27, %v1700_v18  ;;  %v1704_v31 = vadd.f32 %v1231_v23, %v633_v26 }
  0xfe   :  { %v1171_v32 = vpop.f32.mrb[4].mxu0  ;;  %v1706_v33 = vadd.f32 %v1234_v29, %v636_v30 }
  0xff   :  { %v1235_v34 = vpop.f32.mrb[4].mxu1  ;;  %v1172_v35 = vpop.f32.mrb[5].mxu0 }
 0x100   :  { %v1173_v36 = vadd.f32 %v1172_v35, %v1171_v32  ;;  %v1236_v37 = vpop.f32.mrb[5].mxu1  ;;  %v1174_v38 = vpop.f32.mrb[6].mxu0 }
 0x101   :  { %v1237_v39 = vadd.f32 %v1236_v37, %v1235_v34  ;;  %v1238_v40 = vpop.f32.mrb[6].mxu1  ;;  %v1175_v41 = vpop.f32.mrb[7].mxu0 }
 0x102   :  { %v641_v42 = vadd.f32 %v1173_v36, %v1700_v18  ;;  %v1176_v43 = vadd.f32 %v1175_v41, %v1174_v38  ;;  %v1239_v44 = vpop.f32.mrb[7].mxu1 }
 0x103   :  { %v1240_v45 = vadd.f32 %v1239_v44, %v1238_v40 }
 0x104   :  { %v644_v46 = vadd.f32 %v1176_v43, %v1700_v18  ;;  %v1710_v47 = vadd.f32 %v1237_v39, %v641_v42 }
 0x106   :  { %v1177_v48 = vpop.f32.mrb[8].mxu0  ;;  %v1712_v49 = vadd.f32 %v1240_v45, %v644_v46 }
 0x107   :  { %v1241_v50 = vpop.f32.mrb[8].mxu1  ;;  %v1178_v51 = vpop.f32.mrb[9].mxu0 }
 0x108   :  { %v1179_v52 = vadd.f32 %v1178_v51, %v1177_v48  ;;  %v1242_v53 = vpop.f32.mrb[9].mxu1  ;;  %v1180_v54 = vpop.f32.mrb[10].mxu0 }
 0x109   :  { %v1243_v55 = vadd.f32 %v1242_v53, %v1241_v50  ;;  %v1244_v56 = vpop.f32.mrb[10].mxu1  ;;  %v1181_v57 = vpop.f32.mrb[11].mxu0 }
 0x10a   :  { %v649_v58 = vadd.f32 %v1179_v52, %v1700_v18  ;;  %v1182_v59 = vadd.f32 %v1181_v57, %v1180_v54  ;;  %v1245_v60 = vpop.f32.mrb[11].mxu1 }
 0x10b   :  { %v1246_v61 = vadd.f32 %v1245_v60, %v1244_v56 }
 0x10c   :  { %v652_v62 = vadd.f32 %v1182_v59, %v1700_v18  ;;  %v1716_v63 = vadd.f32 %v1243_v55, %v649_v58 }
 0x10e   :  { %v1183_v0 = vpop.f32.mrb[12].mxu0  ;;  %v1718_v1 = vadd.f32 %v1246_v61, %v652_v62 }
 0x10f   :  { %v1247_v2 = vpop.f32.mrb[12].mxu1  ;;  %v1184_v3 = vpop.f32.mrb[13].mxu0 }
 0x110   :  { %v1185_v4 = vadd.f32 %v1184_v3, %v1183_v0  ;;  %v1248_v5 = vpop.f32.mrb[13].mxu1  ;;  %v1186_v6 = vpop.f32.mrb[14].mxu0 }
 0x111   :  { %v1249_v7 = vadd.f32 %v1248_v5, %v1247_v2  ;;  %v1250_v8 = vpop.f32.mrb[14].mxu1  ;;  %v1187_v9 = vpop.f32.mrb[15].mxu0 }
 0x112   :  { %v657_v10 = vadd.f32 %v1185_v4, %v1700_v18  ;;  %v1188_v11 = vadd.f32 %v1187_v9, %v1186_v6  ;;  %v1251_v12 = vpop.f32.mrb[15].mxu1 }
 0x113   :  { %v1252_v13 = vadd.f32 %v1251_v12, %v1250_v8 }
 0x114   :  { %v660_v14 = vadd.f32 %v1188_v11, %v1700_v18  ;;  %v1722_v15 = vadd.f32 %v1249_v7, %v657_v10 }
 0x116   :  { %v1189_v16 = vpop.f32.mrb[16].mxu0  ;;  %v1724_v17 = vadd.f32 %v1252_v13, %v660_v14 }
 0x117   :  { %v1253_v19 = vpop.f32.mrb[16].mxu1  ;;  %v1190_v20 = vpop.f32.mrb[17].mxu0 }
 0x118   :  { %v1191_v21 = vadd.f32 %v1190_v20, %v1189_v16  ;;  %v1254_v22 = vpop.f32.mrb[17].mxu1  ;;  %v1192_v23 = vpop.f32.mrb[18].mxu0 }
 0x119   :  { %v1255_v24 = vadd.f32 %v1254_v22, %v1253_v19  ;;  %v1256_v25 = vpop.f32.mrb[18].mxu1  ;;  %v1193_v26 = vpop.f32.mrb[19].mxu0 }
 0x11a   :  { %v665_v27 = vadd.f32 %v1191_v21, %v1700_v18  ;;  %v1194_v28 = vadd.f32 %v1193_v26, %v1192_v23  ;;  %v1257_v29 = vpop.f32.mrb[19].mxu1 }
 0x11b   :  { %v1258_v30 = vadd.f32 %v1257_v29, %v1256_v25 }
 0x11c   :  { %v668_v32 = vadd.f32 %v1194_v28, %v1700_v18  ;;  %v762_v34 = vadd.f32 %v1255_v24, %v665_v27 }
 0x11e   :  { %v1195_v35 = vpop.f32.mrb[20].mxu0  ;;  %v1728_v36 = vadd.f32 %v1258_v30, %v668_v32 }
 0x11f   :  { %v1259_v37 = vpop.f32.mrb[20].mxu1  ;;  %v1196_v38 = vpop.f32.mrb[21].mxu0 }
 0x120   :  { %v1197_v39 = vadd.f32 %v1196_v38, %v1195_v35  ;;  %v1260_v40 = vpop.f32.mrb[21].mxu1  ;;  %v1198_v41 = vpop.f32.mrb[22].mxu0 }
 0x121   :  { %v1261_v42 = vadd.f32 %v1260_v40, %v1259_v37  ;;  %v1262_v43 = vpop.f32.mrb[22].mxu1  ;;  %v1199_v44 = vpop.f32.mrb[23].mxu0 }
 0x122   :  { %v673_v45 = vadd.f32 %v1197_v39, %v1700_v18  ;;  %v1200_v46 = vadd.f32 %v1199_v44, %v1198_v41  ;;  %v1263_v48 = vpop.f32.mrb[23].mxu1 }
 0x123   :  { %v1264_v50 = vadd.f32 %v1263_v48, %v1262_v43 }
 0x124   :  { %v676_v51 = vadd.f32 %v1200_v46, %v1700_v18  ;;  %v770_v52 = vadd.f32 %v1261_v42, %v673_v45 }
 0x126   :  { %v1201_v53 = vpop.f32.mrb[24].mxu0  ;;  %v773_v54 = vadd.f32 %v1264_v50, %v676_v51 }
 0x127   :  { %v1265_v55 = vpop.f32.mrb[24].mxu1  ;;  %v1202_v56 = vpop.f32.mrb[25].mxu0 }
 0x128   :  { %v1203_v57 = vadd.f32 %v1202_v56, %v1201_v53  ;;  %v1266_v58 = vpop.f32.mrb[25].mxu1  ;;  %v1204_v59 = vpop.f32.mrb[26].mxu0 }
 0x129   :  { %v1267_v60 = vadd.f32 %v1266_v58, %v1265_v55  ;;  %v1268_v61 = vpop.f32.mrb[26].mxu1  ;;  %v1205_v62 = vpop.f32.mrb[27].mxu0 }
 0x12a   :  { %v681_v0 = vadd.f32 %v1203_v57, %v1700_v18  ;;  %v1206_v2 = vadd.f32 %v1205_v62, %v1204_v59  ;;  %v1269_v3 = vpop.f32.mrb[27].mxu1 }
 0x12b   :  { %v1270_v4 = vadd.f32 %v1269_v3, %v1268_v61 }
 0x12c   :  { %v684_v5 = vadd.f32 %v1206_v2, %v1700_v18  ;;  %v778_v6 = vadd.f32 %v1267_v60, %v681_v0 }
 0x12e   :  { %v1207_v7 = vpop.f32.mrb[28].mxu0  ;;  %v1734_v8 = vadd.f32 %v1270_v4, %v684_v5 }
 0x12f   :  { %v1271_v9 = vpop.f32.mrb[28].mxu1  ;;  %v1208_v10 = vpop.f32.mrb[29].mxu0 }
 0x130   :  { %v1209_v11 = vadd.f32 %v1208_v10, %v1207_v7  ;;  %v1272_v12 = vpop.f32.mrb[29].mxu1  ;;  %v1210_v13 = vpop.f32.mrb[30].mxu0 }
 0x131   :  { %v1273_v14 = vadd.f32 %v1272_v12, %v1271_v9  ;;  %v1274_v16 = vpop.f32.mrb[30].mxu1  ;;  %v1211_v19 = vpop.f32.mrb[31].mxu0 }
 0x132   :  { %v689_v20 = vadd.f32 %v1209_v11, %v1700_v18  ;;  %v1212_v21 = vadd.f32 %v1211_v19, %v1210_v13  ;;  %v1275_v22 = vpop.f32.mrb[31].mxu1 }
 0x133   :  { %v1276_v23 = vadd.f32 %v1275_v22, %v1274_v16 }
 0x134   :  { %v692_v24 = vadd.f32 %v1212_v21, %v1700_v18  ;;  %v786_v25 = vadd.f32 %v1273_v14, %v689_v20 }
 0x136   :  { %v1311_v26 = vpop.f32.mrb[32].mxu0  ;;  %v789_v27 = vadd.f32 %v1276_v23, %v692_v24 }
 0x137   :  { %v835_v28 = vadd.f32 %v1311_v26, %v1710_v47  ;;  %v1319_v29 = vpop.f32.mrb[32].mxu1  ;;  %v826_v30 = vpop.f32.mrb[33].mxu0 }
 0x138   :  { %v867_v32 = vadd.f32 %v1319_v29, %v770_v52  ;;  %v827_v35 = vadd.f32 %v826_v30, %v1704_v31  ;;  %v858_v37 = vpop.f32.mrb[33].mxu1  ;;  %v1312_v38 = vpop.f32.mrb[34].mxu0 }
 0x139   :  { %v859_v39 = vadd.f32 %v858_v37, %v762_v34  ;;  %v838_v40 = vadd.f32 %v1312_v38, %v1712_v49  ;;  %v1320_v41 = vpop.f32.mrb[34].mxu1  ;;  %v829_v42 = vpop.f32.mrb[35].mxu0  ;;  %v891_v45 = vmax.f32 %v835_v28, 0.0 }
 0x13a   :  { %v870_v43 = vadd.f32 %v1320_v41, %v773_v54  ;;  %v830_v18 = vadd.f32 %v829_v42, %v1706_v33  ;;  %v861_v44 = vpop.f32.mrb[35].mxu1  ;;  %v899_v48 = vmax.f32 %v867_v32, 0.0  ;;  %v889_v50 = vmax.f32 %v827_v35, 0.0 }
 0x13b   :  { %v892_v46 = vmax.f32 %v838_v40, 0.0  ;;  %v862_v47 = vadd.f32 %v861_v44, %v1728_v36  ;;  %v897_v31 = vmax.f32 %v859_v39, 0.0 }
 0x13c   :  { %v900_v51 = vmax.f32 %v870_v43, 0.0  ;;  %v890_v52 = vmax.f32 %v830_v18, 0.0 }
 0x13d   :  { %v1110_v53 = vpack.c.bf16 %v892_v46, %v891_v45  ;;  %v898_v55 = vmax.f32 %v862_v47, 0.0 }
 0x13e   :  { %v1130_v34 = vpack.c.bf16 %v900_v51, %v899_v48  ;;  %v1105_v56 = vpack.c.bf16 %v890_v52, %v889_v50  ;;  %v1315_v49 = vpop.f32.mrb[36].mxu0 }
 0x13f   :  { %1142 = vst [vmem:[%s1775_s3 + $0x8] sm:$0xff] %v1110_v53   ;;  %v1125_v33 = vpack.c.bf16 %v898_v55, %v897_v31  ;;  %v851_v54 = vadd.f32 %v1315_v49, %v1722_v15  ;;  %v1323_v57 = vpop.f32.mrb[36].mxu1  ;;  %v842_v58 = vpop.f32.mrb[37].mxu0 }
 0x140   :  { %1146 = vst [vmem:[%s1775_s3 + $0x28] sm:$0xff] %v1130_v34   ;;  %1106 = vst [vmem:[%s1775_s3] sm:$0xff] %v1105_v56   ;;  %v883_v36 = vadd.f32 %v1323_v57, %v786_v25  ;;  %v843_v59 = vadd.f32 %v842_v58, %v1716_v63  ;;  %v874_v60 = vpop.f32.mrb[37].mxu1  ;;  %v1316_v61 = vpop.f32.mrb[38].mxu0 }
 0x141   :  { %1145 = vst [vmem:[%s1775_s3 + $0x20] sm:$0xff] %v1125_v33   ;;  %v875_v15 = vadd.f32 %v874_v60, %v778_v6  ;;  %v854_v62 = vadd.f32 %v1316_v61, %v1724_v17  ;;  %v1324_v0 = vpop.f32.mrb[38].mxu1  ;;  %v845_v2 = vpop.f32.mrb[39].mxu0  ;;  %v895_v7 = vmax.f32 %v851_v54, 0.0 }
 0x142   :  { %v886_v3 = vadd.f32 %v1324_v0, %v789_v27  ;;  %v846_v4 = vadd.f32 %v845_v2, %v1718_v1  ;;  %v877_v5 = vpop.f32.mrb[39].mxu1  ;;  %v903_v63 = vmax.f32 %v883_v36, 0.0  ;;  %v893_v11 = vmax.f32 %v843_v59, 0.0 }
 0x143   :  { %v896_v9 = vmax.f32 %v854_v62, 0.0  ;;  %v878_v10 = vadd.f32 %v877_v5, %v1734_v8  ;;  %v901_v14 = vmax.f32 %v875_v15, 0.0 }
 0x144   :  { %v904_v12 = vmax.f32 %v886_v3, 0.0  ;;  %v894_v13 = vmax.f32 %v846_v4, 0.0 }
 0x145   :  { %v1120_v16 = vpack.c.bf16 %v896_v9, %v895_v7  ;;  %v902_v19 = vmax.f32 %v878_v10, 0.0 }
 0x146   :  { %v1140_v6 = vpack.c.bf16 %v904_v12, %v903_v63  ;;  %v1115_v20 = vpack.c.bf16 %v894_v13, %v893_v11 }
 0x147   :  { %1144 = vst [vmem:[%s1775_s3 + $0x18] sm:$0xff] %v1120_v16   ;;  %v1135_v17 = vpack.c.bf16 %v902_v19, %v901_v14 }
 0x148   :  { %1148 = vst [vmem:[%s1775_s3 + $0x38] sm:$0xff] %v1140_v6   ;;  %1143 = vst [vmem:[%s1775_s3 + $0x10] sm:$0xff] %v1115_v20  }
 0x149   :  { %1147 = vst [vmem:[%s1775_s3 + $0x30] sm:$0xff] %v1135_v17  }

// kernel: fool_clip_forward.27
= control target key start
LH: loop header
LB: loop body
LE: loop exit
PB: predicated region body
PF: predicated region fallthrough
CT: control target
= control target key end

     0   :  { %s8259_s15 = smov 0   ;;  %s10222_s0 = inlined_call_operand.vmem [shape: bf16[512,2688], index: 0, kind: input, shape index: {}]   ;;  %s10223_s1 = inlined_call_operand.vmem [shape: bf16[2688,128], index: 1, kind: input, shape index: {}]   ;;  %s10224_s2 = inlined_call_operand.vmem [shape: f32[512,128], index: 2, kind: input, shape index: {}]   ;;  %s10225_s3 = inlined_call_operand.vmem [shape: f32[512,128], index: 3, kind: output, shape index: {0}]   ;;  %s10226_s4 = inlined_call_operand.vmem [shape: f32[512,128], index: 4, kind: output, shape index: {1}]  }
   0x1 LB: > { %s5794_s16 = sadd.s32 4294967295, %s8232_s15   ;;  %p5798_p0 = scmp.ge.s32.totalorder %s8232_s15, 1  ;;  %s8232_s15 = sphi %s8259_s15, %s15_s15  }
   0x2   : > { %p178_p1 = scmp.lt.s32.totalorder %s8232_s15, 3 }
   0x4   : > { %p179_p2 = pnand %p5798_p0, %p178_p1 }
   0x5   : > { %v7562_v0 = vld [vmem:[%s10223_s1 + $0x40] sm:$0xff] (!%p179_p2)   ;;  %s5799_s19 = sshll.u32 (!%p179_p2), %s5794_s16, 5  ;;  %v7564_v2 = vld [vmem:[%s10223_s1 + $0x48] sm:$0xff] (!%p179_p2)   ;;  %v7566_v4 = vld [vmem:[%s10223_s1 + $0x50] sm:$0xff] (!%p179_p2)  }
   0x6   : > { %182 = sbr.rel (%p179_p2) target bundleno = 934 (0x3a6), region = 32  ;;  %v7563_v1 = vld [vmem:[%s10223_s1] sm:$0xff] (!%p179_p2)   ;;  %6345 = vmatprep.subr.bf16.mxu0 (!%p179_p2), %v7562_v0  ;;  %7537 = vmatprep.subr.bf16.mxu1 (!%p179_p2), %v7562_v0  ;;  %p216_p3 = scmp.lt.s32.totalorder (!%p179_p2), %s5799_s19, 63  ;;  %v7565_v3 = vld [vmem:[%s10223_s1 + $0x8] sm:$0xff] (!%p179_p2)   ;;  %v7567_v5 = vld [vmem:[%s10223_s1 + $0x10] sm:$0xff] (!%p179_p2)  }
   0x7   : > { %6346 = vmatpush3.bf16.msra.mxu0 (!%p179_p2), %v7563_v1  ;;  %7545 = vmatpush3.bf16.msra.mxu1 (!%p179_p2), %v7563_v1  ;;  %v7568_v6 = vld [vmem:[%s10223_s1 + $0x58] sm:$0xff] (!%p179_p2)   ;;  %v7570_v8 = vld [vmem:[%s10223_s1 + $0x60] sm:$0xff] (!%p179_p2)   ;;  %v7572_v10 = vld [vmem:[%s10223_s1 + $0x68] sm:$0xff] (!%p179_p2)  }
   0x8   : > { %6347 = vmatprep.subr.bf16.mxu0 (!%p179_p2), %v7564_v2  ;;  %7538 = vmatprep.subr.bf16.mxu1 (!%p179_p2), %v7564_v2  ;;  %v7569_v7 = vld [vmem:[%s10223_s1 + $0x18] sm:$0xff] (!%p179_p2)   ;;  %v7571_v9 = vld [vmem:[%s10223_s1 + $0x20] sm:$0xff] (!%p179_p2)   ;;  %v7573_v13 = vld [vmem:[%s10223_s1 + $0x28] sm:$0xff] (!%p179_p2)  }
   0x9   : > { %v7574_v14 = vld [vmem:[%s10223_s1 + $0x70] sm:$0xff] (!%p179_p2)   ;;  %v7576_v16 = vld [vmem:[%s10223_s1 + $0x78] sm:$0xff] (!%p179_p2)   ;;  %v7584_v18 = vld [vmem:[%s10223_s1 + $0xc0] sm:$0xff] (!%p179_p2)  }
   0xa   : > { %v7575_v15 = vld [vmem:[%s10223_s1 + $0x30] sm:$0xff] (!%p179_p2)   ;;  %v7577_v17 = vld [vmem:[%s10223_s1 + $0x38] sm:$0xff] (!%p179_p2)   ;;  %v7587_v21 = vld [vmem:[%s10223_s1 + $0x140] sm:$0xff] (!%p179_p2)  }
   0xb   : > { %6348 = vmatpush3.bf16.msra.mxu0 (!%p179_p2), %v7565_v3  ;;  %7546 = vmatpush3.bf16.msra.mxu1 (!%p179_p2), %v7565_v3  ;;  %v7585_v22 = vld [vmem:[%s10223_s1 + $0x80] sm:$0xff] (!%p179_p2)   ;;  %v7586_v23 = vld [vmem:[%s10223_s1 + $0xc8] sm:$0xff] (!%p179_p2)   ;;  %v7596_v31 = vld [vmem:[%s10223_s1 + $0xd0] sm:$0xff] (!%p179_p2)  }
   0xc   : > { %6349 = vmatprep.subr.bf16.mxu0 (!%p179_p2), %v7566_v4  ;;  %7539 = vmatprep.subr.bf16.mxu1 (!%p179_p2), %v7566_v4  ;;  %v7589_v24 = vld [vmem:[%s10223_s1 + $0x100] sm:$0xff] (!%p179_p2)   ;;  %v7588_v27 = vld [vmem:[%s10223_s1 + $0x88] sm:$0xff] (!%p179_p2)   ;;  %v7597_v32 = vld [vmem:[%s10223_s1 + $0x90] sm:$0xff] (!%p179_p2)  }
   0xd   : > { %s10228_s19 = smov (!%p216_p3, %s5799_s19), 63  ;;  %v7607_v28 = vld [vmem:[%s10223_s1 + $0x148] sm:$0xff]   ;;  %v7598_v34 = vld [vmem:[%s10223_s1 + $0xd8] sm:$0xff]   ;;  %v7606_v40 = vld [vmem:[%s10223_s1 + $0xe0] sm:$0xff]  }
   0xe   : > { %s7553_s6 = smul.u32 84, %s10228_s19  ;;  %v7609_v33 = vld [vmem:[%s10223_s1 + $0x108] sm:$0xff]   ;;  %v7599_v37 = vld [vmem:[%s10223_s1 + $0x98] sm:$0xff]   ;;  %v7608_v41 = vld [vmem:[%s10223_s1 + $0xa0] sm:$0xff]  }
   0xf   : > { %6350 = vmatpush3.bf16.msra.mxu0 %v7567_v5  ;;  %7547 = vmatpush3.bf16.msra.mxu1 %v7567_v5  ;;  %v7610_v42 = vld [vmem:[%s10223_s1 + $0xe8] sm:$0xff]   ;;  %v7621_v43 = vld [vmem:[%s10223_s1 + $0x150] sm:$0xff]   ;;  %v7620_v52 = vld [vmem:[%s10223_s1 + $0xf8] sm:$0xff]  }
  0x10   : > { %6351 = vmatprep.subr.bf16.mxu0 %v7568_v6  ;;  %7540 = vmatprep.subr.bf16.mxu1 %v7568_v6  ;;  %s8300_s13 = scalar_lea.vmem %s10222_s0, %s7553_s6  ;;  %v7623_v46 = vld [vmem:[%s10223_s1 + $0x110] sm:$0xff]   ;;  %v7611_v47 = vld [vmem:[%s10223_s1 + $0xa8] sm:$0xff]   ;;  %v7638_v55 = vld [vmem:[%s10223_s1 + $0x158] sm:$0xff]  }
  0x11   : > { %v7580_v11 = vld [vmem:[%s8300_s13 + $0x4] ss:$84 sps:$4 sm:$0xff]   ;;  %v7578_v19 = vld [vmem:[%s8300_s13] ss:$84 sps:$4 sm:$0xff]   ;;  %v7594_v29 = vld [vmem:[%s8300_s13 + $0xa8] ss:$84 sps:$4 sm:$0xff]  }
  0x12   : > { %v7583_v12 = vld [vmem:[%s8300_s13 + $0x7e4] ss:$84 sps:$4 sm:$0xff]   ;;  %3665 = vmatprep.mubr.bf16.mxu0 %v7580_v11  ;;  %v7581_v20 = vld [vmem:[%s8300_s13 + $0x7e0] ss:$84 sps:$4 sm:$0xff]   ;;  %v7595_v30 = vld [vmem:[%s8300_s13 + $0x888] ss:$84 sps:$4 sm:$0xff]  }
  0x13   : > { %6352 = vmatpush3.bf16.msra.mxu0 %v7569_v7  ;;  %7548 = vmatpush3.bf16.msra.mxu1 %v7569_v7  ;;  %v7590_v25 = vld [vmem:[%s8300_s13 + $0xac] ss:$84 sps:$4 sm:$0xff]   ;;  %v7600_v35 = vld [vmem:[%s8300_s13 + $0x154] ss:$84 sps:$4 sm:$0xff]   ;;  %v7604_v38 = vld [vmem:[%s8300_s13 + $0x150] ss:$84 sps:$4 sm:$0xff]  }
  0x14   : > { %6353 = vmatprep.subr.bf16.mxu0 %v7570_v8  ;;  %7541 = vmatprep.subr.bf16.mxu1 %v7570_v8  ;;  %v7592_v26 = vld [vmem:[%s8300_s13 + $0x88c] ss:$84 sps:$4 sm:$0xff]   ;;  %v7602_v36 = vld [vmem:[%s8300_s13 + $0x934] ss:$84 sps:$4 sm:$0xff]   ;;  %v7605_v39 = vld [vmem:[%s8300_s13 + $0x930] ss:$84 sps:$4 sm:$0xff]  }
  0x15   : > { %3761 = vmatprep.mubr.bf16.mxu1 %v7583_v12  ;;  %v7612_v44 = vld [vmem:[%s8300_s13 + $0x1fc] ss:$84 sps:$4 sm:$0xff]   ;;  %v7616_v49 = vld [vmem:[%s8300_s13 + $0x1f8] ss:$84 sps:$4 sm:$0xff]   ;;  %v7629_v59 = vld [vmem:[%s8300_s13 + $0x2a0] ss:$84 sps:$4 sm:$0xff]  }
  0x16   : > { %v7614_v45 = vld [vmem:[%s8300_s13 + $0x9dc] ss:$84 sps:$4 sm:$0xff]   ;;  %v7617_v50 = vld [vmem:[%s8300_s13 + $0x9d8] ss:$84 sps:$4 sm:$0xff]   ;;  %v7630_v60 = vld [vmem:[%s10223_s1 + $0x1c0] sm:$0xff]  }
  0x17   : > { %6354 = vmatpush3.bf16.msra.mxu0 %v7571_v9  ;;  %7549 = vmatpush3.bf16.msra.mxu1 %v7571_v9  ;;  %v7618_v48 = vld [vmem:[%s10223_s1 + $0xf0] sm:$0xff]   ;;  %v7624_v53 = vld [vmem:[%s8300_s13 + $0x2a4] ss:$84 sps:$4 sm:$0xff]   ;;  %v7628_v54 = vld [vmem:[%s8300_s13 + $0xc] ss:$84 sps:$4 sm:$0xff]  }
  0x18   : > { %6355 = vmatprep.subr.bf16.mxu0 %v7572_v10  ;;  %7542 = vmatprep.subr.bf16.mxu1 %v7572_v10  ;;  %v7619_v51 = vld [vmem:[%s10223_s1 + $0xb0] sm:$0xff]   ;;  %v7639_v56 = vld [vmem:[%s10223_s1 + $0x118] sm:$0xff]   ;;  %v7631_v61 = vld [vmem:[%s10223_s1 + $0x180] sm:$0xff]  }
  0x19   : > { %v7622_v57 = vld [vmem:[%s10223_s1 + $0xb8] sm:$0xff]   ;;  %v7632_v62 = vld [vmem:[%s8300_s13 + $0x34c] ss:$84 sps:$4 sm:$0xff]   ;;  %v7634_v63 = vld [vmem:[%s8300_s13 + $0xb4] ss:$84 sps:$4 sm:$0xff]  }
  0x1a   : > { %v7626_v58 = vld [vmem:[%s8300_s13 + $0x8] ss:$84 sps:$4 sm:$0xff]   ;;  %v7648_v0 = vld [vmem:[%s10223_s1 + $0x160] sm:$0xff]   ;;  %v7663_v9 = vld [vmem:[%s10223_s1 + $0x1d0] sm:$0xff]  }
  0x1b   : > { %6356 = vmatpush3.bf16.msra.mxu0 %v7573_v13  ;;  %7550 = vmatpush3.bf16.msra.mxu1 %v7573_v13  ;;  %v7646_v1 = vld [vmem:[%s10223_s1 + $0x1c8] sm:$0xff]   ;;  %v7649_v2 = vld [vmem:[%s10223_s1 + $0x120] sm:$0xff]   ;;  %v7642_v7 = vld [vmem:[%s8300_s13 + $0x15c] ss:$84 sps:$4 sm:$0xff]  }
  0x1c   : > { %6357 = vmatprep.subr.bf16.mxu0 %v7574_v14  ;;  %7543 = vmatprep.subr.bf16.mxu1 %v7574_v14  ;;  %v7647_v3 = vld [vmem:[%s10223_s1 + $0x188] sm:$0xff]   ;;  %v7637_v5 = vld [vmem:[%s8300_s13 + $0xb0] ss:$84 sps:$4 sm:$0xff]  }
  0x1d   : > { %v7636_v4 = vld [vmem:[%s8300_s13 + $0x348] ss:$84 sps:$4 sm:$0xff]   ;;  %v7665_v11 = vld [vmem:[%s10223_s1 + $0x190] sm:$0xff]   ;;  %v7645_v13 = vld [vmem:[%s8300_s13 + $0x158] ss:$84 sps:$4 sm:$0xff]  }
  0x1e   : > { %v7640_v6 = vld [vmem:[%s8300_s13 + $0x3f4] ss:$84 sps:$4 sm:$0xff]   ;;  %v7644_v12 = vld [vmem:[%s8300_s13 + $0x3f0] ss:$84 sps:$4 sm:$0xff]  }
  0x1f   : > { %6358 = vmatpush3.bf16.msra.mxu0 %v7575_v15  ;;  %7551 = vmatpush3.bf16.msra.mxu1 %v7575_v15  ;;  %v7662_v8 = vld [vmem:[%s10223_s1 + $0x168] sm:$0xff]   ;;  %v7650_v14 = vld [vmem:[%s8300_s13 + $0x49c] ss:$84 sps:$4 sm:$0xff]  }
  0x20   : > { %6359 = vmatprep.subr.bf16.mxu0 %v7576_v16  ;;  %7544 = vmatprep.subr.bf16.mxu1 %v7576_v16  ;;  %v7664_v10 = vld [vmem:[%s10223_s1 + $0x128] sm:$0xff]   ;;  %v7672_v15 = vld [vmem:[%s10223_s1 + $0x170] sm:$0xff]  }
  0x21   : > { %v7673_v16 = vld [vmem:[%s10223_s1 + $0x130] sm:$0xff]  }
  0x23   : > { %6360 = vmatpush3.bf16.msra.mxu0 %v7577_v17  ;;  %7552 = vmatpush3.bf16.msra.mxu1 %v7577_v17  ;;  %v7652_v17 = vld [vmem:[%s8300_s13 + $0x204] ss:$84 sps:$4 sm:$0xff]  }
  0x24   : > { %6457 = vmatprep.subr.bf16.mxu1 %v7584_v18  ;;  %6569 = vmatprep.subr.bf16.mxu0 %v7587_v21  ;;  %v7680_v18 = vld [vmem:[%s10223_s1 + $0x1d8] sm:$0xff]   ;;  %v7655_v21 = vld [vmem:[%s8300_s13 + $0x200] ss:$84 sps:$4 sm:$0xff]  }
  0x26   : > { %3666 = vmatmul.mubr.bf16.vlgmr.msra.gmra.mrb[0].mxu0 %v7578_v19  ;;  %3762 = vmatmul.mubr.bf16.vlgmr.msra.gmra.mrb[0].mxu1 %v7581_v20  ;;  %v7681_v19 = vld [vmem:[%s10223_s1 + $0x198] sm:$0xff]  }
  0x27   : > { %6458 = vmatpush3.bf16.msra.mxu1 %v7585_v22  ;;  %6570 = vmatpush3.bf16.msra.mxu0 %v7589_v24  ;;  %v7654_v20 = vld [vmem:[%s8300_s13 + $0x498] ss:$84 sps:$4 sm:$0xff]  }
  0x28   : > { %6459 = vmatprep.subr.bf16.mxu1 %v7586_v23  ;;  %3673 = vmatprep.mubr.bf16.mxu0 %v7590_v25  ;;  %v7656_v22 = vld [vmem:[%s8300_s13 + $0x544] ss:$84 sps:$4 sm:$0xff]   ;;  %v7658_v23 = vld [vmem:[%s8300_s13 + $0x2ac] ss:$84 sps:$4 sm:$0xff]  }
  0x29   : > { %3769 = vmatprep.mubr.bf16.mxu1 %v7592_v26  ;;  %6571 = vmatprep.subr.bf16.mxu0 %v7607_v28  ;;  %v7688_v24 = vld [vmem:[%s10223_s1 + $0x178] sm:$0xff]   ;;  %v7696_v26 = vld [vmem:[%s10223_s1 + $0x1e0] sm:$0xff]  }
  0x2a   : > { %v7689_v25 = vld [vmem:[%s10223_s1 + $0x138] sm:$0xff]  }
  0x2b   : > { %6460 = vmatpush3.bf16.msra.mxu1 %v7588_v27  ;;  %6572 = vmatpush3.bf16.msra.mxu0 %v7609_v33  ;;  %v7660_v27 = vld [vmem:[%s8300_s13 + $0x540] ss:$84 sps:$4 sm:$0xff]   ;;  %v7661_v28 = vld [vmem:[%s8300_s13 + $0x2a8] ss:$84 sps:$4 sm:$0xff]  }
  0x2c   : > { %6461 = vmatprep.subr.bf16.mxu1 %v7596_v31  ;;  %6573 = vmatprep.subr.bf16.mxu0 %v7621_v43  ;;  %v7666_v31 = vld [vmem:[%s8300_s13 + $0x5ec] ss:$84 sps:$4 sm:$0xff]   ;;  %v7670_v33 = vld [vmem:[%s8300_s13 + $0x5e8] ss:$84 sps:$4 sm:$0xff]   ;;  %v7728_v43 = vld [vmem:[%s10223_s1 + $0x1f0] sm:$0xff]  }
  0x2e   : > { %3674 = vmatmul.mubr.bf16.gmra.mrb[4].mxu0 %v7594_v29  ;;  %3770 = vmatmul.mubr.bf16.gmra.mrb[4].mxu1 %v7595_v30  ;;  %v7697_v29 = vld [vmem:[%s10223_s1 + $0x1a0] sm:$0xff]  }
  0x2f   : > { %6462 = vmatpush3.bf16.msra.mxu1 %v7597_v32  ;;  %3681 = vmatprep.mubr.bf16.mxu0 %v7600_v35  ;;  %v7698_v30 = vld [vmem:[%s10223_s1 + $0x240] sm:$0xff]   ;;  %v7668_v32 = vld [vmem:[%s8300_s13 + $0x354] ss:$84 sps:$4 sm:$0xff]  }
  0x30   : > { %6463 = vmatprep.subr.bf16.mxu1 %v7598_v34  ;;  %3777 = vmatprep.mubr.bf16.mxu1 %v7602_v36  ;;  %v7671_v34 = vld [vmem:[%s8300_s13 + $0x350] ss:$84 sps:$4 sm:$0xff]   ;;  %v7712_v35 = vld [vmem:[%s10223_s1 + $0x1e8] sm:$0xff]  }
  0x31   : > { %6574 = vmatpush3.bf16.msra.mxu0 %v7623_v46  ;;  %v7713_v36 = vld [vmem:[%s10223_s1 + $0x1a8] sm:$0xff]   ;;  %v7687_v46 = vld [vmem:[%s8300_s13 + $0x4a0] ss:$84 sps:$4 sm:$0xff]  }
  0x32   : > { %6575 = vmatprep.subr.bf16.mxu0 %v7638_v55  ;;  %v7702_v55 = vld [vmem:[%s8300_s13 + $0xbc] ss:$84 sps:$4 sm:$0xff]  }
  0x33   : > { %6464 = vmatpush3.bf16.msra.mxu1 %v7599_v37  ;;  %v7674_v37 = vld [vmem:[%s8300_s13 + $0x694] ss:$84 sps:$4 sm:$0xff]  }
  0x34   : > { %6465 = vmatprep.subr.bf16.mxu1 %v7606_v40  ;;  %v7679_v40 = vld [vmem:[%s8300_s13 + $0x3f8] ss:$84 sps:$4 sm:$0xff]  }
  0x35   : > { %6576 = vmatpush3.bf16.msra.mxu0 %v7639_v56  ;;  %v7714_v56 = vld [vmem:[%s10223_s1 + $0x248] sm:$0xff]  }
  0x36   : > { %3682 = vmatmul.mubr.bf16.gmra.mrb[8].mxu0 %v7604_v38  ;;  %3778 = vmatmul.mubr.bf16.gmra.mrb[8].mxu1 %v7605_v39  ;;  %v7676_v38 = vld [vmem:[%s8300_s13 + $0x3fc] ss:$84 sps:$4 sm:$0xff]  }
  0x37   : > { %6466 = vmatpush3.bf16.msra.mxu1 %v7608_v41  ;;  %3689 = vmatprep.mubr.bf16.mxu0 %v7612_v44  ;;  %v7678_v39 = vld [vmem:[%s8300_s13 + $0x690] ss:$84 sps:$4 sm:$0xff]  }
  0x38   : > { %6467 = vmatprep.subr.bf16.mxu1 %v7610_v42  ;;  %3785 = vmatprep.mubr.bf16.mxu1 %v7614_v45  ;;  %v7682_v41 = vld [vmem:[%s8300_s13 + $0x73c] ss:$84 sps:$4 sm:$0xff]   ;;  %v7684_v42 = vld [vmem:[%s8300_s13 + $0x4a4] ss:$84 sps:$4 sm:$0xff]  }
  0x39   : > { %6577 = vmatprep.subr.bf16.mxu0 %v7648_v0  ;;  %v7729_v44 = vld [vmem:[%s10223_s1 + $0x1b0] sm:$0xff]   ;;  %v7686_v45 = vld [vmem:[%s8300_s13 + $0x738] ss:$84 sps:$4 sm:$0xff]  }
  0x3a   : > { %6578 = vmatpush3.bf16.msra.mxu0 %v7649_v2  ;;  %v7731_v0 = vld [vmem:[%s10223_s1 + $0x210] sm:$0xff]   ;;  %v7710_v2 = vld [vmem:[%s8300_s13 + $0x698] ss:$84 sps:$4 sm:$0xff]  }
  0x3b   : > { %6468 = vmatpush3.bf16.msra.mxu1 %v7611_v47  ;;  %6579 = vmatprep.subr.bf16.mxu0 %v7662_v8  ;;  %v7690_v47 = vld [vmem:[%s8300_s13 + $0x54c] ss:$84 sps:$4 sm:$0xff]  }
  0x3c   : > { %6469 = vmatprep.subr.bf16.mxu1 %v7618_v48  ;;  %v7694_v48 = vld [vmem:[%s8300_s13 + $0x14] ss:$84 sps:$4 sm:$0xff]   ;;  %v7763_v8 = vld [vmem:[%s10223_s1 + $0x220] sm:$0xff]  }
  0x3e   : > { %3690 = vmatmul.mubr.bf16.gmra.mrb[12].mxu0 %v7616_v49  ;;  %3786 = vmatmul.mubr.bf16.gmra.mrb[12].mxu1 %v7617_v50  ;;  %v7744_v49 = vld [vmem:[%s10223_s1 + $0x1f8] sm:$0xff]  }
  0x3f   : > { %6470 = vmatpush3.bf16.msra.mxu1 %v7619_v51  ;;  %3697 = vmatprep.mubr.bf16.mxu0 %v7624_v53  ;;  %v7745_v50 = vld [vmem:[%s10223_s1 + $0x1b8] sm:$0xff]   ;;  %v7692_v51 = vld [vmem:[%s8300_s13 + $0x10] ss:$84 sps:$4 sm:$0xff]  }
  0x40   : > { %6471 = vmatprep.subr.bf16.mxu1 %v7620_v52  ;;  %3826 = vmatprep.mubr.bf16.mxu1 %v7628_v54  ;;  %v7695_v52 = vld [vmem:[%s8300_s13 + $0x548] ss:$84 sps:$4 sm:$0xff]   ;;  %v7699_v53 = vld [vmem:[%s10223_s1 + $0x200] sm:$0xff]  }
  0x41   : > { %6580 = vmatpush3.bf16.msra.mxu0 %v7664_v10  ;;  %v7700_v54 = vld [vmem:[%s8300_s13 + $0x5f4] ss:$84 sps:$4 sm:$0xff]  }
  0x42   : > { %6581 = vmatprep.subr.bf16.mxu0 %v7672_v15  ;;  %v7720_v10 = vld [vmem:[%s8300_s13 + $0x740] ss:$84 sps:$4 sm:$0xff]  }
  0x43   : > { %6472 = vmatpush3.bf16.msra.mxu1 %v7622_v57  ;;  %v7760_v57 = vld [vmem:[%s10223_s1 + $0x2c0] sm:$0xff]   ;;  %v7724_v15 = vld [vmem:[%s8300_s13 + $0x2b4] ss:$84 sps:$4 sm:$0xff]  }
  0x44   : > { %6681 = vmatprep.subr.bf16.mxu1 %v7630_v60  ;;  %v7704_v60 = vld [vmem:[%s8300_s13 + $0x5f0] ss:$84 sps:$4 sm:$0xff]  }
  0x45   : > { %6582 = vmatpush3.bf16.msra.mxu0 %v7673_v16  ;;  %v7795_v16 = vld [vmem:[%s10223_s1 + $0x230] sm:$0xff]  }
  0x46   : > { %3698 = vmatmul.mubr.bf16.gmra.mrb[16].mxu0 %v7629_v59  ;;  %3827 = vmatmul.mubr.bf16.vlgmr.msra.gmra.mrb[16].mxu1 %v7626_v58  ;;  %v7715_v58 = vld [vmem:[%s10223_s1 + $0x208] sm:$0xff]   ;;  %v7730_v59 = vld [vmem:[%s10223_s1 + $0x250] sm:$0xff]  }
  0x47   : > { %6682 = vmatpush3.bf16.msra.mxu1 %v7631_v61  ;;  %3705 = vmatprep.mubr.bf16.mxu0 %v7632_v62  ;;  %v7705_v61 = vld [vmem:[%s8300_s13 + $0xb8] ss:$84 sps:$4 sm:$0xff]   ;;  %v7706_v62 = vld [vmem:[%s8300_s13 + $0x69c] ss:$84 sps:$4 sm:$0xff]  }
  0x48   : > { %3834 = vmatprep.mubr.bf16.mxu1 %v7634_v63  ;;  %6683 = vmatprep.subr.bf16.mxu1 %v7646_v1  ;;  %v7708_v63 = vld [vmem:[%s8300_s13 + $0x164] ss:$84 sps:$4 sm:$0xff]  }
  0x49   : > { %6583 = vmatprep.subr.bf16.mxu0 %v7688_v24  ;;  %v7746_v1 = vld [vmem:[%s10223_s1 + $0x258] sm:$0xff]  }
  0x4a   : > { %6584 = vmatpush3.bf16.msra.mxu0 %v7689_v25  ;;  %v7737_v24 = vld [vmem:[%s8300_s13 + $0x358] ss:$84 sps:$4 sm:$0xff]   ;;  %v7738_v25 = vld [vmem:[%s8300_s13 + $0x93c] ss:$84 sps:$4 sm:$0xff]  }
  0x4b   : > { %6684 = vmatpush3.bf16.msra.mxu1 %v7647_v3  ;;  %6793 = vmatprep.subr.bf16.mxu0 %v7698_v30  ;;  %v7747_v3 = vld [vmem:[%s10223_s1 + $0x218] sm:$0xff]  }
  0x4c   : > { %6685 = vmatprep.subr.bf16.mxu1 %v7663_v9  ;;  %v7778_v9 = vld [vmem:[%s10223_s1 + $0x268] sm:$0xff]   ;;  %v7748_v30 = vld [vmem:[%s8300_s13 + $0x9e4] ss:$84 sps:$4 sm:$0xff]  }
  0x4e   : > { %3706 = vmatmul.mubr.bf16.gmra.mrb[20].mxu0 %v7636_v4  ;;  %3835 = vmatmul.mubr.bf16.gmra.mrb[20].mxu1 %v7637_v5  ;;  %v7762_v4 = vld [vmem:[%s10223_s1 + $0x260] sm:$0xff]  }
  0x4f   : > { %3713 = vmatprep.mubr.bf16.mxu0 %v7640_v6  ;;  %3842 = vmatprep.mubr.bf16.mxu1 %v7642_v7  ;;  %v7711_v5 = vld [vmem:[%s8300_s13 + $0x160] ss:$84 sps:$4 sm:$0xff]   ;;  %v7716_v6 = vld [vmem:[%s8300_s13 + $0x744] ss:$84 sps:$4 sm:$0xff]  }
  0x50   : > { %6686 = vmatpush3.bf16.msra.mxu1 %v7665_v11  ;;  %v7718_v7 = vld [vmem:[%s8300_s13 + $0x20c] ss:$84 sps:$4 sm:$0xff]   ;;  %v7721_v11 = vld [vmem:[%s8300_s13 + $0x208] ss:$84 sps:$4 sm:$0xff]  }
  0x51   : > { %6687 = vmatprep.subr.bf16.mxu1 %v7680_v18  ;;  %v7727_v18 = vld [vmem:[%s8300_s13 + $0x2b0] ss:$84 sps:$4 sm:$0xff]  }
  0x54   : > { %6688 = vmatpush3.bf16.msra.mxu1 %v7681_v19  ;;  %v7732_v19 = vld [vmem:[%s8300_s13 + $0x894] ss:$84 sps:$4 sm:$0xff]  }
  0x55   : > { %6689 = vmatprep.subr.bf16.mxu1 %v7696_v26  ;;  %v7740_v26 = vld [vmem:[%s8300_s13 + $0x404] ss:$84 sps:$4 sm:$0xff]  }
  0x56   : > { %3714 = vmatmul.mubr.bf16.gmra.mrb[24].mxu0 %v7644_v12  ;;  %3843 = vmatmul.mubr.bf16.gmra.mrb[24].mxu1 %v7645_v13  ;;  %v7779_v12 = vld [vmem:[%s10223_s1 + $0x228] sm:$0xff]   ;;  %v7794_v13 = vld [vmem:[%s10223_s1 + $0x270] sm:$0xff]  }
  0x57   : > { %3721 = vmatprep.mubr.bf16.mxu0 %v7650_v14  ;;  %3850 = vmatprep.mubr.bf16.mxu1 %v7652_v17  ;;  %v7722_v14 = vld [vmem:[%s8300_s13 + $0x7ec] ss:$84 sps:$4 sm:$0xff]   ;;  %v7726_v17 = vld [vmem:[%s8300_s13 + $0x7e8] ss:$84 sps:$4 sm:$0xff]  }
  0x58   : > { %6690 = vmatpush3.bf16.msra.mxu1 %v7697_v29  ;;  %v7743_v29 = vld [vmem:[%s8300_s13 + $0x400] ss:$84 sps:$4 sm:$0xff]  }
  0x59   : > { %6691 = vmatprep.subr.bf16.mxu1 %v7712_v35  ;;  %v7758_v35 = vld [vmem:[%s8300_s13 + $0x1c] ss:$84 sps:$4 sm:$0xff]  }
  0x5c   : > { %6692 = vmatpush3.bf16.msra.mxu1 %v7713_v36  ;;  %v7756_v36 = vld [vmem:[%s8300_s13 + $0x18] ss:$84 sps:$4 sm:$0xff]  }
  0x5d   : > { %6693 = vmatprep.subr.bf16.mxu1 %v7728_v43  ;;  %v7792_v43 = vld [vmem:[%s10223_s1 + $0x2d0] sm:$0xff]  }
  0x5e   : > { %3722 = vmatmul.mubr.bf16.gmra.mrb[28].mxu0 %v7654_v20  ;;  %3851 = vmatmul.mubr.bf16.gmra.mrb[28].mxu1 %v7655_v21  ;;  %v7734_v20 = vld [vmem:[%s8300_s13 + $0x35c] ss:$84 sps:$4 sm:$0xff]  }
  0x5f   : > { %3729 = vmatprep.mubr.bf16.mxu0 %v7656_v22  ;;  %3858 = vmatprep.mubr.bf16.mxu1 %v7658_v23  ;;  %v7810_v21 = vld [vmem:[%s10223_s1 + $0x278] sm:$0xff]   ;;  %v7736_v23 = vld [vmem:[%s8300_s13 + $0x890] ss:$84 sps:$4 sm:$0xff]  }
  0x60   : > { %6694 = vmatpush3.bf16.msra.mxu1 %v7729_v44  ;;  %v7811_v22 = vld [vmem:[%s10223_s1 + $0x238] sm:$0xff]  }
  0x61   : > { %6695 = vmatprep.subr.bf16.mxu1 %v7744_v49  ;;  %v7768_v44 = vld [vmem:[%s8300_s13 + $0x5f8] ss:$84 sps:$4 sm:$0xff]  }
  0x62   : > { %v7808_v49 = vld [vmem:[%s10223_s1 + $0x2d8] sm:$0xff]  }
  0x64   : > { %6696 = vmatpush3.bf16.msra.mxu1 %v7745_v50  ;;  %v7774_v50 = vld [vmem:[%s8300_s13 + $0x6a0] ss:$84 sps:$4 sm:$0xff]  }
  0x65   : > { %6905 = vmatprep.subr.bf16.mxu1 %v7760_v57  ;;  %v7840_v57 = vld [vmem:[%s10223_s1 + $0x2e8] sm:$0xff]  }
  0x66   : > { %3730 = vmatmul.mubr.bf16.gmra.mrb[32].mxu0 %v7660_v27  ;;  %3859 = vmatmul.mubr.bf16.gmra.mrb[32].mxu1 %v7661_v28  ;;  %v7826_v27 = vld [vmem:[%s10223_s1 + $0x340] sm:$0xff]   ;;  %v7742_v28 = vld [vmem:[%s8300_s13 + $0x938] ss:$84 sps:$4 sm:$0xff]  }
  0x67   : > { %3737 = vmatprep.mubr.bf16.mxu0 %v7666_v31  ;;  %3866 = vmatprep.mubr.bf16.mxu1 %v7668_v32  ;;  %v7750_v31 = vld [vmem:[%s8300_s13 + $0x4ac] ss:$84 sps:$4 sm:$0xff]  }
  0x68   : > { %v7752_v32 = vld [vmem:[%s8300_s13 + $0x9e0] ss:$84 sps:$4 sm:$0xff]  }
  0x6e   : > { %3738 = vmatmul.mubr.bf16.gmra.mrb[36].mxu0 %v7670_v33  ;;  %3867 = vmatmul.mubr.bf16.gmra.mrb[36].mxu1 %v7671_v34  ;;  %v7753_v33 = vld [vmem:[%s8300_s13 + $0x4a8] ss:$84 sps:$4 sm:$0xff]  }
  0x6f   : > { %3745 = vmatprep.mubr.bf16.mxu0 %v7674_v37  ;;  %3874 = vmatprep.mubr.bf16.mxu1 %v7676_v38  ;;  %v7754_v34 = vld [vmem:[%s8300_s13 + $0x554] ss:$84 sps:$4 sm:$0xff]   ;;  %v7759_v37 = vld [vmem:[%s8300_s13 + $0x550] ss:$84 sps:$4 sm:$0xff]  }
  0x70   : > { %v7761_v38 = vld [vmem:[%s10223_s1 + $0x280] sm:$0xff]  }
  0x76   : > { %3746 = vmatmul.mubr.bf16.gmra.mrb[40].mxu0 %v7678_v39  ;;  %3875 = vmatmul.mubr.bf16.gmra.mrb[40].mxu1 %v7679_v40  ;;  %v7764_v39 = vld [vmem:[%s8300_s13 + $0x5fc] ss:$84 sps:$4 sm:$0xff]   ;;  %v7766_v40 = vld [vmem:[%s8300_s13 + $0xc4] ss:$84 sps:$4 sm:$0xff]  }
  0x77   : > { %3753 = vmatprep.mubr.bf16.mxu0 %v7682_v41  ;;  %3882 = vmatprep.mubr.bf16.mxu1 %v7684_v42  ;;  %v7776_v41 = vld [vmem:[%s10223_s1 + $0x2c8] sm:$0xff]  }
  0x78   : > { %v7777_v42 = vld [vmem:[%s10223_s1 + $0x288] sm:$0xff]  }
  0x7e   : > { %3754 = vmatmul.mubr.bf16.gmra.mrb[44].mxu0 %v7686_v45  ;;  %3883 = vmatmul.mubr.bf16.gmra.mrb[44].mxu1 %v7687_v46  ;;  %v7769_v45 = vld [vmem:[%s8300_s13 + $0xc0] ss:$84 sps:$4 sm:$0xff]   ;;  %v7770_v46 = vld [vmem:[%s8300_s13 + $0x6a4] ss:$84 sps:$4 sm:$0xff]  }
  0x7f   : > { %3890 = vmatprep.mubr.bf16.mxu1 %v7690_v47  ;;  %3987 = vmatprep.mubr.bf16.mxu0 %v7694_v48  ;;  %v7772_v47 = vld [vmem:[%s8300_s13 + $0x16c] ss:$84 sps:$4 sm:$0xff]   ;;  %v7793_v48 = vld [vmem:[%s10223_s1 + $0x290] sm:$0xff]  }
  0x86   : > { %3891 = vmatmul.mubr.bf16.gmra.mrb[48].mxu1 %v7695_v52  ;;  %3988 = vmatmul.mubr.bf16.vlgmr.msra.gmra.mrb[48].mxu0 %v7692_v51  ;;  %v7775_v51 = vld [vmem:[%s8300_s13 + $0x168] ss:$84 sps:$4 sm:$0xff]  }
  0x87   : > { %6794 = vmatpush3.bf16.msra.mxu0 %v7699_v53  ;;  %3898 = vmatprep.mubr.bf16.mxu1 %v7700_v54  ;;  %v7809_v52 = vld [vmem:[%s10223_s1 + $0x298] sm:$0xff]   ;;  %v7824_v53 = vld [vmem:[%s10223_s1 + $0x2e0] sm:$0xff]  }
  0x88   : > { %3995 = vmatprep.mubr.bf16.mxu0 %v7702_v55  ;;  %6795 = vmatprep.subr.bf16.mxu0 %v7714_v56  ;;  %v7780_v54 = vld [vmem:[%s8300_s13 + $0x74c] ss:$84 sps:$4 sm:$0xff]   ;;  %v7782_v55 = vld [vmem:[%s8300_s13 + $0x214] ss:$84 sps:$4 sm:$0xff]  }
  0x89   : > { %v7825_v56 = vld [vmem:[%s10223_s1 + $0x2a0] sm:$0xff]  }
  0x8b   : > { %6796 = vmatpush3.bf16.msra.mxu0 %v7715_v58  ;;  %v7784_v58 = vld [vmem:[%s8300_s13 + $0x748] ss:$84 sps:$4 sm:$0xff]  }
  0x8c   : > { %6797 = vmatprep.subr.bf16.mxu0 %v7730_v59  ;;  %v7785_v59 = vld [vmem:[%s8300_s13 + $0x210] ss:$84 sps:$4 sm:$0xff]  }
  0x8e   : > { %3899 = vmatmul.mubr.bf16.gmra.mrb[52].mxu1 %v7704_v60  ;;  %3996 = vmatmul.mubr.bf16.gmra.mrb[52].mxu0 %v7705_v61  ;;  %v7841_v60 = vld [vmem:[%s10223_s1 + $0x2a8] sm:$0xff]   ;;  %v7856_v61 = vld [vmem:[%s10223_s1 + $0x2f0] sm:$0xff]  }
  0x8f   : > { %3906 = vmatprep.mubr.bf16.mxu1 %v7706_v62  ;;  %4003 = vmatprep.mubr.bf16.mxu0 %v7708_v63  ;;  %v7786_v62 = vld [vmem:[%s8300_s13 + $0x7f4] ss:$84 sps:$4 sm:$0xff]   ;;  %v7788_v63 = vld [vmem:[%s8300_s13 + $0x2bc] ss:$84 sps:$4 sm:$0xff]  }
  0x90   : > { %6798 = vmatpush3.bf16.msra.mxu0 %v7731_v0  ;;  %v7857_v0 = vld [vmem:[%s10223_s1 + $0x2b0] sm:$0xff]  }
  0x91   : > { %6799 = vmatprep.subr.bf16.mxu0 %v7746_v1  ;;  %v7872_v1 = vld [vmem:[%s10223_s1 + $0x2f8] sm:$0xff]  }
  0x94   : > { %6800 = vmatpush3.bf16.msra.mxu0 %v7747_v3  ;;  %v7888_v3 = vld [vmem:[%s10223_s1 + $0x3c0] sm:$0xff]  }
  0x95   : > { %6801 = vmatprep.subr.bf16.mxu0 %v7762_v4  ;;  %v7790_v4 = vld [vmem:[%s8300_s13 + $0x7f0] ss:$84 sps:$4 sm:$0xff]  }
  0x96   : > { %3907 = vmatmul.mubr.bf16.gmra.mrb[56].mxu1 %v7710_v2  ;;  %4004 = vmatmul.mubr.bf16.gmra.mrb[56].mxu0 %v7711_v5  ;;  %v7873_v2 = vld [vmem:[%s10223_s1 + $0x2b8] sm:$0xff]  }
  0x97   : > { %3914 = vmatprep.mubr.bf16.mxu1 %v7716_v6  ;;  %4011 = vmatprep.mubr.bf16.mxu0 %v7718_v7  ;;  %v7791_v5 = vld [vmem:[%s8300_s13 + $0x2b8] ss:$84 sps:$4 sm:$0xff]   ;;  %v7796_v6 = vld [vmem:[%s8300_s13 + $0x89c] ss:$84 sps:$4 sm:$0xff]  }
  0x98   : > { %6802 = vmatpush3.bf16.msra.mxu0 %v7763_v8  ;;  %v7798_v7 = vld [vmem:[%s8300_s13 + $0x364] ss:$84 sps:$4 sm:$0xff]  }
  0x99   : > { %6803 = vmatprep.subr.bf16.mxu0 %v7778_v9  ;;  %v7800_v8 = vld [vmem:[%s8300_s13 + $0x898] ss:$84 sps:$4 sm:$0xff]   ;;  %v7801_v9 = vld [vmem:[%s8300_s13 + $0x360] ss:$84 sps:$4 sm:$0xff]  }
  0x9c   : > { %6804 = vmatpush3.bf16.msra.mxu0 %v7779_v12  ;;  %v7806_v12 = vld [vmem:[%s8300_s13 + $0x940] ss:$84 sps:$4 sm:$0xff]  }
  0x9d   : > { %6805 = vmatprep.subr.bf16.mxu0 %v7794_v13  ;;  %v7807_v13 = vld [vmem:[%s8300_s13 + $0x408] ss:$84 sps:$4 sm:$0xff]  }
  0x9e   : > { %3915 = vmatmul.mubr.bf16.gmra.mrb[60].mxu1 %v7720_v10  ;;  %4012 = vmatmul.mubr.bf16.gmra.mrb[60].mxu0 %v7721_v11  ;;  %v7802_v10 = vld [vmem:[%s8300_s13 + $0x944] ss:$84 sps:$4 sm:$0xff]   ;;  %v7804_v11 = vld [vmem:[%s8300_s13 + $0x40c] ss:$84 sps:$4 sm:$0xff]  }
  0x9f   : > { %3922 = vmatprep.mubr.bf16.mxu1 %v7722_v14  ;;  %4019 = vmatprep.mubr.bf16.mxu0 %v7724_v15  ;;  %v7812_v14 = vld [vmem:[%s8300_s13 + $0x9ec] ss:$84 sps:$4 sm:$0xff]   ;;  %v7814_v15 = vld [vmem:[%s8300_s13 + $0x4b4] ss:$84 sps:$4 sm:$0xff]  }
  0xa0   : > { %6806 = vmatpush3.bf16.msra.mxu0 %v7795_v16  ;;  %v7816_v16 = vld [vmem:[%s8300_s13 + $0x9e8] ss:$84 sps:$4 sm:$0xff]  }
  0xa1   : > { %6807 = vmatprep.subr.bf16.mxu0 %v7810_v21 }
  0xa4   : > { %6808 = vmatpush3.bf16.msra.mxu0 %v7811_v22 }
  0xa5   : > { %7017 = vmatprep.subr.bf16.mxu0 %v7826_v27  ;;  %v7822_v27 = vld [vmem:[%s8300_s13 + $0x24] ss:$84 sps:$4 sm:$0xff]  }
  0xa6   : > { %3923 = vmatmul.mubr.bf16.gmra.mrb[64].mxu1 %v7726_v17  ;;  %4020 = vmatmul.mubr.bf16.gmra.mrb[64].mxu0 %v7727_v18  ;;  %v7817_v17 = vld [vmem:[%s8300_s13 + $0x4b0] ss:$84 sps:$4 sm:$0xff]  }
  0xa7   : > { %3930 = vmatprep.mubr.bf16.mxu1 %v7732_v19  ;;  %4027 = vmatprep.mubr.bf16.mxu0 %v7734_v20 }
  0xae   : > { %3931 = vmatmul.mubr.bf16.gmra.mrb[68].mxu1 %v7736_v23  ;;  %4028 = vmatmul.mubr.bf16.gmra.mrb[68].mxu0 %v7737_v24 }
  0xaf   : > { %3938 = vmatprep.mubr.bf16.mxu1 %v7738_v25  ;;  %4035 = vmatprep.mubr.bf16.mxu0 %v7740_v26  ;;  %v7818_v26 = vld [vmem:[%s8300_s13 + $0x55c] ss:$84 sps:$4 sm:$0xff]  }
  0xb6   : > { %3939 = vmatmul.mubr.bf16.gmra.mrb[72].mxu1 %v7742_v28  ;;  %4036 = vmatmul.mubr.bf16.gmra.mrb[72].mxu0 %v7743_v29 }
  0xb7   : > { %3946 = vmatprep.mubr.bf16.mxu1 %v7748_v30  ;;  %4043 = vmatprep.mubr.bf16.mxu0 %v7750_v31 }
  0xbe   : > { %3947 = vmatmul.mubr.bf16.gmra.mrb[76].mxu1 %v7752_v32  ;;  %4044 = vmatmul.mubr.bf16.gmra.mrb[76].mxu0 %v7753_v33  ;;  %v7820_v32 = vld [vmem:[%s8300_s13 + $0x20] ss:$84 sps:$4 sm:$0xff]   ;;  %v7823_v33 = vld [vmem:[%s8300_s13 + $0x558] ss:$84 sps:$4 sm:$0xff]  }
  0xbf   : > { %4051 = vmatprep.mubr.bf16.mxu0 %v7754_v34  ;;  %4148 = vmatprep.mubr.bf16.mxu1 %v7758_v35 }
  0xc6   : > { %4052 = vmatmul.mubr.bf16.gmra.mrb[80].mxu0 %v7759_v37  ;;  %4149 = vmatmul.mubr.bf16.vlgmr.msra.gmra.mrb[80].mxu1 %v7756_v36 }
  0xc7   : > { %6906 = vmatpush3.bf16.msra.mxu1 %v7761_v38  ;;  %4059 = vmatprep.mubr.bf16.mxu0 %v7764_v39 }
  0xc8   : > { %4156 = vmatprep.mubr.bf16.mxu1 %v7766_v40  ;;  %6907 = vmatprep.subr.bf16.mxu1 %v7776_v41 }
  0xcb   : > { %6908 = vmatpush3.bf16.msra.mxu1 %v7777_v42  ;;  %v7827_v42 = vld [vmem:[%s10223_s1 + $0x300] sm:$0xff]  }
  0xcc   : > { %6909 = vmatprep.subr.bf16.mxu1 %v7792_v43  ;;  %v7828_v43 = vld [vmem:[%s8300_s13 + $0x604] ss:$84 sps:$4 sm:$0xff]  }
  0xce   : > { %4060 = vmatmul.mubr.bf16.gmra.mrb[84].mxu0 %v7768_v44  ;;  %4157 = vmatmul.mubr.bf16.gmra.mrb[84].mxu1 %v7769_v45 }
  0xcf   : > { %4067 = vmatprep.mubr.bf16.mxu0 %v7770_v46  ;;  %4164 = vmatprep.mubr.bf16.mxu1 %v7772_v47  ;;  %v7830_v46 = vld [vmem:[%s8300_s13 + $0xcc] ss:$84 sps:$4 sm:$0xff]  }
  0xd0   : > { %6910 = vmatpush3.bf16.msra.mxu1 %v7793_v48  ;;  %v7842_v47 = vld [vmem:[%s10223_s1 + $0x348] sm:$0xff]  }
  0xd1   : > { %6911 = vmatprep.subr.bf16.mxu1 %v7808_v49 }
  0xd4   : > { %6912 = vmatpush3.bf16.msra.mxu1 %v7809_v52  ;;  %v7832_v52 = vld [vmem:[%s8300_s13 + $0x600] ss:$84 sps:$4 sm:$0xff]  }
  0xd5   : > { %6913 = vmatprep.subr.bf16.mxu1 %v7824_v53  ;;  %v7833_v53 = vld [vmem:[%s8300_s13 + $0xc8] ss:$84 sps:$4 sm:$0xff]  }
  0xd6   : > { %4068 = vmatmul.mubr.bf16.gmra.mrb[88].mxu0 %v7774_v50  ;;  %4165 = vmatmul.mubr.bf16.gmra.mrb[88].mxu1 %v7775_v51  ;;  %v7843_v50 = vld [vmem:[%s10223_s1 + $0x308] sm:$0xff]   ;;  %v7858_v51 = vld [vmem:[%s10223_s1 + $0x350] sm:$0xff]  }
  0xd7   : > { %4075 = vmatprep.mubr.bf16.mxu0 %v7780_v54  ;;  %4172 = vmatprep.mubr.bf16.mxu1 %v7782_v55 }
  0xd8   : > { %6914 = vmatpush3.bf16.msra.mxu1 %v7825_v56 }
  0xd9   : > { %6915 = vmatprep.subr.bf16.mxu1 %v7840_v57 }
  0xdc   : > { %6916 = vmatpush3.bf16.msra.mxu1 %v7841_v60 }
  0xdd   : > { %6917 = vmatprep.subr.bf16.mxu1 %v7856_v61 }
  0xde   : > { %4076 = vmatmul.mubr.bf16.gmra.mrb[92].mxu0 %v7784_v58  ;;  %4173 = vmatmul.mubr.bf16.gmra.mrb[92].mxu1 %v7785_v59 }
  0xdf   : > { %4083 = vmatprep.mubr.bf16.mxu0 %v7786_v62  ;;  %4180 = vmatprep.mubr.bf16.mxu1 %v7788_v63  ;;  %v7834_v62 = vld [vmem:[%s8300_s13 + $0x6ac] ss:$84 sps:$4 sm:$0xff]   ;;  %v7836_v63 = vld [vmem:[%s8300_s13 + $0x174] ss:$84 sps:$4 sm:$0xff]  }
  0xe0   : > { %6918 = vmatpush3.bf16.msra.mxu1 %v7857_v0 }
  0xe1   : > { %6919 = vmatprep.subr.bf16.mxu1 %v7872_v1 }
  0xe4   : > { %6920 = vmatpush3.bf16.msra.mxu1 %v7873_v2  ;;  %v7859_v2 = vld [vmem:[%s10223_s1 + $0x310] sm:$0xff]  }
  0xe5   : > { %7129 = vmatprep.subr.bf16.mxu1 %v7888_v3 }
  0xe6   : > { %4084 = vmatmul.mubr.bf16.gmra.mrb[96].mxu0 %v7790_v4  ;;  %4181 = vmatmul.mubr.bf16.gmra.mrb[96].mxu1 %v7791_v5  ;;  %v7874_v5 = vld [vmem:[%s10223_s1 + $0x358] sm:$0xff]  }
  0xe7   : > { %4091 = vmatprep.mubr.bf16.mxu0 %v7796_v6  ;;  %4188 = vmatprep.mubr.bf16.mxu1 %v7798_v7  ;;  %v7875_v6 = vld [vmem:[%s10223_s1 + $0x318] sm:$0xff]   ;;  %v7890_v7 = vld [vmem:[%s10223_s1 + $0x360] sm:$0xff]  }
  0xee   : > { %4092 = vmatmul.mubr.bf16.gmra.mrb[100].mxu0 %v7800_v8  ;;  %4189 = vmatmul.mubr.bf16.gmra.mrb[100].mxu1 %v7801_v9  ;;  %v7838_v8 = vld [vmem:[%s8300_s13 + $0x6a8] ss:$84 sps:$4 sm:$0xff]   ;;  %v7839_v9 = vld [vmem:[%s8300_s13 + $0x170] ss:$84 sps:$4 sm:$0xff]  }
  0xef   : > { %4099 = vmatprep.mubr.bf16.mxu0 %v7802_v10  ;;  %4196 = vmatprep.mubr.bf16.mxu1 %v7804_v11 }
  0xf6   : > { %4100 = vmatmul.mubr.bf16.gmra.mrb[104].mxu0 %v7806_v12  ;;  %4197 = vmatmul.mubr.bf16.gmra.mrb[104].mxu1 %v7807_v13 }
  0xf7   : > { %4107 = vmatprep.mubr.bf16.mxu0 %v7812_v14  ;;  %4204 = vmatprep.mubr.bf16.mxu1 %v7814_v15 }
  0xf9   : > { %v6433_v18 = vpop.f32.mrb[0].mxu1  ;;  %v6361_v19 = vpop.f32.mrb[0].mxu0 }
  0xfa   : > { %v6434_v20 = vpop.f32.mrb[1].mxu1  ;;  %v6362_v21 = vpop.f32.mrb[1].mxu0 }
  0xfb   : > { %v8681_v22 = vadd.f32 %v6434_v20, %v6433_v18  ;;  %v6436_v23 = vpop.f32.mrb[2].mxu1  ;;  %v8683_v24 = vadd.f32 %v6362_v21, %v6361_v19  ;;  %v6364_v25 = vpop.f32.mrb[2].mxu0  ;;  %v7844_v18 = vld [vmem:[%s8300_s13 + $0x754] ss:$84 sps:$4 sm:$0xff]   ;;  %v7846_v19 = vld [vmem:[%s8300_s13 + $0x21c] ss:$84 sps:$4 sm:$0xff]  }
  0xfc   : > { %v6437_v28 = vpop.f32.mrb[3].mxu1  ;;  %v6365_v29 = vpop.f32.mrb[3].mxu0 }
  0xfd   : > { %v8687_v30 = vadd.f32 %v6437_v28, %v6436_v23  ;;  %v8689_v31 = vadd.f32 %v6365_v29, %v6364_v25  ;;  %v7891_v23 = vld [vmem:[%s10223_s1 + $0x320] sm:$0xff]   ;;  %v7906_v25 = vld [vmem:[%s10223_s1 + $0x368] sm:$0xff]   ;;  %v7922_v29 = vld [vmem:[%s10223_s1 + $0x370] sm:$0xff]  }
  0xfe   : > { %4108 = vmatmul.mubr.bf16.gmra.mrb[108].mxu0 %v7816_v16  ;;  %4205 = vmatmul.mubr.bf16.gmra.mrb[108].mxu1 %v7817_v17  ;;  %v7907_v28 = vld [vmem:[%s10223_s1 + $0x328] sm:$0xff]  }
  0xff   : > { %4212 = vmatprep.mubr.bf16.mxu1 %v7818_v26  ;;  %4309 = vmatprep.mubr.bf16.mxu0 %v7822_v27 }
 0x101   : > { %v6439_v34 = vpop.f32.mrb[4].mxu1  ;;  %v6367_v35 = vpop.f32.mrb[4].mxu0 }
 0x102   : > { %v6440_v36 = vpop.f32.mrb[5].mxu1  ;;  %v6368_v37 = vpop.f32.mrb[5].mxu0 }
 0x103   : > { %v8693_v38 = vadd.f32 %v6440_v36, %v6439_v34  ;;  %v6442_v39 = vpop.f32.mrb[6].mxu1  ;;  %v8695_v40 = vadd.f32 %v6368_v37, %v6367_v35  ;;  %v6370_v41 = vpop.f32.mrb[6].mxu0 }
 0x104   : > { %v6443_v44 = vpop.f32.mrb[7].mxu1  ;;  %v6371_v45 = vpop.f32.mrb[7].mxu0 }
 0x105   : > { %v8705_v48 = vadd.f32 %v6443_v44, %v6442_v39  ;;  %v8707_v49 = vadd.f32 %v6371_v45, %v6370_v41  ;;  %v7850_v44 = vld [vmem:[%s8300_s13 + $0x7fc] ss:$84 sps:$4 sm:$0xff]   ;;  %v7852_v45 = vld [vmem:[%s8300_s13 + $0x2c4] ss:$84 sps:$4 sm:$0xff]  }
 0x106   : > { %4213 = vmatmul.mubr.bf16.gmra.mrb[112].mxu1 %v7823_v33  ;;  %4310 = vmatmul.mubr.bf16.vlgmr.msra.gmra.mrb[112].mxu0 %v7820_v32  ;;  %v7848_v32 = vld [vmem:[%s8300_s13 + $0x750] ss:$84 sps:$4 sm:$0xff]   ;;  %v7849_v33 = vld [vmem:[%s8300_s13 + $0x218] ss:$84 sps:$4 sm:$0xff]  }
 0x107   : > { %7018 = vmatpush3.bf16.msra.mxu0 %v7827_v42  ;;  %4220 = vmatprep.mubr.bf16.mxu1 %v7828_v43 }
 0x108   : > { %4317 = vmatprep.mubr.bf16.mxu0 %v7830_v46  ;;  %7019 = vmatprep.subr.bf16.mxu0 %v7842_v47 }
 0x109   : > { %v6445_v54 = vpop.f32.mrb[8].mxu1  ;;  %v6373_v55 = vpop.f32.mrb[8].mxu0 }
 0x10a   : > { %v6446_v56 = vpop.f32.mrb[9].mxu1  ;;  %v6374_v57 = vpop.f32.mrb[9].mxu0 }
 0x10b   : > { %v8717_v58 = vadd.f32 %v6446_v56, %v6445_v54  ;;  %v6448_v59 = vpop.f32.mrb[10].mxu1  ;;  %v8719_v60 = vadd.f32 %v6374_v57, %v6373_v55  ;;  %v6376_v61 = vpop.f32.mrb[10].mxu0  ;;  %7020 = vmatpush3.bf16.msra.mxu0 %v7843_v50  ;;  %v7923_v50 = vld [vmem:[%s10223_s1 + $0x330] sm:$0xff]   ;;  %v7938_v54 = vld [vmem:[%s10223_s1 + $0x378] sm:$0xff]  }
 0x10c   : > { %v6449_v0 = vpop.f32.mrb[11].mxu1  ;;  %v6377_v1 = vpop.f32.mrb[11].mxu0  ;;  %7021 = vmatprep.subr.bf16.mxu0 %v7858_v51  ;;  %v7939_v55 = vld [vmem:[%s10223_s1 + $0x338] sm:$0xff]  }
 0x10d   : > { %v8726_v3 = vadd.f32 %v6449_v0, %v6448_v59  ;;  %v8728_v4 = vadd.f32 %v6377_v1, %v6376_v61  ;;  %v7854_v57 = vld [vmem:[%s8300_s13 + $0x7f8] ss:$84 sps:$4 sm:$0xff]   ;;  %v7855_v59 = vld [vmem:[%s8300_s13 + $0x2c0] ss:$84 sps:$4 sm:$0xff]  }
 0x10e   : > { %4221 = vmatmul.mubr.bf16.gmra.mrb[116].mxu1 %v7832_v52  ;;  %4318 = vmatmul.mubr.bf16.gmra.mrb[116].mxu0 %v7833_v53 }
 0x10f   : > { %4228 = vmatprep.mubr.bf16.mxu1 %v7834_v62  ;;  %4325 = vmatprep.mubr.bf16.mxu0 %v7836_v63 }
 0x110   : > { %7022 = vmatpush3.bf16.msra.mxu0 %v7859_v2 }
 0x111   : > { %v6451_v10 = vpop.f32.mrb[12].mxu1  ;;  %v6379_v11 = vpop.f32.mrb[12].mxu0  ;;  %7023 = vmatprep.subr.bf16.mxu0 %v7874_v5 }
 0x112   : > { %v6452_v12 = vpop.f32.mrb[13].mxu1  ;;  %v6380_v13 = vpop.f32.mrb[13].mxu0 }
 0x113   : > { %v8741_v14 = vadd.f32 %v6452_v12, %v6451_v10  ;;  %v6454_v15 = vpop.f32.mrb[14].mxu1  ;;  %v8743_v16 = vadd.f32 %v6380_v13, %v6379_v11  ;;  %v6382_v17 = vpop.f32.mrb[14].mxu0 }
 0x114   : > { %v6455_v20 = vpop.f32.mrb[15].mxu1  ;;  %v6383_v21 = vpop.f32.mrb[15].mxu0  ;;  %7024 = vmatpush3.bf16.msra.mxu0 %v7875_v6  ;;  %v7860_v6 = vld [vmem:[%s8300_s13 + $0x8a4] ss:$84 sps:$4 sm:$0xff]  }
 0x115   : > { %v8753_v26 = vadd.f32 %v6455_v20, %v6454_v15  ;;  %v8755_v27 = vadd.f32 %v6383_v21, %v6382_v17  ;;  %7025 = vmatprep.subr.bf16.mxu0 %v7890_v7  ;;  %v7862_v7 = vld [vmem:[%s8300_s13 + $0x36c] ss:$84 sps:$4 sm:$0xff]   ;;  %v7865_v17 = vld [vmem:[%s8300_s13 + $0x368] ss:$84 sps:$4 sm:$0xff]  }
 0x116   : > { %4229 = vmatmul.mubr.bf16.gmra.mrb[120].mxu1 %v7838_v8  ;;  %4326 = vmatmul.mubr.bf16.gmra.mrb[120].mxu0 %v7839_v9  ;;  %v7864_v15 = vld [vmem:[%s8300_s13 + $0x8a0] ss:$84 sps:$4 sm:$0xff]  }
 0x117   : > { %4236 = vmatprep.mubr.bf16.mxu1 %v7844_v18  ;;  %4333 = vmatprep.mubr.bf16.mxu0 %v7846_v19 }
 0x118   : > { %7026 = vmatpush3.bf16.msra.mxu0 %v7891_v23 }
 0x119   : > { %v6473_v34 = vpop.f32.mrb[16].mxu1  ;;  %v6385_v35 = vpop.f32.mrb[16].mxu0  ;;  %7027 = vmatprep.subr.bf16.mxu0 %v7906_v25 }
 0x11a   : > { %v6474_v36 = vpop.f32.mrb[17].mxu1  ;;  %v6386_v37 = vpop.f32.mrb[17].mxu0 }
 0x11b   : > { %v6475_v39 = vadd.f32 %v6474_v36, %v6473_v34  ;;  %v6476_v41 = vpop.f32.mrb[18].mxu1  ;;  %v8765_v42 = vadd.f32 %v6386_v37, %v6385_v35  ;;  %v6388_v43 = vpop.f32.mrb[18].mxu0 }
 0x11c   : > { %v6477_v46 = vpop.f32.mrb[19].mxu1  ;;  %v6389_v47 = vpop.f32.mrb[19].mxu0  ;;  %7028 = vmatpush3.bf16.msra.mxu0 %v7907_v28 }
 0x11d   : > { %v8773_v51 = vadd.f32 %v6475_v39, %v8683_v24  ;;  %v6478_v52 = vadd.f32 %v6477_v46, %v6476_v41  ;;  %v8775_v53 = vadd.f32 %v6389_v47, %v6388_v43  ;;  %7029 = vmatprep.subr.bf16.mxu0 %v7922_v29  ;;  %v7954_v24 = vld [vmem:[%s10223_s1 + $0x440] sm:$0xff]   ;;  %v7870_v39 = vld [vmem:[%s8300_s13 + $0x948] ss:$84 sps:$4 sm:$0xff]  }
 0x11e   : > { %4237 = vmatmul.mubr.bf16.gmra.mrb[124].mxu1 %v7848_v32  ;;  %4334 = vmatmul.mubr.bf16.gmra.mrb[124].mxu0 %v7849_v33  ;;  %v7866_v29 = vld [vmem:[%s8300_s13 + $0x94c] ss:$84 sps:$4 sm:$0xff]   ;;  %v7868_v32 = vld [vmem:[%s8300_s13 + $0x414] ss:$84 sps:$4 sm:$0xff]   ;;  %v7871_v41 = vld [vmem:[%s8300_s13 + $0x410] ss:$84 sps:$4 sm:$0xff]  }
 0x11f   : > { %v8784_v56 = vadd.f32 %v6478_v52, %v8689_v31  ;;  %4244 = vmatprep.mubr.bf16.mxu1 %v7850_v44  ;;  %4341 = vmatprep.mubr.bf16.mxu0 %v7852_v45 }
 0x120   : > { %7030 = vmatpush3.bf16.msra.mxu0 %v7923_v50 }
 0x121   : > { %v6479_v61 = vpop.f32.mrb[20].mxu1  ;;  %v6391_v62 = vpop.f32.mrb[20].mxu0  ;;  %7031 = vmatprep.subr.bf16.mxu0 %v7938_v54  ;;  %v7876_v54 = vld [vmem:[%s8300_s13 + $0x9f4] ss:$84 sps:$4 sm:$0xff]  }
 0x122   : > { %v6480_v63 = vpop.f32.mrb[21].mxu1  ;;  %v6392_v0 = vpop.f32.mrb[21].mxu0 }
 0x123   : > { %v6481_v1 = vadd.f32 %v6480_v63, %v6479_v61  ;;  %v6482_v2 = vpop.f32.mrb[22].mxu1  ;;  %v8791_v31 = vadd.f32 %v6392_v0, %v6391_v62  ;;  %v6394_v5 = vpop.f32.mrb[22].mxu0  ;;  %v7880_v63 = vld [vmem:[%s8300_s13 + $0x9f0] ss:$84 sps:$4 sm:$0xff]   ;;  %v7881_v0 = vld [vmem:[%s8300_s13 + $0x4b8] ss:$84 sps:$4 sm:$0xff]  }
 0x124   : > { %v6483_v8 = vpop.f32.mrb[23].mxu1  ;;  %v6395_v9 = vpop.f32.mrb[23].mxu0  ;;  %7032 = vmatpush3.bf16.msra.mxu0 %v7939_v55  ;;  %v7878_v55 = vld [vmem:[%s8300_s13 + $0x4bc] ss:$84 sps:$4 sm:$0xff]  }
 0x125   : > { %v8796_v10 = vadd.f32 %v6481_v1, %v8695_v40  ;;  %v6484_v11 = vadd.f32 %v6483_v8, %v6482_v2  ;;  %v8798_v12 = vadd.f32 %v6395_v9, %v6394_v5  ;;  %7241 = vmatprep.subr.bf16.mxu0 %v7954_v24 }
 0x126   : > { %4245 = vmatmul.mubr.bf16.gmra.mrb[128].mxu1 %v7854_v57  ;;  %4342 = vmatmul.mubr.bf16.gmra.mrb[128].mxu0 %v7855_v59 }
 0x127   : > { %v8801_v13 = vadd.f32 %v6484_v11, %v8707_v49  ;;  %4252 = vmatprep.mubr.bf16.mxu1 %v7860_v6  ;;  %4349 = vmatprep.mubr.bf16.mxu0 %v7862_v7  ;;  %v7882_v11 = vld [vmem:[%s8300_s13 + $0x564] ss:$84 sps:$4 sm:$0xff]  }
 0x129   : > { %v6485_v18 = vpop.f32.mrb[24].mxu1  ;;  %v6397_v19 = vpop.f32.mrb[24].mxu0 }
 0x12a   : > { %v6486_v20 = vpop.f32.mrb[25].mxu1  ;;  %v6398_v40 = vpop.f32.mrb[25].mxu0 }
 0x12b   : > { %v6487_v21 = vadd.f32 %v6486_v20, %v6485_v18  ;;  %v6488_v23 = vpop.f32.mrb[26].mxu1  ;;  %v8805_v25 = vadd.f32 %v6398_v40, %v6397_v19  ;;  %v6400_v28 = vpop.f32.mrb[26].mxu0 }
 0x12c   : > { %v6489_v33 = vpop.f32.mrb[27].mxu1  ;;  %v6401_v49 = vpop.f32.mrb[27].mxu0 }
 0x12d   : > { %v8810_v34 = vadd.f32 %v6487_v21, %v8719_v60  ;;  %v6490_v35 = vadd.f32 %v6489_v33, %v6488_v23  ;;  %v8812_v36 = vadd.f32 %v6401_v49, %v6400_v28  ;;  %v7884_v21 = vld [vmem:[%s8300_s13 + $0x28] ss:$84 sps:$4 sm:$0xff]   ;;  %v7887_v23 = vld [vmem:[%s8300_s13 + $0x560] ss:$84 sps:$4 sm:$0xff]  }
 0x12e   : > { %4253 = vmatmul.mubr.bf16.gmra.mrb[132].mxu1 %v7864_v15  ;;  %4350 = vmatmul.mubr.bf16.gmra.mrb[132].mxu0 %v7865_v17  ;;  %v7886_v15 = vld [vmem:[%s8300_s13 + $0x2c] ss:$84 sps:$4 sm:$0xff]  }
 0x12f   : > { %v8815_v37 = vadd.f32 %v6490_v35, %v8728_v4  ;;  %4260 = vmatprep.mubr.bf16.mxu1 %v7866_v29  ;;  %4357 = vmatprep.mubr.bf16.mxu0 %v7868_v32 }
 0x131   : > { %v6491_v43 = vpop.f32.mrb[28].mxu1  ;;  %v6403_v44 = vpop.f32.mrb[28].mxu0 }
 0x132   : > { %v6492_v45 = vpop.f32.mrb[29].mxu1  ;;  %v6404_v46 = vpop.f32.mrb[29].mxu0 }
 0x133   : > { %v6493_v60 = vadd.f32 %v6492_v45, %v6491_v43  ;;  %v6494_v47 = vpop.f32.mrb[30].mxu1  ;;  %v8819_v50 = vadd.f32 %v6404_v46, %v6403_v44  ;;  %v6406_v52 = vpop.f32.mrb[30].mxu0  ;;  %v7894_v45 = vld [vmem:[%s8300_s13 + $0xd4] ss:$84 sps:$4 sm:$0xff]  }
 0x134   : > { %v6495_v24 = vpop.f32.mrb[31].mxu1  ;;  %v6407_v4 = vpop.f32.mrb[31].mxu0  ;;  %v7904_v46 = vld [vmem:[%s10223_s1 + $0x3c8] sm:$0xff]  }
 0x135   : > { %v8824_v57 = vadd.f32 %v6493_v60, %v8743_v16  ;;  %v6496_v59 = vadd.f32 %v6495_v24, %v6494_v47  ;;  %v8826_v61 = vadd.f32 %v6407_v4, %v6406_v52  ;;  %v7896_v24 = vld [vmem:[%s8300_s13 + $0x608] ss:$84 sps:$4 sm:$0xff]   ;;  %v7897_v4 = vld [vmem:[%s8300_s13 + $0xd0] ss:$84 sps:$4 sm:$0xff]  }
 0x136   : > { %4261 = vmatmul.mubr.bf16.gmra.mrb[136].mxu1 %v7870_v39  ;;  %4358 = vmatmul.mubr.bf16.gmra.mrb[136].mxu0 %v7871_v41  ;;  %v7889_v41 = vld [vmem:[%s10223_s1 + $0x380] sm:$0xff]  }
 0x137   : > { %v8829_v62 = vadd.f32 %v6496_v59, %v8755_v27  ;;  %4268 = vmatprep.mubr.bf16.mxu1 %v7876_v54  ;;  %4365 = vmatprep.mubr.bf16.mxu0 %v7878_v55  ;;  %v7905_v55 = vld [vmem:[%s10223_s1 + $0x388] sm:$0xff]  }
 0x139   : > { %v6497_v1 = vpop.f32.mrb[32].mxu1  ;;  %v6409_v2 = vpop.f32.mrb[32].mxu0 }
 0x13a   : > { %v6498_v5 = vpop.f32.mrb[33].mxu1  ;;  %v6410_v6 = vpop.f32.mrb[33].mxu0 }
 0x13b   : > { %v6499_v16 = vadd.f32 %v6498_v5, %v6497_v1  ;;  %v6500_v7 = vpop.f32.mrb[34].mxu1  ;;  %v8833_v8 = vadd.f32 %v6410_v6, %v6409_v2  ;;  %v6412_v9 = vpop.f32.mrb[34].mxu0 }
 0x13c   : > { %v6501_v17 = vpop.f32.mrb[35].mxu1  ;;  %v6413_v27 = vpop.f32.mrb[35].mxu0 }
 0x13d   : > { %v8838_v18 = vadd.f32 %v6499_v16, %v8765_v42  ;;  %v6502_v19 = vadd.f32 %v6501_v17, %v6500_v7  ;;  %v8840_v20 = vadd.f32 %v6413_v27, %v6412_v9  ;;  %v7898_v16 = vld [vmem:[%s8300_s13 + $0x6b4] ss:$84 sps:$4 sm:$0xff]   ;;  %v7900_v7 = vld [vmem:[%s8300_s13 + $0x17c] ss:$84 sps:$4 sm:$0xff]  }
 0x13e   : > { %4269 = vmatmul.mubr.bf16.gmra.mrb[140].mxu1 %v7880_v63  ;;  %4366 = vmatmul.mubr.bf16.gmra.mrb[140].mxu0 %v7881_v0 }
 0x13f   : > { %v8843_v40 = vadd.f32 %v6502_v19, %v8775_v53  ;;  %4373 = vmatprep.mubr.bf16.mxu0 %v7882_v11  ;;  %4470 = vmatprep.mubr.bf16.mxu1 %v7886_v15  ;;  %v7892_v53 = vld [vmem:[%s8300_s13 + $0x60c] ss:$84 sps:$4 sm:$0xff]   ;;  %v7921_v15 = vld [vmem:[%s10223_s1 + $0x390] sm:$0xff]  }
 0x141   : > { %v6503_v28 = vpop.f32.mrb[36].mxu1  ;;  %v6415_v29 = vpop.f32.mrb[36].mxu0 }
 0x142   : > { %v6504_v32 = vpop.f32.mrb[37].mxu1  ;;  %v6416_v33 = vpop.f32.mrb[37].mxu0 }
 0x143   : > { %v6505_v42 = vadd.f32 %v6504_v32, %v6503_v28  ;;  %v6506_v49 = vpop.f32.mrb[38].mxu1  ;;  %v8847_v35 = vadd.f32 %v6416_v33, %v6415_v29  ;;  %v6418_v39 = vpop.f32.mrb[38].mxu0  ;;  %v7902_v29 = vld [vmem:[%s8300_s13 + $0x6b0] ss:$84 sps:$4 sm:$0xff]   ;;  %v7903_v32 = vld [vmem:[%s8300_s13 + $0x178] ss:$84 sps:$4 sm:$0xff]  }
 0x144   : > { %v6507_v43 = vpop.f32.mrb[39].mxu1  ;;  %v6419_v44 = vpop.f32.mrb[39].mxu0 }
 0x145   : > { %v8858_v60 = vadd.f32 %v6505_v42, %v8791_v31  ;;  %v6508_v47 = vadd.f32 %v6507_v43, %v6506_v49  ;;  %v8860_v52 = vadd.f32 %v6419_v44, %v6418_v39  ;;  %v7920_v31 = vld [vmem:[%s10223_s1 + $0x3d0] sm:$0xff]  }
 0x146   : > { %4374 = vmatmul.mubr.bf16.gmra.mrb[144].mxu0 %v7887_v23  ;;  %4471 = vmatmul.mubr.bf16.vlgmr.msra.gmra.mrb[144].mxu1 %v7884_v21  ;;  %v7936_v21 = vld [vmem:[%s10223_s1 + $0x3d8] sm:$0xff]  }
 0x147   : > { %v8863_v54 = vadd.f32 %v6508_v47, %v8798_v12  ;;  %7130 = vmatpush3.bf16.msra.mxu1 %v7889_v41  ;;  %4381 = vmatprep.mubr.bf16.mxu0 %v7892_v53  ;;  %v7937_v23 = vld [vmem:[%s10223_s1 + $0x398] sm:$0xff]  }
 0x148   : > { %4478 = vmatprep.mubr.bf16.mxu1 %v7894_v45  ;;  %7131 = vmatprep.subr.bf16.mxu1 %v7904_v46  ;;  %v7908_v44 = vld [vmem:[%s8300_s13 + $0x75c] ss:$84 sps:$4 sm:$0xff]   ;;  %v7910_v45 = vld [vmem:[%s8300_s13 + $0x224] ss:$84 sps:$4 sm:$0xff]  }
 0x149   : > { %v6509_v59 = vpop.f32.mrb[40].mxu1  ;;  %v6421_v63 = vpop.f32.mrb[40].mxu0 }
 0x14a   : > { %v6510_v12 = vpop.f32.mrb[41].mxu1  ;;  %v6422_v0 = vpop.f32.mrb[41].mxu0 }
 0x14b   : > { %v6511_v1 = vadd.f32 %v6510_v12, %v6509_v59  ;;  %v6512_v2 = vpop.f32.mrb[42].mxu1  ;;  %v8873_v5 = vadd.f32 %v6422_v0, %v6421_v63  ;;  %v6424_v6 = vpop.f32.mrb[42].mxu0  ;;  %7132 = vmatpush3.bf16.msra.mxu1 %v7905_v55  ;;  %v7953_v55 = vld [vmem:[%s10223_s1 + $0x3a0] sm:$0xff]   ;;  %v7969_v12 = vld [vmem:[%s10223_s1 + $0x3a8] sm:$0xff]  }
 0x14c   : > { %v6513_v9 = vpop.f32.mrb[43].mxu1  ;;  %v6425_v11 = vpop.f32.mrb[43].mxu0  ;;  %7133 = vmatprep.subr.bf16.mxu1 %v7920_v31  ;;  %v7968_v31 = vld [vmem:[%s10223_s1 + $0x3e8] sm:$0xff]  }
 0x14d   : > { %v8881_v17 = vadd.f32 %v6511_v1, %v8805_v25  ;;  %v6514_v27 = vadd.f32 %v6513_v9, %v6512_v2  ;;  %v8883_v19 = vadd.f32 %v6425_v11, %v6424_v6  ;;  %v7952_v25 = vld [vmem:[%s10223_s1 + $0x3e0] sm:$0xff]   ;;  %v7912_v0 = vld [vmem:[%s8300_s13 + $0x758] ss:$84 sps:$4 sm:$0xff]  }
 0x14e   : > { %4382 = vmatmul.mubr.bf16.gmra.mrb[148].mxu0 %v7896_v24  ;;  %4479 = vmatmul.mubr.bf16.gmra.mrb[148].mxu1 %v7897_v4  ;;  %v7913_v1 = vld [vmem:[%s8300_s13 + $0x220] ss:$84 sps:$4 sm:$0xff]  }
 0x14f   : > { %v8892_v28 = vadd.f32 %v6514_v27, %v8812_v36  ;;  %4389 = vmatprep.mubr.bf16.mxu0 %v7898_v16  ;;  %4486 = vmatprep.mubr.bf16.mxu1 %v7900_v7  ;;  %v7914_v27 = vld [vmem:[%s8300_s13 + $0x804] ss:$84 sps:$4 sm:$0xff]  }
 0x150   : > { %7134 = vmatpush3.bf16.msra.mxu1 %v7921_v15 }
 0x151   : > { %v6515_v33 = vpop.f32.mrb[44].mxu1  ;;  %v6427_v42 = vpop.f32.mrb[44].mxu0  ;;  %7135 = vmatprep.subr.bf16.mxu1 %v7936_v21  ;;  %v7916_v21 = vld [vmem:[%s8300_s13 + $0x2cc] ss:$84 sps:$4 sm:$0xff]  }
 0x152   : > { %v6516_v49 = vpop.f32.mrb[45].mxu1  ;;  %v6428_v39 = vpop.f32.mrb[45].mxu0 }
 0x153   : > { %v6517_v41 = vadd.f32 %v6516_v49, %v6515_v33  ;;  %v6518_v53 = vpop.f32.mrb[46].mxu1  ;;  %v8899_v36 = vadd.f32 %v6428_v39, %v6427_v42  ;;  %v6430_v43 = vpop.f32.mrb[46].mxu0  ;;  %v8000_v39 = vld [vmem:[%s10223_s1 + $0x3f8] sm:$0xff]  }
 0x154   : > { %v6519_v46 = vpop.f32.mrb[47].mxu1  ;;  %v6431_v47 = vpop.f32.mrb[47].mxu0  ;;  %7136 = vmatpush3.bf16.msra.mxu1 %v7937_v23 }
 0x155   : > { %v8910_v24 = vadd.f32 %v6517_v41, %v8819_v50  ;;  %v6520_v4 = vadd.f32 %v6519_v46, %v6518_v53  ;;  %v8912_v59 = vadd.f32 %v6431_v47, %v6430_v43  ;;  %7137 = vmatprep.subr.bf16.mxu1 %v7952_v25  ;;  %v7984_v50 = vld [vmem:[%s10223_s1 + $0x3f0] sm:$0xff]   ;;  %v8001_v41 = vld [vmem:[%s10223_s1 + $0x3b8] sm:$0xff]   ;;  %v8016_v53 = vld [vmem:[%s10223_s1 + $0x4c0] sm:$0xff]  }
 0x156   : > { %4390 = vmatmul.mubr.bf16.gmra.mrb[152].mxu0 %v7902_v29  ;;  %4487 = vmatmul.mubr.bf16.gmra.mrb[152].mxu1 %v7903_v32  ;;  %v7985_v29 = vld [vmem:[%s10223_s1 + $0x3b0] sm:$0xff]  }
 0x157   : > { %v8915_v63 = vadd.f32 %v6520_v4, %v8826_v61  ;;  %4397 = vmatprep.mubr.bf16.mxu0 %v7908_v44  ;;  %4494 = vmatprep.mubr.bf16.mxu1 %v7910_v45  ;;  %v7918_v43 = vld [vmem:[%s8300_s13 + $0x800] ss:$84 sps:$4 sm:$0xff]   ;;  %v7919_v44 = vld [vmem:[%s8300_s13 + $0x2c8] ss:$84 sps:$4 sm:$0xff]  }
 0x158   : > { %7138 = vmatpush3.bf16.msra.mxu1 %v7953_v55 }
 0x159   : > { %v6521_v2 = vpop.f32.mrb[48].mxu1  ;;  %v6585_v6 = vpop.f32.mrb[48].mxu0  ;;  %7139 = vmatprep.subr.bf16.mxu1 %v7968_v31 }
 0x15a   : > { %v6522_v61 = vpop.f32.mrb[49].mxu1  ;;  %v6586_v16 = vpop.f32.mrb[49].mxu0 }
 0x15b   : > { %v6523_v7 = vadd.f32 %v6522_v61, %v6521_v2  ;;  %v6587_v9 = vadd.f32 %v6586_v16, %v6585_v6  ;;  %v6524_v11 = vpop.f32.mrb[50].mxu1  ;;  %v6588_v15 = vpop.f32.mrb[50].mxu0 }
 0x15c   : > { %v6525_v23 = vpop.f32.mrb[51].mxu1  ;;  %v6589_v25 = vpop.f32.mrb[51].mxu0  ;;  %7140 = vmatpush3.bf16.msra.mxu1 %v7969_v12 }
 0x15d   : > { %v6526_v32 = vadd.f32 %v6525_v23, %v6524_v11  ;;  %v6590_v33 = vadd.f32 %v6589_v25, %v6588_v15  ;;  %v8931_v42 = vadd.f32 %v6523_v7, %v8833_v8  ;;  %v8934_v49 = vadd.f32 %v6587_v9, %v8773_v51  ;;  %7141 = vmatprep.subr.bf16.mxu1 %v7984_v50  ;;  %v7924_v50 = vld [vmem:[%s8300_s13 + $0x8ac] ss:$84 sps:$4 sm:$0xff]   ;;  %v7928_v11 = vld [vmem:[%s8300_s13 + $0x8a8] ss:$84 sps:$4 sm:$0xff]   ;;  %v7929_v15 = vld [vmem:[%s8300_s13 + $0x370] ss:$84 sps:$4 sm:$0xff]  }
 0x15e   : > { %4398 = vmatmul.mubr.bf16.gmra.mrb[156].mxu0 %v7912_v0  ;;  %4495 = vmatmul.mubr.bf16.gmra.mrb[156].mxu1 %v7913_v1 }
 0x15f   : > { %4405 = vmatprep.mubr.bf16.mxu0 %v7914_v27  ;;  %4502 = vmatprep.mubr.bf16.mxu1 %v7916_v21  ;;  %v8943_v8 = vadd.f32 %v6526_v32, %v8840_v20  ;;  %v8946_v51 = vadd.f32 %v6590_v33, %v8784_v56  ;;  %v7926_v56 = vld [vmem:[%s8300_s13 + $0x374] ss:$84 sps:$4 sm:$0xff]  }
 0x160   : > { %7142 = vmatpush3.bf16.msra.mxu1 %v7985_v29  ;;  %v7930_v33 = vld [vmem:[%s8300_s13 + $0x954] ss:$84 sps:$4 sm:$0xff]  }
 0x161   : > { %v6527_v45 = vpop.f32.mrb[52].mxu1  ;;  %v6591_v46 = vpop.f32.mrb[52].mxu0  ;;  %7143 = vmatprep.subr.bf16.mxu1 %v8000_v39  ;;  %v7932_v39 = vld [vmem:[%s8300_s13 + $0x41c] ss:$84 sps:$4 sm:$0xff]  }
 0x162   : > { %v6528_v47 = vpop.f32.mrb[53].mxu1  ;;  %v6592_v55 = vpop.f32.mrb[53].mxu0 }
 0x163   : > { %v6529_v31 = vadd.f32 %v6528_v47, %v6527_v45  ;;  %v6593_v4 = vadd.f32 %v6592_v55, %v6591_v46  ;;  %v6530_v20 = vpop.f32.mrb[54].mxu1  ;;  %v6594_v12 = vpop.f32.mrb[54].mxu0  ;;  %v7934_v47 = vld [vmem:[%s8300_s13 + $0x950] ss:$84 sps:$4 sm:$0xff]   ;;  %v7935_v55 = vld [vmem:[%s8300_s13 + $0x418] ss:$84 sps:$4 sm:$0xff]  }
 0x164   : > { %v6531_v0 = vpop.f32.mrb[55].mxu1  ;;  %v6595_v1 = vpop.f32.mrb[55].mxu0  ;;  %7144 = vmatpush3.bf16.msra.mxu1 %v8001_v41 }
 0x165   : > { %v6532_v2 = vadd.f32 %v6531_v0, %v6530_v20  ;;  %v6596_v6 = vadd.f32 %v6595_v1, %v6594_v12  ;;  %v8956_v61 = vadd.f32 %v6529_v31, %v8847_v35  ;;  %v8959_v16 = vadd.f32 %v6593_v4, %v8796_v10  ;;  %7353 = vmatprep.subr.bf16.mxu1 %v8016_v53  ;;  %v7940_v0 = vld [vmem:[%s8300_s13 + $0x9fc] ss:$84 sps:$4 sm:$0xff]   ;;  %v7942_v1 = vld [vmem:[%s8300_s13 + $0x4c4] ss:$84 sps:$4 sm:$0xff]  }
 0x166   : > { %4406 = vmatmul.mubr.bf16.gmra.mrb[160].mxu0 %v7918_v43  ;;  %4503 = vmatmul.mubr.bf16.gmra.mrb[160].mxu1 %v7919_v44 }
 0x167   : > { %4413 = vmatprep.mubr.bf16.mxu0 %v7924_v50  ;;  %4510 = vmatprep.mubr.bf16.mxu1 %v7926_v56  ;;  %v8962_v7 = vadd.f32 %v6532_v2, %v8860_v52  ;;  %v8965_v9 = vadd.f32 %v6596_v6, %v8801_v13 }
 0x169   : > { %v6533_v35 = vpop.f32.mrb[56].mxu1  ;;  %v6597_v27 = vpop.f32.mrb[56].mxu0 }
 0x16a   : > { %v6534_v21 = vpop.f32.mrb[57].mxu1  ;;  %v6598_v10 = vpop.f32.mrb[57].mxu0 }
 0x16b   : > { %v6535_v23 = vadd.f32 %v6534_v21, %v6533_v35  ;;  %v6599_v25 = vadd.f32 %v6598_v10, %v6597_v27  ;;  %v6536_v29 = vpop.f32.mrb[58].mxu1  ;;  %v6600_v32 = vpop.f32.mrb[58].mxu0 }
 0x16c   : > { %v6537_v41 = vpop.f32.mrb[59].mxu1  ;;  %v6601_v52 = vpop.f32.mrb[59].mxu0 }
 0x16d   : > { %v6538_v53 = vadd.f32 %v6537_v41, %v6536_v29  ;;  %v6602_v43 = vadd.f32 %v6601_v52, %v6600_v32  ;;  %v8972_v13 = vadd.f32 %v6535_v23, %v8873_v5  ;;  %v8975_v44 = vadd.f32 %v6599_v25, %v8810_v34  ;;  %v7944_v25 = vld [vmem:[%s8300_s13 + $0x9f8] ss:$84 sps:$4 sm:$0xff]   ;;  %v7945_v29 = vld [vmem:[%s8300_s13 + $0x4c0] ss:$84 sps:$4 sm:$0xff]  }
 0x16e   : > { %4414 = vmatmul.mubr.bf16.gmra.mrb[164].mxu0 %v7928_v11  ;;  %4511 = vmatmul.mubr.bf16.gmra.mrb[164].mxu1 %v7929_v15  ;;  %v7946_v41 = vld [vmem:[%s8300_s13 + $0x56c] ss:$84 sps:$4 sm:$0xff]   ;;  %v7950_v52 = vld [vmem:[%s8300_s13 + $0x34] ss:$84 sps:$4 sm:$0xff]  }
 0x16f   : > { %4421 = vmatprep.mubr.bf16.mxu0 %v7930_v33  ;;  %4518 = vmatprep.mubr.bf16.mxu1 %v7932_v39  ;;  %v8978_v45 = vadd.f32 %v6538_v53, %v8883_v19  ;;  %v8981_v46 = vadd.f32 %v6602_v43, %v8815_v37 }
 0x171   : > { %v6539_v31 = vpop.f32.mrb[60].mxu1  ;;  %v6603_v5 = vpop.f32.mrb[60].mxu0 }
 0x172   : > { %v6540_v4 = vpop.f32.mrb[61].mxu1  ;;  %v6604_v20 = vpop.f32.mrb[61].mxu0 }
 0x173   : > { %v6541_v34 = vadd.f32 %v6540_v4, %v6539_v31  ;;  %v6605_v12 = vadd.f32 %v6604_v20, %v6603_v5  ;;  %v6542_v50 = vpop.f32.mrb[62].mxu1  ;;  %v6606_v56 = vpop.f32.mrb[62].mxu0 }
 0x174   : > { %v6543_v2 = vpop.f32.mrb[63].mxu1  ;;  %v6607_v6 = vpop.f32.mrb[63].mxu0 }
 0x175   : > { %v6544_v19 = vadd.f32 %v6543_v2, %v6542_v50  ;;  %v6608_v11 = vadd.f32 %v6607_v6, %v6606_v56  ;;  %v8988_v37 = vadd.f32 %v6541_v34, %v8899_v36  ;;  %v8991_v15 = vadd.f32 %v6605_v12, %v8824_v57  ;;  %v7948_v12 = vld [vmem:[%s8300_s13 + $0x30] ss:$84 sps:$4 sm:$0xff]   ;;  %v7951_v50 = vld [vmem:[%s8300_s13 + $0x568] ss:$84 sps:$4 sm:$0xff]  }
 0x176   : > { %4422 = vmatmul.mubr.bf16.gmra.mrb[168].mxu0 %v7934_v47  ;;  %4519 = vmatmul.mubr.bf16.gmra.mrb[168].mxu1 %v7935_v55  ;;  %v7955_v2 = vld [vmem:[%s10223_s1 + $0x400] sm:$0xff]  }
 0x177   : > { %4429 = vmatprep.mubr.bf16.mxu0 %v7940_v0  ;;  %4526 = vmatprep.mubr.bf16.mxu1 %v7942_v1  ;;  %v8994_v35 = vadd.f32 %v6544_v19, %v8912_v59  ;;  %v8997_v27 = vadd.f32 %v6608_v11, %v8829_v62  ;;  %v7958_v11 = vld [vmem:[%s8300_s13 + $0xdc] ss:$84 sps:$4 sm:$0xff]  }
 0x179   : > { %v6545_v21 = vpop.f32.mrb[64].mxu1  ;;  %v6609_v10 = vpop.f32.mrb[64].mxu0 }
 0x17a   : > { %v6546_v23 = vpop.f32.mrb[65].mxu1  ;;  %v6610_v36 = vpop.f32.mrb[65].mxu0 }
 0x17b   : > { %v6547_v57 = vadd.f32 %v6546_v23, %v6545_v21  ;;  %v6611_v32 = vadd.f32 %v6610_v36, %v6609_v10  ;;  %v6548_v33 = vpop.f32.mrb[66].mxu1  ;;  %v6612_v39 = vpop.f32.mrb[66].mxu0 }
 0x17c   : > { %v6549_v53 = vpop.f32.mrb[67].mxu1  ;;  %v6613_v43 = vpop.f32.mrb[67].mxu0 }
 0x17d   : > { %v6550_v59 = vadd.f32 %v6549_v53, %v6548_v33  ;;  %v6614_v47 = vadd.f32 %v6613_v43, %v6612_v39  ;;  %v9004_v62 = vadd.f32 %v6547_v57, %v8681_v22  ;;  %v9007_v55 = vadd.f32 %v6611_v32, %v8838_v18 }
 0x17e   : > { %4430 = vmatmul.mubr.bf16.gmra.mrb[172].mxu0 %v7944_v25  ;;  %4527 = vmatmul.mubr.bf16.gmra.mrb[172].mxu1 %v7945_v29  ;;  %v7971_v25 = vld [vmem:[%s10223_s1 + $0x408] sm:$0xff]  }
 0x17f   : > { %4534 = vmatprep.mubr.bf16.mxu1 %v7946_v41  ;;  %4631 = vmatprep.mubr.bf16.mxu0 %v7950_v52  ;;  %v9010_v31 = vadd.f32 %v6550_v59, %v8687_v30  ;;  %v9013_v5 = vadd.f32 %v6614_v47, %v8843_v40  ;;  %v7956_v30 = vld [vmem:[%s8300_s13 + $0x614] ss:$84 sps:$4 sm:$0xff]   ;;  %v7960_v41 = vld [vmem:[%s8300_s13 + $0x610] ss:$84 sps:$4 sm:$0xff]   ;;  %v7961_v52 = vld [vmem:[%s8300_s13 + $0xd8] ss:$84 sps:$4 sm:$0xff]  }
 0x180   : > { %v7970_v40 = vld [vmem:[%s10223_s1 + $0x448] sm:$0xff]   ;;  %v7962_v47 = vld [vmem:[%s8300_s13 + $0x6bc] ss:$84 sps:$4 sm:$0xff]  }
 0x181   : > { %v6551_v4 = vpop.f32.mrb[68].mxu1  ;;  %v6615_v20 = vpop.f32.mrb[68].mxu0 }
 0x182   : > { %v6552_v34 = vpop.f32.mrb[69].mxu1  ;;  %v6616_v22 = vpop.f32.mrb[69].mxu0 }
 0x183   : > { %v6553_v18 = vadd.f32 %v6552_v34, %v6551_v4  ;;  %v6617_v56 = vadd.f32 %v6616_v22, %v6615_v20  ;;  %v6554_v0 = vpop.f32.mrb[70].mxu1  ;;  %v6618_v1 = vpop.f32.mrb[70].mxu0  ;;  %v7964_v4 = vld [vmem:[%s8300_s13 + $0x184] ss:$84 sps:$4 sm:$0xff]   ;;  %v7987_v34 = vld [vmem:[%s10223_s1 + $0x410] sm:$0xff]  }
 0x184   : > { %v6555_v6 = vpop.f32.mrb[71].mxu1  ;;  %v6619_v19 = vpop.f32.mrb[71].mxu0 }
 0x185   : > { %v6556_v21 = vadd.f32 %v6555_v6, %v6554_v0  ;;  %v6620_v10 = vadd.f32 %v6619_v19, %v6618_v1  ;;  %v9026_v23 = vadd.f32 %v6553_v18, %v8693_v38  ;;  %v9029_v36 = vadd.f32 %v6617_v56, %v8858_v60  ;;  %v7986_v60 = vld [vmem:[%s10223_s1 + $0x450] sm:$0xff]   ;;  %v7966_v19 = vld [vmem:[%s8300_s13 + $0x6b8] ss:$84 sps:$4 sm:$0xff]  }
 0x186   : > { %4535 = vmatmul.mubr.bf16.gmra.mrb[176].mxu1 %v7951_v50  ;;  %4632 = vmatmul.mubr.bf16.vlgmr.msra.gmra.mrb[176].mxu0 %v7948_v12  ;;  %v8002_v50 = vld [vmem:[%s10223_s1 + $0x458] sm:$0xff]  }
 0x187   : > { %7242 = vmatpush3.bf16.msra.mxu0 %v7955_v2  ;;  %4542 = vmatprep.mubr.bf16.mxu1 %v7956_v30  ;;  %v9035_v29 = vadd.f32 %v6556_v21, %v8705_v48  ;;  %v9038_v38 = vadd.f32 %v6620_v10, %v8863_v54  ;;  %v8018_v30 = vld [vmem:[%s10223_s1 + $0x460] sm:$0xff]  }
 0x188   : > { %4639 = vmatprep.mubr.bf16.mxu0 %v7958_v11  ;;  %7243 = vmatprep.subr.bf16.mxu0 %v7970_v40  ;;  %v7967_v11 = vld [vmem:[%s8300_s13 + $0x180] ss:$84 sps:$4 sm:$0xff]  }
 0x189   : > { %v6557_v57 = vpop.f32.mrb[72].mxu1  ;;  %v6621_v32 = vpop.f32.mrb[72].mxu0 }
 0x18a   : > { %v6558_v33 = vpop.f32.mrb[73].mxu1  ;;  %v6622_v39 = vpop.f32.mrb[73].mxu0 }
 0x18b   : > { %v6559_v53 = vadd.f32 %v6558_v33, %v6557_v57  ;;  %v6623_v43 = vadd.f32 %v6622_v39, %v6621_v32  ;;  %v6560_v48 = vpop.f32.mrb[74].mxu1  ;;  %v6624_v59 = vpop.f32.mrb[74].mxu0  ;;  %7244 = vmatpush3.bf16.msra.mxu0 %v7971_v25  ;;  %v7972_v25 = vld [vmem:[%s8300_s13 + $0x764] ss:$84 sps:$4 sm:$0xff]  }
 0x18c   : > { %v6561_v54 = vpop.f32.mrb[75].mxu1  ;;  %v6625_v20 = vpop.f32.mrb[75].mxu0  ;;  %7245 = vmatprep.subr.bf16.mxu0 %v7986_v60  ;;  %v7974_v60 = vld [vmem:[%s8300_s13 + $0x22c] ss:$84 sps:$4 sm:$0xff]  }
 0x18d   : > { %v6562_v22 = vadd.f32 %v6561_v54, %v6560_v48  ;;  %v6626_v12 = vadd.f32 %v6625_v20, %v6624_v59  ;;  %v9054_v18 = vadd.f32 %v6559_v53, %v8717_v58  ;;  %v9057_v56 = vadd.f32 %v6623_v43, %v8881_v17  ;;  %v8003_v58 = vld [vmem:[%s10223_s1 + $0x418] sm:$0xff]   ;;  %v8019_v33 = vld [vmem:[%s10223_s1 + $0x420] sm:$0xff]   ;;  %v8034_v43 = vld [vmem:[%s10223_s1 + $0x468] sm:$0xff]  }
 0x18e   : > { %4543 = vmatmul.mubr.bf16.gmra.mrb[180].mxu1 %v7960_v41  ;;  %4640 = vmatmul.mubr.bf16.gmra.mrb[180].mxu0 %v7961_v52  ;;  %v7976_v20 = vld [vmem:[%s8300_s13 + $0x760] ss:$84 sps:$4 sm:$0xff]  }
 0x18f   : > { %4550 = vmatprep.mubr.bf16.mxu1 %v7962_v47  ;;  %4647 = vmatprep.mubr.bf16.mxu0 %v7964_v4  ;;  %v9060_v0 = vadd.f32 %v6562_v22, %v8726_v3  ;;  %v9063_v1 = vadd.f32 %v6626_v12, %v8892_v28  ;;  %v8050_v4 = vld [vmem:[%s10223_s1 + $0x470] sm:$0xff]  }
 0x190   : > { %7246 = vmatpush3.bf16.msra.mxu0 %v7987_v34  ;;  %v7977_v34 = vld [vmem:[%s8300_s13 + $0x228] ss:$84 sps:$4 sm:$0xff]  }
 0x191   : > { %v6563_v17 = vpop.f32.mrb[76].mxu1  ;;  %v6627_v2 = vpop.f32.mrb[76].mxu0  ;;  %7247 = vmatprep.subr.bf16.mxu0 %v8002_v50 }
 0x192   : > { %v6564_v6 = vpop.f32.mrb[77].mxu1  ;;  %v6628_v3 = vpop.f32.mrb[77].mxu0 }
 0x193   : > { %v6565_v40 = vadd.f32 %v6564_v6, %v6563_v17  ;;  %v6629_v28 = vadd.f32 %v6628_v3, %v6627_v2  ;;  %v6566_v21 = vpop.f32.mrb[78].mxu1  ;;  %v6630_v10 = vpop.f32.mrb[78].mxu0  ;;  %v7980_v17 = vld [vmem:[%s8300_s13 + $0x2d4] ss:$84 sps:$4 sm:$0xff]  }
 0x194   : > { %v6567_v57 = vpop.f32.mrb[79].mxu1  ;;  %v6631_v32 = vpop.f32.mrb[79].mxu0  ;;  %7248 = vmatpush3.bf16.msra.mxu0 %v8003_v58  ;;  %v7978_v58 = vld [vmem:[%s8300_s13 + $0x80c] ss:$84 sps:$4 sm:$0xff]   ;;  %v8051_v6 = vld [vmem:[%s10223_s1 + $0x430] sm:$0xff]  }
 0x195   : > { %v6568_v39 = vadd.f32 %v6567_v57, %v6566_v21  ;;  %v6632_v41 = vadd.f32 %v6631_v32, %v6630_v10  ;;  %7249 = vmatprep.subr.bf16.mxu0 %v8018_v30  ;;  %v9079_v52 = vadd.f32 %v6565_v40, %v8741_v14  ;;  %v9082_v53 = vadd.f32 %v6629_v28, %v8910_v24  ;;  %v8035_v24 = vld [vmem:[%s10223_s1 + $0x428] sm:$0xff]   ;;  %v8066_v28 = vld [vmem:[%s10223_s1 + $0x478] sm:$0xff]   ;;  %v7983_v32 = vld [vmem:[%s8300_s13 + $0x2d0] ss:$84 sps:$4 sm:$0xff]  }
 0x196   : > { %4551 = vmatmul.mubr.bf16.gmra.mrb[184].mxu1 %v7966_v19  ;;  %4648 = vmatmul.mubr.bf16.gmra.mrb[184].mxu0 %v7967_v11  ;;  %v7982_v57 = vld [vmem:[%s8300_s13 + $0x808] ss:$84 sps:$4 sm:$0xff]  }
 0x197   : > { %4558 = vmatprep.mubr.bf16.mxu1 %v7972_v25  ;;  %4655 = vmatprep.mubr.bf16.mxu0 %v7974_v60  ;;  %v9088_v48 = vadd.f32 %v6568_v39, %v8753_v26  ;;  %v9091_v14 = vadd.f32 %v6632_v41, %v8915_v63 }
 0x198   : > { %7250 = vmatpush3.bf16.msra.mxu0 %v8019_v33 }
 0x199   : > { %v6633_v59 = vpop.f32.mrb[80].mxu0  ;;  %v6697_v47 = vpop.f32.mrb[80].mxu1  ;;  %7251 = vmatprep.subr.bf16.mxu0 %v8034_v43 }
 0x19a   : > { %v6634_v54 = vpop.f32.mrb[81].mxu0  ;;  %v6698_v26 = vpop.f32.mrb[81].mxu1 }
 0x19b   : > { %v6635_v22 = vadd.f32 %v6634_v54, %v6633_v59  ;;  %v6699_v63 = vadd.f32 %v6698_v26, %v6697_v47  ;;  %v6636_v12 = vpop.f32.mrb[82].mxu0  ;;  %v6700_v50 = vpop.f32.mrb[82].mxu1  ;;  %v7990_v59 = vld [vmem:[%s8300_s13 + $0x37c] ss:$84 sps:$4 sm:$0xff]  }
 0x19c   : > { %v6637_v2 = vpop.f32.mrb[83].mxu0  ;;  %v6701_v30 = vpop.f32.mrb[83].mxu1  ;;  %7252 = vmatpush3.bf16.msra.mxu0 %v8035_v24  ;;  %v7988_v24 = vld [vmem:[%s8300_s13 + $0x8b4] ss:$84 sps:$4 sm:$0xff]  }
 0x19d   : > { %v9107_v3 = vadd.f32 %v6635_v22, %v8931_v42  ;;  %v9110_v19 = vadd.f32 %v6699_v63, %v8934_v49  ;;  %v6638_v11 = vadd.f32 %v6637_v2, %v6636_v12  ;;  %v6702_v40 = vadd.f32 %v6701_v30, %v6700_v50  ;;  %7253 = vmatprep.subr.bf16.mxu0 %v8050_v4  ;;  %v8067_v49 = vld [vmem:[%s10223_s1 + $0x438] sm:$0xff]  }
 0x19e   : > { %4559 = vmatmul.mubr.bf16.gmra.mrb[188].mxu1 %v7976_v20  ;;  %4656 = vmatmul.mubr.bf16.gmra.mrb[188].mxu0 %v7977_v34 }
 0x19f   : > { %v9116_v21 = vadd.f32 %v6638_v11, %v8943_v8  ;;  %v9119_v42 = vadd.f32 %v6702_v40, %v8946_v51  ;;  %4566 = vmatprep.mubr.bf16.mxu1 %v7978_v58  ;;  %4663 = vmatprep.mubr.bf16.mxu0 %v7980_v17  ;;  %v9127_v8 = vld [vmem:[%s10223_s1 + $0x500] sm:$0xff]   ;;  %v7993_v17 = vld [vmem:[%s8300_s13 + $0x378] ss:$84 sps:$4 sm:$0xff]   ;;  %v7994_v40 = vld [vmem:[%s8300_s13 + $0x95c] ss:$84 sps:$4 sm:$0xff]  }
 0x1a0   : > { %7254 = vmatpush3.bf16.msra.mxu0 %v8051_v6  ;;  %v7992_v58 = vld [vmem:[%s8300_s13 + $0x8b0] ss:$84 sps:$4 sm:$0xff]  }
 0x1a1   : > { %v6639_v10 = vpop.f32.mrb[84].mxu0  ;;  %v6703_v25 = vpop.f32.mrb[84].mxu1  ;;  %7255 = vmatprep.subr.bf16.mxu0 %v8066_v28  ;;  %v7996_v28 = vld [vmem:[%s8300_s13 + $0x424] ss:$84 sps:$4 sm:$0xff]  }
 0x1a2   : > { %v6640_v60 = vpop.f32.mrb[85].mxu0  ;;  %v6704_v51 = vpop.f32.mrb[85].mxu1 }
 0x1a3   : > { %v6641_v33 = vadd.f32 %v6640_v60, %v6639_v10  ;;  %v6705_v39 = vadd.f32 %v6704_v51, %v6703_v25  ;;  %v6642_v41 = vpop.f32.mrb[86].mxu0  ;;  %v6706_v43 = vpop.f32.mrb[86].mxu1 }
 0x1a4   : > { %v6643_v47 = vpop.f32.mrb[87].mxu0  ;;  %v6707_v4 = vpop.f32.mrb[87].mxu1  ;;  %7256 = vmatpush3.bf16.msra.mxu0 %v8067_v49 }
 0x1a5   : > { %v9134_v54 = vadd.f32 %v6641_v33, %v8956_v61  ;;  %v9137_v26 = vadd.f32 %v6705_v39, %v8959_v16  ;;  %v6644_v20 = vadd.f32 %v6643_v47, %v6642_v41  ;;  %v6708_v34 = vadd.f32 %v6707_v4, %v6706_v43  ;;  %7489 = vmatprep.subr.bf16.mxu0 %v9127_v8  ;;  %v7999_v41 = vld [vmem:[%s8300_s13 + $0x420] ss:$84 sps:$4 sm:$0xff]   ;;  %v8004_v4 = vld [vmem:[%s8300_s13 + $0xa04] ss:$84 sps:$4 sm:$0xff]  }
 0x1a6   : > { %4567 = vmatmul.mubr.bf16.gmra.mrb[192].mxu1 %v7982_v57  ;;  %4664 = vmatmul.mubr.bf16.gmra.mrb[192].mxu0 %v7983_v32 }
 0x1a7   : > { %v9141_v22 = vadd.f32 %v6644_v20, %v8962_v7  ;;  %v9144_v63 = vadd.f32 %v6708_v34, %v8965_v9  ;;  %4574 = vmatprep.mubr.bf16.mxu1 %v7988_v24  ;;  %4671 = vmatprep.mubr.bf16.mxu0 %v7990_v59  ;;  %v8006_v20 = vld [vmem:[%s8300_s13 + $0x4cc] ss:$84 sps:$4 sm:$0xff]  }
 0x1a9   : > { %v6645_v61 = vpop.f32.mrb[88].mxu0  ;;  %v6709_v12 = vpop.f32.mrb[88].mxu1 }
 0x1aa   : > { %v6646_v16 = vpop.f32.mrb[89].mxu0  ;;  %v6710_v50 = vpop.f32.mrb[89].mxu1 }
 0x1ab   : > { %v6647_v2 = vadd.f32 %v6646_v16, %v6645_v61  ;;  %v6711_v30 = vadd.f32 %v6710_v50, %v6709_v12  ;;  %v6648_v6 = vpop.f32.mrb[90].mxu0  ;;  %v6712_v11 = vpop.f32.mrb[90].mxu1 }
 0x1ac   : > { %v6649_v49 = vpop.f32.mrb[91].mxu0  ;;  %v6713_v7 = vpop.f32.mrb[91].mxu1 }
 0x1ad   : > { %v9151_v9 = vadd.f32 %v6647_v2, %v8972_v13  ;;  %v9154_v10 = vadd.f32 %v6711_v30, %v8975_v44  ;;  %v6650_v25 = vadd.f32 %v6649_v49, %v6648_v6  ;;  %v6714_v60 = vadd.f32 %v6713_v7, %v6712_v11  ;;  %v7998_v44 = vld [vmem:[%s8300_s13 + $0x958] ss:$84 sps:$4 sm:$0xff]   ;;  %v8009_v6 = vld [vmem:[%s8300_s13 + $0x4c8] ss:$84 sps:$4 sm:$0xff]  }
 0x1ae   : > { %4575 = vmatmul.mubr.bf16.gmra.mrb[196].mxu1 %v7992_v58  ;;  %4672 = vmatmul.mubr.bf16.gmra.mrb[196].mxu0 %v7993_v17  ;;  %v8010_v7 = vld [vmem:[%s8300_s13 + $0x574] ss:$84 sps:$4 sm:$0xff]  }
 0x1af   : > { %v9157_v51 = vadd.f32 %v6650_v25, %v8978_v45  ;;  %v9160_v57 = vadd.f32 %v6714_v60, %v8981_v46  ;;  %4582 = vmatprep.mubr.bf16.mxu1 %v7994_v40  ;;  %4679 = vmatprep.mubr.bf16.mxu0 %v7996_v28  ;;  %v8014_v25 = vld [vmem:[%s8300_s13 + $0x3c] ss:$84 sps:$4 sm:$0xff]  }
 0x1b1   : > { %v6651_v32 = vpop.f32.mrb[92].mxu0  ;;  %v6715_v13 = vpop.f32.mrb[92].mxu1 }
 0x1b2   : > { %v6652_v33 = vpop.f32.mrb[93].mxu0  ;;  %v6716_v39 = vpop.f32.mrb[93].mxu1 }
 0x1b3   : > { %v6653_v43 = vadd.f32 %v6652_v33, %v6651_v32  ;;  %v6717_v24 = vadd.f32 %v6716_v39, %v6715_v13  ;;  %v6654_v59 = vpop.f32.mrb[94].mxu0  ;;  %v6718_v47 = vpop.f32.mrb[94].mxu1 }
 0x1b4   : > { %v6655_v34 = vpop.f32.mrb[95].mxu0  ;;  %v6719_v45 = vpop.f32.mrb[95].mxu1 }
 0x1b5   : > { %v9167_v46 = vadd.f32 %v6653_v43, %v8988_v37  ;;  %v9170_v61 = vadd.f32 %v6717_v24, %v8991_v15  ;;  %v6656_v12 = vadd.f32 %v6655_v34, %v6654_v59  ;;  %v6720_v16 = vadd.f32 %v6719_v45, %v6718_v47  ;;  %v8008_v15 = vld [vmem:[%s8300_s13 + $0xa00] ss:$84 sps:$4 sm:$0xff]   ;;  %v8015_v59 = vld [vmem:[%s8300_s13 + $0x570] ss:$84 sps:$4 sm:$0xff]  }
 0x1b6   : > { %4583 = vmatmul.mubr.bf16.gmra.mrb[200].mxu1 %v7998_v44  ;;  %4680 = vmatmul.mubr.bf16.gmra.mrb[200].mxu0 %v7999_v41  ;;  %v8020_v45 = vld [vmem:[%s8300_s13 + $0x61c] ss:$84 sps:$4 sm:$0xff]  }
 0x1b7   : > { %v9173_v50 = vadd.f32 %v6656_v12, %v8994_v35  ;;  %v9176_v58 = vadd.f32 %v6720_v16, %v8997_v27  ;;  %4590 = vmatprep.mubr.bf16.mxu1 %v8004_v4  ;;  %4687 = vmatprep.mubr.bf16.mxu0 %v8006_v20  ;;  %v8022_v16 = vld [vmem:[%s8300_s13 + $0xe4] ss:$84 sps:$4 sm:$0xff]  }
 0x1b9   : > { %v6657_v17 = vpop.f32.mrb[96].mxu0  ;;  %v6721_v37 = vpop.f32.mrb[96].mxu1 }
 0x1ba   : > { %v6658_v2 = vpop.f32.mrb[97].mxu0  ;;  %v6722_v30 = vpop.f32.mrb[97].mxu1 }
 0x1bb   : > { %v6659_v11 = vadd.f32 %v6658_v2, %v6657_v17  ;;  %v6723_v40 = vadd.f32 %v6722_v30, %v6721_v37  ;;  %v6660_v28 = vpop.f32.mrb[98].mxu0  ;;  %v6724_v49 = vpop.f32.mrb[98].mxu1  ;;  %v8032_v17 = vld [vmem:[%s10223_s1 + $0x4c8] sm:$0xff]  }
 0x1bc   : > { %v6661_v60 = vpop.f32.mrb[99].mxu0  ;;  %v6725_v35 = vpop.f32.mrb[99].mxu1 }
 0x1bd   : > { %v9183_v27 = vadd.f32 %v6659_v11, %v9004_v62  ;;  %v9186_v32 = vadd.f32 %v6723_v40, %v9007_v55  ;;  %v6662_v13 = vadd.f32 %v6661_v60, %v6660_v28  ;;  %v6726_v33 = vadd.f32 %v6725_v35, %v6724_v49  ;;  %v8012_v55 = vld [vmem:[%s8300_s13 + $0x38] ss:$84 sps:$4 sm:$0xff]  }
 0x1be   : > { %4591 = vmatmul.mubr.bf16.gmra.mrb[204].mxu1 %v8008_v15  ;;  %4688 = vmatmul.mubr.bf16.gmra.mrb[204].mxu0 %v8009_v6 }
 0x1bf   : > { %v9189_v39 = vadd.f32 %v6662_v13, %v9010_v31  ;;  %v9192_v44 = vadd.f32 %v6726_v33, %v9013_v5  ;;  %4695 = vmatprep.mubr.bf16.mxu0 %v8010_v7  ;;  %4792 = vmatprep.mubr.bf16.mxu1 %v8014_v25  ;;  %v8017_v31 = vld [vmem:[%s10223_s1 + $0x480] sm:$0xff]  }
 0x1c0   : > { %v8025_v7 = vld [vmem:[%s8300_s13 + $0xe0] ss:$84 sps:$4 sm:$0xff]   ;;  %v8026_v33 = vld [vmem:[%s8300_s13 + $0x6c4] ss:$84 sps:$4 sm:$0xff]  }
 0x1c1   : > { %v6663_v41 = vpop.f32.mrb[100].mxu0  ;;  %v6727_v62 = vpop.f32.mrb[100].mxu1 }
 0x1c2   : > { %v6664_v43 = vpop.f32.mrb[101].mxu0  ;;  %v6728_v24 = vpop.f32.mrb[101].mxu1 }
 0x1c3   : > { %v6665_v47 = vadd.f32 %v6664_v43, %v6663_v41  ;;  %v6729_v4 = vadd.f32 %v6728_v24, %v6727_v62  ;;  %v6666_v20 = vpop.f32.mrb[102].mxu0  ;;  %v6730_v34 = vpop.f32.mrb[102].mxu1  ;;  %v8028_v41 = vld [vmem:[%s8300_s13 + $0x18c] ss:$84 sps:$4 sm:$0xff]   ;;  %v8049_v24 = vld [vmem:[%s10223_s1 + $0x490] sm:$0xff]  }
 0x1c4   : > { %v6667_v5 = vpop.f32.mrb[103].mxu0  ;;  %v6731_v12 = vpop.f32.mrb[103].mxu1 }
 0x1c5   : > { %v9205_v37 = vadd.f32 %v6665_v47, %v9026_v23  ;;  %v9208_v2 = vadd.f32 %v6729_v4, %v9029_v36  ;;  %v6668_v30 = vadd.f32 %v6667_v5, %v6666_v20  ;;  %v6732_v15 = vadd.f32 %v6731_v12, %v6730_v34  ;;  %v8033_v23 = vld [vmem:[%s10223_s1 + $0x488] sm:$0xff]   ;;  %v8048_v36 = vld [vmem:[%s10223_s1 + $0x4d0] sm:$0xff]   ;;  %v8064_v20 = vld [vmem:[%s10223_s1 + $0x4d8] sm:$0xff]  }
 0x1c6   : > { %4696 = vmatmul.mubr.bf16.gmra.mrb[208].mxu0 %v8015_v59  ;;  %4793 = vmatmul.mubr.bf16.vlgmr.msra.gmra.mrb[208].mxu1 %v8012_v55 }
 0x1c7   : > { %v9211_v6 = vadd.f32 %v6668_v30, %v9035_v29  ;;  %v9214_v11 = vadd.f32 %v6732_v15, %v9038_v38  ;;  %7354 = vmatpush3.bf16.msra.mxu1 %v8017_v31  ;;  %4703 = vmatprep.mubr.bf16.mxu0 %v8020_v45  ;;  %v8024_v38 = vld [vmem:[%s8300_s13 + $0x618] ss:$84 sps:$4 sm:$0xff]  }
 0x1c8   : > { %4800 = vmatprep.mubr.bf16.mxu1 %v8022_v16  ;;  %7355 = vmatprep.subr.bf16.mxu1 %v8032_v17  ;;  %v8031_v16 = vld [vmem:[%s8300_s13 + $0x188] ss:$84 sps:$4 sm:$0xff]  }
 0x1c9   : > { %v6669_v40 = vpop.f32.mrb[104].mxu0  ;;  %v6733_v29 = vpop.f32.mrb[104].mxu1 }
 0x1ca   : > { %v6670_v28 = vpop.f32.mrb[105].mxu0  ;;  %v6734_v49 = vpop.f32.mrb[105].mxu1 }
 0x1cb   : > { %v6671_v25 = vadd.f32 %v6670_v28, %v6669_v40  ;;  %v6735_v60 = vadd.f32 %v6734_v49, %v6733_v29  ;;  %v6672_v35 = vpop.f32.mrb[106].mxu0  ;;  %v6736_v13 = vpop.f32.mrb[106].mxu1  ;;  %7356 = vmatpush3.bf16.msra.mxu1 %v8033_v23  ;;  %v8038_v40 = vld [vmem:[%s8300_s13 + $0x234] ss:$84 sps:$4 sm:$0xff]   ;;  %v8081_v49 = vld [vmem:[%s10223_s1 + $0x4a0] sm:$0xff]  }
 0x1cc   : > { %v6673_v62 = vpop.f32.mrb[107].mxu0  ;;  %v6737_v43 = vpop.f32.mrb[107].mxu1  ;;  %7357 = vmatprep.subr.bf16.mxu1 %v8048_v36  ;;  %v8036_v36 = vld [vmem:[%s8300_s13 + $0x76c] ss:$84 sps:$4 sm:$0xff]  }
 0x1cd   : > { %v9230_v55 = vadd.f32 %v6671_v25, %v9054_v18  ;;  %v9233_v59 = vadd.f32 %v6735_v60, %v9057_v56  ;;  %v6674_v47 = vadd.f32 %v6673_v62, %v6672_v35  ;;  %v6738_v4 = vadd.f32 %v6737_v43, %v6736_v13  ;;  %v8065_v18 = vld [vmem:[%s10223_s1 + $0x498] sm:$0xff]   ;;  %v8095_v35 = vld [vmem:[%s10223_s1 + $0x4e8] sm:$0xff]  }
 0x1ce   : > { %4704 = vmatmul.mubr.bf16.gmra.mrb[212].mxu0 %v8024_v38  ;;  %4801 = vmatmul.mubr.bf16.gmra.mrb[212].mxu1 %v8025_v7 }
 0x1cf   : > { %v9239_v34 = vadd.f32 %v6674_v47, %v9060_v0  ;;  %v9242_v31 = vadd.f32 %v6738_v4, %v9063_v1  ;;  %4711 = vmatprep.mubr.bf16.mxu0 %v8026_v33  ;;  %4808 = vmatprep.mubr.bf16.mxu1 %v8028_v41  ;;  %v8080_v0 = vld [vmem:[%s10223_s1 + $0x4e0] sm:$0xff]  }
 0x1d0   : > { %7358 = vmatpush3.bf16.msra.mxu1 %v8049_v24  ;;  %v8030_v1 = vld [vmem:[%s8300_s13 + $0x6c0] ss:$84 sps:$4 sm:$0xff]   ;;  %v8041_v24 = vld [vmem:[%s8300_s13 + $0x230] ss:$84 sps:$4 sm:$0xff]  }
 0x1d1   : > { %v6675_v56 = vpop.f32.mrb[108].mxu0  ;;  %v6739_v45 = vpop.f32.mrb[108].mxu1  ;;  %7359 = vmatprep.subr.bf16.mxu1 %v8064_v20 }
 0x1d2   : > { %v6676_v5 = vpop.f32.mrb[109].mxu0  ;;  %v6740_v12 = vpop.f32.mrb[109].mxu1 }
 0x1d3   : > { %v6677_v17 = vadd.f32 %v6676_v5, %v6675_v56  ;;  %v6741_v30 = vadd.f32 %v6740_v12, %v6739_v45  ;;  %v6678_v15 = vpop.f32.mrb[110].mxu0  ;;  %v6742_v23 = vpop.f32.mrb[110].mxu1  ;;  %v8042_v56 = vld [vmem:[%s8300_s13 + $0x814] ss:$84 sps:$4 sm:$0xff]   ;;  %v8044_v45 = vld [vmem:[%s8300_s13 + $0x2dc] ss:$84 sps:$4 sm:$0xff]  }
 0x1d4   : > { %v6679_v29 = vpop.f32.mrb[111].mxu0  ;;  %v6743_v28 = vpop.f32.mrb[111].mxu1  ;;  %7360 = vmatpush3.bf16.msra.mxu1 %v8065_v18  ;;  %v8111_v12 = vld [vmem:[%s10223_s1 + $0x4b0] sm:$0xff]  }
 0x1d5   : > { %v9258_v38 = vadd.f32 %v6677_v17, %v9079_v52  ;;  %v9261_v7 = vadd.f32 %v6741_v30, %v9082_v53  ;;  %v6680_v25 = vadd.f32 %v6679_v29, %v6678_v15  ;;  %v6744_v60 = vadd.f32 %v6743_v28, %v6742_v23  ;;  %7361 = vmatprep.subr.bf16.mxu1 %v8080_v0  ;;  %v8096_v53 = vld [vmem:[%s10223_s1 + $0x4a8] sm:$0xff]   ;;  %v8125_v15 = vld [vmem:[%s10223_s1 + $0x4f8] sm:$0xff]  }
 0x1d6   : > { %4712 = vmatmul.mubr.bf16.gmra.mrb[216].mxu0 %v8030_v1  ;;  %4809 = vmatmul.mubr.bf16.gmra.mrb[216].mxu1 %v8031_v16 }
 0x1d7   : > { %v9267_v13 = vadd.f32 %v6680_v25, %v9088_v48  ;;  %v9270_v52 = vadd.f32 %v6744_v60, %v9091_v14  ;;  %4719 = vmatprep.mubr.bf16.mxu0 %v8036_v36  ;;  %4816 = vmatprep.mubr.bf16.mxu1 %v8038_v40  ;;  %v8110_v48 = vld [vmem:[%s10223_s1 + $0x4f0] sm:$0xff]   ;;  %v8040_v14 = vld [vmem:[%s8300_s13 + $0x768] ss:$84 sps:$4 sm:$0xff]  }
 0x1d8   : > { %7362 = vmatpush3.bf16.msra.mxu1 %v8081_v49  ;;  %v8046_v49 = vld [vmem:[%s8300_s13 + $0x810] ss:$84 sps:$4 sm:$0xff]  }
 0x1d9   : > { %v6745_v33 = vpop.f32.mrb[112].mxu1  ;;  %v6809_v41 = vpop.f32.mrb[112].mxu0  ;;  %7363 = vmatprep.subr.bf16.mxu1 %v8095_v35 }
 0x1da   : > { %v6746_v62 = vpop.f32.mrb[113].mxu1  ;;  %v6810_v43 = vpop.f32.mrb[113].mxu0 }
 0x1db   : > { %v6747_v47 = vadd.f32 %v6746_v62, %v6745_v33  ;;  %v6811_v4 = vadd.f32 %v6810_v43, %v6809_v41  ;;  %v6748_v20 = vpop.f32.mrb[114].mxu1  ;;  %v6812_v18 = vpop.f32.mrb[114].mxu0  ;;  %v8054_v33 = vld [vmem:[%s8300_s13 + $0x384] ss:$84 sps:$4 sm:$0xff]  }
 0x1dc   : > { %v6749_v0 = vpop.f32.mrb[115].mxu1  ;;  %v6813_v5 = vpop.f32.mrb[115].mxu0  ;;  %7364 = vmatpush3.bf16.msra.mxu1 %v8096_v53  ;;  %v8052_v53 = vld [vmem:[%s8300_s13 + $0x8bc] ss:$84 sps:$4 sm:$0xff]  }
 0x1dd   : > { %v9286_v1 = vadd.f32 %v6747_v47, %v9107_v3  ;;  %v9289_v16 = vadd.f32 %v6811_v4, %v9110_v19  ;;  %v6750_v17 = vadd.f32 %v6749_v0, %v6748_v20  ;;  %v6814_v30 = vadd.f32 %v6813_v5, %v6812_v18  ;;  %7365 = vmatprep.subr.bf16.mxu1 %v8110_v48  ;;  %v8126_v19 = vld [vmem:[%s10223_s1 + $0x4b8] sm:$0xff]  }
 0x1de   : > { %4720 = vmatmul.mubr.bf16.gmra.mrb[220].mxu0 %v8040_v14  ;;  %4817 = vmatmul.mubr.bf16.gmra.mrb[220].mxu1 %v8041_v24 }
 0x1df   : > { %v9295_v23 = vadd.f32 %v6750_v17, %v9116_v21  ;;  %v9298_v3 = vadd.f32 %v6814_v30, %v9119_v42  ;;  %4727 = vmatprep.mubr.bf16.mxu0 %v8042_v56  ;;  %4824 = vmatprep.mubr.bf16.mxu1 %v8044_v45  ;;  %v8047_v21 = vld [vmem:[%s8300_s13 + $0x2d8] ss:$84 sps:$4 sm:$0xff]   ;;  %v8057_v45 = vld [vmem:[%s8300_s13 + $0x380] ss:$84 sps:$4 sm:$0xff]  }
 0x1e0   : > { %7366 = vmatpush3.bf16.msra.mxu1 %v8111_v12  ;;  %v8058_v30 = vld [vmem:[%s8300_s13 + $0x964] ss:$84 sps:$4 sm:$0xff]  }
 0x1e1   : > { %v6751_v36 = vpop.f32.mrb[116].mxu1  ;;  %v6815_v40 = vpop.f32.mrb[116].mxu0  ;;  %7367 = vmatprep.subr.bf16.mxu1 %v8125_v15  ;;  %v8060_v15 = vld [vmem:[%s8300_s13 + $0x42c] ss:$84 sps:$4 sm:$0xff]  }
 0x1e2   : > { %v6752_v29 = vpop.f32.mrb[117].mxu1  ;;  %v6816_v28 = vpop.f32.mrb[117].mxu0 }
 0x1e3   : > { %v6753_v25 = vadd.f32 %v6752_v29, %v6751_v36  ;;  %v6817_v60 = vadd.f32 %v6816_v28, %v6815_v40  ;;  %v6754_v42 = vpop.f32.mrb[118].mxu1  ;;  %v6818_v35 = vpop.f32.mrb[118].mxu0 }
 0x1e4   : > { %v6755_v41 = vpop.f32.mrb[119].mxu1  ;;  %v6819_v48 = vpop.f32.mrb[119].mxu0  ;;  %7368 = vmatpush3.bf16.msra.mxu1 %v8126_v19 }
 0x1e5   : > { %v9308_v62 = vadd.f32 %v6753_v25, %v9134_v54  ;;  %v9311_v43 = vadd.f32 %v6817_v60, %v9137_v26  ;;  %v6756_v14 = vadd.f32 %v6755_v41, %v6754_v42  ;;  %v6820_v24 = vadd.f32 %v6819_v48, %v6818_v35  ;;  %v8056_v26 = vld [vmem:[%s8300_s13 + $0x8b8] ss:$84 sps:$4 sm:$0xff]   ;;  %v8063_v42 = vld [vmem:[%s8300_s13 + $0x428] ss:$84 sps:$4 sm:$0xff]  }
 0x1e6   : > { %4728 = vmatmul.mubr.bf16.gmra.mrb[224].mxu0 %v8046_v49  ;;  %4825 = vmatmul.mubr.bf16.gmra.mrb[224].mxu1 %v8047_v21  ;;  %v8068_v48 = vld [vmem:[%s8300_s13 + $0xa0c] ss:$84 sps:$4 sm:$0xff]  }
 0x1e7   : > { %v9314_v47 = vadd.f32 %v6756_v14, %v9141_v22  ;;  %v9317_v4 = vadd.f32 %v6820_v24, %v9144_v63  ;;  %4735 = vmatprep.mubr.bf16.mxu0 %v8052_v53  ;;  %4832 = vmatprep.mubr.bf16.mxu1 %v8054_v33  ;;  %v8070_v14 = vld [vmem:[%s8300_s13 + $0x4d4] ss:$84 sps:$4 sm:$0xff]  }
 0x1e9   : > { %v6757_v20 = vpop.f32.mrb[120].mxu1  ;;  %v6821_v54 = vpop.f32.mrb[120].mxu0 }
 0x1ea   : > { %v6758_v18 = vpop.f32.mrb[121].mxu1  ;;  %v6822_v56 = vpop.f32.mrb[121].mxu0 }
 0x1eb   : > { %v6759_v0 = vadd.f32 %v6758_v18, %v6757_v20  ;;  %v6823_v5 = vadd.f32 %v6822_v56, %v6821_v54  ;;  %v6760_v12 = vpop.f32.mrb[122].mxu1  ;;  %v6824_v17 = vpop.f32.mrb[122].mxu0 }
 0x1ec   : > { %v6761_v19 = vpop.f32.mrb[123].mxu1  ;;  %v6825_v22 = vpop.f32.mrb[123].mxu0 }
 0x1ed   : > { %v9324_v63 = vadd.f32 %v6759_v0, %v9151_v9  ;;  %v9327_v36 = vadd.f32 %v6823_v5, %v9154_v10  ;;  %v6762_v40 = vadd.f32 %v6761_v19, %v6760_v12  ;;  %v6826_v29 = vadd.f32 %v6825_v22, %v6824_v17  ;;  %v8062_v10 = vld [vmem:[%s8300_s13 + $0x960] ss:$84 sps:$4 sm:$0xff]   ;;  %v8073_v12 = vld [vmem:[%s8300_s13 + $0x4d0] ss:$84 sps:$4 sm:$0xff]  }
 0x1ee   : > { %4736 = vmatmul.mubr.bf16.gmra.mrb[228].mxu0 %v8056_v26  ;;  %4833 = vmatmul.mubr.bf16.gmra.mrb[228].mxu1 %v8057_v45  ;;  %v8074_v22 = vld [vmem:[%s8300_s13 + $0x57c] ss:$84 sps:$4 sm:$0xff]  }
 0x1ef   : > { %v9330_v28 = vadd.f32 %v6762_v40, %v9157_v51  ;;  %v9333_v49 = vadd.f32 %v6826_v29, %v9160_v57  ;;  %4743 = vmatprep.mubr.bf16.mxu0 %v8058_v30  ;;  %4840 = vmatprep.mubr.bf16.mxu1 %v8060_v15  ;;  %v8078_v40 = vld [vmem:[%s8300_s13 + $0x44] ss:$84 sps:$4 sm:$0xff]  }
 0x1f1   : > { %v6763_v21 = vpop.f32.mrb[124].mxu1  ;;  %v6827_v9 = vpop.f32.mrb[124].mxu0 }
 0x1f2   : > { %v6764_v25 = vpop.f32.mrb[125].mxu1  ;;  %v6828_v60 = vpop.f32.mrb[125].mxu0 }
 0x1f3   : > { %v6765_v35 = vadd.f32 %v6764_v25, %v6763_v21  ;;  %v6829_v53 = vadd.f32 %v6828_v60, %v6827_v9  ;;  %v6766_v33 = vpop.f32.mrb[126].mxu1  ;;  %v6830_v41 = vpop.f32.mrb[126].mxu0 }
 0x1f4   : > { %v6767_v24 = vpop.f32.mrb[127].mxu1  ;;  %v6831_v51 = vpop.f32.mrb[127].mxu0 }
 0x1f5   : > { %v9340_v57 = vadd.f32 %v6765_v35, %v9167_v46  ;;  %v9343_v20 = vadd.f32 %v6829_v53, %v9170_v61  ;;  %v6768_v54 = vadd.f32 %v6767_v24, %v6766_v33  ;;  %v6832_v18 = vadd.f32 %v6831_v51, %v6830_v41  ;;  %v8072_v61 = vld [vmem:[%s8300_s13 + $0xa08] ss:$84 sps:$4 sm:$0xff]   ;;  %v8079_v33 = vld [vmem:[%s8300_s13 + $0x578] ss:$84 sps:$4 sm:$0xff]  }
 0x1f6   : > { %4744 = vmatmul.mubr.bf16.gmra.mrb[232].mxu0 %v8062_v10  ;;  %4841 = vmatmul.mubr.bf16.gmra.mrb[232].mxu1 %v8063_v42  ;;  %v8083_v51 = vld [vmem:[%s8300_s13 + $0x624] ss:$84 sps:$4 sm:$0xff]  }
 0x1f7   : > { %v9346_v56 = vadd.f32 %v6768_v54, %v9173_v50  ;;  %v9349_v26 = vadd.f32 %v6832_v18, %v9176_v58  ;;  %4751 = vmatprep.mubr.bf16.mxu0 %v8068_v48  ;;  %4848 = vmatprep.mubr.bf16.mxu1 %v8070_v14  ;;  %v8085_v18 = vld [vmem:[%s8300_s13 + $0xec] ss:$84 sps:$4 sm:$0xff]  }
 0x1f9   : > { %v6769_v45 = vpop.f32.mrb[128].mxu1  ;;  %v6833_v46 = vpop.f32.mrb[128].mxu0 }
 0x1fa   : > { %v6770_v0 = vpop.f32.mrb[129].mxu1  ;;  %v6834_v5 = vpop.f32.mrb[129].mxu0 }
 0x1fb   : > { %v6771_v17 = vadd.f32 %v6770_v0, %v6769_v45  ;;  %v6835_v30 = vadd.f32 %v6834_v5, %v6833_v46  ;;  %v6772_v15 = vpop.f32.mrb[130].mxu1  ;;  %v6836_v19 = vpop.f32.mrb[130].mxu0 }
 0x1fc   : > { %v6773_v29 = vpop.f32.mrb[131].mxu1  ;;  %v6837_v50 = vpop.f32.mrb[131].mxu0 }
 0x1fd   : > { %v9356_v58 = vadd.f32 %v6771_v17, %v9183_v27  ;;  %v9359_v21 = vadd.f32 %v6835_v30, %v9186_v32  ;;  %v6774_v9 = vadd.f32 %v6773_v29, %v6772_v15  ;;  %v6838_v25 = vadd.f32 %v6837_v50, %v6836_v19  ;;  %v8076_v32 = vld [vmem:[%s8300_s13 + $0x40] ss:$84 sps:$4 sm:$0xff]   ;;  %v8088_v19 = vld [vmem:[%s8300_s13 + $0xe8] ss:$84 sps:$4 sm:$0xff]  }
 0x1fe   : > { %4752 = vmatmul.mubr.bf16.gmra.mrb[236].mxu0 %v8072_v61  ;;  %4849 = vmatmul.mubr.bf16.gmra.mrb[236].mxu1 %v8073_v12  ;;  %v8089_v50 = vld [vmem:[%s8300_s13 + $0x6cc] ss:$84 sps:$4 sm:$0xff]  }
 0x1ff   : > { %v9362_v60 = vadd.f32 %v6774_v9, %v9189_v39  ;;  %v9365_v10 = vadd.f32 %v6838_v25, %v9192_v44  ;;  %4856 = vmatprep.mubr.bf16.mxu1 %v8074_v22  ;;  %4953 = vmatprep.mubr.bf16.mxu0 %v8078_v40  ;;  %v8097_v44 = vld [vmem:[%s10223_s1 + $0x508] sm:$0xff]  }
 0x201   : > { %v6775_v42 = vpop.f32.mrb[132].mxu1  ;;  %v6839_v27 = vpop.f32.mrb[132].mxu0 }
 0x202   : > { %v6776_v35 = vpop.f32.mrb[133].mxu1  ;;  %v6840_v53 = vpop.f32.mrb[133].mxu0 }
 0x203   : > { %v6777_v41 = vadd.f32 %v6776_v35, %v6775_v42  ;;  %v6841_v48 = vadd.f32 %v6840_v53, %v6839_v27  ;;  %v6778_v14 = vpop.f32.mrb[134].mxu1  ;;  %v6842_v24 = vpop.f32.mrb[134].mxu0 }
 0x204   : > { %v6779_v54 = vpop.f32.mrb[135].mxu1  ;;  %v6843_v39 = vpop.f32.mrb[135].mxu0 }
 0x205   : > { %v9375_v45 = vadd.f32 %v6777_v41, %v9205_v37  ;;  %v9378_v46 = vadd.f32 %v6841_v48, %v9208_v2  ;;  %v6780_v0 = vadd.f32 %v6779_v54, %v6778_v14  ;;  %v6844_v5 = vadd.f32 %v6843_v39, %v6842_v24  ;;  %v8112_v37 = vld [vmem:[%s10223_s1 + $0x510] sm:$0xff]   ;;  %v8140_v48 = vld [vmem:[%s10223_s1 + $0x520] sm:$0xff]  }
 0x206   : > { %4857 = vmatmul.mubr.bf16.gmra.mrb[240].mxu1 %v8079_v33  ;;  %4954 = vmatmul.mubr.bf16.vlgmr.msra.gmra.mrb[240].mxu0 %v8076_v32  ;;  %v8127_v32 = vld [vmem:[%s10223_s1 + $0x518] sm:$0xff]  }
 0x207   : > { %v9381_v61 = vadd.f32 %v6780_v0, %v9211_v6  ;;  %v9384_v12 = vadd.f32 %v6844_v5, %v9214_v11  ;;  %7490 = vmatpush3.bf16.msra.mxu0 %v9127_v8  ;;  %4864 = vmatprep.mubr.bf16.mxu1 %v8083_v51  ;;  %v8087_v6 = vld [vmem:[%s8300_s13 + $0x620] ss:$84 sps:$4 sm:$0xff]   ;;  %v8093_v51 = vld [vmem:[%s8300_s13 + $0x6c8] ss:$84 sps:$4 sm:$0xff]  }
 0x208   : > { %4961 = vmatprep.mubr.bf16.mxu0 %v8085_v18  ;;  %7491 = vmatprep.subr.bf16.mxu0 %v8097_v44  ;;  %v8091_v8 = vld [vmem:[%s8300_s13 + $0x194] ss:$84 sps:$4 sm:$0xff]   ;;  %v8100_v0 = vld [vmem:[%s8300_s13 + $0x23c] ss:$84 sps:$4 sm:$0xff]  }
 0x209   : > { %v6781_v2 = vpop.f32.mrb[136].mxu1  ;;  %v6845_v17 = vpop.f32.mrb[136].mxu0 }
 0x20a   : > { %v6782_v30 = vpop.f32.mrb[137].mxu1  ;;  %v6846_v15 = vpop.f32.mrb[137].mxu0 }
 0x20b   : > { %v6783_v22 = vadd.f32 %v6782_v30, %v6781_v2  ;;  %v6847_v11 = vadd.f32 %v6846_v15, %v6845_v17  ;;  %v6784_v40 = vpop.f32.mrb[138].mxu1  ;;  %v6848_v29 = vpop.f32.mrb[138].mxu0  ;;  %7492 = vmatpush3.bf16.msra.mxu0 %v8097_v44  ;;  %v8098_v44 = vld [vmem:[%s8300_s13 + $0x774] ss:$84 sps:$4 sm:$0xff]  }
 0x20c   : > { %v6785_v9 = vpop.f32.mrb[139].mxu1  ;;  %v6849_v25 = vpop.f32.mrb[139].mxu0  ;;  %7493 = vmatprep.subr.bf16.mxu0 %v8112_v37 }
 0x20d   : > { %v9395_v42 = vadd.f32 %v6783_v22, %v9230_v55  ;;  %v9398_v27 = vadd.f32 %v6847_v11, %v9233_v59  ;;  %v6786_v35 = vadd.f32 %v6785_v9, %v6784_v40  ;;  %v6850_v53 = vadd.f32 %v6849_v25, %v6848_v29  ;;  %v8166_v11 = vld [vmem:[%s10223_s1 + $0x530] sm:$0xff]  }
 0x20e   : > { %4865 = vmatmul.mubr.bf16.gmra.mrb[244].mxu1 %v8087_v6  ;;  %4962 = vmatmul.mubr.bf16.gmra.mrb[244].mxu0 %v8088_v19  ;;  %v8153_v6 = vld [vmem:[%s10223_s1 + $0x528] sm:$0xff]  }
 0x20f   : > { %v9404_v33 = vadd.f32 %v6786_v35, %v9239_v34  ;;  %v9407_v41 = vadd.f32 %v6850_v53, %v9242_v31  ;;  %4872 = vmatprep.mubr.bf16.mxu1 %v8089_v50  ;;  %4969 = vmatprep.mubr.bf16.mxu0 %v8091_v8  ;;  %v8094_v34 = vld [vmem:[%s8300_s13 + $0x190] ss:$84 sps:$4 sm:$0xff]  }
 0x210   : > { %7494 = vmatpush3.bf16.msra.mxu0 %v8112_v37  ;;  %v8102_v50 = vld [vmem:[%s8300_s13 + $0x770] ss:$84 sps:$4 sm:$0xff]  }
 0x211   : > { %v6787_v55 = vpop.f32.mrb[140].mxu1  ;;  %v6851_v59 = vpop.f32.mrb[140].mxu0  ;;  %7495 = vmatprep.subr.bf16.mxu0 %v8127_v32  ;;  %v8106_v35 = vld [vmem:[%s8300_s13 + $0x81c] ss:$84 sps:$4 sm:$0xff]   ;;  %v8109_v53 = vld [vmem:[%s8300_s13 + $0x2e4] ss:$84 sps:$4 sm:$0xff]  }
 0x212   : > { %v6788_v14 = vpop.f32.mrb[141].mxu1  ;;  %v6852_v24 = vpop.f32.mrb[141].mxu0 }
 0x213   : > { %v6789_v54 = vadd.f32 %v6788_v14, %v6787_v55  ;;  %v6853_v39 = vadd.f32 %v6852_v24, %v6851_v59  ;;  %v6790_v31 = vpop.f32.mrb[142].mxu1  ;;  %v6854_v18 = vpop.f32.mrb[142].mxu0 }
 0x214   : > { %v6791_v5 = vpop.f32.mrb[143].mxu1  ;;  %v6855_v2 = vpop.f32.mrb[143].mxu0  ;;  %7496 = vmatpush3.bf16.msra.mxu0 %v8127_v32 }
 0x215   : > { %v9417_v37 = vadd.f32 %v6789_v54, %v9258_v38  ;;  %v9420_v17 = vadd.f32 %v6853_v39, %v9261_v7  ;;  %v6792_v30 = vadd.f32 %v6791_v5, %v6790_v31  ;;  %v6856_v15 = vadd.f32 %v6855_v2, %v6854_v18  ;;  %7497 = vmatprep.subr.bf16.mxu0 %v8140_v48  ;;  %v8104_v18 = vld [vmem:[%s8300_s13 + $0x818] ss:$84 sps:$4 sm:$0xff]  }
 0x216   : > { %4873 = vmatmul.mubr.bf16.gmra.mrb[248].mxu1 %v8093_v51  ;;  %4970 = vmatmul.mubr.bf16.gmra.mrb[248].mxu0 %v8094_v34  ;;  %v8179_v51 = vld [vmem:[%s10223_s1 + $0x538] sm:$0xff]  }
 0x217   : > { %v9426_v19 = vadd.f32 %v6792_v30, %v9267_v13  ;;  %v9429_v38 = vadd.f32 %v6856_v15, %v9270_v52  ;;  %4880 = vmatprep.mubr.bf16.mxu1 %v8098_v44  ;;  %4977 = vmatprep.mubr.bf16.mxu0 %v8100_v0  ;;  %v8103_v13 = vld [vmem:[%s8300_s13 + $0x238] ss:$84 sps:$4 sm:$0xff]   ;;  %v8107_v44 = vld [vmem:[%s8300_s13 + $0x2e0] ss:$84 sps:$4 sm:$0xff]  }
 0x218   : > { %7498 = vmatpush3.bf16.msra.mxu0 %v8140_v48  ;;  %v8115_v30 = vld [vmem:[%s8300_s13 + $0x8c4] ss:$84 sps:$4 sm:$0xff]   ;;  %v8118_v15 = vld [vmem:[%s8300_s13 + $0x38c] ss:$84 sps:$4 sm:$0xff]  }
 0x219   : > { %v6857_v7 = vpop.f32.mrb[144].mxu0  ;;  %v6921_v22 = vpop.f32.mrb[144].mxu1  ;;  %7499 = vmatprep.subr.bf16.mxu0 %v8153_v6 }
 0x21a   : > { %v6858_v40 = vpop.f32.mrb[145].mxu0  ;;  %v6922_v29 = vpop.f32.mrb[145].mxu1 }
 0x21b   : > { %v6859_v8 = vadd.f32 %v6858_v40, %v6857_v7  ;;  %v6923_v9 = vadd.f32 %v6922_v29, %v6921_v22  ;;  %v6860_v52 = vpop.f32.mrb[146].mxu0  ;;  %v6924_v25 = vpop.f32.mrb[146].mxu1 }
 0x21c   : > { %v6861_v32 = vpop.f32.mrb[147].mxu0  ;;  %v6925_v55 = vpop.f32.mrb[147].mxu1  ;;  %7500 = vmatpush3.bf16.msra.mxu0 %v8153_v6 }
 0x21d   : > { %v9439_v59 = vadd.f32 %v6859_v8, %v9286_v1  ;;  %v9442_v48 = vadd.f32 %v6923_v9, %v9289_v16  ;;  %v6862_v14 = vadd.f32 %v6861_v32, %v6860_v52  ;;  %v6926_v24 = vadd.f32 %v6925_v55, %v6924_v25  ;;  %7501 = vmatprep.subr.bf16.mxu0 %v8166_v11  ;;  %v8116_v52 = vld [vmem:[%s8300_s13 + $0x388] ss:$84 sps:$4 sm:$0xff]   ;;  %v8121_v55 = vld [vmem:[%s8300_s13 + $0x96c] ss:$84 sps:$4 sm:$0xff]  }
 0x21e   : > { %4881 = vmatmul.mubr.bf16.gmra.mrb[252].mxu1 %v8102_v50  ;;  %4978 = vmatmul.mubr.bf16.gmra.mrb[252].mxu0 %v8103_v13 }
 0x21f   : > { %v9448_v34 = vadd.f32 %v6862_v14, %v9295_v23  ;;  %v9451_v1 = vadd.f32 %v6926_v24, %v9298_v3  ;;  %4888 = vmatprep.mubr.bf16.mxu1 %v8106_v35  ;;  %4985 = vmatprep.mubr.bf16.mxu0 %v8109_v53  ;;  %v8124_v14 = vld [vmem:[%s8300_s13 + $0x434] ss:$84 sps:$4 sm:$0xff]  }
 0x220   : > { %7502 = vmatpush3.bf16.msra.mxu0 %v8166_v11 }
 0x221   : > { %v6863_v16 = vpop.f32.mrb[148].mxu0  ;;  %v6927_v54 = vpop.f32.mrb[148].mxu1  ;;  %7503 = vmatprep.subr.bf16.mxu0 %v8179_v51 }
 0x222   : > { %v6864_v39 = vpop.f32.mrb[149].mxu0  ;;  %v6928_v31 = vpop.f32.mrb[149].mxu1 }
 0x223   : > { %v6865_v0 = vadd.f32 %v6864_v39, %v6863_v16  ;;  %v6929_v5 = vadd.f32 %v6928_v31, %v6927_v54  ;;  %v6866_v2 = vpop.f32.mrb[150].mxu0  ;;  %v6930_v23 = vpop.f32.mrb[150].mxu1 }
 0x224   : > { %v6867_v6 = vpop.f32.mrb[151].mxu0  ;;  %v6931_v3 = vpop.f32.mrb[151].mxu1  ;;  %7504 = vmatpush3.bf16.msra.mxu0 %v8179_v51 }
 0x225   : > { %v9458_v7 = vadd.f32 %v6865_v0, %v9308_v62  ;;  %v9461_v22 = vadd.f32 %v6929_v5, %v9311_v43  ;;  %v6868_v11 = vadd.f32 %v6867_v6, %v6866_v2  ;;  %v6932_v40 = vadd.f32 %v6931_v3, %v6930_v23  ;;  %v8113_v43 = vld [vmem:[%s8300_s13 + $0x8c0] ss:$84 sps:$4 sm:$0xff]   ;;  %v8122_v5 = vld [vmem:[%s8300_s13 + $0x430] ss:$84 sps:$4 sm:$0xff]  }
 0x226   : > { %4889 = vmatmul.mubr.bf16.gmra.mrb[0].mxu1 %v8104_v18  ;;  %4986 = vmatmul.mubr.bf16.gmra.mrb[0].mxu0 %v8107_v44  ;;  %v8130_v6 = vld [vmem:[%s8300_s13 + $0xa14] ss:$84 sps:$4 sm:$0xff]   ;;  %v8133_v3 = vld [vmem:[%s8300_s13 + $0x4dc] ss:$84 sps:$4 sm:$0xff]  }
 0x227   : > { %v9464_v29 = vadd.f32 %v6868_v11, %v9314_v47  ;;  %v9467_v50 = vadd.f32 %v6932_v40, %v9317_v4  ;;  %4896 = vmatprep.mubr.bf16.mxu1 %v8115_v30  ;;  %4993 = vmatprep.mubr.bf16.mxu0 %v8118_v15 }
 0x229   : > { %v6869_v13 = vpop.f32.mrb[152].mxu0  ;;  %v6933_v62 = vpop.f32.mrb[152].mxu1 }
 0x22a   : > { %v6870_v8 = vpop.f32.mrb[153].mxu0  ;;  %v6934_v9 = vpop.f32.mrb[153].mxu1 }
 0x22b   : > { %v6871_v25 = vadd.f32 %v6870_v8, %v6869_v13  ;;  %v6935_v35 = vadd.f32 %v6934_v9, %v6933_v62  ;;  %v6872_v53 = vpop.f32.mrb[154].mxu0  ;;  %v6936_v32 = vpop.f32.mrb[154].mxu1 }
 0x22c   : > { %v6873_v24 = vpop.f32.mrb[155].mxu0  ;;  %v6937_v47 = vpop.f32.mrb[155].mxu1 }
 0x22d   : > { %v9474_v4 = vadd.f32 %v6871_v25, %v9324_v63  ;;  %v9477_v51 = vadd.f32 %v6935_v35, %v9327_v36  ;;  %v6874_v16 = vadd.f32 %v6873_v24, %v6872_v53  ;;  %v6938_v54 = vadd.f32 %v6937_v47, %v6936_v32  ;;  %v8119_v36 = vld [vmem:[%s8300_s13 + $0x968] ss:$84 sps:$4 sm:$0xff]   ;;  %v8131_v35 = vld [vmem:[%s8300_s13 + $0x4d8] ss:$84 sps:$4 sm:$0xff]  }
 0x22e   : > { %4897 = vmatmul.mubr.bf16.gmra.mrb[4].mxu1 %v8113_v43  ;;  %4994 = vmatmul.mubr.bf16.gmra.mrb[4].mxu0 %v8116_v52  ;;  %v8136_v24 = vld [vmem:[%s8300_s13 + $0x584] ss:$84 sps:$4 sm:$0xff]   ;;  %v8139_v47 = vld [vmem:[%s8300_s13 + $0x4c] ss:$84 sps:$4 sm:$0xff]  }
 0x22f   : > { %v9480_v39 = vadd.f32 %v6874_v16, %v9330_v28  ;;  %v9483_v31 = vadd.f32 %v6938_v54, %v9333_v49  ;;  %4904 = vmatprep.mubr.bf16.mxu1 %v8121_v55  ;;  %5001 = vmatprep.mubr.bf16.mxu0 %v8124_v14 }
 0x231   : > { %v6875_v18 = vpop.f32.mrb[156].mxu0  ;;  %v6939_v63 = vpop.f32.mrb[156].mxu1 }
 0x232   : > { %v6876_v44 = vpop.f32.mrb[157].mxu0  ;;  %v6940_v0 = vpop.f32.mrb[157].mxu1 }
 0x233   : > { %v6877_v2 = vadd.f32 %v6876_v44, %v6875_v18  ;;  %v6941_v23 = vadd.f32 %v6940_v0, %v6939_v63  ;;  %v6878_v30 = vpop.f32.mrb[158].mxu0  ;;  %v6942_v15 = vpop.f32.mrb[158].mxu1 }
 0x234   : > { %v6879_v11 = vpop.f32.mrb[159].mxu0  ;;  %v6943_v28 = vpop.f32.mrb[159].mxu1 }
 0x235   : > { %v9490_v49 = vadd.f32 %v6877_v2, %v9340_v57  ;;  %v9493_v40 = vadd.f32 %v6941_v23, %v9343_v20  ;;  %v6880_v13 = vadd.f32 %v6879_v11, %v6878_v30  ;;  %v6944_v62 = vadd.f32 %v6943_v28, %v6942_v15  ;;  %v8128_v20 = vld [vmem:[%s8300_s13 + $0xa10] ss:$84 sps:$4 sm:$0xff]   ;;  %v8137_v23 = vld [vmem:[%s8300_s13 + $0x48] ss:$84 sps:$4 sm:$0xff]   ;;  %v8143_v11 = vld [vmem:[%s8300_s13 + $0x62c] ss:$84 sps:$4 sm:$0xff]  }
 0x236   : > { %4905 = vmatmul.mubr.bf16.gmra.mrb[8].mxu1 %v8119_v36  ;;  %5002 = vmatmul.mubr.bf16.gmra.mrb[8].mxu0 %v8122_v5  ;;  %v8146_v28 = vld [vmem:[%s8300_s13 + $0xf4] ss:$84 sps:$4 sm:$0xff]  }
 0x237   : > { %v9496_v8 = vadd.f32 %v6880_v13, %v9346_v56  ;;  %v9499_v9 = vadd.f32 %v6944_v62, %v9349_v26  ;;  %4912 = vmatprep.mubr.bf16.mxu1 %v8130_v6  ;;  %5009 = vmatprep.mubr.bf16.mxu0 %v8133_v3 }
 0x239   : > { %v6881_v43 = vpop.f32.mrb[160].mxu0  ;;  %v6945_v57 = vpop.f32.mrb[160].mxu1 }
 0x23a   : > { %v6882_v52 = vpop.f32.mrb[161].mxu0  ;;  %v6946_v25 = vpop.f32.mrb[161].mxu1 }
 0x23b   : > { %v6883_v53 = vadd.f32 %v6882_v52, %v6881_v43  ;;  %v6947_v32 = vadd.f32 %v6946_v25, %v6945_v57  ;;  %v6884_v55 = vpop.f32.mrb[162].mxu0  ;;  %v6948_v14 = vpop.f32.mrb[162].mxu1 }
 0x23c   : > { %v6885_v16 = vpop.f32.mrb[163].mxu0  ;;  %v6949_v56 = vpop.f32.mrb[163].mxu1 }
 0x23d   : > { %v9506_v26 = vadd.f32 %v6883_v53, %v9356_v58  ;;  %v9509_v54 = vadd.f32 %v6947_v32, %v9359_v21  ;;  %v6886_v18 = vadd.f32 %v6885_v16, %v6884_v55  ;;  %v6950_v63 = vadd.f32 %v6949_v56, %v6948_v14  ;;  %v8134_v21 = vld [vmem:[%s8300_s13 + $0x580] ss:$84 sps:$4 sm:$0xff]   ;;  %v8144_v32 = vld [vmem:[%s8300_s13 + $0xf0] ss:$84 sps:$4 sm:$0xff]  }
 0x23e   : > { %4913 = vmatmul.mubr.bf16.gmra.mrb[12].mxu1 %v8128_v20  ;;  %5010 = vmatmul.mubr.bf16.gmra.mrb[12].mxu0 %v8131_v35  ;;  %v8149_v16 = vld [vmem:[%s8300_s13 + $0x6d4] ss:$84 sps:$4 sm:$0xff]   ;;  %v8152_v56 = vld [vmem:[%s8300_s13 + $0x19c] ss:$84 sps:$4 sm:$0xff]  }
 0x23f   : > { %v9512_v44 = vadd.f32 %v6886_v18, %v9362_v60  ;;  %v9515_v0 = vadd.f32 %v6950_v63, %v9365_v10  ;;  %5017 = vmatprep.mubr.bf16.mxu0 %v8136_v24  ;;  %5114 = vmatprep.mubr.bf16.mxu1 %v8139_v47 }
 0x241   : > { %v6887_v36 = vpop.f32.mrb[164].mxu0  ;;  %v6951_v58 = vpop.f32.mrb[164].mxu1 }
 0x242   : > { %v6888_v5 = vpop.f32.mrb[165].mxu0  ;;  %v6952_v2 = vpop.f32.mrb[165].mxu1 }
 0x243   : > { %v6889_v30 = vadd.f32 %v6888_v5, %v6887_v36  ;;  %v6953_v15 = vadd.f32 %v6952_v2, %v6951_v58  ;;  %v6890_v6 = vpop.f32.mrb[166].mxu0  ;;  %v6954_v3 = vpop.f32.mrb[166].mxu1 }
 0x244   : > { %v6891_v13 = vpop.f32.mrb[167].mxu0  ;;  %v6955_v60 = vpop.f32.mrb[167].mxu1 }
 0x245   : > { %v9522_v10 = vadd.f32 %v6889_v30, %v9375_v45  ;;  %v9525_v62 = vadd.f32 %v6953_v15, %v9378_v46  ;;  %v6892_v43 = vadd.f32 %v6891_v13, %v6890_v6  ;;  %v6956_v57 = vadd.f32 %v6955_v60, %v6954_v3  ;;  %v8141_v46 = vld [vmem:[%s8300_s13 + $0x628] ss:$84 sps:$4 sm:$0xff]   ;;  %v8150_v15 = vld [vmem:[%s8300_s13 + $0x198] ss:$84 sps:$4 sm:$0xff]  }
 0x246   : > { %5018 = vmatmul.mubr.bf16.gmra.mrb[16].mxu0 %v8134_v21  ;;  %5115 = vmatmul.mubr.bf16.vlgmr.msra.gmra.mrb[16].mxu1 %v8137_v23  ;;  %v8156_v13 = vld [vmem:[%s8300_s13 + $0x77c] ss:$84 sps:$4 sm:$0xff]   ;;  %v8159_v60 = vld [vmem:[%s8300_s13 + $0x244] ss:$84 sps:$4 sm:$0xff]  }
 0x247   : > { %v9528_v52 = vadd.f32 %v6892_v43, %v9381_v61  ;;  %v9531_v25 = vadd.f32 %v6956_v57, %v9384_v12  ;;  %5025 = vmatprep.mubr.bf16.mxu0 %v8143_v11  ;;  %5122 = vmatprep.mubr.bf16.mxu1 %v8146_v28 }
 0x249   : > { %v6893_v20 = vpop.f32.mrb[168].mxu0  ;;  %v6957_v45 = vpop.f32.mrb[168].mxu1 }
 0x24a   : > { %v6894_v35 = vpop.f32.mrb[169].mxu0  ;;  %v6958_v53 = vpop.f32.mrb[169].mxu1 }
 0x24b   : > { %v6895_v55 = vadd.f32 %v6894_v35, %v6893_v20  ;;  %v6959_v14 = vadd.f32 %v6958_v53, %v6957_v45  ;;  %v6896_v24 = vpop.f32.mrb[170].mxu0  ;;  %v6960_v47 = vpop.f32.mrb[170].mxu1 }
 0x24c   : > { %v6897_v18 = vpop.f32.mrb[171].mxu0  ;;  %v6961_v61 = vpop.f32.mrb[171].mxu1 }
 0x24d   : > { %v9538_v12 = vadd.f32 %v6895_v55, %v9395_v42  ;;  %v9541_v63 = vadd.f32 %v6959_v14, %v9398_v27  ;;  %v6898_v36 = vadd.f32 %v6897_v18, %v6896_v24  ;;  %v6962_v58 = vadd.f32 %v6961_v61, %v6960_v47  ;;  %v8147_v27 = vld [vmem:[%s8300_s13 + $0x6d0] ss:$84 sps:$4 sm:$0xff]   ;;  %v8157_v14 = vld [vmem:[%s8300_s13 + $0x240] ss:$84 sps:$4 sm:$0xff]  }
 0x24e   : > { %5026 = vmatmul.mubr.bf16.gmra.mrb[20].mxu0 %v8141_v46  ;;  %5123 = vmatmul.mubr.bf16.gmra.mrb[20].mxu1 %v8144_v32  ;;  %v8162_v18 = vld [vmem:[%s8300_s13 + $0x824] ss:$84 sps:$4 sm:$0xff]   ;;  %v8165_v61 = vld [vmem:[%s8300_s13 + $0x2ec] ss:$84 sps:$4 sm:$0xff]  }
 0x24f   : > { %v9544_v5 = vadd.f32 %v6898_v36, %v9404_v33  ;;  %v9547_v2 = vadd.f32 %v6962_v58, %v9407_v41  ;;  %5033 = vmatprep.mubr.bf16.mxu0 %v8149_v16  ;;  %5130 = vmatprep.mubr.bf16.mxu1 %v8152_v56 }
 0x251   : > { %v6899_v21 = vpop.f32.mrb[172].mxu0  ;;  %v6963_v42 = vpop.f32.mrb[172].mxu1 }
 0x252   : > { %v6900_v23 = vpop.f32.mrb[173].mxu0  ;;  %v6964_v30 = vpop.f32.mrb[173].mxu1 }
 0x253   : > { %v6901_v6 = vadd.f32 %v6900_v23, %v6899_v21  ;;  %v6965_v3 = vadd.f32 %v6964_v30, %v6963_v42  ;;  %v6902_v11 = vpop.f32.mrb[174].mxu0  ;;  %v6966_v28 = vpop.f32.mrb[174].mxu1 }
 0x254   : > { %v6903_v43 = vpop.f32.mrb[175].mxu0  ;;  %v6967_v33 = vpop.f32.mrb[175].mxu1 }
 0x255   : > { %v9554_v41 = vadd.f32 %v6901_v6, %v9417_v37  ;;  %v9557_v57 = vadd.f32 %v6965_v3, %v9420_v17  ;;  %v6904_v20 = vadd.f32 %v6903_v43, %v6902_v11  ;;  %v6968_v45 = vadd.f32 %v6967_v33, %v6966_v28  ;;  %v8154_v17 = vld [vmem:[%s8300_s13 + $0x778] ss:$84 sps:$4 sm:$0xff]   ;;  %v8163_v3 = vld [vmem:[%s8300_s13 + $0x2e8] ss:$84 sps:$4 sm:$0xff]  }
 0x256   : > { %5034 = vmatmul.mubr.bf16.gmra.mrb[24].mxu0 %v8147_v27  ;;  %5131 = vmatmul.mubr.bf16.gmra.mrb[24].mxu1 %v8150_v15  ;;  %v8169_v43 = vld [vmem:[%s8300_s13 + $0x8cc] ss:$84 sps:$4 sm:$0xff]   ;;  %v8172_v33 = vld [vmem:[%s8300_s13 + $0x394] ss:$84 sps:$4 sm:$0xff]  }
 0x257   : > { %v9560_v35 = vadd.f32 %v6904_v20, %v9426_v19  ;;  %v9563_v53 = vadd.f32 %v6968_v45, %v9429_v38  ;;  %5041 = vmatprep.mubr.bf16.mxu0 %v8156_v13  ;;  %5138 = vmatprep.mubr.bf16.mxu1 %v8159_v60 }
 0x259   : > { %v6969_v46 = vpop.f32.mrb[176].mxu1  ;;  %v7033_v37 = vpop.f32.mrb[176].mxu0 }
 0x25a   : > { %v6970_v32 = vpop.f32.mrb[177].mxu1  ;;  %v7034_v55 = vpop.f32.mrb[177].mxu0 }
 0x25b   : > { %v6971_v24 = vadd.f32 %v6970_v32, %v6969_v46  ;;  %v7035_v47 = vadd.f32 %v7034_v55, %v7033_v37  ;;  %v6972_v16 = vpop.f32.mrb[178].mxu1  ;;  %v7036_v56 = vpop.f32.mrb[178].mxu0 }
 0x25c   : > { %v6973_v36 = vpop.f32.mrb[179].mxu1  ;;  %v7037_v19 = vpop.f32.mrb[179].mxu0 }
 0x25d   : > { %v9570_v38 = vadd.f32 %v6971_v24, %v9439_v59  ;;  %v9573_v58 = vadd.f32 %v7035_v47, %v9442_v48  ;;  %v6974_v21 = vadd.f32 %v6973_v36, %v6972_v16  ;;  %v7038_v42 = vadd.f32 %v7037_v19, %v7036_v56  ;;  %v8160_v48 = vld [vmem:[%s8300_s13 + $0x820] ss:$84 sps:$4 sm:$0xff]   ;;  %v8170_v47 = vld [vmem:[%s8300_s13 + $0x390] ss:$84 sps:$4 sm:$0xff]  }
 0x25e   : > { %5042 = vmatmul.mubr.bf16.gmra.mrb[28].mxu0 %v8154_v17  ;;  %5139 = vmatmul.mubr.bf16.gmra.mrb[28].mxu1 %v8157_v14  ;;  %v8175_v36 = vld [vmem:[%s8300_s13 + $0x974] ss:$84 sps:$4 sm:$0xff]   ;;  %v8178_v19 = vld [vmem:[%s8300_s13 + $0x43c] ss:$84 sps:$4 sm:$0xff]  }
 0x25f   : > { %v9576_v23 = vadd.f32 %v6974_v21, %v9448_v34  ;;  %v9579_v30 = vadd.f32 %v7038_v42, %v9451_v1  ;;  %5049 = vmatprep.mubr.bf16.mxu0 %v8162_v18  ;;  %5146 = vmatprep.mubr.bf16.mxu1 %v8165_v61 }
 0x261   : > { %v6975_v27 = vpop.f32.mrb[180].mxu1  ;;  %v7039_v59 = vpop.f32.mrb[180].mxu0 }
 0x262   : > { %v6976_v15 = vpop.f32.mrb[181].mxu1  ;;  %v7040_v6 = vpop.f32.mrb[181].mxu0 }
 0x263   : > { %v6977_v11 = vadd.f32 %v6976_v15, %v6975_v27  ;;  %v7041_v28 = vadd.f32 %v7040_v6, %v7039_v59  ;;  %v6978_v13 = vpop.f32.mrb[182].mxu1  ;;  %v7042_v60 = vpop.f32.mrb[182].mxu0 }
 0x264   : > { %v6979_v20 = vpop.f32.mrb[183].mxu1  ;;  %v7043_v34 = vpop.f32.mrb[183].mxu0 }
 0x265   : > { %v9586_v1 = vadd.f32 %v6977_v11, %v9458_v7  ;;  %v9589_v45 = vadd.f32 %v7041_v28, %v9461_v22  ;;  %v6980_v46 = vadd.f32 %v6979_v20, %v6978_v13  ;;  %v7044_v37 = vadd.f32 %v7043_v34, %v7042_v60  ;;  %v8167_v22 = vld [vmem:[%s8300_s13 + $0x8c8] ss:$84 sps:$4 sm:$0xff]   ;;  %v8176_v28 = vld [vmem:[%s8300_s13 + $0x438] ss:$84 sps:$4 sm:$0xff]  }
 0x266   : > { %5050 = vmatmul.mubr.bf16.gmra.mrb[32].mxu0 %v8160_v48  ;;  %5147 = vmatmul.mubr.bf16.gmra.mrb[32].mxu1 %v8163_v3  ;;  %v8182_v20 = vld [vmem:[%s8300_s13 + $0xa1c] ss:$84 sps:$4 sm:$0xff]   ;;  %v8185_v34 = vld [vmem:[%s8300_s13 + $0x4e4] ss:$84 sps:$4 sm:$0xff]  }
 0x267   : > { %v9592_v32 = vadd.f32 %v6980_v46, %v9464_v29  ;;  %v9595_v55 = vadd.f32 %v7044_v37, %v9467_v50  ;;  %5057 = vmatprep.mubr.bf16.mxu0 %v8169_v43  ;;  %5154 = vmatprep.mubr.bf16.mxu1 %v8172_v33 }
 0x269   : > { %v6981_v17 = vpop.f32.mrb[184].mxu1  ;;  %v7045_v7 = vpop.f32.mrb[184].mxu0 }
 0x26a   : > { %v6982_v14 = vpop.f32.mrb[185].mxu1  ;;  %v7046_v24 = vpop.f32.mrb[185].mxu0 }
 0x26b   : > { %v6983_v16 = vadd.f32 %v6982_v14, %v6981_v17  ;;  %v7047_v56 = vadd.f32 %v7046_v24, %v7045_v7  ;;  %v6984_v18 = vpop.f32.mrb[186].mxu1  ;;  %v7048_v61 = vpop.f32.mrb[186].mxu0 }
 0x26c   : > { %v6985_v21 = vpop.f32.mrb[187].mxu1  ;;  %v7049_v29 = vpop.f32.mrb[187].mxu0 }
 0x26d   : > { %v9602_v50 = vadd.f32 %v6983_v16, %v9474_v4  ;;  %v9605_v42 = vadd.f32 %v7047_v56, %v9477_v51  ;;  %v6986_v27 = vadd.f32 %v6985_v21, %v6984_v18  ;;  %v7050_v59 = vadd.f32 %v7049_v29, %v7048_v61  ;;  %v8173_v51 = vld [vmem:[%s8300_s13 + $0x970] ss:$84 sps:$4 sm:$0xff]   ;;  %v8183_v56 = vld [vmem:[%s8300_s13 + $0x4e0] ss:$84 sps:$4 sm:$0xff]  }
 0x26e   : > { %5058 = vmatmul.mubr.bf16.gmra.mrb[36].mxu0 %v8167_v22  ;;  %5155 = vmatmul.mubr.bf16.gmra.mrb[36].mxu1 %v8170_v47  ;;  %v8188_v21 = vld [vmem:[%s8300_s13 + $0x58c] ss:$84 sps:$4 sm:$0xff]   ;;  %v8189_v29 = vld [vmem:[%s8300_s13 + $0x50] ss:$84 sps:$4 sm:$0xff]  }
 0x26f   : > { %v9608_v15 = vadd.f32 %v6986_v27, %v9480_v39  ;;  %v9611_v6 = vadd.f32 %v7050_v59, %v9483_v31  ;;  %5065 = vmatprep.mubr.bf16.mxu0 %v8175_v36  ;;  %5162 = vmatprep.mubr.bf16.mxu1 %v8178_v19 }
 0x271   : > { %v6987_v48 = vpop.f32.mrb[188].mxu1  ;;  %v7051_v4 = vpop.f32.mrb[188].mxu0 }
 0x272   : > { %v6988_v3 = vpop.f32.mrb[189].mxu1  ;;  %v7052_v11 = vpop.f32.mrb[189].mxu0 }
 0x273   : > { %v6989_v13 = vadd.f32 %v6988_v3, %v6987_v48  ;;  %v7053_v60 = vadd.f32 %v7052_v11, %v7051_v4  ;;  %v6990_v43 = vpop.f32.mrb[190].mxu1  ;;  %v7054_v33 = vpop.f32.mrb[190].mxu0 }
 0x274   : > { %v6991_v46 = vpop.f32.mrb[191].mxu1  ;;  %v7055_v39 = vpop.f32.mrb[191].mxu0 }
 0x275   : > { %v9618_v31 = vadd.f32 %v6989_v13, %v9490_v49  ;;  %v9621_v37 = vadd.f32 %v7053_v60, %v9493_v40  ;;  %v6992_v17 = vadd.f32 %v6991_v46, %v6990_v43  ;;  %v7056_v7 = vadd.f32 %v7055_v39, %v7054_v33  ;;  %v8180_v40 = vld [vmem:[%s8300_s13 + $0xa18] ss:$84 sps:$4 sm:$0xff]   ;;  %v8193_v46 = vld [vmem:[%s8300_s13 + $0x634] ss:$84 sps:$4 sm:$0xff]  }
 0x276   : > { %5066 = vmatmul.mubr.bf16.gmra.mrb[40].mxu0 %v8173_v51  ;;  %5163 = vmatmul.mubr.bf16.gmra.mrb[40].mxu1 %v8176_v28  ;;  %v8190_v60 = vld [vmem:[%s8300_s13 + $0xf8] ss:$84 sps:$4 sm:$0xff]   ;;  %v8194_v39 = vld [vmem:[%s8300_s13 + $0x1a0] ss:$84 sps:$4 sm:$0xff]  }
 0x277   : > { %v9624_v14 = vadd.f32 %v6992_v17, %v9496_v8  ;;  %v9627_v24 = vadd.f32 %v7056_v7, %v9499_v9  ;;  %5073 = vmatprep.mubr.bf16.mxu0 %v8182_v20  ;;  %5170 = vmatprep.mubr.bf16.mxu1 %v8185_v34 }
 0x279   : > { %v6993_v22 = vpop.f32.mrb[192].mxu1  ;;  %v7057_v49 = vpop.f32.mrb[192].mxu0 }
 0x27a   : > { %v6994_v47 = vpop.f32.mrb[193].mxu1  ;;  %v7058_v16 = vpop.f32.mrb[193].mxu0 }
 0x27b   : > { %v6995_v18 = vadd.f32 %v6994_v47, %v6993_v22  ;;  %v7059_v61 = vadd.f32 %v7058_v16, %v7057_v49  ;;  %v6996_v36 = vpop.f32.mrb[194].mxu1  ;;  %v7060_v19 = vpop.f32.mrb[194].mxu0 }
 0x27c   : > { %v6997_v27 = vpop.f32.mrb[195].mxu1  ;;  %v7061_v8 = vpop.f32.mrb[195].mxu0 }
 0x27d   : > { %v9634_v9 = vadd.f32 %v6995_v18, %v9506_v26  ;;  %v9637_v59 = vadd.f32 %v7059_v61, %v9509_v54  ;;  %v6998_v48 = vadd.f32 %v6997_v27, %v6996_v36  ;;  %v7062_v4 = vadd.f32 %v7061_v8, %v7060_v19  ;;  %v8186_v54 = vld [vmem:[%s8300_s13 + $0x588] ss:$84 sps:$4 sm:$0xff]   ;;  %v8199_v8 = vld [vmem:[%s8300_s13 + $0x2f0] ss:$84 sps:$4 sm:$0xff]  }
 0x27e   : > { %5074 = vmatmul.mubr.bf16.gmra.mrb[44].mxu0 %v8180_v40  ;;  %5171 = vmatmul.mubr.bf16.gmra.mrb[44].mxu1 %v8183_v56  ;;  %v8195_v61 = vld [vmem:[%s8300_s13 + $0x248] ss:$84 sps:$4 sm:$0xff]  }
 0x27f   : > { %v9640_v3 = vadd.f32 %v6998_v48, %v9512_v44  ;;  %v9643_v11 = vadd.f32 %v7062_v4, %v9515_v0  ;;  %5178 = vmatprep.mubr.bf16.mxu1 %v8188_v21  ;;  %7505 = vmatprep.mubr.bf16.mxu0 %v8189_v29  ;;  %v8198_v27 = vld [vmem:[%s8300_s13 + $0x6dc] ss:$84 sps:$4 sm:$0xff]  }
 0x281   : > { %v6999_v51 = vpop.f32.mrb[196].mxu1  ;;  %v7063_v26 = vpop.f32.mrb[196].mxu0 }
 0x282   : > { %v7000_v28 = vpop.f32.mrb[197].mxu1  ;;  %v7064_v13 = vpop.f32.mrb[197].mxu0 }
 0x283   : > { %v7001_v43 = vadd.f32 %v7000_v28, %v6999_v51  ;;  %v7065_v33 = vadd.f32 %v7064_v13, %v7063_v26  ;;  %v7002_v20 = vpop.f32.mrb[198].mxu1  ;;  %v7066_v34 = vpop.f32.mrb[198].mxu0 }
 0x284   : > { %v7003_v17 = vpop.f32.mrb[199].mxu1  ;;  %v7067_v44 = vpop.f32.mrb[199].mxu0 }
 0x285   : > { %v9650_v0 = vadd.f32 %v7001_v43, %v9522_v10  ;;  %v9653_v7 = vadd.f32 %v7065_v33, %v9525_v62  ;;  %v7004_v22 = vadd.f32 %v7003_v17, %v7002_v20  ;;  %v7068_v49 = vadd.f32 %v7067_v44, %v7066_v34  ;;  %v8191_v62 = vld [vmem:[%s8300_s13 + $0x630] ss:$84 sps:$4 sm:$0xff]   ;;  %v8200_v33 = vld [vmem:[%s8300_s13 + $0x398] ss:$84 sps:$4 sm:$0xff]   ;;  %v8204_v44 = vld [vmem:[%s8300_s13 + $0x440] ss:$84 sps:$4 sm:$0xff]  }
 0x286   : > { %5179 = vmatmul.mubr.bf16.gmra.mrb[48].mxu1 %v8186_v54  ;;  %7506 = vmatmul.mubr.bf16.vlgmr.msra.gmra.mrb[48].mxu0 %v8190_v60  ;;  %v8203_v17 = vld [vmem:[%s8300_s13 + $0x784] ss:$84 sps:$4 sm:$0xff]  }
 0x287   : > { %v9656_v47 = vadd.f32 %v7004_v22, %v9528_v52  ;;  %v9659_v16 = vadd.f32 %v7068_v49, %v9531_v25  ;;  %5186 = vmatprep.mubr.bf16.mxu1 %v8193_v46  ;;  %7509 = vmatprep.mubr.bf16.mxu0 %v8194_v39 }
 0x289   : > { %v7005_v40 = vpop.f32.mrb[200].mxu1  ;;  %v7069_v10 = vpop.f32.mrb[200].mxu0 }
 0x28a   : > { %v7006_v56 = vpop.f32.mrb[201].mxu1  ;;  %v7070_v18 = vpop.f32.mrb[201].mxu0 }
 0x28b   : > { %v7007_v36 = vadd.f32 %v7006_v56, %v7005_v40  ;;  %v7071_v19 = vadd.f32 %v7070_v18, %v7069_v10  ;;  %v7008_v21 = vpop.f32.mrb[202].mxu1  ;;  %v7072_v29 = vpop.f32.mrb[202].mxu0 }
 0x28c   : > { %v7009_v48 = vpop.f32.mrb[203].mxu1  ;;  %v7073_v52 = vpop.f32.mrb[203].mxu0 }
 0x28d   : > { %v9666_v25 = vadd.f32 %v7007_v36, %v9538_v12  ;;  %v9669_v4 = vadd.f32 %v7071_v19, %v9541_v63  ;;  %v7010_v51 = vadd.f32 %v7009_v48, %v7008_v21  ;;  %v7074_v26 = vadd.f32 %v7073_v52, %v7072_v29  ;;  %v8196_v63 = vld [vmem:[%s8300_s13 + $0x6d8] ss:$84 sps:$4 sm:$0xff]   ;;  %v8205_v19 = vld [vmem:[%s8300_s13 + $0x4e8] ss:$84 sps:$4 sm:$0xff]   ;;  %v8209_v52 = vld [vmem:[%s8300_s13 + $0x590] ss:$84 sps:$4 sm:$0xff]  }
 0x28e   : > { %5187 = vmatmul.mubr.bf16.gmra.mrb[52].mxu1 %v8191_v62  ;;  %7510 = vmatmul.mubr.bf16.gmra.mrb[52].mxu0 %v8195_v61  ;;  %v8208_v48 = vld [vmem:[%s8300_s13 + $0x82c] ss:$84 sps:$4 sm:$0xff]  }
 0x28f   : > { %v9672_v28 = vadd.f32 %v7010_v51, %v9544_v5  ;;  %v9675_v13 = vadd.f32 %v7074_v26, %v9547_v2  ;;  %5194 = vmatprep.mubr.bf16.mxu1 %v8198_v27  ;;  %7513 = vmatprep.mubr.bf16.mxu0 %v8199_v8 }
 0x291   : > { %v7011_v54 = vpop.f32.mrb[204].mxu1  ;;  %v7075_v12 = vpop.f32.mrb[204].mxu0 }
 0x292   : > { %v7012_v60 = vpop.f32.mrb[205].mxu1  ;;  %v7076_v43 = vpop.f32.mrb[205].mxu0 }
 0x293   : > { %v7013_v20 = vadd.f32 %v7012_v60, %v7011_v54  ;;  %v7077_v34 = vadd.f32 %v7076_v43, %v7075_v12  ;;  %v7014_v46 = vpop.f32.mrb[206].mxu1  ;;  %v7078_v39 = vpop.f32.mrb[206].mxu0 }
 0x294   : > { %v7015_v22 = vpop.f32.mrb[207].mxu1  ;;  %v7079_v5 = vpop.f32.mrb[207].mxu0 }
 0x295   : > { %v9682_v2 = vadd.f32 %v7013_v20, %v9554_v41  ;;  %v9685_v49 = vadd.f32 %v7077_v34, %v9557_v57  ;;  %v7016_v40 = vadd.f32 %v7015_v22, %v7014_v46  ;;  %v7080_v10 = vadd.f32 %v7079_v5, %v7078_v39  ;;  %v8201_v57 = vld [vmem:[%s8300_s13 + $0x780] ss:$84 sps:$4 sm:$0xff]   ;;  %v8210_v34 = vld [vmem:[%s8300_s13 + $0x638] ss:$84 sps:$4 sm:$0xff]  }
 0x296   : > { %5195 = vmatmul.mubr.bf16.gmra.mrb[56].mxu1 %v8196_v63  ;;  %7514 = vmatmul.mubr.bf16.gmra.mrb[56].mxu0 %v8200_v33  ;;  %v8213_v22 = vld [vmem:[%s8300_s13 + $0x8d4] ss:$84 sps:$4 sm:$0xff]  }
 0x297   : > { %v9688_v56 = vadd.f32 %v7016_v40, %v9560_v35  ;;  %v9691_v18 = vadd.f32 %v7080_v10, %v9563_v53  ;;  %5202 = vmatprep.mubr.bf16.mxu1 %v8203_v17  ;;  %7517 = vmatprep.mubr.bf16.mxu0 %v8204_v44  ;;  %v8214_v5 = vld [vmem:[%s8300_s13 + $0x6e0] ss:$84 sps:$4 sm:$0xff]  }
 0x299   : > { %v7081_v62 = vpop.f32.mrb[208].mxu0  ;;  %v7145_v41 = vpop.f32.mrb[208].mxu1 }
 0x29a   : > { %v7082_v61 = vpop.f32.mrb[209].mxu0  ;;  %v7146_v36 = vpop.f32.mrb[209].mxu1 }
 0x29b   : > { %v7083_v21 = vadd.f32 %v7082_v61, %v7081_v62  ;;  %v7147_v29 = vadd.f32 %v7146_v36, %v7145_v41  ;;  %v7084_v27 = vpop.f32.mrb[210].mxu0  ;;  %v7148_v8 = vpop.f32.mrb[210].mxu1 }
 0x29c   : > { %v7085_v51 = vpop.f32.mrb[211].mxu0  ;;  %v7149_v35 = vpop.f32.mrb[211].mxu1 }
 0x29d   : > { %v9698_v53 = vadd.f32 %v7083_v21, %v9570_v38  ;;  %v9701_v26 = vadd.f32 %v7147_v29, %v9573_v58  ;;  %v7086_v54 = vadd.f32 %v7085_v51, %v7084_v27  ;;  %v7150_v12 = vadd.f32 %v7149_v35, %v7148_v8  ;;  %v8206_v58 = vld [vmem:[%s8300_s13 + $0x828] ss:$84 sps:$4 sm:$0xff]   ;;  %v8219_v35 = vld [vmem:[%s8300_s13 + $0x830] ss:$84 sps:$4 sm:$0xff]  }
 0x29e   : > { %5203 = vmatmul.mubr.bf16.gmra.mrb[60].mxu1 %v8201_v57  ;;  %7518 = vmatmul.mubr.bf16.gmra.mrb[60].mxu0 %v8205_v19  ;;  %v8215_v29 = vld [vmem:[%s8300_s13 + $0x788] ss:$84 sps:$4 sm:$0xff]  }
 0x29f   : > { %v9704_v60 = vadd.f32 %v7086_v54, %v9576_v23  ;;  %v9707_v43 = vadd.f32 %v7150_v12, %v9579_v30  ;;  %5210 = vmatprep.mubr.bf16.mxu1 %v8208_v48  ;;  %7521 = vmatprep.mubr.bf16.mxu0 %v8209_v52  ;;  %v8218_v51 = vld [vmem:[%s8300_s13 + $0x97c] ss:$84 sps:$4 sm:$0xff]  }
 0x2a1   : > { %v7087_v63 = vpop.f32.mrb[212].mxu0  ;;  %v7151_v38 = vpop.f32.mrb[212].mxu1 }
 0x2a2   : > { %v7088_v33 = vpop.f32.mrb[213].mxu0  ;;  %v7152_v20 = vpop.f32.mrb[213].mxu1 }
 0x2a3   : > { %v7089_v46 = vadd.f32 %v7088_v33, %v7087_v63  ;;  %v7153_v39 = vadd.f32 %v7152_v20, %v7151_v38  ;;  %v7090_v17 = vpop.f32.mrb[214].mxu0  ;;  %v7154_v44 = vpop.f32.mrb[214].mxu1 }
 0x2a4   : > { %v7091_v40 = vpop.f32.mrb[215].mxu0  ;;  %v7155_v23 = vpop.f32.mrb[215].mxu1 }
 0x2a5   : > { %v9714_v30 = vadd.f32 %v7089_v46, %v9586_v1  ;;  %v9717_v10 = vadd.f32 %v7153_v39, %v9589_v45  ;;  %v7092_v62 = vadd.f32 %v7091_v40, %v7090_v17  ;;  %v7156_v41 = vadd.f32 %v7155_v23, %v7154_v44  ;;  %v8211_v45 = vld [vmem:[%s8300_s13 + $0x8d0] ss:$84 sps:$4 sm:$0xff]   ;;  %v8220_v39 = vld [vmem:[%s8300_s13 + $0x8d8] ss:$84 sps:$4 sm:$0xff]   ;;  %v8224_v23 = vld [vmem:[%s8300_s13 + $0x980] ss:$84 sps:$4 sm:$0xff]  }
 0x2a6   : > { %5211 = vmatmul.mubr.bf16.gmra.mrb[64].mxu1 %v8206_v58  ;;  %7522 = vmatmul.mubr.bf16.gmra.mrb[64].mxu0 %v8210_v34  ;;  %v8223_v40 = vld [vmem:[%s8300_s13 + $0xa24] ss:$84 sps:$4 sm:$0xff]  }
 0x2a7   : > { %v9720_v61 = vadd.f32 %v7092_v62, %v9592_v32  ;;  %v9723_v36 = vadd.f32 %v7156_v41, %v9595_v55  ;;  %5218 = vmatprep.mubr.bf16.mxu1 %v8213_v22  ;;  %7525 = vmatprep.mubr.bf16.mxu0 %v8214_v5 }
 0x2a9   : > { %v7093_v57 = vpop.f32.mrb[216].mxu0  ;;  %v7157_v1 = vpop.f32.mrb[216].mxu1 }
 0x2aa   : > { %v7094_v19 = vpop.f32.mrb[217].mxu0  ;;  %v7158_v21 = vpop.f32.mrb[217].mxu1 }
 0x2ab   : > { %v7095_v27 = vadd.f32 %v7094_v19, %v7093_v57  ;;  %v7159_v8 = vadd.f32 %v7158_v21, %v7157_v1  ;;  %v7096_v48 = vpop.f32.mrb[218].mxu0  ;;  %v7160_v52 = vpop.f32.mrb[218].mxu1 }
 0x2ac   : > { %v7097_v54 = vpop.f32.mrb[219].mxu0  ;;  %v7161_v32 = vpop.f32.mrb[219].mxu1 }
 0x2ad   : > { %v9730_v55 = vadd.f32 %v7095_v27, %v9602_v50  ;;  %v9733_v12 = vadd.f32 %v7159_v8, %v9605_v42  ;;  %v7098_v63 = vadd.f32 %v7097_v54, %v7096_v48  ;;  %v7162_v38 = vadd.f32 %v7161_v32, %v7160_v52  ;;  %v8216_v42 = vld [vmem:[%s8300_s13 + $0x978] ss:$84 sps:$4 sm:$0xff]   ;;  %v8221_v8 = vld [vmem:[%s8300_s13 + $0xa20] ss:$84 sps:$4 sm:$0xff]   ;;  %v8225_v48 = vld [vmem:[%s8300_s13 + $0xa28] ss:$84 sps:$4 sm:$0xff]  }
 0x2ae   : > { %5219 = vmatmul.mubr.bf16.gmra.mrb[68].mxu1 %v8211_v45  ;;  %7526 = vmatmul.mubr.bf16.gmra.mrb[68].mxu0 %v8215_v29  ;;  %s9991_s13 = sshll.u32 %s10228_s19, 3 }
 0x2af   : > { %v9736_v33 = vadd.f32 %v7098_v63, %v9608_v15  ;;  %v9739_v20 = vadd.f32 %v7162_v38, %v9611_v6  ;;  %5226 = vmatprep.mubr.bf16.mxu1 %v8218_v51  ;;  %7529 = vmatprep.mubr.bf16.mxu0 %v8219_v35  ;;  %s10006_s11 = scalar_lea.vmem %s10224_s2, %s9991_s13  ;;  %s10026_s14 = scalar_lea.vmem %s10225_s3, %s9991_s13 }
 0x2b0   : > { %s10033_s18 = scalar_lea.vmem %s10226_s4, %s9991_s13 }
 0x2b1   : > { %v7099_v58 = vpop.f32.mrb[220].mxu0  ;;  %v7163_v50 = vpop.f32.mrb[220].mxu1 }
 0x2b2   : > { %v7100_v34 = vpop.f32.mrb[221].mxu0  ;;  %v7164_v46 = vpop.f32.mrb[221].mxu1 }
 0x2b3   : > { %v7101_v17 = vadd.f32 %v7100_v34, %v7099_v58  ;;  %v7165_v44 = vadd.f32 %v7164_v46, %v7163_v50  ;;  %v7102_v22 = vpop.f32.mrb[222].mxu0  ;;  %v7166_v5 = vpop.f32.mrb[222].mxu1 }
 0x2b4   : > { %v7103_v62 = vpop.f32.mrb[223].mxu0  ;;  %v7167_v15 = vpop.f32.mrb[223].mxu1 }
 0x2b5   : > { %v9746_v6 = vadd.f32 %v7101_v17, %v9618_v31  ;;  %v9749_v41 = vadd.f32 %v7165_v44, %v9621_v37  ;;  %v7104_v57 = vadd.f32 %v7103_v62, %v7102_v22  ;;  %v7168_v1 = vadd.f32 %v7167_v15, %v7166_v5 }
 0x2b6   : > { %5227 = vmatmul.mubr.bf16.gmra.mrb[72].mxu1 %v8216_v42  ;;  %7530 = vmatmul.mubr.bf16.gmra.mrb[72].mxu0 %v8220_v39 }
 0x2b7   : > { %v9752_v19 = vadd.f32 %v7104_v57, %v9624_v14  ;;  %v9755_v21 = vadd.f32 %v7168_v1, %v9627_v24  ;;  %5234 = vmatprep.mubr.bf16.mxu1 %v8223_v40  ;;  %7533 = vmatprep.mubr.bf16.mxu0 %v8224_v23 }
 0x2b9   : > { %v7105_v45 = vpop.f32.mrb[224].mxu0  ;;  %v7169_v29 = vpop.f32.mrb[224].mxu1 }
 0x2ba   : > { %v7106_v27 = vpop.f32.mrb[225].mxu0  ;;  %v7170_v31 = vpop.f32.mrb[225].mxu1 }
 0x2bb   : > { %v7107_v37 = vadd.f32 %v7106_v27, %v7105_v45  ;;  %v7171_v52 = vadd.f32 %v7170_v31, %v7169_v29  ;;  %v7108_v51 = vpop.f32.mrb[226].mxu0  ;;  %v7172_v35 = vpop.f32.mrb[226].mxu1 }
 0x2bc   : > { %v7109_v54 = vpop.f32.mrb[227].mxu0  ;;  %v7173_v32 = vpop.f32.mrb[227].mxu1 }
 0x2bd   : > { %v9760_v14 = vadd.f32 %v7107_v37, %v9634_v9  ;;  %v9763_v24 = vadd.f32 %v7171_v52, %v9637_v59  ;;  %v7110_v63 = vadd.f32 %v7109_v54, %v7108_v51  ;;  %v7174_v38 = vadd.f32 %v7173_v32, %v7172_v35 }
 0x2be   : > { %5235 = vmatmul.mubr.bf16.gmra.mrb[76].mxu1 %v8221_v8  ;;  %7534 = vmatmul.mubr.bf16.gmra.mrb[76].mxu0 %v8225_v48 }
 0x2bf   : > { %v9766_v58 = vadd.f32 %v7110_v63, %v9640_v3  ;;  %v9769_v50 = vadd.f32 %v7174_v38, %v9643_v11 }
 0x2c1   : > { %v7111_v34 = vpop.f32.mrb[228].mxu0  ;;  %v7175_v46 = vpop.f32.mrb[228].mxu1 }
 0x2c2   : > { %v7112_v42 = vpop.f32.mrb[229].mxu0  ;;  %v7176_v39 = vpop.f32.mrb[229].mxu1 }
 0x2c3   : > { %v7113_v17 = vadd.f32 %v7112_v42, %v7111_v34  ;;  %v7177_v9 = vadd.f32 %v7176_v39, %v7175_v46  ;;  %v7114_v44 = vpop.f32.mrb[230].mxu0  ;;  %v7178_v22 = vpop.f32.mrb[230].mxu1 }
 0x2c4   : > { %v7115_v59 = vpop.f32.mrb[231].mxu0  ;;  %v7179_v5 = vpop.f32.mrb[231].mxu1 }
 0x2c5   : > { %v9772_v40 = vadd.f32 %v7113_v17, %v9650_v0  ;;  %v9775_v23 = vadd.f32 %v7177_v9, %v9653_v7  ;;  %v7116_v3 = vadd.f32 %v7115_v59, %v7114_v44  ;;  %v7180_v62 = vadd.f32 %v7179_v5, %v7178_v22 }
 0x2c7   : > { %v9778_v11 = vadd.f32 %v7116_v3, %v9656_v47  ;;  %v9781_v15 = vadd.f32 %v7180_v62, %v9659_v16 }
 0x2c9   : > { %v7117_v57 = vpop.f32.mrb[232].mxu0  ;;  %v7181_v1 = vpop.f32.mrb[232].mxu1 }
 0x2ca   : > { %v7118_v45 = vpop.f32.mrb[233].mxu0  ;;  %v7182_v29 = vpop.f32.mrb[233].mxu1 }
 0x2cb   : > { %v7119_v27 = vadd.f32 %v7118_v45, %v7117_v57  ;;  %v7183_v31 = vadd.f32 %v7182_v29, %v7181_v1  ;;  %v7120_v8 = vpop.f32.mrb[234].mxu0  ;;  %v7184_v0 = vpop.f32.mrb[234].mxu1 }
 0x2cc   : > { %v7121_v48 = vpop.f32.mrb[235].mxu0  ;;  %v7185_v37 = vpop.f32.mrb[235].mxu1 }
 0x2cd   : > { %v9784_v7 = vadd.f32 %v7119_v27, %v9666_v25  ;;  %v9787_v52 = vadd.f32 %v7183_v31, %v9669_v4  ;;  %v7122_v47 = vadd.f32 %v7121_v48, %v7120_v8  ;;  %v7186_v51 = vadd.f32 %v7185_v37, %v7184_v0 }
 0x2cf   : > { %v9790_v16 = vadd.f32 %v7122_v47, %v9672_v28  ;;  %v9793_v35 = vadd.f32 %v7186_v51, %v9675_v13 }
 0x2d1   : > { %v7123_v54 = vpop.f32.mrb[236].mxu0  ;;  %v7187_v32 = vpop.f32.mrb[236].mxu1 }
 0x2d2   : > { %v7124_v63 = vpop.f32.mrb[237].mxu0  ;;  %v7188_v38 = vpop.f32.mrb[237].mxu1 }
 0x2d3   : > { %v7125_v34 = vadd.f32 %v7124_v63, %v7123_v54  ;;  %v7189_v46 = vadd.f32 %v7188_v38, %v7187_v32  ;;  %v7126_v42 = vpop.f32.mrb[238].mxu0  ;;  %v7190_v25 = vpop.f32.mrb[238].mxu1 }
 0x2d4   : > { %v7127_v39 = vpop.f32.mrb[239].mxu0  ;;  %v7191_v17 = vpop.f32.mrb[239].mxu1 }
 0x2d5   : > { %v9796_v4 = vadd.f32 %v7125_v34, %v9682_v2  ;;  %v9799_v9 = vadd.f32 %v7189_v46, %v9685_v49  ;;  %v7128_v28 = vadd.f32 %v7127_v39, %v7126_v42  ;;  %v7192_v44 = vadd.f32 %v7191_v17, %v7190_v25 }
 0x2d7   : > { %v9802_v13 = vadd.f32 %v7128_v28, %v9688_v56  ;;  %v9805_v22 = vadd.f32 %v7192_v44, %v9691_v18 }
 0x2d9   : > { %v7193_v59 = vpop.f32.mrb[240].mxu1  ;;  %v7257_v5 = vpop.f32.mrb[240].mxu0 }
 0x2da   : > { %v7194_v3 = vpop.f32.mrb[241].mxu1  ;;  %v7258_v62 = vpop.f32.mrb[241].mxu0 }
 0x2db   : > { %v7195_v57 = vadd.f32 %v7194_v3, %v7193_v59  ;;  %v7259_v1 = vadd.f32 %v7258_v62, %v7257_v5  ;;  %v7196_v45 = vpop.f32.mrb[242].mxu1  ;;  %v7260_v2 = vpop.f32.mrb[242].mxu0 }
 0x2dc   : > { %v7197_v29 = vpop.f32.mrb[243].mxu1  ;;  %v7261_v27 = vpop.f32.mrb[243].mxu0 }
 0x2dd   : > { %v9808_v49 = vadd.f32 %v7195_v57, %v9698_v53  ;;  %v9811_v31 = vadd.f32 %v7259_v1, %v9701_v26  ;;  %v7198_v56 = vadd.f32 %v7197_v29, %v7196_v45  ;;  %v7262_v8 = vadd.f32 %v7261_v27, %v7260_v2 }
 0x2df   : > { %v9814_v18 = vadd.f32 %v7198_v56, %v9704_v60  ;;  %v9817_v0 = vadd.f32 %v7262_v8, %v9707_v43 }
 0x2e1   : > { %v7199_v48 = vpop.f32.mrb[244].mxu1  ;;  %v7263_v37 = vpop.f32.mrb[244].mxu0 }
 0x2e2   : > { %v7200_v47 = vpop.f32.mrb[245].mxu1  ;;  %v7264_v51 = vpop.f32.mrb[245].mxu0 }
 0x2e3   : > { %v7201_v54 = vadd.f32 %v7200_v47, %v7199_v48  ;;  %v7265_v32 = vadd.f32 %v7264_v51, %v7263_v37  ;;  %v7202_v63 = vpop.f32.mrb[246].mxu1  ;;  %v7266_v53 = vpop.f32.mrb[246].mxu0 }
 0x2e4   : > { %v7203_v38 = vpop.f32.mrb[247].mxu1  ;;  %v7267_v34 = vpop.f32.mrb[247].mxu0 }
 0x2e5   : > { %v9820_v26 = vadd.f32 %v7201_v54, %v9714_v30  ;;  %v9823_v46 = vadd.f32 %v7265_v32, %v9717_v10  ;;  %v7204_v60 = vadd.f32 %v7203_v38, %v7202_v63  ;;  %v7268_v42 = vadd.f32 %v7267_v34, %v7266_v53 }
 0x2e7   : > { %v9826_v43 = vadd.f32 %v7204_v60, %v9720_v61  ;;  %v9829_v25 = vadd.f32 %v7268_v42, %v9723_v36 }
 0x2e9   : > { %v7205_v39 = vpop.f32.mrb[248].mxu1  ;;  %v7269_v17 = vpop.f32.mrb[248].mxu0 }
 0x2ea   : > { %v7206_v28 = vpop.f32.mrb[249].mxu1  ;;  %v7270_v44 = vpop.f32.mrb[249].mxu0 }
 0x2eb   : > { %v7207_v59 = vadd.f32 %v7206_v28, %v7205_v39  ;;  %v7271_v5 = vadd.f32 %v7270_v44, %v7269_v17  ;;  %v7208_v3 = vpop.f32.mrb[250].mxu1  ;;  %v7272_v30 = vpop.f32.mrb[250].mxu0 }
 0x2ec   : > { %v7209_v62 = vpop.f32.mrb[251].mxu1  ;;  %v7273_v57 = vpop.f32.mrb[251].mxu0 }
 0x2ed   : > { %v9832_v10 = vadd.f32 %v7207_v59, %v9730_v55  ;;  %v9835_v1 = vadd.f32 %v7271_v5, %v9733_v12  ;;  %v7210_v61 = vadd.f32 %v7209_v62, %v7208_v3  ;;  %v7274_v45 = vadd.f32 %v7273_v57, %v7272_v30 }
 0x2ef   : > { %v9838_v36 = vadd.f32 %v7210_v61, %v9736_v33  ;;  %v9841_v2 = vadd.f32 %v7274_v45, %v9739_v20 }
 0x2f1   : > { %v7211_v29 = vpop.f32.mrb[252].mxu1  ;;  %v7275_v27 = vpop.f32.mrb[252].mxu0 }
 0x2f2   : > { %v7212_v56 = vpop.f32.mrb[253].mxu1  ;;  %v7276_v8 = vpop.f32.mrb[253].mxu0 }
 0x2f3   : > { %v7213_v48 = vadd.f32 %v7212_v56, %v7211_v29  ;;  %v7277_v37 = vadd.f32 %v7276_v8, %v7275_v27  ;;  %v7214_v47 = vpop.f32.mrb[254].mxu1  ;;  %v7278_v55 = vpop.f32.mrb[254].mxu0 }
 0x2f4   : > { %v7215_v51 = vpop.f32.mrb[255].mxu1  ;;  %v7279_v54 = vpop.f32.mrb[255].mxu0 }
 0x2f5   : > { %v9844_v12 = vadd.f32 %v7213_v48, %v9746_v6  ;;  %v9847_v32 = vadd.f32 %v7277_v37, %v9749_v41  ;;  %v7216_v33 = vadd.f32 %v7215_v51, %v7214_v47  ;;  %v7280_v63 = vadd.f32 %v7279_v54, %v7278_v55 }
 0x2f7   : > { %v9850_v20 = vadd.f32 %v7216_v33, %v9752_v19  ;;  %v9853_v53 = vadd.f32 %v7280_v63, %v9755_v21 }
 0x2f9   : > { %v7217_v38 = vpop.f32.mrb[0].mxu1  ;;  %v7281_v34 = vpop.f32.mrb[0].mxu0 }
 0x2fa   : > { %v7218_v60 = vpop.f32.mrb[1].mxu1  ;;  %v7282_v42 = vpop.f32.mrb[1].mxu0 }
 0x2fb   : > { %v7219_v39 = vadd.f32 %v7218_v60, %v7217_v38  ;;  %v7283_v17 = vadd.f32 %v7282_v42, %v7281_v34  ;;  %v7220_v28 = vpop.f32.mrb[2].mxu1  ;;  %v7284_v6 = vpop.f32.mrb[2].mxu0 }
 0x2fc   : > { %v7221_v44 = vpop.f32.mrb[3].mxu1  ;;  %v7285_v59 = vpop.f32.mrb[3].mxu0 }
 0x2fd   : > { %v9856_v41 = vadd.f32 %v7219_v39, %v9760_v14  ;;  %v9859_v5 = vadd.f32 %v7283_v17, %v9763_v24  ;;  %v7222_v19 = vadd.f32 %v7221_v44, %v7220_v28  ;;  %v7286_v3 = vadd.f32 %v7285_v59, %v7284_v6 }
 0x2ff   : > { %v9862_v21 = vadd.f32 %v7222_v19, %v9766_v58  ;;  %v9865_v30 = vadd.f32 %v7286_v3, %v9769_v50 }
 0x301   : > { %v7223_v62 = vpop.f32.mrb[4].mxu1  ;;  %v7287_v57 = vpop.f32.mrb[4].mxu0 }
 0x302   : > { %v7224_v61 = vpop.f32.mrb[5].mxu1  ;;  %v7288_v45 = vpop.f32.mrb[5].mxu0 }
 0x303   : > { %v7225_v29 = vadd.f32 %v7224_v61, %v7223_v62  ;;  %v7289_v27 = vadd.f32 %v7288_v45, %v7287_v57  ;;  %v7226_v56 = vpop.f32.mrb[6].mxu1  ;;  %v7290_v14 = vpop.f32.mrb[6].mxu0 }
 0x304   : > { %v7227_v8 = vpop.f32.mrb[7].mxu1  ;;  %v7291_v48 = vpop.f32.mrb[7].mxu0 }
 0x305   : > { %v9868_v24 = vadd.f32 %v7225_v29, %v9772_v40  ;;  %v9871_v37 = vadd.f32 %v7289_v27, %v9775_v23  ;;  %v7228_v58 = vadd.f32 %v7227_v8, %v7226_v56  ;;  %v7292_v47 = vadd.f32 %v7291_v48, %v7290_v14 }
 0x307   : > { %v9874_v50 = vadd.f32 %v7228_v58, %v9778_v11  ;;  %v9877_v55 = vadd.f32 %v7292_v47, %v9781_v15 }
 0x309   : > { %v7229_v51 = vpop.f32.mrb[8].mxu1  ;;  %v7293_v54 = vpop.f32.mrb[8].mxu0 }
 0x30a   : > { %v7230_v33 = vpop.f32.mrb[9].mxu1  ;;  %v7294_v63 = vpop.f32.mrb[9].mxu0 }
 0x30b   : > { %v7231_v38 = vadd.f32 %v7230_v33, %v7229_v51  ;;  %v7295_v34 = vadd.f32 %v7294_v63, %v7293_v54  ;;  %v7232_v60 = vpop.f32.mrb[10].mxu1  ;;  %v7296_v40 = vpop.f32.mrb[10].mxu0 }
 0x30c   : > { %v7233_v42 = vpop.f32.mrb[11].mxu1  ;;  %v7297_v39 = vpop.f32.mrb[11].mxu0 }
 0x30d   : > { %v9880_v23 = vadd.f32 %v7231_v38, %v9784_v7  ;;  %v9883_v17 = vadd.f32 %v7295_v34, %v9787_v52  ;;  %v7234_v11 = vadd.f32 %v7233_v42, %v7232_v60  ;;  %v7298_v28 = vadd.f32 %v7297_v39, %v7296_v40 }
 0x30f   : > { %v9886_v15 = vadd.f32 %v7234_v11, %v9790_v16  ;;  %v9889_v6 = vadd.f32 %v7298_v28, %v9793_v35 }
 0x311   : > { %v7235_v44 = vpop.f32.mrb[12].mxu1  ;;  %v7299_v59 = vpop.f32.mrb[12].mxu0 }
 0x312   : > { %v7236_v19 = vpop.f32.mrb[13].mxu1  ;;  %v7300_v3 = vpop.f32.mrb[13].mxu0 }
 0x313   : > { %v7237_v62 = vadd.f32 %v7236_v19, %v7235_v44  ;;  %v7301_v57 = vadd.f32 %v7300_v3, %v7299_v59  ;;  %v7238_v61 = vpop.f32.mrb[14].mxu1  ;;  %v7302_v7 = vpop.f32.mrb[14].mxu0 }
 0x314   : > { %v7239_v45 = vpop.f32.mrb[15].mxu1  ;;  %v7303_v29 = vpop.f32.mrb[15].mxu0 }
 0x315   : > { %v9892_v52 = vadd.f32 %v7237_v62, %v9796_v4  ;;  %v9895_v27 = vadd.f32 %v7301_v57, %v9799_v9  ;;  %v7240_v16 = vadd.f32 %v7239_v45, %v7238_v61  ;;  %v7304_v56 = vadd.f32 %v7303_v29, %v7302_v7 }
 0x317   : > { %v9898_v35 = vadd.f32 %v7240_v16, %v9802_v13  ;;  %v9901_v14 = vadd.f32 %v7304_v56, %v9805_v22 }
 0x319   : > { %v7305_v8 = vpop.f32.mrb[16].mxu0  ;;  %v7369_v48 = vpop.f32.mrb[16].mxu1 }
 0x31a   : > { %v7306_v58 = vpop.f32.mrb[17].mxu0  ;;  %v7370_v47 = vpop.f32.mrb[17].mxu1 }
 0x31b   : > { %v7307_v51 = vadd.f32 %v7306_v58, %v7305_v8  ;;  %v7371_v54 = vadd.f32 %v7370_v47, %v7369_v48  ;;  %v7308_v33 = vpop.f32.mrb[18].mxu0  ;;  %v7372_v4 = vpop.f32.mrb[18].mxu1 }
 0x31c   : > { %v7309_v63 = vpop.f32.mrb[19].mxu0  ;;  %v7373_v38 = vpop.f32.mrb[19].mxu1 }
 0x31d   : > { %v9904_v9 = vadd.f32 %v7307_v51, %v9808_v49  ;;  %v7310_v34 = vadd.f32 %v7309_v63, %v7308_v33  ;;  %v7374_v60 = vadd.f32 %v7373_v38, %v7372_v4  ;;  %v9907_v13 = vadd.f32 %v7371_v54, %v9811_v31 }
 0x31f   : > { %v9910_v22 = vadd.f32 %v7310_v34, %v9814_v18  ;;  %v9913_v40 = vadd.f32 %v7374_v60, %v9817_v0 }
 0x321   : > { %v7311_v42 = vpop.f32.mrb[20].mxu0  ;;  %v7375_v39 = vpop.f32.mrb[20].mxu1 }
 0x322   : > { %v7312_v11 = vpop.f32.mrb[21].mxu0  ;;  %v7376_v28 = vpop.f32.mrb[21].mxu1 }
 0x323   : > { %v7313_v44 = vadd.f32 %v7312_v11, %v7311_v42  ;;  %v7377_v59 = vadd.f32 %v7376_v28, %v7375_v39  ;;  %v7314_v19 = vpop.f32.mrb[22].mxu0  ;;  %v7378_v49 = vpop.f32.mrb[22].mxu1 }
 0x324   : > { %v7315_v3 = vpop.f32.mrb[23].mxu0  ;;  %v7379_v62 = vpop.f32.mrb[23].mxu1 }
 0x325   : > { %v9916_v57 = vadd.f32 %v7313_v44, %v9820_v26  ;;  %v7316_v31 = vadd.f32 %v7315_v3, %v7314_v19  ;;  %v7380_v61 = vadd.f32 %v7379_v62, %v7378_v49  ;;  %v9919_v18 = vadd.f32 %v7377_v59, %v9823_v46 }
 0x327   : > { %v9922_v0 = vadd.f32 %v7316_v31, %v9826_v43  ;;  %v9925_v7 = vadd.f32 %v7380_v61, %v9829_v25 }
 0x329   : > { %v7317_v45 = vpop.f32.mrb[24].mxu0  ;;  %v7381_v29 = vpop.f32.mrb[24].mxu1 }
 0x32a   : > { %v7318_v16 = vpop.f32.mrb[25].mxu0  ;;  %v7382_v56 = vpop.f32.mrb[25].mxu1 }
 0x32b   : > { %v7319_v8 = vadd.f32 %v7318_v16, %v7317_v45  ;;  %v7383_v48 = vadd.f32 %v7382_v56, %v7381_v29  ;;  %v7320_v58 = vpop.f32.mrb[26].mxu0  ;;  %v7384_v26 = vpop.f32.mrb[26].mxu1 }
 0x32c   : > { %v7321_v47 = vpop.f32.mrb[27].mxu0  ;;  %v7385_v51 = vpop.f32.mrb[27].mxu1 }
 0x32d   : > { %v9928_v54 = vadd.f32 %v7319_v8, %v9832_v10  ;;  %v7322_v46 = vadd.f32 %v7321_v47, %v7320_v58  ;;  %v7386_v33 = vadd.f32 %v7385_v51, %v7384_v26  ;;  %v9931_v43 = vadd.f32 %v7383_v48, %v9835_v1 }
 0x32f   : > { %v9934_v25 = vadd.f32 %v7322_v46, %v9838_v36  ;;  %v9937_v4 = vadd.f32 %v7386_v33, %v9841_v2 }
 0x331   : > { %v7323_v63 = vpop.f32.mrb[28].mxu0  ;;  %v7387_v38 = vpop.f32.mrb[28].mxu1 }
 0x332   : > { %v7324_v34 = vpop.f32.mrb[29].mxu0  ;;  %v7388_v60 = vpop.f32.mrb[29].mxu1 }
 0x333   : > { %v7325_v42 = vadd.f32 %v7324_v34, %v7323_v63  ;;  %v7389_v39 = vadd.f32 %v7388_v60, %v7387_v38  ;;  %v7326_v11 = vpop.f32.mrb[30].mxu0  ;;  %v7390_v10 = vpop.f32.mrb[30].mxu1 }
 0x334   : > { %v7327_v28 = vpop.f32.mrb[31].mxu0  ;;  %v7391_v44 = vpop.f32.mrb[31].mxu1 }
 0x335   : > { %v9940_v59 = vadd.f32 %v7325_v42, %v9844_v12  ;;  %v7328_v1 = vadd.f32 %v7327_v28, %v7326_v11  ;;  %v7392_v19 = vadd.f32 %v7391_v44, %v7390_v10  ;;  %v9943_v36 = vadd.f32 %v7389_v39, %v9847_v32 }
 0x337   : > { %v9946_v2 = vadd.f32 %v7328_v1, %v9850_v20  ;;  %v9949_v49 = vadd.f32 %v7392_v19, %v9853_v53 }
 0x339   : > { %v7329_v3 = vpop.f32.mrb[32].mxu0  ;;  %v7393_v62 = vpop.f32.mrb[32].mxu1 }
 0x33a   : > { %v7330_v31 = vpop.f32.mrb[33].mxu0  ;;  %v7394_v61 = vpop.f32.mrb[33].mxu1 }
 0x33b   : > { %v7331_v45 = vadd.f32 %v7330_v31, %v7329_v3  ;;  %v7395_v29 = vadd.f32 %v7394_v61, %v7393_v62  ;;  %v7332_v16 = vpop.f32.mrb[34].mxu0  ;;  %v7396_v12 = vpop.f32.mrb[34].mxu1 }
 0x33c   : > { %v7333_v56 = vpop.f32.mrb[35].mxu0  ;;  %v7397_v8 = vpop.f32.mrb[35].mxu1 }
 0x33d   : > { %v9952_v48 = vadd.f32 %v7331_v45, %v9856_v41  ;;  %v7334_v32 = vadd.f32 %v7333_v56, %v7332_v16  ;;  %v7398_v58 = vadd.f32 %v7397_v8, %v7396_v12  ;;  %v9955_v20 = vadd.f32 %v7395_v29, %v9859_v5 }
 0x33f   : > { %v9958_v53 = vadd.f32 %v7334_v32, %v9862_v21  ;;  %v9961_v26 = vadd.f32 %v7398_v58, %v9865_v30 }
 0x341   : > { %v7335_v47 = vpop.f32.mrb[36].mxu0  ;;  %v7399_v51 = vpop.f32.mrb[36].mxu1 }
 0x342   : > { %v7336_v46 = vpop.f32.mrb[37].mxu0  ;;  %v7400_v33 = vpop.f32.mrb[37].mxu1 }
 0x343   : > { %v7337_v63 = vadd.f32 %v7336_v46, %v7335_v47  ;;  %v7401_v38 = vadd.f32 %v7400_v33, %v7399_v51  ;;  %v7338_v34 = vpop.f32.mrb[38].mxu0  ;;  %v7402_v41 = vpop.f32.mrb[38].mxu1 }
 0x344   : > { %v7339_v60 = vpop.f32.mrb[39].mxu0  ;;  %v7403_v42 = vpop.f32.mrb[39].mxu1 }
 0x345   : > { %v9964_v39 = vadd.f32 %v7337_v63, %v9868_v24  ;;  %v7340_v5 = vadd.f32 %v7339_v60, %v7338_v34  ;;  %v7404_v11 = vadd.f32 %v7403_v42, %v7402_v41  ;;  %v9967_v21 = vadd.f32 %v7401_v38, %v9871_v37 }
 0x347   : > { %v9970_v30 = vadd.f32 %v7340_v5, %v9874_v50  ;;  %v9973_v10 = vadd.f32 %v7404_v11, %v9877_v55  ;;  %v5470_v11 = vld [vmem:[%s10006_s11 + $0x10] sm:$0xff] }
 0x349   : > { %v7341_v28 = vpop.f32.mrb[40].mxu0  ;;  %v7405_v44 = vpop.f32.mrb[40].mxu1 }
 0x34a   : > { %v7342_v1 = vpop.f32.mrb[41].mxu0  ;;  %v7406_v19 = vpop.f32.mrb[41].mxu1 }
 0x34b   : > { %v7343_v3 = vadd.f32 %v7342_v1, %v7341_v28  ;;  %v7407_v62 = vadd.f32 %v7406_v19, %v7405_v44  ;;  %v7344_v31 = vpop.f32.mrb[42].mxu0  ;;  %v7408_v24 = vpop.f32.mrb[42].mxu1  ;;  %v5468_v19 = vld [vmem:[%s10006_s11] sm:$0xff] }
 0x34c   : > { %v7345_v61 = vpop.f32.mrb[43].mxu0  ;;  %v7409_v45 = vpop.f32.mrb[43].mxu1 }
 0x34d   : > { %v9976_v29 = vadd.f32 %v7343_v3, %v9880_v23  ;;  %v7346_v37 = vadd.f32 %v7345_v61, %v7344_v31  ;;  %v7410_v16 = vadd.f32 %v7409_v45, %v7408_v24  ;;  %v9979_v50 = vadd.f32 %v7407_v62, %v9883_v17  ;;  %v5471_v61 = vld [vmem:[%s10006_s11 + $0x18] sm:$0xff] }
 0x34f   : > { %v9982_v55 = vadd.f32 %v7346_v37, %v9886_v15  ;;  %v9985_v12 = vadd.f32 %v7410_v16, %v9889_v6 }
 0x351   : > { %v7347_v56 = vpop.f32.mrb[44].mxu0  ;;  %v7411_v8 = vpop.f32.mrb[44].mxu1 }
 0x352   : > { %v7348_v32 = vpop.f32.mrb[45].mxu0  ;;  %v7412_v58 = vpop.f32.mrb[45].mxu1 }
 0x353   : > { %v7349_v47 = vadd.f32 %v7348_v32, %v7347_v56  ;;  %v7413_v51 = vadd.f32 %v7412_v58, %v7411_v8  ;;  %v7350_v23 = vpop.f32.mrb[46].mxu0  ;;  %v7414_v46 = vpop.f32.mrb[46].mxu1 }
 0x354   : > { %v7351_v33 = vpop.f32.mrb[47].mxu0  ;;  %v7415_v63 = vpop.f32.mrb[47].mxu1 }
 0x355   : > { %v9988_v17 = vadd.f32 %v7349_v47, %v9892_v52  ;;  %v7352_v38 = vadd.f32 %v7351_v33, %v7350_v23  ;;  %v7416_v34 = vadd.f32 %v7415_v63, %v7414_v46  ;;  %v9994_v15 = vadd.f32 %v7413_v51, %v9895_v27 }
 0x357   : > { %v9997_v6 = vadd.f32 %v7352_v38, %v9898_v35  ;;  %v10000_v41 = vadd.f32 %v7416_v34, %v9901_v14 }
 0x359   : > { %v7417_v52 = vpop.f32.mrb[48].mxu1  ;;  %v7507_v60 = vpop.f32.mrb[48].mxu0 }
 0x35a   : > { %v5286_v42 = vadd.f32 %v7507_v60, %v9919_v18  ;;  %v7418_v27 = vpop.f32.mrb[49].mxu1  ;;  %v5277_v5 = vpop.f32.mrb[49].mxu0  ;;  %v10036_v60 = vld [vmem:[%s10006_s11 + $0x30] sm:$0xff] }
 0x35b   : > { %v7419_v35 = vadd.f32 %v7418_v27, %v7417_v52  ;;  %v5278_v14 = vadd.f32 %v5277_v5, %v9907_v13  ;;  %v7420_v28 = vpop.f32.mrb[50].mxu1  ;;  %v7508_v44 = vpop.f32.mrb[50].mxu0  ;;  %v5469_v13 = vld [vmem:[%s10006_s11 + $0x8] sm:$0xff] }
 0x35c   : > { %v6313_v1 = vclamps-f32 %v5286_v42, 0.1  ;;  %v5289_v3 = vadd.f32 %v7508_v44, %v9925_v7  ;;  %v7421_v62 = vpop.f32.mrb[51].mxu1  ;;  %v5280_v31 = vpop.f32.mrb[51].mxu0  ;;  %v10041_v44 = vld [vmem:[%s10006_s11 + $0x20] sm:$0xff] }
 0x35d   : > { %v6311_v24 = vclamps-f32 %v5278_v14, 0.1  ;;  %v7422_v45 = vadd.f32 %v7421_v62, %v7420_v28  ;;  %v5281_v18 = vadd.f32 %v5280_v31, %v9913_v40  ;;  %v10016_v37 = vadd.f32 %v7419_v35, %v9904_v9 }
 0x35e   : > { %v5502_v16 = vadd.f32 %v6313_v1, %v5470_v11  ;;  %v6314_v56 = vclamps-f32 %v5289_v3, 0.1 }
 0x35f   : > { %v5500_v8 = vadd.f32 %v6311_v24, %v5468_v19  ;;  %v6312_v32 = vclamps-f32 %v5281_v18, 0.1  ;;  %v10020_v58 = vadd.f32 %v7422_v45, %v9910_v22  ;;  %v5475_v45 = vld [vmem:[%s10006_s11 + $0x38] sm:$0xff] }
 0x360   : > { %v5534_v7 = vmax.f32 %v5502_v16, 0.0  ;;  %v5503_v47 = vadd.f32 %v6314_v56, %v5471_v61 }
 0x361   : > { %v5532_v40 = vmax.f32 %v5500_v8, 0.0  ;;  %v5501_v9 = vadd.f32 %v6312_v32, %v5469_v13  ;;  %v7423_v51 = vpop.f32.mrb[52].mxu1  ;;  %v7511_v23 = vpop.f32.mrb[52].mxu0 }
 0x362   : > { %v5566_v46 = vmin.f32 %v5534_v7, 1.0  ;;  %v5535_v33 = vmax.f32 %v5503_v47, 0.0  ;;  %v5302_v63 = vadd.f32 %v7511_v23, %v9943_v36  ;;  %v7424_v22 = vpop.f32.mrb[53].mxu1  ;;  %v5293_v38 = vpop.f32.mrb[53].mxu0 }
 0x363   : > { %v5564_v34 = vmin.f32 %v5532_v40, 1.0  ;;  %v5533_v52 = vmax.f32 %v5501_v9, 0.0  ;;  %v7425_v42 = vadd.f32 %v7424_v22, %v7423_v51  ;;  %v5294_v27 = vadd.f32 %v5293_v38, %v9931_v43  ;;  %v7426_v5 = vpop.f32.mrb[54].mxu1  ;;  %v7512_v35 = vpop.f32.mrb[54].mxu0  ;;  %v10064_v38 = vld [vmem:[%s10006_s11 + $0x50] sm:$0xff] }
 0x364   : > { %5598 = vst [vmem:[%s10026_s14 + $0x10] sm:$0xff] %v5566_v46  ;;  %v5630_v36 = vsub.f32 %v5566_v46, %v5470_v11  ;;  %v5567_v14 = vmin.f32 %v5535_v33, 1.0  ;;  %v6317_v28 = vclamps-f32 %v5302_v63, 0.1  ;;  %v5305_v1 = vadd.f32 %v7512_v35, %v9949_v49  ;;  %v7427_v3 = vpop.f32.mrb[55].mxu1  ;;  %v5296_v62 = vpop.f32.mrb[55].mxu0 }
 0x365   : > { %5596 = vst [vmem:[%s10026_s14] sm:$0xff] %v5564_v34  ;;  %v5628_v31 = vsub.f32 %v5564_v34, %v5468_v19  ;;  %v5565_v43 = vmin.f32 %v5533_v52, 1.0  ;;  %v6315_v24 = vclamps-f32 %v5294_v27, 0.1  ;;  %v7428_v18 = vadd.f32 %v7427_v3, %v7426_v5  ;;  %v5473_v19 = vld [vmem:[%s10006_s11 + $0x28] sm:$0xff] }
 0x366   : > { %5662 = vst [vmem:[%s10033_s18 + $0x10] sm:$0xff] %v5630_v36  ;;  %5599 = vst [vmem:[%s10026_s14 + $0x18] sm:$0xff] %v5567_v14  ;;  %v5631_v11 = vsub.f32 %v5567_v14, %v5471_v61  ;;  %v5506_v16 = vadd.f32 %v6317_v28, %v10036_v60  ;;  %v6318_v56 = vclamps-f32 %v5305_v1, 0.1  ;;  %v5297_v49 = vadd.f32 %v5296_v62, %v9937_v4 }
 0x367   : > { %5660 = vst [vmem:[%s10033_s18] sm:$0xff] %v5628_v31  ;;  %5597 = vst [vmem:[%s10026_s14 + $0x8] sm:$0xff] %v5565_v43  ;;  %v5629_v8 = vsub.f32 %v5565_v43, %v5469_v13  ;;  %v5504_v32 = vadd.f32 %v6315_v24, %v10041_v44  ;;  %v10055_v7 = vadd.f32 %v7425_v42, %v9916_v57  ;;  %v10068_v42 = vld [vmem:[%s10006_s11 + $0x40] sm:$0xff] }
 0x368   : > { %v10058_v47 = vadd.f32 %v7428_v18, %v9922_v0  ;;  %5663 = vst [vmem:[%s10033_s18 + $0x18] sm:$0xff] %v5631_v11  ;;  %v5538_v61 = vmax.f32 %v5506_v16, 0.0  ;;  %v5507_v40 = vadd.f32 %v6318_v56, %v5475_v45  ;;  %v6316_v9 = vclamps-f32 %v5297_v49, 0.1  ;;  %v5479_v18 = vld [vmem:[%s10006_s11 + $0x58] sm:$0xff]  ;;  %v5477_v56 = vld [vmem:[%s10006_s11 + $0x48] sm:$0xff] }
 0x369   : > { %5661 = vst [vmem:[%s10033_s18 + $0x8] sm:$0xff] %v5629_v8  ;;  %v5536_v4 = vmax.f32 %v5504_v32, 0.0  ;;  %v7429_v51 = vpop.f32.mrb[56].mxu1  ;;  %v7515_v13 = vpop.f32.mrb[56].mxu0 }
 0x36a   : > { %v5570_v23 = vmin.f32 %v5538_v61, 1.0  ;;  %v5539_v46 = vmax.f32 %v5507_v40, 0.0  ;;  %v5505_v33 = vadd.f32 %v6316_v9, %v5473_v19  ;;  %v5318_v57 = vadd.f32 %v7515_v13, %v9967_v21  ;;  %v7430_v63 = vpop.f32.mrb[57].mxu1  ;;  %v5309_v0 = vpop.f32.mrb[57].mxu0 }
 0x36b   : > { %v5568_v22 = vmin.f32 %v5536_v4, 1.0  ;;  %v7431_v34 = vadd.f32 %v7430_v63, %v7429_v51  ;;  %v5310_v52 = vadd.f32 %v5309_v0, %v9955_v20  ;;  %v7432_v27 = vpop.f32.mrb[58].mxu1  ;;  %v7516_v5 = vpop.f32.mrb[58].mxu0 }
 0x36c   : > { %5602 = vst [vmem:[%s10026_s14 + $0x30] sm:$0xff] %v5570_v23  ;;  %v5634_v35 = vsub.f32 %v5570_v23, %v10036_v60  ;;  %v5571_v21 = vmin.f32 %v5539_v46, 1.0  ;;  %v5537_v36 = vmax.f32 %v5505_v33, 0.0  ;;  %v6321_v14 = vclamps-f32 %v5318_v57, 0.1  ;;  %v7433_v28 = vpop.f32.mrb[59].mxu1 }
 0x36d   : > { %v5312_v1 = vpop.f32.mrb[59].mxu0  ;;  %5600 = vst [vmem:[%s10026_s14 + $0x20] sm:$0xff] %v5568_v22  ;;  %v5632_v20 = vsub.f32 %v5568_v22, %v10041_v44  ;;  %v6319_v3 = vclamps-f32 %v5310_v52, 0.1  ;;  %v5321_v62 = vadd.f32 %v7516_v5, %v9973_v10  ;;  %v7434_v31 = vadd.f32 %v7433_v28, %v7432_v27  ;;  %v10094_v33 = vld [vmem:[%s10006_s11 + $0x70] sm:$0xff] }
 0x36e   : > { %5666 = vst [vmem:[%s10033_s18 + $0x30] sm:$0xff] %v5634_v35  ;;  %5603 = vst [vmem:[%s10026_s14 + $0x38] sm:$0xff] %v5571_v21  ;;  %v5635_v60 = vsub.f32 %v5571_v21, %v5475_v45  ;;  %v5569_v43 = vmin.f32 %v5537_v36, 1.0  ;;  %v5510_v24 = vadd.f32 %v6321_v14, %v10064_v38  ;;  %v5313_v11 = vadd.f32 %v5312_v1, %v9961_v26  ;;  %v5483_v14 = vld [vmem:[%s10006_s11 + $0x78] sm:$0xff] }
 0x36f   : > { %5664 = vst [vmem:[%s10033_s18 + $0x20] sm:$0xff] %v5632_v20  ;;  %v5508_v16 = vadd.f32 %v6319_v3, %v10068_v42  ;;  %v6322_v44 = vclamps-f32 %v5321_v62, 0.1  ;;  %v10084_v49 = vadd.f32 %v7431_v34, %v9928_v54  ;;  %v10087_v10 = vadd.f32 %v7434_v31, %v9934_v25 }
 0x370   : > { %5667 = vst [vmem:[%s10033_s18 + $0x38] sm:$0xff] %v5635_v60  ;;  %5601 = vst [vmem:[%s10026_s14 + $0x28] sm:$0xff] %v5569_v43  ;;  %v5633_v45 = vsub.f32 %v5569_v43, %v5473_v19  ;;  %v5542_v8 = vmax.f32 %v5510_v24, 0.0  ;;  %v6320_v32 = vclamps-f32 %v5313_v11, 0.1 }
 0x371   : > { %v5540_v61 = vmax.f32 %v5508_v16, 0.0  ;;  %v5511_v26 = vadd.f32 %v6322_v44, %v5479_v18  ;;  %v7435_v40 = vpop.f32.mrb[60].mxu1  ;;  %v7519_v9 = vpop.f32.mrb[60].mxu0 }
 0x372   : > { %5665 = vst [vmem:[%s10033_s18 + $0x28] sm:$0xff] %v5633_v45  ;;  %v5574_v4 = vmin.f32 %v5542_v8, 1.0  ;;  %v5509_v51 = vadd.f32 %v6320_v32, %v5477_v56  ;;  %v5334_v54 = vadd.f32 %v7519_v9, %v9994_v15  ;;  %v7436_v13 = vpop.f32.mrb[61].mxu1  ;;  %v5325_v25 = vpop.f32.mrb[61].mxu0  ;;  %v10100_v15 = vld [vmem:[%s10006_s11 + $0x60] sm:$0xff] }
 0x373   : > { %v5572_v23 = vmin.f32 %v5540_v61, 1.0  ;;  %v5543_v46 = vmax.f32 %v5511_v26, 0.0  ;;  %v7437_v19 = vadd.f32 %v7436_v13, %v7435_v40  ;;  %v5326_v57 = vadd.f32 %v5325_v25, %v9979_v50  ;;  %v7438_v63 = vpop.f32.mrb[62].mxu1  ;;  %v7520_v0 = vpop.f32.mrb[62].mxu0  ;;  %v10122_v26 = vld [vmem:[%s10006_s11 + $0x90] sm:$0xff] }
 0x374   : > { %5606 = vst [vmem:[%s10026_s14 + $0x50] sm:$0xff] %v5574_v4  ;;  %v5638_v22 = vsub.f32 %v5574_v4, %v10064_v38  ;;  %v5541_v34 = vmax.f32 %v5509_v51, 0.0  ;;  %v6325_v52 = vclamps-f32 %v5334_v54, 0.1  ;;  %v5337_v27 = vadd.f32 %v7520_v0, %v10000_v41  ;;  %v7439_v5 = vpop.f32.mrb[63].mxu1  ;;  %v5328_v35 = vpop.f32.mrb[63].mxu0 }
 0x375   : > { %5604 = vst [vmem:[%s10026_s14 + $0x40] sm:$0xff] %v5572_v23  ;;  %v5636_v50 = vsub.f32 %v5572_v23, %v10068_v42  ;;  %v5575_v21 = vmin.f32 %v5543_v46, 1.0  ;;  %v6323_v36 = vclamps-f32 %v5326_v57, 0.1  ;;  %v7440_v28 = vadd.f32 %v7439_v5, %v7438_v63  ;;  %v5481_v42 = vld [vmem:[%s10006_s11 + $0x68] sm:$0xff]  ;;  %v10126_v4 = vld [vmem:[%s10006_s11 + $0x80] sm:$0xff] }
 0x376   : > { %5670 = vst [vmem:[%s10033_s18 + $0x50] sm:$0xff] %v5638_v22  ;;  %v5573_v38 = vmin.f32 %v5541_v34, 1.0  ;;  %v5514_v1 = vadd.f32 %v6325_v52, %v10094_v33  ;;  %v6326_v20 = vclamps-f32 %v5337_v27, 0.1  ;;  %v5329_v3 = vadd.f32 %v5328_v35, %v9985_v12  ;;  %v5487_v52 = vld [vmem:[%s10006_s11 + $0x98] sm:$0xff]  ;;  %v5485_v35 = vld [vmem:[%s10006_s11 + $0x88] sm:$0xff] }
 0x377   : > { %5668 = vst [vmem:[%s10033_s18 + $0x40] sm:$0xff] %v5636_v50  ;;  %5607 = vst [vmem:[%s10026_s14 + $0x58] sm:$0xff] %v5575_v21  ;;  %v5639_v41 = vsub.f32 %v5575_v21, %v5479_v18  ;;  %v5512_v62 = vadd.f32 %v6323_v36, %v10100_v15  ;;  %v5205_v31 = vadd.f32 %v7437_v19, %v9940_v59 }
 0x378   : > { %v10115_v60 = vadd.f32 %v7440_v28, %v9946_v2  ;;  %5605 = vst [vmem:[%s10026_s14 + $0x48] sm:$0xff] %v5573_v38  ;;  %v5637_v43 = vsub.f32 %v5573_v38, %v5477_v56  ;;  %v5546_v24 = vmax.f32 %v5514_v1, 0.0  ;;  %v5515_v11 = vadd.f32 %v6326_v20, %v5483_v14 }
 0x379   : > { %v6324_v16 = vclamps-f32 %v5329_v3, 0.1  ;;  %5671 = vst [vmem:[%s10033_s18 + $0x58] sm:$0xff] %v5639_v41  ;;  %v5544_v12 = vmax.f32 %v5512_v62, 0.0  ;;  %v7441_v44 = vpop.f32.mrb[64].mxu1  ;;  %v7523_v18 = vpop.f32.mrb[64].mxu0 }
 0x37a   : > { %5669 = vst [vmem:[%s10033_s18 + $0x48] sm:$0xff] %v5637_v43  ;;  %v5578_v45 = vmin.f32 %v5546_v24, 1.0  ;;  %v5547_v8 = vmax.f32 %v5515_v11, 0.0  ;;  %v5350_v59 = vadd.f32 %v7523_v18, %v10055_v7  ;;  %v7442_v2 = vpop.f32.mrb[65].mxu1  ;;  %v5341_v61 = vpop.f32.mrb[65].mxu0  ;;  %v10151_v24 = vld [vmem:[%s10006_s11 + $0xb0] sm:$0xff] }
 0x37b   : > { %v5513_v32 = vadd.f32 %v6324_v16, %v5481_v42  ;;  %v5576_v56 = vmin.f32 %v5544_v12, 1.0  ;;  %v7443_v40 = vadd.f32 %v7442_v2, %v7441_v44  ;;  %v5342_v9 = vadd.f32 %v5341_v61, %v10016_v37  ;;  %v7444_v51 = vpop.f32.mrb[66].mxu1  ;;  %v7524_v54 = vpop.f32.mrb[66].mxu0 }
 0x37c   : > { %5610 = vst [vmem:[%s10026_s14 + $0x70] sm:$0xff] %v5578_v45  ;;  %v5642_v13 = vsub.f32 %v5578_v45, %v10094_v33  ;;  %v5579_v7 = vmin.f32 %v5547_v8, 1.0  ;;  %v6329_v23 = vclamps-f32 %v5350_v59, 0.1  ;;  %v7445_v46 = vpop.f32.mrb[67].mxu1  ;;  %v5344_v19 = vpop.f32.mrb[67].mxu0  ;;  %v5353_v63 = vadd.f32 %v7524_v54, %v10058_v47 }
 0x37d   : > { %v5545_v25 = vmax.f32 %v5513_v32, 0.0  ;;  %5608 = vst [vmem:[%s10026_s14 + $0x60] sm:$0xff] %v5576_v56  ;;  %v5640_v37 = vsub.f32 %v5576_v56, %v10100_v15  ;;  %v6327_v57 = vclamps-f32 %v5342_v9, 0.1  ;;  %v7446_v0 = vadd.f32 %v7445_v46, %v7444_v51  ;;  %v5491_v56 = vld [vmem:[%s10006_s11 + $0xb8] sm:$0xff] }
 0x37e   : > { %5674 = vst [vmem:[%s10033_s18 + $0x70] sm:$0xff] %v5642_v13  ;;  %5611 = vst [vmem:[%s10026_s14 + $0x78] sm:$0xff] %v5579_v7  ;;  %v5643_v33 = vsub.f32 %v5579_v7, %v5483_v14  ;;  %v5518_v34 = vadd.f32 %v6329_v23, %v10122_v26  ;;  %v5345_v27 = vadd.f32 %v5344_v19, %v10020_v58  ;;  %v6330_v15 = vclamps-f32 %v5353_v63, 0.1 }
 0x37f   : > { %v5577_v22 = vmin.f32 %v5545_v25, 1.0  ;;  %5672 = vst [vmem:[%s10033_s18 + $0x60] sm:$0xff] %v5640_v37  ;;  %v5516_v5 = vadd.f32 %v6327_v57, %v10126_v4  ;;  %v10142_v50 = vadd.f32 %v7443_v40, %v9952_v48  ;;  %v10145_v47 = vadd.f32 %v7446_v0, %v9958_v53 }
 0x380   : > { %5675 = vst [vmem:[%s10033_s18 + $0x78] sm:$0xff] %v5643_v33  ;;  %v5550_v36 = vmax.f32 %v5518_v34, 0.0  ;;  %v6328_v14 = vclamps-f32 %v5345_v27, 0.1  ;;  %v5519_v58 = vadd.f32 %v6330_v15, %v5487_v52  ;;  %v5494_v27 = vld [vmem:[%s10006_s11 + $0xd0] sm:$0xff] }
 0x381   : > { %5609 = vst [vmem:[%s10026_s14 + $0x68] sm:$0xff] %v5577_v22  ;;  %v5641_v21 = vsub.f32 %v5577_v22, %v5481_v42  ;;  %v5548_v28 = vmax.f32 %v5516_v5, 0.0  ;;  %v7447_v38 = vpop.f32.mrb[68].mxu1  ;;  %v7527_v1 = vpop.f32.mrb[68].mxu0 }
 0x382   : > { %v5582_v20 = vmin.f32 %v5550_v36, 1.0  ;;  %v5517_v3 = vadd.f32 %v6328_v14, %v5485_v35  ;;  %v5366_v48 = vadd.f32 %v7527_v1, %v5205_v31  ;;  %v7448_v41 = vpop.f32.mrb[69].mxu1  ;;  %v5357_v62 = vpop.f32.mrb[69].mxu0  ;;  %v5551_v43 = vmax.f32 %v5519_v58, 0.0  ;;  %v10157_v31 = vld [vmem:[%s10006_s11 + $0xa0] sm:$0xff] }
 0x383   : > { %5673 = vst [vmem:[%s10033_s18 + $0x68] sm:$0xff] %v5641_v21  ;;  %v5580_v53 = vmin.f32 %v5548_v28, 1.0  ;;  %v7449_v42 = vadd.f32 %v7448_v41, %v7447_v38  ;;  %v5358_v11 = vadd.f32 %v5357_v62, %v10084_v49  ;;  %v7450_v16 = vpop.f32.mrb[70].mxu1  ;;  %v7528_v12 = vpop.f32.mrb[70].mxu0 }
 0x384   : > { %5614 = vst [vmem:[%s10026_s14 + $0x90] sm:$0xff] %v5582_v20  ;;  %v5646_v44 = vsub.f32 %v5582_v20, %v10122_v26  ;;  %v5549_v18 = vmax.f32 %v5517_v3, 0.0  ;;  %v6333_v45 = vclamps-f32 %v5366_v48, 0.1  ;;  %v5369_v8 = vadd.f32 %v7528_v12, %v10115_v60  ;;  %v7451_v32 = vpop.f32.mrb[71].mxu1  ;;  %v5360_v59 = vpop.f32.mrb[71].mxu0 }
 0x385   : > { %5612 = vst [vmem:[%s10026_s14 + $0x80] sm:$0xff] %v5580_v53  ;;  %v5644_v49 = vsub.f32 %v5580_v53, %v10126_v4  ;;  %v5583_v2 = vmin.f32 %v5551_v43, 1.0  ;;  %v6331_v61 = vclamps-f32 %v5358_v11, 0.1  ;;  %v7452_v40 = vadd.f32 %v7451_v32, %v7450_v16  ;;  %v5489_v4 = vld [vmem:[%s10006_s11 + $0xa8] sm:$0xff] }
 0x386   : > { %5678 = vst [vmem:[%s10033_s18 + $0x90] sm:$0xff] %v5646_v44  ;;  %v5581_v26 = vmin.f32 %v5549_v18, 1.0  ;;  %v5522_v9 = vadd.f32 %v6333_v45, %v10151_v24  ;;  %v6334_v51 = vclamps-f32 %v5369_v8, 0.1  ;;  %v5361_v54 = vadd.f32 %v5360_v59, %v10087_v10  ;;  %v5493_v12 = vld [vmem:[%s10006_s11 + $0xc8] sm:$0xff] }
 0x387   : > { %5676 = vst [vmem:[%s10033_s18 + $0x80] sm:$0xff] %v5644_v49  ;;  %5615 = vst [vmem:[%s10026_s14 + $0x98] sm:$0xff] %v5583_v2  ;;  %v5647_v60 = vsub.f32 %v5583_v2, %v5487_v52  ;;  %v5520_v13 = vadd.f32 %v6331_v61, %v10157_v31  ;;  %v5221_v7 = vadd.f32 %v7449_v42, %v9964_v39 }
 0x388   : > { %v5224_v25 = vadd.f32 %v7452_v40, %v9970_v30  ;;  %5613 = vst [vmem:[%s10026_s14 + $0x88] sm:$0xff] %v5581_v26  ;;  %v5645_v23 = vsub.f32 %v5581_v26, %v5485_v35  ;;  %v5554_v46 = vmax.f32 %v5522_v9, 0.0  ;;  %v5523_v19 = vadd.f32 %v6334_v51, %v5491_v56  ;;  %v10178_v35 = vld [vmem:[%s10006_s11 + $0xc0] sm:$0xff] }
 0x389   : > { %v6332_v37 = vclamps-f32 %v5361_v54, 0.1  ;;  %5679 = vst [vmem:[%s10033_s18 + $0x98] sm:$0xff] %v5647_v60  ;;  %v5552_v10 = vmax.f32 %v5520_v13, 0.0  ;;  %v7453_v57 = vpop.f32.mrb[72].mxu1  ;;  %v7531_v63 = vpop.f32.mrb[72].mxu0 }
 0x38a   : > { %5677 = vst [vmem:[%s10033_s18 + $0x88] sm:$0xff] %v5645_v23  ;;  %v5586_v0 = vmin.f32 %v5554_v46, 1.0  ;;  %v5555_v33 = vmax.f32 %v5523_v19, 0.0  ;;  %v5382_v34 = vadd.f32 %v7531_v63, %v5221_v7  ;;  %v7454_v39 = vpop.f32.mrb[73].mxu1  ;;  %v5373_v30 = vpop.f32.mrb[73].mxu0 }
 0x38b   : > { %v5521_v22 = vadd.f32 %v6332_v37, %v5489_v4  ;;  %v5584_v52 = vmin.f32 %v5552_v10, 1.0  ;;  %v7455_v5 = vadd.f32 %v7454_v39, %v7453_v57  ;;  %v5374_v15 = vadd.f32 %v5373_v30, %v10142_v50  ;;  %v7456_v21 = vpop.f32.mrb[74].mxu1  ;;  %v7532_v36 = vpop.f32.mrb[74].mxu0  ;;  %v5498_v30 = vld [vmem:[%s10006_s11 + $0xf0] sm:$0xff] }
 0x38c   : > { %5618 = vst [vmem:[%s10026_s14 + $0xb0] sm:$0xff] %v5586_v0  ;;  %v5650_v14 = vsub.f32 %v5586_v0, %v10151_v24  ;;  %v5587_v28 = vmin.f32 %v5555_v33, 1.0  ;;  %v6337_v38 = vclamps-f32 %v5382_v34, 0.1  ;;  %v7457_v1 = vpop.f32.mrb[75].mxu1  ;;  %v5376_v20 = vpop.f32.mrb[75].mxu0  ;;  %v5385_v48 = vadd.f32 %v7532_v36, %v5224_v25 }
 0x38d   : > { %v5553_v58 = vmax.f32 %v5521_v22, 0.0  ;;  %5616 = vst [vmem:[%s10026_s14 + $0xa0] sm:$0xff] %v5584_v52  ;;  %v5648_v50 = vsub.f32 %v5584_v52, %v10157_v31  ;;  %v6335_v3 = vclamps-f32 %v5374_v15, 0.1  ;;  %v7458_v41 = vadd.f32 %v7457_v1, %v7456_v21  ;;  %v5495_v24 = vld [vmem:[%s10006_s11 + $0xd8] sm:$0xff]  ;;  %v5497_v34 = vld [vmem:[%s10006_s11 + $0xe8] sm:$0xff] }
 0x38e   : > { %5682 = vst [vmem:[%s10033_s18 + $0xb0] sm:$0xff] %v5650_v14  ;;  %5619 = vst [vmem:[%s10026_s14 + $0xb8] sm:$0xff] %v5587_v28  ;;  %v5651_v62 = vsub.f32 %v5587_v28, %v5491_v56  ;;  %v5526_v43 = vadd.f32 %v6337_v38, %v5494_v27  ;;  %v5377_v42 = vadd.f32 %v5376_v20, %v10145_v47  ;;  %v6338_v16 = vclamps-f32 %v5385_v48, 0.1  ;;  %v5499_v14 = vld [vmem:[%s10006_s11 + $0xf8] sm:$0xff] }
 0x38f   : > { %v5585_v53 = vmin.f32 %v5553_v58, 1.0  ;;  %5680 = vst [vmem:[%s10033_s18 + $0xa0] sm:$0xff] %v5648_v50  ;;  %v5524_v11 = vadd.f32 %v6335_v3, %v10178_v35  ;;  %v5229_v44 = vadd.f32 %v7455_v5, %v9976_v29  ;;  %v5232_v18 = vadd.f32 %v7458_v41, %v9982_v55 }
 0x390   : > { %5683 = vst [vmem:[%s10033_s18 + $0xb8] sm:$0xff] %v5651_v62  ;;  %v5558_v31 = vmax.f32 %v5526_v43, 0.0  ;;  %v6336_v8 = vclamps-f32 %v5377_v42, 0.1  ;;  %v5527_v59 = vadd.f32 %v6338_v16, %v5495_v24 }
 0x391   : > { %5617 = vst [vmem:[%s10026_s14 + $0xa8] sm:$0xff] %v5585_v53  ;;  %v5649_v45 = vsub.f32 %v5585_v53, %v5489_v4  ;;  %v5556_v32 = vmax.f32 %v5524_v11, 0.0  ;;  %v7459_v49 = vpop.f32.mrb[76].mxu1  ;;  %v7535_v47 = vpop.f32.mrb[76].mxu0  ;;  %v5496_v4 = vld [vmem:[%s10006_s11 + $0xe0] sm:$0xff] }
 0x392   : > { %v5590_v2 = vmin.f32 %v5558_v31, 1.0  ;;  %v5525_v61 = vadd.f32 %v6336_v8, %v5493_v12  ;;  %v7460_v56 = vpop.f32.mrb[77].mxu1  ;;  %v5389_v40 = vpop.f32.mrb[77].mxu0  ;;  %v5559_v26 = vmax.f32 %v5527_v59, 0.0 }
 0x393   : > { %5681 = vst [vmem:[%s10033_s18 + $0xa8] sm:$0xff] %v5649_v45  ;;  %v5588_v29 = vmin.f32 %v5556_v32, 1.0  ;;  %v7461_v55 = vadd.f32 %v7460_v56, %v7459_v49  ;;  %v5390_v9 = vadd.f32 %v5389_v40, %v5229_v44  ;;  %v7462_v51 = vpop.f32.mrb[78].mxu1  ;;  %v7536_v54 = vpop.f32.mrb[78].mxu0 }
 0x394   : > { %5622 = vst [vmem:[%s10026_s14 + $0xd0] sm:$0xff] %v5590_v2  ;;  %v5654_v60 = vsub.f32 %v5590_v2, %v5494_v27  ;;  %v5557_v13 = vmax.f32 %v5525_v61, 0.0  ;;  %v7463_v7 = vpop.f32.mrb[79].mxu1  ;;  %v5392_v25 = vpop.f32.mrb[79].mxu0  ;;  %v5591_v46 = vmin.f32 %v5559_v26, 1.0 }
 0x395   : > { %5620 = vst [vmem:[%s10026_s14 + $0xc0] sm:$0xff] %v5588_v29  ;;  %v5652_v23 = vsub.f32 %v5588_v29, %v10178_v35  ;;  %v5237_v19 = vadd.f32 %v7461_v55, %v9988_v17  ;;  %v6339_v37 = vclamps-f32 %v5390_v9, 0.1  ;;  %v7464_v57 = vadd.f32 %v7463_v7, %v7462_v51 }
 0x396   : > { %5686 = vst [vmem:[%s10033_s18 + $0xd0] sm:$0xff] %v5654_v60  ;;  %v5589_v10 = vmin.f32 %v5557_v13, 1.0  ;;  %v5393_v63 = vadd.f32 %v5392_v25, %v5232_v18  ;;  %5623 = vst [vmem:[%s10026_s14 + $0xd8] sm:$0xff] %v5591_v46  ;;  %v5655_v0 = vsub.f32 %v5591_v46, %v5495_v24 }
 0x397   : > { %5684 = vst [vmem:[%s10033_s18 + $0xc0] sm:$0xff] %v5652_v23  ;;  %v5398_v33 = vadd.f32 %v7535_v47, %v5237_v19  ;;  %v5528_v22 = vadd.f32 %v6339_v37, %v5496_v4  ;;  %v5240_v17 = vadd.f32 %v7464_v57, %v9997_v6 }
 0x398   : > { %5621 = vst [vmem:[%s10026_s14 + $0xc8] sm:$0xff] %v5589_v10  ;;  %v5653_v39 = vsub.f32 %v5589_v10, %v5493_v12  ;;  %v6340_v52 = vclamps-f32 %v5393_v63, 0.1  ;;  %5687 = vst [vmem:[%s10033_s18 + $0xd8] sm:$0xff] %v5655_v0 }
 0x399   : > { %v6341_v27 = vclamps-f32 %v5398_v33, 0.1  ;;  %v5560_v5 = vmax.f32 %v5528_v22, 0.0  ;;  %v5401_v15 = vadd.f32 %v7536_v54, %v5240_v17 }
 0x39a   : > { %5685 = vst [vmem:[%s10033_s18 + $0xc8] sm:$0xff] %v5653_v39  ;;  %v5529_v35 = vadd.f32 %v6340_v52, %v5497_v34 }
 0x39b   : > { %v5530_v21 = vadd.f32 %v6341_v27, %v5498_v30  ;;  %v5592_v36 = vmin.f32 %v5560_v5, 1.0  ;;  %v6342_v28 = vclamps-f32 %v5401_v15, 0.1 }
 0x39c   : > { %v5561_v58 = vmax.f32 %v5529_v35, 0.0 }
 0x39d   : > { %v5562_v38 = vmax.f32 %v5530_v21, 0.0  ;;  %5624 = vst [vmem:[%s10026_s14 + $0xe0] sm:$0xff] %v5592_v36  ;;  %v5656_v6 = vsub.f32 %v5592_v36, %v5496_v4  ;;  %v5531_v1 = vadd.f32 %v6342_v28, %v5499_v14 }
 0x39e   : > { %v5593_v20 = vmin.f32 %v5561_v58, 1.0 }
 0x39f   : > { %v5594_v50 = vmin.f32 %v5562_v38, 1.0  ;;  %5688 = vst [vmem:[%s10033_s18 + $0xe0] sm:$0xff] %v5656_v6  ;;  %v5563_v3 = vmax.f32 %v5531_v1, 0.0 }
 0x3a0   : > { %5625 = vst [vmem:[%s10026_s14 + $0xe8] sm:$0xff] %v5593_v20  ;;  %v5657_v48 = vsub.f32 %v5593_v20, %v5497_v34 }
 0x3a1   : > { %5626 = vst [vmem:[%s10026_s14 + $0xf0] sm:$0xff] %v5594_v50  ;;  %v5658_v41 = vsub.f32 %v5594_v50, %v5498_v30  ;;  %v5595_v62 = vmin.f32 %v5563_v3, 1.0 }
 0x3a2   : > { %5689 = vst [vmem:[%s10033_s18 + $0xe8] sm:$0xff] %v5657_v48 }
 0x3a3   : > { %5690 = vst [vmem:[%s10033_s18 + $0xf0] sm:$0xff] %v5658_v41  ;;  %5627 = vst [vmem:[%s10026_s14 + $0xf8] sm:$0xff] %v5595_v62  ;;  %v5659_v53 = vsub.f32 %v5595_v62, %v5499_v14 }
 0x3a5   : > { %5691 = vst [vmem:[%s10033_s18 + $0xf8] sm:$0xff] %v5659_v53 }
 0x3a6 PF: > { %s15_s15 = sadd.s32 1, %s8232_s15  }
 0x3a7   : > { %p12_p4 = scmp.ge.s32.totalorder %s15_s15, 4  }
 0x3a9   :  { %14 = sbr.rel (!%p12_p4) target bundleno = 1 (0x1), region = 77 }

</bundles_post_ra>
